<compile_context>
chip_gen: v7x
topology: tpu7x:2x2x1
jax: 0.10.0
libtpu: 0.0.40
codegen_flags: <defaults>
</compile_context>

<pallas_src>
import functools

import jax
import jax.numpy as jnp
from jax import lax
from jax.experimental import pallas as pl
from jax.experimental.pallas import tpu as pltpu


# ----------------------------- kernel helpers -----------------------------

def _replicate_pad(x, H, W):
    """(N, H, W, C) -> (N, H+2, W+2, C) with 'edge' (replicate) padding, as a value."""
    x = jnp.concatenate([x[:, :1], x, x[:, H - 1:H]], axis=1)          # pad H
    x = jnp.concatenate([x[:, :, :1], x, x[:, :, W - 1:W]], axis=2)    # pad W (corners ok)
    return x


def _im2col_into(patch_ref, x_pad, H, W, C):
    """Write the 9 shifted 3x3 taps of x_pad (N,H+2,W+2,C) into patch_ref (N,H,W,9*C)."""
    for dy in range(3):
        for dx in range(3):
            k = dy * 3 + dx
            patch_ref[:, :, :, k * C:(k + 1) * C] = x_pad[:, dy:dy + H, dx:dx + W, :]


def _sepconv_branch_kernel(x_ref, w0_ref, b0_ref, w1_ref, b1_ref, o_ref,
                           p0_ref, p1_ref, *, N, H, W, Cin, Chid, Cout):
    """One grid step = one branch, full batch.

    x_ref : (1, N*H, W, Cin)    branch input (NHWC, N and H merged to keep refs 4-D)
    w0_ref: (1, 9*Cin, Chid)    conv0 weights in im2col layout
    b0_ref: (1, 1, Chid)
    w1_ref: (1, 9*Chid, Cout)   conv1 weights (gamma pre-folded)
    b1_ref: (1, 1, Cout)        conv1 bias   (gamma pre-folded)
    o_ref : (1, N*H, W, Cout)
    p0_ref/p1_ref: VMEM scratch patch matrices for the two im2col matmuls.
    """
    M = N * H * W

    # ---- conv0: replicate pad -> im2col -> one (M, 9*Cin) x (9*Cin, Chid) MXU matmul
    x = x_ref[0].reshape(N, H, W, Cin)
    x_pad = _replicate_pad(x, H, W)                       # (N, H+2, W+2, Cin)
    _im2col_into(p0_ref, x_pad, H, W, Cin)
    h = jnp.dot(p0_ref[...].reshape(M, 9 * Cin), w0_ref[0],
                preferred_element_type=jnp.float32) + b0_ref[0]
    h = jnp.maximum(h, 0.0)                               # ReLU

    # ---- conv1 (gamma folded into w1/b1); intermediate stays on-chip
    y_pad = _replicate_pad(h.reshape(N, H, W, Chid), H, W)
    _im2col_into(p1_ref, y_pad, H, W, Chid)
    out = jnp.dot(p1_ref[...].reshape(M, 9 * Chid), w1_ref[0],
                  preferred_element_type=jnp.float32) + b1_ref[0]

    o_ref[0] = out.reshape(N * H, W, Cout).astype(o_ref.dtype)


# ----------------------------- pallas wrapper -----------------------------

def sepconv_forward_pallas(x_stack, w0s, b0s, w1s, b1s, *, N, H, W):
    """x_stack: (5, N*H, W, Cin) f32 -> (5, N*H, W, Cout) f32 (all 5 branches fused)."""
    B = x_stack.shape[0]
    Cin = x_stack.shape[-1]
    Chid = w0s.shape[-1]
    Cout = w1s.shape[-1]

    kern = functools.partial(_sepconv_branch_kernel, N=N, H=H, W=W,
                             Cin=Cin, Chid=Chid, Cout=Cout)
    return pl.pallas_call(
        kern,
        grid=(B,),
        in_specs=[
            pl.BlockSpec((1, N * H, W, Cin), lambda b: (b, 0, 0, 0)),
            pl.BlockSpec((1, 9 * Cin, Chid), lambda b: (b, 0, 0)),
            pl.BlockSpec((1, 1, Chid), lambda b: (b, 0, 0)),
            pl.BlockSpec((1, 9 * Chid, Cout), lambda b: (b, 0, 0)),
            pl.BlockSpec((1, 1, Cout), lambda b: (b, 0, 0)),
        ],
        out_specs=pl.BlockSpec((1, N * H, W, Cout), lambda b: (b, 0, 0, 0)),
        out_shape=jax.ShapeDtypeStruct((B, N * H, W, Cout), jnp.float32),
        scratch_shapes=[
            pltpu.VMEM((N, H, W, 9 * Cin), jnp.float32),   # conv0 patch matrix
            pltpu.VMEM((N, H, W, 9 * Chid), jnp.float32),  # conv1 patch matrix
        ],
        compiler_params=pltpu.CompilerParams(
            dimension_semantics=("parallel",)),
    )(x_stack, w0s, b0s, w1s, b1s)


def _im2col_weight(w_oihw):
    # (Cout, Cin, 3, 3) -> (3, 3, Cin, Cout) -> (9*Cin, Cout); rows ordered (dy, dx, cin)
    cout = w_oihw.shape[0]
    return jnp.transpose(w_oihw, (2, 3, 1, 0)).reshape(-1, cout)


@jax.jit
def _forward_impl(w0s, b0s, w1s, b1s, x0, x1, x2, x3, x4):
    N, Cin, H, W = x0.shape
    x = jnp.stack((x0, x1, x2, x3, x4))                 # (5, N, Cin, H, W)
    x = jnp.transpose(x, (0, 1, 3, 4, 2))               # (5, N, H, W, Cin)
    x = x.reshape(5, N * H, W, Cin)                     # keep kernel refs 4-D
    y = sepconv_forward_pallas(x, w0s, b0s, w1s, b1s, N=N, H=H, W=W)
    Cout = y.shape[-1]
    y = y.reshape(5, N, H, W, Cout)
    y = jnp.transpose(y, (0, 1, 4, 2, 3))               # (5, N, Cout, H, W)
    return (y[0], y[1], y[2], y[3], y[4])


class SeparatedConvolutionsPallas:
    """JAX/Pallas port of SeparatedConvolutions (use_gamma=True, batch_norm=False)."""

    def __init__(self, in_channels, channels, channels_hidden, key):
        ks = jax.random.split(key, 25)

        def w(k, cout, cin):
            return jax.random.normal(k, (cout, cin, 3, 3), jnp.float32) * 0.1

        def bias(k, cout):
            return jax.random.normal(k, (cout,), jnp.float32) * 0.05

        self.params = {}
        for i in range(5):
            self.params[f"w{i}_0"] = w(ks[5 * i + 0], channels_hidden, in_channels)
            self.params[f"b{i}_0"] = bias(ks[5 * i + 1], channels_hidden)
            self.params[f"w{i}_1"] = w(ks[5 * i + 2], channels, channels_hidden)
            self.params[f"b{i}_1"] = bias(ks[5 * i + 3], channels)
            # PyTorch __init__ sets gamma_i = 0; deterministic nonzero values keep the
            # test non-trivial (forward semantics are identical).
            self.params[f"gamma{i}"] = jnp.float32([0.5, -0.3, 0.7, 0.2, -0.1][i])

        # Pre-packed kernel operands (done once): im2col weight layout, 5 branches
        # stacked, gamma folded into the second conv (conv is linear in w/b).
        p = self.params
        self.w0s = jnp.stack([_im2col_weight(p[f"w{i}_0"]) for i in range(5)])      # (5, 9*Cin, Chid)
        self.b0s = jnp.stack([p[f"b{i}_0"].reshape(1, -1) for i in range(5)])       # (5, 1, Chid)
        self.w1s = jnp.stack([_im2col_weight(p[f"w{i}_1"]) * p[f"gamma{i}"]
                              for i in range(5)])                                   # (5, 9*Chid, Cout)
        self.b1s = jnp.stack([(p[f"b{i}_1"] * p[f"gamma{i}"]).reshape(1, -1)
                              for i in range(5)])                                   # (5, 1, Cout)

    def __call__(self, x0, x1, x2, x3, x4):
        return _forward_impl(self.w0s, self.b0s, self.w1s, self.b1s,
                             x0, x1, x2, x3, x4)


# ---------------- pure-JAX reference (for correctness check) ----------------

def _ref_conv3x3(x_nhwc, w_hwio, b):
    xp = jnp.pad(x_nhwc, ((0, 0), (1, 1), (1, 1), (0, 0)), mode='edge')
    y = lax.conv_general_dilated(
        xp, w_hwio, window_strides=(1, 1), padding='VALID',
        dimension_numbers=('NHWC', 'HWIO', 'NHWC'))
    return y + b


def _ref_branch(x_nchw, w0, b0, w1, b1, gamma):
    x = jnp.transpose(x_nchw, (0, 2, 3, 1))
    w0_hwio = jnp.transpose(w0, (2, 3, 1, 0))
    w1_hwio = jnp.transpose(w1, (2, 3, 1, 0))
    y = jnp.maximum(_ref_conv3x3(x, w0_hwio, b0), 0.0)
    out = _ref_conv3x3(y, w1_hwio, b1) * gamma
    return jnp.transpose(out, (0, 3, 1, 2))


if __name__ == "__main__":
    key = jax.random.PRNGKey(0)
    k_params, *k_inputs = jax.random.split(key, 6)

    N, Cin, H, W = 2, 4, 16, 16
    C_hidden, C_out = 8, 4

    xs = [jax.random.normal(k, (N, Cin, H, W), jnp.float32) for k in k_inputs]

    module = SeparatedConvolutionsPallas(Cin, C_out, C_hidden, k_params)
    outs = module(*xs)
    outs = jax.block_until_ready(outs)

    # verify against pure-JAX reference
    for i, (x, o) in enumerate(zip(xs, outs)):
        p = module.params
        ref = _ref_branch(x, p[f"w{i}_0"], p[f"b{i}_0"],
                          p[f"w{i}_1"], p[f"b{i}_1"], p[f"gamma{i}"])
        assert o.shape == (N, C_out, H, W), f"branch {i} shape {o.shape}"
        assert jnp.allclose(o, ref, atol=1e-4, rtol=1e-4), f"branch {i} mismatch"

    print("KERNEL_OK")
</pallas_src>

<mosaic_0001>
module attributes {stable_mosaic.version = 11 : i64} {
  func.func @_sepconv_branch_kernel(%arg0: i32, %arg1: memref<1x32x16x4xf32, #tpu.memory_space<vmem>>, %arg2: memref<1x36x8xf32, #tpu.memory_space<vmem>>, %arg3: memref<1x1x8xf32, #tpu.memory_space<vmem>>, %arg4: memref<1x72x4xf32, #tpu.memory_space<vmem>>, %arg5: memref<1x1x4xf32, #tpu.memory_space<vmem>>, %arg6: memref<1x32x16x4xf32, #tpu.memory_space<vmem>>, %arg7: memref<2x16x16x36xf32, #tpu.memory_space<vmem>>, %arg8: memref<2x16x16x72xf32, #tpu.memory_space<vmem>>) attributes {dimension_semantics = [#tpu.dimension_semantics<parallel>], iteration_bounds = array<i64: 5>, scalar_prefetch = 0 : i64, scratch_operands = 2 : i64, tpu.core_type = #tpu.core_type<tc>, window_params = [{transform_indices = @transform_0, window_bounds = array<i64: 1, 32, 16, 4>}, {transform_indices = @transform_1, window_bounds = array<i64: 1, 36, 8>}, {transform_indices = @transform_2, window_bounds = array<i64: 1, 1, 8>}, {transform_indices = @transform_3, window_bounds = array<i64: 1, 72, 4>}, {transform_indices = @transform_4, window_bounds = array<i64: 1, 1, 4>}, {transform_indices = @transform_5, window_bounds = array<i64: 1, 32, 16, 4>}]} {
    %c0 = arith.constant 0 : index
    %c0_0 = arith.constant 0 : index
    %c0_1 = arith.constant 0 : index
    %c0_2 = arith.constant 0 : index
    %0 = vector.load %arg1[%c0, %c0_0, %c0_1, %c0_2] : memref<1x32x16x4xf32, #tpu.memory_space<vmem>>, vector<1x32x16x4xf32>
    %1 = vector.shape_cast %0 : vector<1x32x16x4xf32> to vector<32x16x4xf32>
    %2 = vector.shape_cast %1 : vector<32x16x4xf32> to vector<2x16x16x4xf32>
    %3 = vector.extract_strided_slice %2 {offsets = [0, 0, 0, 0], sizes = [2, 1, 16, 4], strides = [1, 1, 1, 1]} : vector<2x16x16x4xf32> to vector<2x1x16x4xf32>
    %4 = vector.extract_strided_slice %2 {offsets = [0, 15, 0, 0], sizes = [2, 1, 16, 4], strides = [1, 1, 1, 1]} : vector<2x16x16x4xf32> to vector<2x1x16x4xf32>
    %5 = tpu.concatenate %3, %2, %4 in 1 : vector<2x1x16x4xf32>, vector<2x16x16x4xf32>, vector<2x1x16x4xf32> -> vector<2x18x16x4xf32>
    %6 = vector.extract_strided_slice %5 {offsets = [0, 0, 0, 0], sizes = [2, 18, 1, 4], strides = [1, 1, 1, 1]} : vector<2x18x16x4xf32> to vector<2x18x1x4xf32>
    %7 = vector.extract_strided_slice %5 {offsets = [0, 0, 15, 0], sizes = [2, 18, 1, 4], strides = [1, 1, 1, 1]} : vector<2x18x16x4xf32> to vector<2x18x1x4xf32>
    %8 = tpu.concatenate %6, %5, %7 in 2 : vector<2x18x1x4xf32>, vector<2x18x16x4xf32>, vector<2x18x1x4xf32> -> vector<2x18x18x4xf32>
    %9 = vector.extract_strided_slice %8 {offsets = [0, 0, 0, 0], sizes = [2, 16, 16, 4], strides = [1, 1, 1, 1]} : vector<2x18x18x4xf32> to vector<2x16x16x4xf32>
    %c0_3 = arith.constant 0 : index
    %c0_4 = arith.constant 0 : index
    %c0_5 = arith.constant 0 : index
    %c0_6 = arith.constant 0 : index
    %10 = vector.load %arg7[%c0_3, %c0_4, %c0_5, %c0_6] : memref<2x16x16x36xf32, #tpu.memory_space<vmem>>, vector<2x16x16x4xf32>
    tpu.vector_store %arg7[%c0_3, %c0_4, %c0_5, %c0_6], %9 {strides = array<i32>} : memref<2x16x16x36xf32, #tpu.memory_space<vmem>>, vector<2x16x16x4xf32>,
    %11 = vector.extract_strided_slice %8 {offsets = [0, 0, 1, 0], sizes = [2, 16, 16, 4], strides = [1, 1, 1, 1]} : vector<2x18x18x4xf32> to vector<2x16x16x4xf32>
    %c0_7 = arith.constant 0 : index
    %c0_8 = arith.constant 0 : index
    %c0_9 = arith.constant 0 : index
    %c4 = arith.constant 4 : index
    %12 = vector.load %arg7[%c0_7, %c0_8, %c0_9, %c4] : memref<2x16x16x36xf32, #tpu.memory_space<vmem>>, vector<2x16x16x4xf32>
    tpu.vector_store %arg7[%c0_7, %c0_8, %c0_9, %c4], %11 {strides = array<i32>} : memref<2x16x16x36xf32, #tpu.memory_space<vmem>>, vector<2x16x16x4xf32>,
    %13 = vector.extract_strided_slice %8 {offsets = [0, 0, 2, 0], sizes = [2, 16, 16, 4], strides = [1, 1, 1, 1]} : vector<2x18x18x4xf32> to vector<2x16x16x4xf32>
    %c0_10 = arith.constant 0 : index
    %c0_11 = arith.constant 0 : index
    %c0_12 = arith.constant 0 : index
    %c8 = arith.constant 8 : index
    %14 = vector.load %arg7[%c0_10, %c0_11, %c0_12, %c8] : memref<2x16x16x36xf32, #tpu.memory_space<vmem>>, vector<2x16x16x4xf32>
    tpu.vector_store %arg7[%c0_10, %c0_11, %c0_12, %c8], %13 {strides = array<i32>} : memref<2x16x16x36xf32, #tpu.memory_space<vmem>>, vector<2x16x16x4xf32>,
    %15 = vector.extract_strided_slice %8 {offsets = [0, 1, 0, 0], sizes = [2, 16, 16, 4], strides = [1, 1, 1, 1]} : vector<2x18x18x4xf32> to vector<2x16x16x4xf32>
    %c0_13 = arith.constant 0 : index
    %c0_14 = arith.constant 0 : index
    %c0_15 = arith.constant 0 : index
    %c12 = arith.constant 12 : index
    %16 = vector.load %arg7[%c0_13, %c0_14, %c0_15, %c12] : memref<2x16x16x36xf32, #tpu.memory_space<vmem>>, vector<2x16x16x4xf32>
    tpu.vector_store %arg7[%c0_13, %c0_14, %c0_15, %c12], %15 {strides = array<i32>} : memref<2x16x16x36xf32, #tpu.memory_space<vmem>>, vector<2x16x16x4xf32>,
    %17 = vector.extract_strided_slice %8 {offsets = [0, 1, 1, 0], sizes = [2, 16, 16, 4], strides = [1, 1, 1, 1]} : vector<2x18x18x4xf32> to vector<2x16x16x4xf32>
    %c0_16 = arith.constant 0 : index
    %c0_17 = arith.constant 0 : index
    %c0_18 = arith.constant 0 : index
    %c16 = arith.constant 16 : index
    %18 = vector.load %arg7[%c0_16, %c0_17, %c0_18, %c16] : memref<2x16x16x36xf32, #tpu.memory_space<vmem>>, vector<2x16x16x4xf32>
    tpu.vector_store %arg7[%c0_16, %c0_17, %c0_18, %c16], %17 {strides = array<i32>} : memref<2x16x16x36xf32, #tpu.memory_space<vmem>>, vector<2x16x16x4xf32>,
    %19 = vector.extract_strided_slice %8 {offsets = [0, 1, 2, 0], sizes = [2, 16, 16, 4], strides = [1, 1, 1, 1]} : vector<2x18x18x4xf32> to vector<2x16x16x4xf32>
    %c0_19 = arith.constant 0 : index
    %c0_20 = arith.constant 0 : index
    %c0_21 = arith.constant 0 : index
    %c20 = arith.constant 20 : index
    %20 = vector.load %arg7[%c0_19, %c0_20, %c0_21, %c20] : memref<2x16x16x36xf32, #tpu.memory_space<vmem>>, vector<2x16x16x4xf32>
    tpu.vector_store %arg7[%c0_19, %c0_20, %c0_21, %c20], %19 {strides = array<i32>} : memref<2x16x16x36xf32, #tpu.memory_space<vmem>>, vector<2x16x16x4xf32>,
    %21 = vector.extract_strided_slice %8 {offsets = [0, 2, 0, 0], sizes = [2, 16, 16, 4], strides = [1, 1, 1, 1]} : vector<2x18x18x4xf32> to vector<2x16x16x4xf32>
    %c0_22 = arith.constant 0 : index
    %c0_23 = arith.constant 0 : index
    %c0_24 = arith.constant 0 : index
    %c24 = arith.constant 24 : index
    %22 = vector.load %arg7[%c0_22, %c0_23, %c0_24, %c24] : memref<2x16x16x36xf32, #tpu.memory_space<vmem>>, vector<2x16x16x4xf32>
    tpu.vector_store %arg7[%c0_22, %c0_23, %c0_24, %c24], %21 {strides = array<i32>} : memref<2x16x16x36xf32, #tpu.memory_space<vmem>>, vector<2x16x16x4xf32>,
    %23 = vector.extract_strided_slice %8 {offsets = [0, 2, 1, 0], sizes = [2, 16, 16, 4], strides = [1, 1, 1, 1]} : vector<2x18x18x4xf32> to vector<2x16x16x4xf32>
    %c0_25 = arith.constant 0 : index
    %c0_26 = arith.constant 0 : index
    %c0_27 = arith.constant 0 : index
    %c28 = arith.constant 28 : index
    %24 = vector.load %arg7[%c0_25, %c0_26, %c0_27, %c28] : memref<2x16x16x36xf32, #tpu.memory_space<vmem>>, vector<2x16x16x4xf32>
    tpu.vector_store %arg7[%c0_25, %c0_26, %c0_27, %c28], %23 {strides = array<i32>} : memref<2x16x16x36xf32, #tpu.memory_space<vmem>>, vector<2x16x16x4xf32>,
    %25 = vector.extract_strided_slice %8 {offsets = [0, 2, 2, 0], sizes = [2, 16, 16, 4], strides = [1, 1, 1, 1]} : vector<2x18x18x4xf32> to vector<2x16x16x4xf32>
    %c0_28 = arith.constant 0 : index
    %c0_29 = arith.constant 0 : index
    %c0_30 = arith.constant 0 : index
    %c32 = arith.constant 32 : index
    %26 = vector.load %arg7[%c0_28, %c0_29, %c0_30, %c32] : memref<2x16x16x36xf32, #tpu.memory_space<vmem>>, vector<2x16x16x4xf32>
    tpu.vector_store %arg7[%c0_28, %c0_29, %c0_30, %c32], %25 {strides = array<i32>} : memref<2x16x16x36xf32, #tpu.memory_space<vmem>>, vector<2x16x16x4xf32>,
    %c0_31 = arith.constant 0 : index
    %c0_32 = arith.constant 0 : index
    %c0_33 = arith.constant 0 : index
    %c0_34 = arith.constant 0 : index
    %27 = vector.load %arg7[%c0_31, %c0_32, %c0_33, %c0_34] : memref<2x16x16x36xf32, #tpu.memory_space<vmem>>, vector<2x16x16x36xf32>
    %28 = vector.shape_cast %27 : vector<2x16x16x36xf32> to vector<512x36xf32>
    %c0_35 = arith.constant 0 : index
    %c0_36 = arith.constant 0 : index
    %c0_37 = arith.constant 0 : index
    %29 = vector.load %arg2[%c0_35, %c0_36, %c0_37] : memref<1x36x8xf32, #tpu.memory_space<vmem>>, vector<1x36x8xf32>
    %30 = vector.shape_cast %29 : vector<1x36x8xf32> to vector<36x8xf32>
    %cst = arith.constant dense<0.000000e+00> : vector<512x8xf32>
    %31 = tpu.matmul %28, %30, %cst {dimension_numbers = #tpu.dot_dimension_numbers<[1], [0], [0], [1], [0, 0, 1, 1], [], []>} : vector<512x36xf32>, vector<36x8xf32>, vector<512x8xf32> -> vector<512x8xf32>
    %c0_38 = arith.constant 0 : index
    %c0_39 = arith.constant 0 : index
    %c0_40 = arith.constant 0 : index
    %32 = vector.load %arg3[%c0_38, %c0_39, %c0_40] : memref<1x1x8xf32, #tpu.memory_space<vmem>>, vector<1x1x8xf32>
    %33 = vector.shape_cast %32 : vector<1x1x8xf32> to vector<1x8xf32>
    %34 = vector.broadcast %33 : vector<1x8xf32> to vector<512x8xf32>
    %35 = arith.addf %31, %34 : vector<512x8xf32>
    %cst_41 = arith.constant 0.000000e+00 : f32
    %36 = vector.broadcast %cst_41 : f32 to vector<512x8xf32>
    %37 = arith.maximumf %35, %36 : vector<512x8xf32>
    %38 = vector.shape_cast %37 : vector<512x8xf32> to vector<2x16x16x8xf32>
    %39 = vector.extract_strided_slice %38 {offsets = [0, 0, 0, 0], sizes = [2, 1, 16, 8], strides = [1, 1, 1, 1]} : vector<2x16x16x8xf32> to vector<2x1x16x8xf32>
    %40 = vector.extract_strided_slice %38 {offsets = [0, 15, 0, 0], sizes = [2, 1, 16, 8], strides = [1, 1, 1, 1]} : vector<2x16x16x8xf32> to vector<2x1x16x8xf32>
    %41 = tpu.concatenate %39, %38, %40 in 1 : vector<2x1x16x8xf32>, vector<2x16x16x8xf32>, vector<2x1x16x8xf32> -> vector<2x18x16x8xf32>
    %42 = vector.extract_strided_slice %41 {offsets = [0, 0, 0, 0], sizes = [2, 18, 1, 8], strides = [1, 1, 1, 1]} : vector<2x18x16x8xf32> to vector<2x18x1x8xf32>
    %43 = vector.extract_strided_slice %41 {offsets = [0, 0, 15, 0], sizes = [2, 18, 1, 8], strides = [1, 1, 1, 1]} : vector<2x18x16x8xf32> to vector<2x18x1x8xf32>
    %44 = tpu.concatenate %42, %41, %43 in 2 : vector<2x18x1x8xf32>, vector<2x18x16x8xf32>, vector<2x18x1x8xf32> -> vector<2x18x18x8xf32>
    %45 = vector.extract_strided_slice %44 {offsets = [0, 0, 0, 0], sizes = [2, 16, 16, 8], strides = [1, 1, 1, 1]} : vector<2x18x18x8xf32> to vector<2x16x16x8xf32>
    %c0_42 = arith.constant 0 : index
    %c0_43 = arith.constant 0 : index
    %c0_44 = arith.constant 0 : index
    %c0_45 = arith.constant 0 : index
    %46 = vector.load %arg8[%c0_42, %c0_43, %c0_44, %c0_45] : memref<2x16x16x72xf32, #tpu.memory_space<vmem>>, vector<2x16x16x8xf32>
    tpu.vector_store %arg8[%c0_42, %c0_43, %c0_44, %c0_45], %45 {strides = array<i32>} : memref<2x16x16x72xf32, #tpu.memory_space<vmem>>, vector<2x16x16x8xf32>,
    %47 = vector.extract_strided_slice %44 {offsets = [0, 0, 1, 0], sizes = [2, 16, 16, 8], strides = [1, 1, 1, 1]} : vector<2x18x18x8xf32> to vector<2x16x16x8xf32>
    %c0_46 = arith.constant 0 : index
    %c0_47 = arith.constant 0 : index
    %c0_48 = arith.constant 0 : index
    %c8_49 = arith.constant 8 : index
    %48 = vector.load %arg8[%c0_46, %c0_47, %c0_48, %c8_49] : memref<2x16x16x72xf32, #tpu.memory_space<vmem>>, vector<2x16x16x8xf32>
    tpu.vector_store %arg8[%c0_46, %c0_47, %c0_48, %c8_49], %47 {strides = array<i32>} : memref<2x16x16x72xf32, #tpu.memory_space<vmem>>, vector<2x16x16x8xf32>,
    %49 = vector.extract_strided_slice %44 {offsets = [0, 0, 2, 0], sizes = [2, 16, 16, 8], strides = [1, 1, 1, 1]} : vector<2x18x18x8xf32> to vector<2x16x16x8xf32>
    %c0_50 = arith.constant 0 : index
    %c0_51 = arith.constant 0 : index
    %c0_52 = arith.constant 0 : index
    %c16_53 = arith.constant 16 : index
    %50 = vector.load %arg8[%c0_50, %c0_51, %c0_52, %c16_53] : memref<2x16x16x72xf32, #tpu.memory_space<vmem>>, vector<2x16x16x8xf32>
    tpu.vector_store %arg8[%c0_50, %c0_51, %c0_52, %c16_53], %49 {strides = array<i32>} : memref<2x16x16x72xf32, #tpu.memory_space<vmem>>, vector<2x16x16x8xf32>,
    %51 = vector.extract_strided_slice %44 {offsets = [0, 1, 0, 0], sizes = [2, 16, 16, 8], strides = [1, 1, 1, 1]} : vector<2x18x18x8xf32> to vector<2x16x16x8xf32>
    %c0_54 = arith.constant 0 : index
    %c0_55 = arith.constant 0 : index
    %c0_56 = arith.constant 0 : index
    %c24_57 = arith.constant 24 : index
    %52 = vector.load %arg8[%c0_54, %c0_55, %c0_56, %c24_57] : memref<2x16x16x72xf32, #tpu.memory_space<vmem>>, vector<2x16x16x8xf32>
    tpu.vector_store %arg8[%c0_54, %c0_55, %c0_56, %c24_57], %51 {strides = array<i32>} : memref<2x16x16x72xf32, #tpu.memory_space<vmem>>, vector<2x16x16x8xf32>,
    %53 = vector.extract_strided_slice %44 {offsets = [0, 1, 1, 0], sizes = [2, 16, 16, 8], strides = [1, 1, 1, 1]} : vector<2x18x18x8xf32> to vector<2x16x16x8xf32>
    %c0_58 = arith.constant 0 : index
    %c0_59 = arith.constant 0 : index
    %c0_60 = arith.constant 0 : index
    %c32_61 = arith.constant 32 : index
    %54 = vector.load %arg8[%c0_58, %c0_59, %c0_60, %c32_61] : memref<2x16x16x72xf32, #tpu.memory_space<vmem>>, vector<2x16x16x8xf32>
    tpu.vector_store %arg8[%c0_58, %c0_59, %c0_60, %c32_61], %53 {strides = array<i32>} : memref<2x16x16x72xf32, #tpu.memory_space<vmem>>, vector<2x16x16x8xf32>,
    %55 = vector.extract_strided_slice %44 {offsets = [0, 1, 2, 0], sizes = [2, 16, 16, 8], strides = [1, 1, 1, 1]} : vector<2x18x18x8xf32> to vector<2x16x16x8xf32>
    %c0_62 = arith.constant 0 : index
    %c0_63 = arith.constant 0 : index
    %c0_64 = arith.constant 0 : index
    %c40 = arith.constant 40 : index
    %56 = vector.load %arg8[%c0_62, %c0_63, %c0_64, %c40] : memref<2x16x16x72xf32, #tpu.memory_space<vmem>>, vector<2x16x16x8xf32>
    tpu.vector_store %arg8[%c0_62, %c0_63, %c0_64, %c40], %55 {strides = array<i32>} : memref<2x16x16x72xf32, #tpu.memory_space<vmem>>, vector<2x16x16x8xf32>,
    %57 = vector.extract_strided_slice %44 {offsets = [0, 2, 0, 0], sizes = [2, 16, 16, 8], strides = [1, 1, 1, 1]} : vector<2x18x18x8xf32> to vector<2x16x16x8xf32>
    %c0_65 = arith.constant 0 : index
    %c0_66 = arith.constant 0 : index
    %c0_67 = arith.constant 0 : index
    %c48 = arith.constant 48 : index
    %58 = vector.load %arg8[%c0_65, %c0_66, %c0_67, %c48] : memref<2x16x16x72xf32, #tpu.memory_space<vmem>>, vector<2x16x16x8xf32>
    tpu.vector_store %arg8[%c0_65, %c0_66, %c0_67, %c48], %57 {strides = array<i32>} : memref<2x16x16x72xf32, #tpu.memory_space<vmem>>, vector<2x16x16x8xf32>,
    %59 = vector.extract_strided_slice %44 {offsets = [0, 2, 1, 0], sizes = [2, 16, 16, 8], strides = [1, 1, 1, 1]} : vector<2x18x18x8xf32> to vector<2x16x16x8xf32>
    %c0_68 = arith.constant 0 : index
    %c0_69 = arith.constant 0 : index
    %c0_70 = arith.constant 0 : index
    %c56 = arith.constant 56 : index
    %60 = vector.load %arg8[%c0_68, %c0_69, %c0_70, %c56] : memref<2x16x16x72xf32, #tpu.memory_space<vmem>>, vector<2x16x16x8xf32>
    tpu.vector_store %arg8[%c0_68, %c0_69, %c0_70, %c56], %59 {strides = array<i32>} : memref<2x16x16x72xf32, #tpu.memory_space<vmem>>, vector<2x16x16x8xf32>,
    %61 = vector.extract_strided_slice %44 {offsets = [0, 2, 2, 0], sizes = [2, 16, 16, 8], strides = [1, 1, 1, 1]} : vector<2x18x18x8xf32> to vector<2x16x16x8xf32>
    %c0_71 = arith.constant 0 : index
    %c0_72 = arith.constant 0 : index
    %c0_73 = arith.constant 0 : index
    %c64 = arith.constant 64 : index
    %62 = vector.load %arg8[%c0_71, %c0_72, %c0_73, %c64] : memref<2x16x16x72xf32, #tpu.memory_space<vmem>>, vector<2x16x16x8xf32>
    tpu.vector_store %arg8[%c0_71, %c0_72, %c0_73, %c64], %61 {strides = array<i32>} : memref<2x16x16x72xf32, #tpu.memory_space<vmem>>, vector<2x16x16x8xf32>,
    %c0_74 = arith.constant 0 : index
    %c0_75 = arith.constant 0 : index
    %c0_76 = arith.constant 0 : index
    %c0_77 = arith.constant 0 : index
    %63 = vector.load %arg8[%c0_74, %c0_75, %c0_76, %c0_77] : memref<2x16x16x72xf32, #tpu.memory_space<vmem>>, vector<2x16x16x72xf32>
    %64 = vector.shape_cast %63 : vector<2x16x16x72xf32> to vector<512x72xf32>
    %c0_78 = arith.constant 0 : index
    %c0_79 = arith.constant 0 : index
    %c0_80 = arith.constant 0 : index
    %65 = vector.load %arg4[%c0_78, %c0_79, %c0_80] : memref<1x72x4xf32, #tpu.memory_space<vmem>>, vector<1x72x4xf32>
    %66 = vector.shape_cast %65 : vector<1x72x4xf32> to vector<72x4xf32>
    %cst_81 = arith.constant dense<0.000000e+00> : vector<512x4xf32>
    %67 = tpu.matmul %64, %66, %cst_81 {dimension_numbers = #tpu.dot_dimension_numbers<[1], [0], [0], [1], [0, 0, 1, 1], [], []>} : vector<512x72xf32>, vector<72x4xf32>, vector<512x4xf32> -> vector<512x4xf32>
    %c0_82 = arith.constant 0 : index
    %c0_83 = arith.constant 0 : index
    %c0_84 = arith.constant 0 : index
    %68 = vector.load %arg5[%c0_82, %c0_83, %c0_84] : memref<1x1x4xf32, #tpu.memory_space<vmem>>, vector<1x1x4xf32>
    %69 = vector.shape_cast %68 : vector<1x1x4xf32> to vector<1x4xf32>
    %70 = vector.broadcast %69 : vector<1x4xf32> to vector<512x4xf32>
    %71 = arith.addf %67, %70 : vector<512x4xf32>
    %72 = vector.shape_cast %71 : vector<512x4xf32> to vector<32x16x4xf32>
    %c0_85 = arith.constant 0 : index
    %c0_86 = arith.constant 0 : index
    %c0_87 = arith.constant 0 : index
    %c0_88 = arith.constant 0 : index
    %73 = vector.load %arg6[%c0_85, %c0_86, %c0_87, %c0_88] : memref<1x32x16x4xf32, #tpu.memory_space<vmem>>, vector<1x32x16x4xf32>
    %74 = vector.shape_cast %73 : vector<1x32x16x4xf32> to vector<32x16x4xf32>
    %75 = vector.shape_cast %72 : vector<32x16x4xf32> to vector<1x32x16x4xf32>
    tpu.vector_store %arg6[%c0_85, %c0_86, %c0_87, %c0_88], %75 {strides = array<i32>} : memref<1x32x16x4xf32, #tpu.memory_space<vmem>>, vector<1x32x16x4xf32>,
    return
  }
  func.func @transform_0(%arg0: i32) -> (i32, i32, i32, i32) {
    %c0_i32 = arith.constant 0 : i32
    %c0_i32_0 = arith.constant 0 : i32
    %c0_i32_1 = arith.constant 0 : i32
    %c0_i32_2 = arith.constant 0 : i32
    return %arg0, %c0_i32, %c0_i32_0, %c0_i32_1 : i32, i32, i32, i32
  }
  func.func @transform_1(%arg0: i32) -> (i32, i32, i32) {
    %c0_i32 = arith.constant 0 : i32
    %c0_i32_0 = arith.constant 0 : i32
    %c0_i32_1 = arith.constant 0 : i32
    return %arg0, %c0_i32, %c0_i32_0 : i32, i32, i32
  }
  func.func @transform_2(%arg0: i32) -> (i32, i32, i32) {
    %c0_i32 = arith.constant 0 : i32
    %c0_i32_0 = arith.constant 0 : i32
    %c0_i32_1 = arith.constant 0 : i32
    return %arg0, %c0_i32, %c0_i32_0 : i32, i32, i32
  }
  func.func @transform_3(%arg0: i32) -> (i32, i32, i32) {
    %c0_i32 = arith.constant 0 : i32
    %c0_i32_0 = arith.constant 0 : i32
    %c0_i32_1 = arith.constant 0 : i32
    return %arg0, %c0_i32, %c0_i32_0 : i32, i32, i32
  }
  func.func @transform_4(%arg0: i32) -> (i32, i32, i32) {
    %c0_i32 = arith.constant 0 : i32
    %c0_i32_0 = arith.constant 0 : i32
    %c0_i32_1 = arith.constant 0 : i32
    return %arg0, %c0_i32, %c0_i32_0 : i32, i32, i32
  }
  func.func @transform_5(%arg0: i32) -> (i32, i32, i32, i32) {
    %c0_i32 = arith.constant 0 : i32
    %c0_i32_0 = arith.constant 0 : i32
    %c0_i32_1 = arith.constant 0 : i32
    %c0_i32_2 = arith.constant 0 : i32
    return %arg0, %c0_i32, %c0_i32_0, %c0_i32_1 : i32, i32, i32, i32
  }
}

</mosaic_0001>

<bundles_post_ra>
// kernel: _forward_impl.1
= control target key start
LH: loop header
LB: loop body
LE: loop exit
PB: predicated region body
PF: predicated region fallthrough
CT: control target
= control target key end

     0   :  { %s9040_s18 = smov 0   ;;  %s14633_s0 = inlined_call_operand.vmem [shape: f32[5,32,16,4], index: 0, kind: input, shape index: {}]   ;;  %s14634_s1 = inlined_call_operand.vmem [shape: f32[5,36,8], index: 1, kind: input, shape index: {}]   ;;  %s14635_s2 = inlined_call_operand.vmem [shape: f32[5,1,8], index: 2, kind: input, shape index: {}]   ;;  %s14636_s3 = inlined_call_operand.vmem [shape: f32[5,72,4], index: 3, kind: input, shape index: {}]   ;;  %s14637_s4 = inlined_call_operand.vmem [shape: f32[5,1,4], index: 4, kind: input, shape index: {}]   ;;  %s14638_s5 = inlined_call_operand.vmem [shape: f32[5,32,16,4], index: 5, kind: output, shape index: {}]  }
   0x1 LB: > { %s8425_s19 = sadd.s32 4294967295, %s8996_s18   ;;  %p8429_p0 = scmp.ge.s32.totalorder %s8996_s18, 1  ;;  %s8996_s18 = sphi %s9040_s18, %s15_s18  }
   0x2   : > { %p223_p1 = scmp.lt.s32.totalorder %s8996_s18, 6 }
   0x4   : > { %p224_p2 = pnand %p8429_p0, %p223_p1 }
   0x6   : > { %227 = sbr.rel (%p224_p2) target bundleno = 3249 (0xcb1), region = 40 }
   0xd   : > { %p267_p3 = scmp.lt.s32.totalorder %s8425_s19, 4  ;;  %vm421_vm0 = vcmask 1040384   ;;  %vm740_vm1 = vcmask 31744   ;;  %s8998_s24 = smov 4   ;;  %vm1139_vm2 = vcmask 57376   ;;  %vm1135_vm3 = vcmask 64545  }
   0xe   : > { %vm1137_vm4 = vcmask 64544   ;;  %s8999_s25 = smov 8   ;;  %vm1506_vm5 = vcmask 97344   ;;  %vm1504_vm6 = vcmask 97346   ;;  %vm1508_vm7 = vcmask 91200   ;;  %s9000_s26 = smov 12  }
   0xf   : > { %s15614_s19 = smov (!%p267_p3, %s8425_s19), 4  ;;  %vm1797_vm8 = vcmask 130144   ;;  %s9001_s27 = smov 16   ;;  %vm2154_vm9 = vcmask 162944   ;;  %vm2152_vm10 = vcmask 162945   ;;  %vm2156_vm11 = vcmask 155776  }
  0x10   : > { %s8569_s20 = sshll.u32 %s15614_s19, 9  ;;  %s9002_s28 = smov 20   ;;  %vm2541_vm12 = vcmask 195744   ;;  %vm2539_vm13 = vcmask 195746   ;;  %vm2543_vm14 = vcmask 189600   ;;  %vm2818_vm15 = vcmask 228544  }
  0x11   : > { %s9056_s23 = scalar_lea.vmem %s14633_s0, %s8569_s20  ;;  %s9003_s29 = smov 24  }
  0x12   : > { %v294_v0 = vld [vmem:[%s9056_s23 + $0x8] sm:$0xff]  ;;  %v293_v1 = vld [vmem:[%s9056_s23] sm:$0xff]  ;;  %v295_v2 = vld [vmem:[%s9056_s23 + $0x10] sm:$0xff]  ;;  %s9004_s30 = smov 28   ;;  %s8967_s6 = smul.u32 40, %s15614_s19 }
  0x13   : > { %v423_v3 = vrot.slane %v294_v0, 7  ;;  %v612_v4 = vrot.slane %v294_v0, 6  ;;  %v422_v5 = vrot.slane %v293_v1, 7  ;;  %v425_v6 = vrot.slane %v295_v2, 7  ;;  %v296_v7 = vld [vmem:[%s9056_s23 + $0x18] sm:$0xff]  ;;  %v297_v8 = vld [vmem:[%s9056_s23 + $0x20] sm:$0xff]  ;;  %s11780_s13 = scalar_lea.vmem %s14635_s2, %s15614_s19 }
  0x14   : > { %v426_v9 = vrot.slane %v296_v7, 7  ;;  %v9064_v10 = vld [vmem:[%s9056_s23 + $0x28] sm:$0xff]  ;;  %v428_v11 = vrot.slane %v297_v8, 7  ;;  %v299_v12 = vld [vmem:[%s9056_s23 + $0x30] sm:$0xff]  ;;  %v9068_v13 = vld [vmem:[%s9056_s23 + $0x38] sm:$0xff]  ;;  %v613_v24 = vrot.slane %v296_v7, 6  ;;  %s276_s9 = scalar_lea.vmem %s14634_s1, %s8967_s6 }
  0x15   : > { %v9071_v14 = vsel %vm421_vm0, %v423_v3, %v612_v4  ;;  %v9074_v15 = vsel %vm421_vm0, %v293_v1, %v422_v5  ;;  %v9077_v16 = vsel %vm421_vm0, %v295_v2, %v425_v6  ;;  %v9080_v17 = vsel %vm421_vm0, %v422_v5, %v423_v3  ;;  %v301_v18 = vld [vmem:[%s9056_s23 + $0x40] sm:$0xff]  ;;  %v9084_v19 = vld [vmem:[%s9056_s23 + $0x48] sm:$0xff]  ;;  %v303_v20 = vld [vmem:[%s9056_s23 + $0x50] sm:$0xff]  ;;  %s9005_s10 = smov 32   ;;  %s9006_s14 = smov 40  }
  0x16   : > { %15073 = vst [vmem:[#allocation4_spill] sm:$0xff] %v9071_v14  ;;  %15074 = vst [vmem:[#allocation5_spill] sm:$0xff] %v9074_v15  ;;  %869 = vrot.lane.b32.xlu1 %v9071_v14, %s8998_s24  ;;  %865 = vrot.lane.b32.xlu0 %v9074_v15, %s8998_s24  ;;  %v9092_v21 = vsel %vm421_vm0, %v425_v6, %v426_v9  ;;  %v429_v22 = vrot.slane %v9064_v10, 7  ;;  %v9096_v23 = vsel %vm421_vm0, %v297_v8, %v428_v11  ;;  %v9120_v31 = vld [vmem:[%s9056_s23 + $0x58] sm:$0xff]  ;;  %v305_v32 = vld [vmem:[%s9056_s23 + $0x60] sm:$0xff]  ;;  %s9007_s15 = smov 48  }
  0x17   : > { %15075 = vst [vmem:[#allocation6_spill] sm:$0xff] %v9077_v16  ;;  %15076 = vst [vmem:[#allocation7_spill] sm:$0xff] %v9080_v17  ;;  %v431_v25 = vrot.slane %v299_v12, 7  ;;  %v432_v26 = vrot.slane %v9068_v13, 7  ;;  %v434_v28 = vrot.slane %v301_v18, 7  ;;  %v435_v29 = vrot.slane %v9084_v19, 7 }
  0x18   : > { %15077 = vst [vmem:[#allocation8_spill] sm:$0xff] %v9092_v21  ;;  %15078 = vst [vmem:[#allocation9_spill] sm:$0xff] %v9096_v23  ;;  %v9116_v27 = vsel %vm421_vm0, %v428_v11, %v429_v22  ;;  %v437_v30 = vrot.slane %v303_v20, 7  ;;  %v9124_v33 = vld [vmem:[%s9056_s23 + $0x68] sm:$0xff]  ;;  %v307_v36 = vld [vmem:[%s9056_s23 + $0x70] sm:$0xff]  ;;  %v9160_v41 = vsel %vm421_vm0, %v426_v9, %v613_v24  ;;  %v438_v42 = vrot.slane %v9120_v31, 7 }
  0x19   : > { %742 = vst.msk [vmem:[#allocation2 + $0x8] sm:$0xff] %vm740_vm1, %v9080_v17  ;;  %744 = vst.msk [vmem:[#allocation2 + $0x18] sm:$0xff] %vm740_vm1, %v9080_v17  ;;  %v9127_v34 = vsel %vm421_vm0, %v299_v12, %v431_v25  ;;  %v9132_v35 = vsel %vm421_vm0, %v431_v25, %v432_v26  ;;  %v9136_v37 = vld [vmem:[%s9056_s23 + $0x78] sm:$0xff]  ;;  %v9147_v38 = vsel %vm421_vm0, %v434_v28, %v435_v29  ;;  %v440_v43 = vrot.slane %v305_v32, 7  ;;  %v309_v47 = vld [vmem:[%s9056_s23 + $0x80] sm:$0xff]  ;;  %s8968_s16 = smul.u32 72, %s15614_s19 }
  0x1a   : > { %741 = vst.msk [vmem:[#allocation2] sm:$0xff] %vm740_vm1, %v9074_v15  ;;  %743 = vst.msk [vmem:[#allocation2 + $0x10] sm:$0xff] %vm740_vm1, %v9074_v15  ;;  %871 = vrot.lane.b32.xlu1 %v9077_v16, %s8998_s24  ;;  %867 = vrot.lane.b32.xlu0 %v9080_v17, %s8998_s24  ;;  %v9150_v39 = vsel %vm421_vm0, %v301_v18, %v434_v28  ;;  %v9153_v40 = vsel %vm421_vm0, %v303_v20, %v437_v30  ;;  %v441_v44 = vrot.slane %v9124_v33, 7  ;;  %v9173_v48 = vld [vmem:[%s9056_s23 + $0x88] sm:$0xff]  ;;  %v311_v49 = vld [vmem:[%s9056_s23 + $0x90] sm:$0xff] }
  0x1b   : > { %745 = vst.msk [vmem:[#allocation2 + $0x20] sm:$0xff] %vm740_vm1, %v9077_v16  ;;  %746 = vst.msk [vmem:[#allocation2 + $0x28] sm:$0xff] %vm740_vm1, %v9092_v21  ;;  %v443_v45 = vrot.slane %v307_v36, 7  ;;  %v14645_v46 = vrot.slane %v9136_v37, 7  ;;  %v9179_v50 = vsel %vm421_vm0, %v437_v30, %v438_v42  ;;  %v9187_v52 = vsel %vm421_vm0, %v305_v32, %v440_v43  ;;  %v9190_v53 = vld [vmem:[%s9056_s23 + $0x98] sm:$0xff]  ;;  %v313_v54 = vld [vmem:[%s9056_s23 + $0xa0] sm:$0xff]  ;;  %s13649_s22 = scalar_lea.vmem %s14636_s3, %s8968_s16 }
  0x1c   : > { %747 = vst.msk [vmem:[#allocation2 + $0x30] sm:$0xff] %vm740_vm1, %v9096_v23  ;;  %15079 = vst [vmem:[#allocation10_spill] sm:$0xff] %v9116_v27  ;;  %v9184_v51 = vsel %vm421_vm0, %v440_v43, %v441_v44  ;;  %v614_v55 = vrot.slane %v9064_v10, 6  ;;  %v446_v58 = vrot.slane %v309_v47, 7  ;;  %v14644_v59 = vrot.slane %v9173_v48, 7  ;;  %v9214_v61 = vld [vmem:[%s9056_s23 + $0xa8] sm:$0xff] }
  0x1d   : > { %15080 = vst [vmem:[#allocation11_spill] sm:$0xff] %v9127_v34  ;;  %15081 = vst [vmem:[#allocation12_spill] sm:$0xff] %v9132_v35  ;;  %v9199_v56 = vsel %vm421_vm0, %v307_v36, %v443_v45  ;;  %v9204_v57 = vsel %vm421_vm0, %v443_v45, %v14645_v46  ;;  %v449_v60 = vrot.slane %v311_v49, 7  ;;  %v615_v62 = vrot.slane %v9068_v13, 6  ;;  %v315_v1 = vld [vmem:[%s9056_s23 + $0xb0] sm:$0xff]  ;;  %v9224_v2 = vld [vmem:[%s9056_s23 + $0xb8] sm:$0xff] }
  0x1e   : > { %748 = vst.msk [vmem:[#allocation2 + $0x38] sm:$0xff] %vm740_vm1, %v9116_v27  ;;  %15082 = vst [vmem:[#allocation13_spill] sm:$0xff] %v9147_v38  ;;  %875 = vrot.lane.b32.xlu1 %v9160_v41, %s8998_s24  ;;  %873 = vrot.lane.b32.xlu0 %v9092_v21, %s8998_s24  ;;  %v14643_v63 = vrot.slane %v9190_v53, 7  ;;  %v452_v0 = vrot.slane %v313_v54, 7  ;;  %v616_v3 = vrot.slane %v9084_v19, 6  ;;  %v9230_v4 = vsel %vm421_vm0, %v446_v58, %v14644_v59  ;;  %v317_v7 = vld [vmem:[%s9056_s23 + $0xc0] sm:$0xff] }
  0x1f   : > { %15083 = vst [vmem:[#allocation14_spill] sm:$0xff] %v9150_v39  ;;  %15084 = vst [vmem:[#allocation15_spill] sm:$0xff] %v9153_v40  ;;  %v9233_v5 = vsel %vm421_vm0, %v309_v47, %v446_v58  ;;  %v9236_v6 = vsel %vm421_vm0, %v311_v49, %v449_v60  ;;  %v9240_v8 = vld [vmem:[%s9056_s23 + $0xc8] sm:$0xff]  ;;  %v319_v9 = vld [vmem:[%s9056_s23 + $0xd0] sm:$0xff]  ;;  %v9250_v11 = vsel %vm421_vm0, %v429_v22, %v614_v55  ;;  %v14641_v18 = vrot.slane %v9214_v61, 7 }
  0x20   : > { %749 = vst.msk [vmem:[#allocation2 + $0x40] sm:$0xff] %vm740_vm1, %v9127_v34  ;;  %750 = vst.msk [vmem:[#allocation2 + $0x48] sm:$0xff] %vm740_vm1, %v9132_v35  ;;  %v9255_v12 = vsel %vm421_vm0, %v449_v60, %v14643_v63  ;;  %v9259_v20 = vsel %vm421_vm0, %v313_v54, %v452_v0  ;;  %v617_v10 = vrot.slane %v9120_v31, 6  ;;  %v618_v22 = vrot.slane %v9124_v33, 6  ;;  %v9281_v43 = vld [vmem:[%s9056_s23 + $0xd8] sm:$0xff]  ;;  %v321_v45 = vld [vmem:[%s9056_s23 + $0xe0] sm:$0xff] }
  0x21   : > { %15085 = vst [vmem:[#allocation16_spill] sm:$0xff] %v9160_v41  ;;  %751 = vst.msk [vmem:[#allocation2 + $0x50] sm:$0xff] %vm740_vm1, %v9150_v39  ;;  %v455_v24 = vrot.slane %v315_v1, 7  ;;  %v14640_v25 = vrot.slane %v9224_v2, 7  ;;  %v9277_v28 = vsel %vm421_vm0, %v452_v0, %v14641_v18  ;;  %v458_v30 = vrot.slane %v317_v7, 7  ;;  %v322_v47 = vld [vmem:[%s9056_s23 + $0xe8] sm:$0xff] }
  0x22   : > { %752 = vst.msk [vmem:[#allocation2 + $0x58] sm:$0xff] %vm740_vm1, %v9147_v38  ;;  %753 = vst.msk [vmem:[#allocation2 + $0x60] sm:$0xff] %vm740_vm1, %v9153_v40  ;;  %879 = vrot.lane.b32.xlu1 %v9116_v27, %s8998_s24  ;;  %877 = vrot.lane.b32.xlu0 %v9096_v23, %s8998_s24  ;;  %v14639_v32 = vrot.slane %v9240_v8, 7  ;;  %v461_v36 = vrot.slane %v319_v9, 7  ;;  %v9288_v49 = vsel %vm421_vm0, %v432_v26, %v615_v62  ;;  %v325_v60 = vld [vmem:[%s9056_s23 + $0x100] sm:$0xff]  ;;  %v326_v0 = vld [vmem:[%s9056_s23 + $0x108] sm:$0xff] }
  0x23   : > { %15086 = vst [vmem:[#allocation17_spill] sm:$0xff] %v9179_v50  ;;  %15087 = vst [vmem:[#allocation18_spill] sm:$0xff] %v9184_v51  ;;  %v9293_v54 = vsel %vm421_vm0, %v435_v29, %v616_v3  ;;  %v9296_v55 = vsel %vm421_vm0, %v315_v1, %v455_v24  ;;  %v9301_v58 = vsel %vm421_vm0, %v455_v24, %v14640_v25  ;;  %v14642_v62 = vrot.slane %v9281_v43, 7  ;;  %v328_v24 = vld [vmem:[%s9056_s23 + $0x118] sm:$0xff]  ;;  %v333_v46 = vld [vmem:[%s9056_s23 + $0x140] sm:$0xff] }
  0x24   : > { %15088 = vst [vmem:[#allocation19_spill] sm:$0xff] %v9187_v52  ;;  %15089 = vst [vmem:[#allocation20_spill] sm:$0xff] %v9199_v56  ;;  %v9314_v13 = vsel %vm421_vm0, %v458_v30, %v14639_v32  ;;  %v9317_v19 = vsel %vm421_vm0, %v317_v7, %v458_v30  ;;  %v9320_v26 = vsel %vm421_vm0, %v319_v9, %v461_v36  ;;  %v464_v1 = vrot.slane %v321_v45, 7  ;;  %v329_v30 = vld [vmem:[%s9056_s23 + $0x120] sm:$0xff]  ;;  %v334_v32 = vld [vmem:[%s9056_s23 + $0x148] sm:$0xff] }
  0x25   : > { %15090 = vst [vmem:[#allocation21_spill] sm:$0xff] %v9204_v57  ;;  %754 = vst.msk [vmem:[#allocation2 + $0x68] sm:$0xff] %vm740_vm1, %v9179_v50  ;;  %v9329_v29 = vsel %vm421_vm0, %v438_v42, %v617_v10  ;;  %v465_v3 = vrot.slane %v322_v47, 7  ;;  %v9341_v31 = vsel %vm421_vm0, %v441_v44, %v618_v22  ;;  %v470_v42 = vrot.slane %v325_v60, 7  ;;  %v327_v10 = vld [vmem:[%s9056_s23 + $0x110] sm:$0xff]  ;;  %v330_v44 = vld [vmem:[%s9056_s23 + $0x128] sm:$0xff] }
  0x26   : > { %755 = vst.msk [vmem:[#allocation2 + $0x70] sm:$0xff] %vm740_vm1, %v9187_v52  ;;  %756 = vst.msk [vmem:[#allocation2 + $0x78] sm:$0xff] %vm740_vm1, %v9184_v51  ;;  %883 = vrot.lane.b32.xlu1 %v9127_v34, %s8998_s24  ;;  %881 = vrot.lane.b32.xlu0 %v9250_v11, %s8998_s24  ;;  %v626_v7 = vrot.slane %v322_v47, 6  ;;  %v471_v9 = vrot.slane %v326_v0, 7  ;;  %v9350_v25 = vsel %vm421_vm0, %v461_v36, %v14642_v62  ;;  %v331_v22 = vld [vmem:[%s9056_s23 + $0x130] sm:$0xff]  ;;  %v628_v62 = vrot.slane %v326_v0, 6 }
  0x27   : > { %757 = vst.msk [vmem:[#allocation2 + $0x80] sm:$0xff] %vm740_vm1, %v9199_v56  ;;  %758 = vst.msk [vmem:[#allocation2 + $0x88] sm:$0xff] %vm740_vm1, %v9204_v57  ;;  %v9353_v18 = vsel %vm421_vm0, %v464_v1, %v465_v3  ;;  %v9356_v33 = vsel %vm421_vm0, %v321_v45, %v464_v1  ;;  %v9365_v47 = vsel %vm421_vm0, %v325_v60, %v470_v42  ;;  %v473_v45 = vrot.slane %v327_v10, 7  ;;  %v332_v0 = vld [vmem:[%s9056_s23 + $0x138] sm:$0xff]  ;;  %v335_v23 = vld [vmem:[%s9056_s23 + $0x150] sm:$0xff] }
  0x28   : > { %15091 = vst [vmem:[#allocation22_spill] sm:$0xff] %v9233_v5  ;;  %15092 = vst [vmem:[#allocation23_spill] sm:$0xff] %v9236_v6  ;;  %v9368_v36 = vsel %vm421_vm0, %v465_v3, %v626_v7  ;;  %v9371_v63 = vsel %vm421_vm0, %v470_v42, %v471_v9  ;;  %v474_v60 = vrot.slane %v328_v24, 7  ;;  %v476_v1 = vrot.slane %v329_v30, 7  ;;  %v338_v27 = vld [vmem:[%s9056_s23 + $0x168] sm:$0xff]  ;;  %v339_v21 = vld [vmem:[%s9056_s23 + $0x170] sm:$0xff] }
  0x29   : > { %15093 = vst [vmem:[#allocation24_spill] sm:$0xff] %v9250_v11  ;;  %15094 = vst [vmem:[#allocation25_spill] sm:$0xff] %v9255_v12  ;;  %v629_v3 = vrot.slane %v328_v24, 6  ;;  %v9389_v42 = vsel %vm421_vm0, %v471_v9, %v628_v62  ;;  %v477_v7 = vrot.slane %v330_v44, 7  ;;  %v630_v24 = vrot.slane %v330_v44, 6  ;;  %v336_v62 = vld [vmem:[%s9056_s23 + $0x158] sm:$0xff] }
  0x2a   : > { %15095 = vst [vmem:[#allocation26_spill] sm:$0xff] %v9259_v20  ;;  %759 = vst.msk [vmem:[#allocation2 + $0x90] sm:$0xff] %vm740_vm1, %v9233_v5  ;;  %887 = vrot.lane.b32.xlu1 %v9288_v49, %s8998_s24  ;;  %885 = vrot.lane.b32.xlu0 %v9132_v35, %s8998_s24  ;;  %v479_v59 = vrot.slane %v331_v22, 7  ;;  %v9394_v35 = vsel %vm421_vm0, %v473_v45, %v474_v60  ;;  %v9400_v11 = vsel %vm421_vm0, %v329_v30, %v476_v1  ;;  %v337_v9 = vld [vmem:[%s9056_s23 + $0x160] sm:$0xff]  ;;  %v340_v41 = vld [vmem:[%s9056_s23 + $0x178] sm:$0xff] }
  0x2b   : > { %760 = vst.msk [vmem:[#allocation2 + $0x98] sm:$0xff] %vm740_vm1, %v9230_v4  ;;  %761 = vst.msk [vmem:[#allocation2 + $0xa0] sm:$0xff] %vm740_vm1, %v9236_v6  ;;  %v9403_v34 = vsel %vm421_vm0, %v474_v60, %v629_v3  ;;  %v9413_v44 = vsel %vm421_vm0, %v476_v1, %v477_v7  ;;  %v480_v30 = vrot.slane %v332_v0, 7  ;;  %v482_v60 = vrot.slane %v333_v46, 7  ;;  %v341_v16 = vld [vmem:[%s9056_s23 + $0x180] sm:$0xff]  ;;  %v342_v15 = vld [vmem:[%s9056_s23 + $0x188] sm:$0xff] }
  0x2c   : > { %762 = vst.msk [vmem:[#allocation2 + $0xa8] sm:$0xff] %vm740_vm1, %v9255_v12  ;;  %763 = vst.msk [vmem:[#allocation2 + $0xb0] sm:$0xff] %vm740_vm1, %v9259_v20  ;;  %v631_v1 = vrot.slane %v332_v0, 6  ;;  %v632_v3 = vrot.slane %v334_v32, 6  ;;  %v343_v17 = vld [vmem:[%s9056_s23 + $0x190] sm:$0xff] }
  0x2d   : > { %15096 = vst [vmem:[#allocation27_spill] sm:$0xff] %v9277_v28  ;;  %15097 = vst [vmem:[#allocation28_spill] sm:$0xff] %v9288_v49  ;;  %v9397_v49 = vsel %vm421_vm0, %v327_v10, %v473_v45  ;;  %v9416_v10 = vsel %vm421_vm0, %v477_v7, %v630_v24  ;;  %v9419_v45 = vsel %vm421_vm0, %v331_v22, %v479_v59  ;;  %v483_v22 = vrot.slane %v334_v32, 7 }
  0x2e   : > { %15098 = vst [vmem:[#allocation29_spill] sm:$0xff] %v9293_v54  ;;  %15099 = vst [vmem:[#allocation30_spill] sm:$0xff] %v9296_v55  ;;  %891 = vrot.lane.b32.xlu1 %v9147_v38, %s8998_s24  ;;  %889 = vrot.lane.b32.xlu0 %v9150_v39, %s8998_s24  ;;  %v9432_v7 = vsel %vm421_vm0, %v479_v59, %v480_v30  ;;  %v485_v24 = vrot.slane %v335_v23, 7  ;;  %v486_v39 = vrot.slane %v336_v62, 7  ;;  %v488_v38 = vrot.slane %v337_v9, 7 }
  0x2f   : > { %15100 = vst [vmem:[#allocation31_spill] sm:$0xff] %v9301_v58  ;;  %764 = vst.msk [vmem:[#allocation2 + $0xb8] sm:$0xff] %vm740_vm1, %v9277_v28  ;;  %v9438_v0 = vsel %vm421_vm0, %v333_v46, %v482_v60  ;;  %v9441_v14 = vsel %vm421_vm0, %v480_v30, %v631_v1  ;;  %v9446_v32 = vsel %vm421_vm0, %v482_v60, %v483_v22  ;;  %v633_v1 = vrot.slane %v336_v62, 6 }
  0x30   : > { %15101 = vst [vmem:[#allocation32_spill] sm:$0xff] %v9314_v13  ;;  %15102 = vst [vmem:[#allocation33_spill] sm:$0xff] %v9317_v19  ;;  %v9449_v59 = vsel %vm421_vm0, %v483_v22, %v632_v3  ;;  %v9462_v46 = vsel %vm421_vm0, %v485_v24, %v486_v39  ;;  %v9465_v30 = vsel %vm421_vm0, %v335_v23, %v485_v24  ;;  %v489_v22 = vrot.slane %v338_v27, 7 }
  0x31   : > { %15103 = vst [vmem:[#allocation34_spill] sm:$0xff] %v9320_v26  ;;  %765 = vst.msk [vmem:[#allocation2 + $0xc0] sm:$0xff] %vm740_vm1, %v9296_v55  ;;  %v9468_v60 = vsel %vm421_vm0, %v337_v9, %v488_v38  ;;  %v634_v3 = vrot.slane %v338_v27, 6  ;;  %v491_v23 = vrot.slane %v339_v21, 7  ;;  %v492_v24 = vrot.slane %v340_v41, 7 }
  0x32   : > { %766 = vst.msk [vmem:[#allocation2 + $0xc8] sm:$0xff] %vm740_vm1, %v9301_v58  ;;  %15104 = vst [vmem:[#allocation35_spill] sm:$0xff] %v9329_v29  ;;  %895 = vrot.lane.b32.xlu1 %v9153_v40, %s8998_s24  ;;  %893 = vrot.lane.b32.xlu0 %v9293_v54, %s8998_s24  ;;  %v9477_v54 = vsel %vm421_vm0, %v486_v39, %v633_v1  ;;  %v494_v9 = vrot.slane %v341_v16, 7  ;;  %v635_v62 = vrot.slane %v340_v41, 6  ;;  %v495_v40 = vrot.slane %v342_v15, 7  ;;  %v346_v39 = vld [vmem:[%s9056_s23 + $0x1a8] sm:$0xff] }
  0x33   : > { %767 = vst.msk [vmem:[#allocation2 + $0xd0] sm:$0xff] %vm740_vm1, %v9317_v19  ;;  %768 = vst.msk [vmem:[#allocation2 + $0xd8] sm:$0xff] %vm740_vm1, %v9314_v13  ;;  %v9492_v27 = vsel %vm421_vm0, %v339_v21, %v491_v23  ;;  %v347_v1 = vld [vmem:[%s9056_s23 + $0x1b0] sm:$0xff] }
  0x34   : > { %769 = vst.msk [vmem:[#allocation2 + $0xe0] sm:$0xff] %vm740_vm1, %v9320_v26  ;;  %15105 = vst [vmem:[#allocation36_spill] sm:$0xff] %v9341_v31  ;;  %v9507_v21 = vsel %vm421_vm0, %v341_v16, %v494_v9  ;;  %v9513_v41 = vsel %vm421_vm0, %v494_v9, %v495_v40  ;;  %v348_v16 = vld [vmem:[%s9056_s23 + $0x1b8] sm:$0xff]  ;;  %v349_v9 = vld [vmem:[%s9056_s23 + $0x1c0] sm:$0xff] }
  0x35   : > { %15106 = vst [vmem:[#allocation37_spill] sm:$0xff] %v9350_v25  ;;  %15107 = vst [vmem:[#allocation38_spill] sm:$0xff] %v9353_v18 }
  0x36   : > { %15108 = vst [vmem:[#allocation39_spill] sm:$0xff] %v9356_v33  ;;  %15109 = vst [vmem:[#allocation40_spill] sm:$0xff] %v9368_v36  ;;  %899 = vrot.lane.b32.xlu1 %v9329_v29, %s8998_s24  ;;  %897 = vrot.lane.b32.xlu0 %v9179_v50, %s8998_s24 }
  0x37   : > { %770 = vst.msk [vmem:[#allocation2 + $0xe8] sm:$0xff] %vm740_vm1, %v9350_v25  ;;  %771 = vst.msk [vmem:[#allocation2 + $0xf0] sm:$0xff] %vm740_vm1, %v9356_v33 }
  0x38   : > { %772 = vst.msk [vmem:[#allocation2 + $0xf8] sm:$0xff] %vm740_vm1, %v9353_v18  ;;  %773 = vst.msk [vmem:[#allocation2 + $0x100] sm:$0xff] %vm740_vm1, %v9365_v47 }
  0x39   : > { %774 = vst.msk [vmem:[#allocation2 + $0x108] sm:$0xff] %vm740_vm1, %v9371_v63  ;;  %775 = vst.msk [vmem:[#allocation2 + $0x110] sm:$0xff] %vm740_vm1, %v9365_v47 }
  0x3a   : > { %776 = vst.msk [vmem:[#allocation2 + $0x118] sm:$0xff] %vm740_vm1, %v9371_v63  ;;  %15110 = vst [vmem:[#allocation41_spill] sm:$0xff] %v9389_v42  ;;  %903 = vrot.lane.b32.xlu1 %v9184_v51, %s8998_s24  ;;  %901 = vrot.lane.b32.xlu0 %v9187_v52, %s8998_s24 }
  0x3b   : > { %15111 = vst [vmem:[#allocation42_spill] sm:$0xff] %v9400_v11  ;;  %15112 = vst [vmem:[#allocation43_spill] sm:$0xff] %v9403_v34 }
  0x3c   : > { %15113 = vst [vmem:[#allocation44_spill] sm:$0xff] %v9413_v44  ;;  %15114 = vst [vmem:[#allocation45_spill] sm:$0xff] %v9416_v10 }
  0x3d   : > { %777 = vst.msk [vmem:[#allocation2 + $0x120] sm:$0xff] %vm740_vm1, %v9397_v49  ;;  %778 = vst.msk [vmem:[#allocation2 + $0x128] sm:$0xff] %vm740_vm1, %v9394_v35 }
  0x3e   : > { %779 = vst.msk [vmem:[#allocation2 + $0x130] sm:$0xff] %vm740_vm1, %v9400_v11  ;;  %780 = vst.msk [vmem:[#allocation2 + $0x138] sm:$0xff] %vm740_vm1, %v9413_v44  ;;  %907 = vrot.lane.b32.xlu1 %v9199_v56, %s8998_s24  ;;  %905 = vrot.lane.b32.xlu0 %v9341_v31, %s8998_s24 }
  0x3f   : > { %781 = vst.msk [vmem:[#allocation2 + $0x140] sm:$0xff] %vm740_vm1, %v9419_v45  ;;  %15115 = vst [vmem:[#allocation46_spill] sm:$0xff] %v9432_v7 }
  0x40   : > { %15116 = vst [vmem:[#allocation47_spill] sm:$0xff] %v9438_v0  ;;  %15117 = vst [vmem:[#allocation48_spill] sm:$0xff] %v9441_v14 }
  0x41   : > { %782 = vst.msk [vmem:[#allocation2 + $0x148] sm:$0xff] %vm740_vm1, %v9432_v7  ;;  %15118 = vst [vmem:[#allocation49_spill] sm:$0xff] %v9446_v32 }
  0x42   : > { %15119 = vst [vmem:[#allocation50_spill] sm:$0xff] %v9449_v59  ;;  %783 = vst.msk [vmem:[#allocation2 + $0x150] sm:$0xff] %vm740_vm1, %v9438_v0  ;;  %v9489_v59 = vsel %vm421_vm0, %v491_v23, %v492_v24  ;;  %909 = vrot.lane.b32.xlu0 %v9204_v57, %s8998_s24 }
  0x43   : > { %784 = vst.msk [vmem:[#allocation2 + $0x158] sm:$0xff] %vm740_vm1, %v9446_v32  ;;  %15120 = vst [vmem:[#allocation51_spill] sm:$0xff] %v9462_v46  ;;  %v345_v32 = vld [vmem:[%s9056_s23 + $0x1a0] sm:$0xff] }
  0x44   : > { %15121 = vst [vmem:[#allocation52_spill] sm:$0xff] %v9465_v30  ;;  %15122 = vst [vmem:[#allocation53_spill] sm:$0xff] %v9468_v60  ;;  %v500_v50 = vrot.slane %v345_v32, 7 }
  0x45   : > { %786 = vst.msk [vmem:[#allocation2 + $0x168] sm:$0xff] %vm740_vm1, %v9462_v46  ;;  %785 = vst.msk [vmem:[#allocation2 + $0x160] sm:$0xff] %vm740_vm1, %v9465_v30  ;;  %v344_v46 = vld [vmem:[%s9056_s23 + $0x198] sm:$0xff]  ;;  %v9483_v30 = vsel %vm421_vm0, %v488_v38, %v489_v22  ;;  %v9510_v38 = vsel %vm421_vm0, %v492_v24, %v635_v62  ;;  %v501_v24 = vrot.slane %v346_v39, 7  ;;  %v638_v62 = vrot.slane %v346_v39, 6  ;;  %v351_v39 = vld [vmem:[%s9056_s23 + $0x1d0] sm:$0xff] }
  0x46   : > { %787 = vst.msk [vmem:[#allocation2 + $0x170] sm:$0xff] %vm740_vm1, %v9468_v60  ;;  %15123 = vst [vmem:[#allocation54_spill] sm:$0xff] %v9477_v54  ;;  %v9486_v60 = vsel %vm421_vm0, %v489_v22, %v634_v3  ;;  %v636_v22 = vrot.slane %v342_v15, 6  ;;  %v497_v3 = vrot.slane %v343_v17, 7  ;;  %v498_v23 = vrot.slane %v344_v46, 7  ;;  %v350_v15 = vld [vmem:[%s9056_s23 + $0x1c8] sm:$0xff]  ;;  %913 = vrot.lane.b32.xlu0 %v9233_v5, %s8998_s24 }
  0x47   : > { %15124 = vst [vmem:[#allocation55_spill] sm:$0xff] %v9483_v30  ;;  %15125 = vst [vmem:[#allocation56_spill] sm:$0xff] %v9486_v60  ;;  %v637_v29 = vrot.slane %v344_v46, 6  ;;  %v507_v52 = vrot.slane %v350_v15, 7 }
  0x48   : > { %15126 = vst [vmem:[#allocation57_spill] sm:$0xff] %v9489_v59  ;;  %15127 = vst [vmem:[#allocation58_spill] sm:$0xff] %v9492_v27 }
  0x49   : > { %788 = vst.msk [vmem:[#allocation2 + $0x178] sm:$0xff] %vm740_vm1, %v9483_v30  ;;  %790 = vst.msk [vmem:[#allocation2 + $0x188] sm:$0xff] %vm740_vm1, %v9489_v59  ;;  %v9532_v59 = vsel %vm421_vm0, %v345_v32, %v500_v50  ;;  %v9535_v46 = vsel %vm421_vm0, %v498_v23, %v637_v29  ;;  %v504_v29 = vrot.slane %v348_v16, 7 }
  0x4a   : > { %789 = vst.msk [vmem:[#allocation2 + $0x180] sm:$0xff] %vm740_vm1, %v9492_v27  ;;  %15128 = vst [vmem:[#allocation59_spill] sm:$0xff] %v9507_v21  ;;  %v9521_v27 = vsel %vm421_vm0, %v495_v40, %v636_v22  ;;  %v9551_v40 = vsel %vm421_vm0, %v501_v24, %v638_v62  ;;  %v352_v22 = vld [vmem:[%s9056_s23 + $0x1d8] sm:$0xff]  ;;  %v509_v62 = vrot.slane %v351_v39, 7 }
  0x4b   : > { %15129 = vst [vmem:[#allocation60_spill] sm:$0xff] %v9510_v38  ;;  %15130 = vst [vmem:[#allocation61_spill] sm:$0xff] %v9513_v41  ;;  %v503_v38 = vrot.slane %v347_v1, 7  ;;  %v510_v51 = vrot.slane %v352_v22, 7 }
  0x4c   : > { %791 = vst.msk [vmem:[#allocation2 + $0x190] sm:$0xff] %vm740_vm1, %v9507_v21  ;;  %792 = vst.msk [vmem:[#allocation2 + $0x198] sm:$0xff] %vm740_vm1, %v9513_v41  ;;  %v9526_v21 = vsel %vm421_vm0, %v497_v3, %v498_v23  ;;  %v9529_v41 = vsel %vm421_vm0, %v343_v17, %v497_v3  ;;  %v9548_v17 = vsel %vm421_vm0, %v500_v50, %v501_v24  ;;  %v506_v3 = vrot.slane %v349_v9, 7 }
  0x4d   : > { %15131 = vst [vmem:[#allocation62_spill] sm:$0xff] %v9521_v27  ;;  %15132 = vst [vmem:[#allocation63_spill] sm:$0xff] %v9526_v21  ;;  %v9554_v32 = vsel %vm421_vm0, %v347_v1, %v503_v38  ;;  %v639_v23 = vrot.slane %v348_v16, 6  ;;  %v640_v50 = vrot.slane %v350_v15, 6  ;;  %v9563_v24 = vsel %vm421_vm0, %v503_v38, %v504_v29 }
  0x4e   : > { %15133 = vst [vmem:[#allocation64_spill] sm:$0xff] %v9529_v41  ;;  %15134 = vst [vmem:[#allocation65_spill] sm:$0xff] %v9532_v59  ;;  %v9568_v1 = vsel %vm421_vm0, %v349_v9, %v506_v3  ;;  %v9588_v38 = vsel %vm421_vm0, %v509_v62, %v510_v51  ;;  %v9591_v9 = vsel %vm421_vm0, %v351_v39, %v509_v62  ;;  %v15146_v15 = vrot.slane %v9136_v37, 6 }
  0x4f   : > { %15135 = vst [vmem:[#allocation66_spill] sm:$0xff] %v9535_v46  ;;  %794 = vst.msk [vmem:[#allocation2 + $0x1a8] sm:$0xff] %vm740_vm1, %v9526_v21  ;;  %v9577_v16 = vsel %vm421_vm0, %v507_v52, %v640_v50  ;;  %v641_v50 = vrot.slane %v352_v22, 6  ;;  %v620_v62 = vrot.slane %v9173_v48, 6 }
  0x50   : > { %793 = vst.msk [vmem:[#allocation2 + $0x1a0] sm:$0xff] %vm740_vm1, %v9529_v41  ;;  %795 = vst.msk [vmem:[#allocation2 + $0x1b0] sm:$0xff] %vm740_vm1, %v9532_v59 }
  0x51   : > { %15136 = vst [vmem:[#allocation67_spill] sm:$0xff] %v9548_v17  ;;  %15137 = vst [vmem:[#allocation68_spill] sm:$0xff] %v9551_v40  ;;  %v9609_v39 = vsel %vm421_vm0, %v510_v51, %v641_v50 }
  0x52   : > { %15138 = vst [vmem:[#allocation69_spill] sm:$0xff] %v9554_v32  ;;  %796 = vst.msk [vmem:[#allocation2 + $0x1b8] sm:$0xff] %vm740_vm1, %v9548_v17  ;;  %v9571_v17 = vsel %vm421_vm0, %v504_v29, %v639_v23  ;;  %v15147_v29 = vrot.slane %v9136_v37, 7  ;;  %v354_v37 = vld [vmem:[%s9056_s23 + $0x1e8] sm:$0xff] }
  0x53   : > { %797 = vst.msk [vmem:[#allocation2 + $0x1c0] sm:$0xff] %vm740_vm1, %v9554_v32  ;;  %15139 = vst [vmem:[#allocation70_spill] sm:$0xff] %v9563_v24  ;;  %v9574_v32 = vsel %vm421_vm0, %v506_v3, %v507_v52  ;;  %v353_v52 = vld [vmem:[%s9056_s23 + $0x1e0] sm:$0xff]  ;;  %v642_v22 = vrot.slane %v354_v37, 6 }
  0x54   : > { %798 = vst.msk [vmem:[#allocation2 + $0x1c8] sm:$0xff] %vm740_vm1, %v9563_v24  ;;  %15140 = vst [vmem:[#allocation71_spill] sm:$0xff] %v9568_v1  ;;  %v9599_v3 = vsel %vm421_vm0, %v15147_v29, %v15146_v15  ;;  %v512_v23 = vrot.slane %v353_v52, 7  ;;  %v513_v15 = vrot.slane %v354_v37, 7  ;;  %v15153_v29 = vrot.slane %v9173_v48, 7 }
  0x55   : > { %15141 = vst [vmem:[#allocation72_spill] sm:$0xff] %v9571_v17  ;;  %15142 = vst [vmem:[#allocation73_spill] sm:$0xff] %v9574_v32  ;;  %911 = vrot.lane.b32.xlu1 %v9599_v3, %s8998_s24  ;;  %v15155_v37 = vrot.slane %v9190_v53, 7  ;;  %v622_v48 = vrot.slane %v9214_v61, 6 }
  0x56   : > { %15143 = vst [vmem:[#allocation74_spill] sm:$0xff] %v9577_v16  ;;  %799 = vst.msk [vmem:[#allocation2 + $0x1d0] sm:$0xff] %vm740_vm1, %v9568_v1  ;;  %v9606_v31 = vsel %vm421_vm0, %v353_v52, %v512_v23  ;;  %v9620_v52 = vsel %vm421_vm0, %v512_v23, %v513_v15  ;;  %v9623_v51 = vsel %vm421_vm0, %v513_v15, %v642_v22  ;;  %v621_v23 = vrot.slane %v9190_v53, 6 }
  0x57   : > { %800 = vst.msk [vmem:[#allocation2 + $0x1d8] sm:$0xff] %vm740_vm1, %v9574_v32  ;;  %15144 = vst [vmem:[#allocation75_spill] sm:$0xff] %v9588_v38  ;;  %v9634_v50 = vsel %vm421_vm0, %v15153_v29, %v620_v62  ;;  %v15157_v62 = vrot.slane %v9214_v61, 7  ;;  %v623_v22 = vrot.slane %v9224_v2, 6  ;;  %v15159_v29 = vrot.slane %v9224_v2, 7 }
  0x58   : > { %15145 = vst [vmem:[#allocation76_spill] sm:$0xff] %v9591_v9  ;;  %15148 = vst [vmem:[#allocation77_spill] sm:$0xff] %v9599_v3  ;;  %917 = vrot.lane.b32.xlu0 %v9634_v50, %s8998_s24  ;;  %v9644_v15 = vsel %vm421_vm0, %v15155_v37, %v621_v23  ;;  %v624_v61 = vrot.slane %v9240_v8, 6  ;;  %v15161_v37 = vrot.slane %v9240_v8, 7 }
  0x59   : > { %802 = vst.msk [vmem:[#allocation2 + $0x1e8] sm:$0xff] %vm740_vm1, %v9588_v38  ;;  %801 = vst.msk [vmem:[#allocation2 + $0x1e0] sm:$0xff] %vm740_vm1, %v9591_v9  ;;  %915 = vrot.lane.b32.xlu1 %v9230_v4, %s8998_s24  ;;  %v9658_v53 = vsel %vm421_vm0, %v15157_v62, %v622_v48  ;;  %v9668_v23 = vsel %vm421_vm0, %v15159_v29, %v623_v22  ;;  %v625_v48 = vrot.slane %v9281_v43, 6  ;;  %v15163_v62 = vrot.slane %v9281_v43, 7  ;;  %v15165_v29 = vld [vmem:[#allocation50_spill] sm:$0xff] }
  0x5a   : > { %15149 = vst [vmem:[#allocation78_spill] sm:$0xff] %v9606_v31  ;;  %15150 = vst [vmem:[#allocation79_spill] sm:$0xff] %v9609_v39  ;;  %v9682_v2 = vsel %vm421_vm0, %v15161_v37, %v624_v61  ;;  %v15166_v61 = vld [vmem:[#allocation49_spill] sm:$0xff] }
  0x5b   : > { %803 = vst.msk [vmem:[#allocation2 + $0x1f0] sm:$0xff] %vm740_vm1, %v9606_v31  ;;  %15151 = vst [vmem:[#allocation80_spill] sm:$0xff] %v9620_v52  ;;  %v9692_v22 = vsel %vm421_vm0, %v15163_v62, %v625_v48  ;;  %v15167_v62 = vld [vmem:[#allocation51_spill] sm:$0xff] }
  0x5c   : > { %15152 = vst [vmem:[#allocation81_spill] sm:$0xff] %v9623_v51  ;;  %804 = vst.msk [vmem:[#allocation2 + $0x1f8] sm:$0xff] %vm740_vm1, %v9620_v52  ;;  %921 = vrot.lane.b32.xlu0 %v9255_v12, %s8998_s24 }
  0x5d   : > { %15154 = vst [vmem:[#allocation82_spill] sm:$0xff] %v9634_v50  ;;  %919 = vrot.lane.b32.xlu1 %v9236_v6, %s8998_s24  ;;  %15156 = vst [vmem:[#allocation83_spill] sm:$0xff] %v9644_v15 }
  0x5e   : > { %15158 = vst [vmem:[#allocation84_spill] sm:$0xff] %v9658_v53  ;;  %15160 = vst [vmem:[#allocation85_spill] sm:$0xff] %v9668_v23 }
  0x5f   : > { %15162 = vst [vmem:[#allocation86_spill] sm:$0xff] %v9682_v2  ;;  %15164 = vst [vmem:[#allocation87_spill] sm:$0xff] %v9692_v22 }
  0x60   : > { %925 = vrot.lane.b32.xlu0 %v9259_v20, %s8998_s24 }
  0x61   : > { %923 = vrot.lane.b32.xlu1 %v9644_v15, %s8998_s24 }
  0x64   : > { %929 = vrot.lane.b32.xlu0 %v9658_v53, %s8998_s24 }
  0x65   : > { %927 = vrot.lane.b32.xlu1 %v9277_v28, %s8998_s24 }
  0x68   : > { %933 = vrot.lane.b32.xlu0 %v9301_v58, %s8998_s24 }
  0x69   : > { %931 = vrot.lane.b32.xlu1 %v9296_v55, %s8998_s24 }
  0x6c   : > { %937 = vrot.lane.b32.xlu0 %v9317_v19, %s8998_s24 }
  0x6d   : > { %935 = vrot.lane.b32.xlu1 %v9668_v23, %s8998_s24 }
  0x70   : > { %941 = vrot.lane.b32.xlu0 %v9682_v2, %s8998_s24 }
  0x71   : > { %939 = vrot.lane.b32.xlu1 %v9314_v13, %s8998_s24 }
  0x74   : > { %945 = vrot.lane.b32.xlu0 %v9350_v25, %s8998_s24 }
  0x75   : > { %943 = vrot.lane.b32.xlu1 %v9320_v26, %s8998_s24 }
  0x78   : > { %949 = vrot.lane.b32.xlu0 %v9356_v33, %s8998_s24 }
  0x79   : > { %947 = vrot.lane.b32.xlu1 %v9692_v22, %s8998_s24 }
  0x7c   : > { %953 = vrot.lane.b32.xlu0 %v9368_v36, %s8998_s24 }
  0x7d   : > { %951 = vrot.lane.b32.xlu1 %v9353_v18, %s8998_s24 }
  0x80   : > { %957 = vrot.lane.b32.xlu0 %v9371_v63, %s8998_s24 }
  0x81   : > { %955 = vrot.lane.b32.xlu1 %v9365_v47, %s8998_s24 }
  0x84   : > { %961 = vrot.lane.b32.xlu0 %v9397_v49, %s8998_s24 }
  0x85   : > { %959 = vrot.lane.b32.xlu1 %v9389_v42, %s8998_s24 }
  0x88   : > { %965 = vrot.lane.b32.xlu0 %v9403_v34, %s8998_s24  ;;  %v870_v8 = vpop.permute.xlu1 %869  ;;  %v866_v43 = vpop.permute.xlu0 %865 }
  0x89   : > { %963 = vrot.lane.b32.xlu1 %v9394_v35, %s8998_s24  ;;  %1140 = vst.msk [vmem:[#allocation2 + $0xf] sm:$0x1] %vm1139_vm2, %v870_v8  ;;  %1143 = vst.msk [vmem:[#allocation2 + $0x1f] sm:$0x1] %vm1139_vm2, %v870_v8  ;;  %v15168_v8 = vld [vmem:[#allocation52_spill] sm:$0xff] }
  0x8a   : > { %1136 = vst.msk [vmem:[#allocation2 - $0x1] sm:$0xfe] %vm1135_vm3, %v866_v43  ;;  %1141 = vst.msk [vmem:[#allocation2 + $0xf] sm:$0xfe] %vm1135_vm3, %v866_v43 }
  0x8c   : > { %969 = vrot.lane.b32.xlu0 %v9413_v44, %s8998_s24  ;;  %v872_v37 = vpop.permute.xlu1 %871  ;;  %v868_v48 = vpop.permute.xlu0 %867 }
  0x8d   : > { %967 = vrot.lane.b32.xlu1 %v9400_v11, %s8998_s24  ;;  %1144 = vst.msk [vmem:[#allocation2 + $0x1f] sm:$0xfe] %vm1135_vm3, %v872_v37 }
  0x8e   : > { %1138 = vst.msk [vmem:[#allocation2 + $0x7] sm:$0xff] %vm1137_vm4, %v868_v48  ;;  %1142 = vst.msk [vmem:[#allocation2 + $0x17] sm:$0xff] %vm1137_vm4, %v868_v48 }
  0x90   : > { %973 = vrot.lane.b32.xlu0 %v9419_v45, %s8998_s24  ;;  %v876_v43 = vpop.permute.xlu1 %875 }
  0x91   : > { %971 = vrot.lane.b32.xlu1 %v9416_v10, %s8998_s24  ;;  %1146 = vst.msk [vmem:[#allocation2 + $0x2f] sm:$0x1] %vm1139_vm2, %v876_v43 }
  0x94   : > { %977 = vrot.lane.b32.xlu0 %v9441_v14, %s8998_s24  ;;  %v880_v37 = vpop.permute.xlu1 %879 }
  0x95   : > { %975 = vrot.lane.b32.xlu1 %v9432_v7, %s8998_s24  ;;  %1148 = vst.msk [vmem:[#allocation2 + $0x37] sm:$0xff] %vm1137_vm4, %v880_v37 }
  0x98   : > { %981 = vrot.lane.b32.xlu0 %v15166_v61, %s8998_s24  ;;  %v15169_v61 = vld [vmem:[#allocation53_spill] sm:$0xff]  ;;  %v884_v43 = vpop.permute.xlu1 %883 }
  0x99   : > { %979 = vrot.lane.b32.xlu1 %v9438_v0, %s8998_s24  ;;  %1150 = vst.msk [vmem:[#allocation2 + $0x3f] sm:$0xfe] %vm1135_vm3, %v884_v43 }
  0x9c   : > { %985 = vrot.lane.b32.xlu0 %v15168_v8, %s8998_s24  ;;  %v888_v37 = vpop.permute.xlu1 %887 }
  0x9d   : > { %983 = vrot.lane.b32.xlu1 %v15165_v29, %s8998_s24  ;;  %v874_v29 = vpop.permute.xlu0 %873  ;;  %1152 = vst.msk [vmem:[#allocation2 + $0x4f] sm:$0x1] %vm1139_vm2, %v888_v37 }
  0x9e   : > { %1145 = vst.msk [vmem:[#allocation2 + $0x27] sm:$0xff] %vm1137_vm4, %v874_v29 }
  0xa0   : > { %989 = vrot.lane.b32.xlu0 %v9477_v54, %s8998_s24  ;;  %v15170_v54 = vld [vmem:[#allocation57_spill] sm:$0xff]  ;;  %v892_v43 = vpop.permute.xlu1 %891 }
  0xa1   : > { %987 = vrot.lane.b32.xlu1 %v15167_v62, %s8998_s24  ;;  %v878_v48 = vpop.permute.xlu0 %877  ;;  %1154 = vst.msk [vmem:[#allocation2 + $0x57] sm:$0xff] %vm1137_vm4, %v892_v43 }
  0xa2   : > { %1147 = vst.msk [vmem:[#allocation2 + $0x2f] sm:$0xfe] %vm1135_vm3, %v878_v48 }
  0xa4   : > { %993 = vrot.lane.b32.xlu0 %v9483_v30, %s8998_s24  ;;  %v15172_v30 = vld [vmem:[#allocation59_spill] sm:$0xff]  ;;  %v896_v37 = vpop.permute.xlu1 %895 }
  0xa5   : > { %991 = vrot.lane.b32.xlu1 %v15169_v61, %s8998_s24  ;;  %v882_v29 = vpop.permute.xlu0 %881  ;;  %v15171_v61 = vld [vmem:[#allocation58_spill] sm:$0xff]  ;;  %1156 = vst.msk [vmem:[#allocation2 + $0x5f] sm:$0xfe] %vm1135_vm3, %v896_v37 }
  0xa6   : > { %1149 = vst.msk [vmem:[#allocation2 + $0x3f] sm:$0x1] %vm1139_vm2, %v882_v29 }
  0xa8   : > { %997 = vrot.lane.b32.xlu0 %v15171_v61, %s8998_s24  ;;  %v15174_v61 = vld [vmem:[#allocation61_spill] sm:$0xff]  ;;  %v900_v43 = vpop.permute.xlu1 %899 }
  0xa9   : > { %995 = vrot.lane.b32.xlu1 %v9486_v60, %s8998_s24  ;;  %v886_v48 = vpop.permute.xlu0 %885  ;;  %v15173_v60 = vld [vmem:[#allocation60_spill] sm:$0xff]  ;;  %1158 = vst.msk [vmem:[#allocation2 + $0x6f] sm:$0x1] %vm1139_vm2, %v900_v43 }
  0xaa   : > { %1151 = vst.msk [vmem:[#allocation2 + $0x47] sm:$0xff] %vm1137_vm4, %v886_v48 }
  0xac   : > { %1001 = vrot.lane.b32.xlu0 %v15173_v60, %s8998_s24  ;;  %v904_v37 = vpop.permute.xlu1 %903 }
  0xad   : > { %999 = vrot.lane.b32.xlu1 %v15170_v54, %s8998_s24  ;;  %v890_v29 = vpop.permute.xlu0 %889  ;;  %1160 = vst.msk [vmem:[#allocation2 + $0x77] sm:$0xff] %vm1137_vm4, %v904_v37 }
  0xae   : > { %1153 = vst.msk [vmem:[#allocation2 + $0x4f] sm:$0xfe] %vm1135_vm3, %v890_v29 }
  0xb0   : > { %1005 = vrot.lane.b32.xlu0 %v15174_v61, %s8998_s24  ;;  %v908_v43 = vpop.permute.xlu1 %907 }
  0xb1   : > { %1003 = vrot.lane.b32.xlu1 %v15172_v30, %s8998_s24  ;;  %v894_v48 = vpop.permute.xlu0 %893  ;;  %1162 = vst.msk [vmem:[#allocation2 + $0x7f] sm:$0xfe] %vm1135_vm3, %v908_v43 }
  0xb2   : > { %1155 = vst.msk [vmem:[#allocation2 + $0x5f] sm:$0x1] %vm1139_vm2, %v894_v48 }
  0xb4   : > { %1009 = vrot.lane.b32.xlu0 %v9529_v41, %s8998_s24  ;;  %v15175_v41 = vld [vmem:[#allocation67_spill] sm:$0xff] }
  0xb5   : > { %1007 = vrot.lane.b32.xlu1 %v9521_v27, %s8998_s24  ;;  %v898_v29 = vpop.permute.xlu0 %897 }
  0xb6   : > { %1157 = vst.msk [vmem:[#allocation2 + $0x67] sm:$0xff] %vm1137_vm4, %v898_v29 }
  0xb8   : > { %1013 = vrot.lane.b32.xlu0 %v9535_v46, %s8998_s24  ;;  %v15176_v46 = vld [vmem:[#allocation69_spill] sm:$0xff] }
  0xb9   : > { %1011 = vrot.lane.b32.xlu1 %v9526_v21, %s8998_s24  ;;  %v902_v48 = vpop.permute.xlu0 %901 }
  0xba   : > { %1159 = vst.msk [vmem:[#allocation2 + $0x6f] sm:$0xfe] %vm1135_vm3, %v902_v48 }
  0xbc   : > { %1017 = vrot.lane.b32.xlu0 %v15175_v41, %s8998_s24 }
  0xbd   : > { %1015 = vrot.lane.b32.xlu1 %v9532_v59, %s8998_s24  ;;  %v906_v29 = vpop.permute.xlu0 %905 }
  0xbe   : > { %1161 = vst.msk [vmem:[#allocation2 + $0x7f] sm:$0x1] %vm1139_vm2, %v906_v29 }
  0xc0   : > { %1021 = vrot.lane.b32.xlu0 %v15176_v46, %s8998_s24 }
  0xc1   : > { %1019 = vrot.lane.b32.xlu1 %v9551_v40, %s8998_s24  ;;  %v910_v48 = vpop.permute.xlu0 %909 }
  0xc2   : > { %1163 = vst.msk [vmem:[#allocation2 + $0x87] sm:$0xff] %vm1137_vm4, %v910_v48 }
  0xc4   : > { %1025 = vrot.lane.b32.xlu0 %v9571_v17, %s8998_s24 }
  0xc5   : > { %1023 = vrot.lane.b32.xlu1 %v9563_v24, %s8998_s24  ;;  %v914_v29 = vpop.permute.xlu0 %913 }
  0xc6   : > { %1165 = vst.msk [vmem:[#allocation2 + $0x8f] sm:$0xfe] %vm1135_vm3, %v914_v29 }
  0xc7   : > { %v912_v37 = vpop.permute.xlu1 %911 }
  0xc8   : > { %1164 = vst.msk [vmem:[#allocation2 + $0x8f] sm:$0x1] %vm1139_vm2, %v912_v37  ;;  %1029 = vrot.lane.b32.xlu0 %v9574_v32, %s8998_s24 }
  0xc9   : > { %1027 = vrot.lane.b32.xlu1 %v9568_v1, %s8998_s24 }
  0xca   : > { %v918_v48 = vpop.permute.xlu0 %917 }
  0xcb   : > { %v916_v43 = vpop.permute.xlu1 %915  ;;  %1167 = vst.msk [vmem:[#allocation2 + $0x9f] sm:$0x1] %vm1139_vm2, %v918_v48 }
  0xcc   : > { %1166 = vst.msk [vmem:[#allocation2 + $0x97] sm:$0xff] %vm1137_vm4, %v916_v43  ;;  %1033 = vrot.lane.b32.xlu0 %v9591_v9, %s8998_s24 }
  0xcd   : > { %1031 = vrot.lane.b32.xlu1 %v9577_v16, %s8998_s24 }
  0xce   : > { %v922_v29 = vpop.permute.xlu0 %921 }
  0xcf   : > { %v920_v37 = vpop.permute.xlu1 %919  ;;  %1169 = vst.msk [vmem:[#allocation2 + $0xa7] sm:$0xff] %vm1137_vm4, %v922_v29 }
  0xd0   : > { %1168 = vst.msk [vmem:[#allocation2 + $0x9f] sm:$0xfe] %vm1135_vm3, %v920_v37  ;;  %1037 = vrot.lane.b32.xlu0 %v9609_v39, %s8998_s24  ;;  %v15177_v39 = vld [vmem:[#allocation7_spill] sm:$0xff] }
  0xd1   : > { %1035 = vrot.lane.b32.xlu1 %v9588_v38, %s8998_s24 }
  0xd2   : > { %v926_v48 = vpop.permute.xlu0 %925 }
  0xd3   : > { %v924_v43 = vpop.permute.xlu1 %923  ;;  %1171 = vst.msk [vmem:[#allocation2 + $0xaf] sm:$0xfe] %vm1135_vm3, %v926_v48 }
  0xd4   : > { %1170 = vst.msk [vmem:[#allocation2 + $0xaf] sm:$0x1] %vm1139_vm2, %v924_v43  ;;  %1041 = vrot.lane.b32.xlu0 %v9620_v52, %s8998_s24  ;;  %v15179_v52 = vld [vmem:[#allocation6_spill] sm:$0xff] }
  0xd5   : > { %1039 = vrot.lane.b32.xlu1 %v9606_v31, %s8998_s24 }
  0xd6   : > { %v930_v29 = vpop.permute.xlu0 %929 }
  0xd7   : > { %v928_v37 = vpop.permute.xlu1 %927  ;;  %1173 = vst.msk [vmem:[#allocation2 + $0xbf] sm:$0x1] %vm1139_vm2, %v930_v29 }
  0xd8   : > { %1172 = vst.msk [vmem:[#allocation2 + $0xb7] sm:$0xff] %vm1137_vm4, %v928_v37  ;;  %v15178_v37 = vld [vmem:[#allocation5_spill] sm:$0xff] }
  0xd9   : > { %1043 = vrot.lane.b32.xlu1 %v9623_v51, %s8998_s24  ;;  %1234 = vrot.lane.b32.xlu0 %v15178_v37, %s8999_s25  ;;  %v15181_v37 = vld [vmem:[#allocation16_spill] sm:$0xff]  ;;  %s9009_s24 = smov 64  }
  0xda   : > { %v934_v31 = vpop.permute.xlu0 %933 }
  0xdb   : > { %v932_v43 = vpop.permute.xlu1 %931  ;;  %1175 = vst.msk [vmem:[#allocation2 + $0xc7] sm:$0xff] %vm1137_vm4, %v934_v31 }
  0xdc   : > { %1174 = vst.msk [vmem:[#allocation2 + $0xbf] sm:$0xfe] %vm1135_vm3, %v932_v43  ;;  %v15180_v43 = vld [vmem:[#allocation4_spill] sm:$0xff] }
  0xdd   : > { %1236 = vrot.lane.b32.xlu1 %v15177_v39, %s8999_s25  ;;  %1238 = vrot.lane.b32.xlu0 %v15180_v43, %s8999_s25  ;;  %v15182_v39 = vld [vmem:[#allocation8_spill] sm:$0xff]  ;;  %v15183_v43 = vld [vmem:[#allocation10_spill] sm:$0xff] }
  0xde   : > { %v938_v51 = vpop.permute.xlu0 %937 }
  0xdf   : > { %v936_v48 = vpop.permute.xlu1 %935  ;;  %1177 = vst.msk [vmem:[#allocation2 + $0xcf] sm:$0xfe] %vm1135_vm3, %v938_v51 }
  0xe0   : > { %1176 = vst.msk [vmem:[#allocation2 + $0xcf] sm:$0x1] %vm1139_vm2, %v936_v48 }
  0xe1   : > { %1240 = vrot.lane.b32.xlu1 %v15179_v52, %s8999_s25  ;;  %1242 = vrot.lane.b32.xlu0 %v15182_v39, %s8999_s25  ;;  %v15184_v52 = vld [vmem:[#allocation9_spill] sm:$0xff]  ;;  %v15186_v39 = vld [vmem:[#allocation24_spill] sm:$0xff] }
  0xe2   : > { %v942_v31 = vpop.permute.xlu0 %941 }
  0xe3   : > { %v940_v29 = vpop.permute.xlu1 %939  ;;  %1179 = vst.msk [vmem:[#allocation2 + $0xdf] sm:$0x1] %vm1139_vm2, %v942_v31 }
  0xe4   : > { %1178 = vst.msk [vmem:[#allocation2 + $0xd7] sm:$0xff] %vm1137_vm4, %v940_v29 }
  0xe5   : > { %1244 = vrot.lane.b32.xlu1 %v15181_v37, %s8999_s25  ;;  %1246 = vrot.lane.b32.xlu0 %v15184_v52, %s8999_s25  ;;  %v15185_v37 = vld [vmem:[#allocation11_spill] sm:$0xff]  ;;  %v15187_v52 = vld [vmem:[#allocation28_spill] sm:$0xff] }
  0xe6   : > { %v946_v51 = vpop.permute.xlu0 %945 }
  0xe7   : > { %v944_v48 = vpop.permute.xlu1 %943  ;;  %1181 = vst.msk [vmem:[#allocation2 + $0xe7] sm:$0xff] %vm1137_vm4, %v946_v51 }
  0xe8   : > { %1180 = vst.msk [vmem:[#allocation2 + $0xdf] sm:$0xfe] %vm1135_vm3, %v944_v48 }
  0xe9   : > { %1248 = vrot.lane.b32.xlu1 %v15183_v43, %s8999_s25  ;;  %1250 = vrot.lane.b32.xlu0 %v15186_v39, %s8999_s25  ;;  %v15188_v43 = vld [vmem:[#allocation12_spill] sm:$0xff]  ;;  %v15189_v39 = vld [vmem:[#allocation13_spill] sm:$0xff] }
  0xea   : > { %v950_v31 = vpop.permute.xlu0 %949 }
  0xeb   : > { %v948_v29 = vpop.permute.xlu1 %947  ;;  %1183 = vst.msk [vmem:[#allocation2 + $0xef] sm:$0xfe] %vm1135_vm3, %v950_v31 }
  0xec   : > { %1182 = vst.msk [vmem:[#allocation2 + $0xef] sm:$0x1] %vm1139_vm2, %v948_v29 }
  0xed   : > { %1252 = vrot.lane.b32.xlu1 %v15185_v37, %s8999_s25  ;;  %1254 = vrot.lane.b32.xlu0 %v15188_v43, %s8999_s25 }
  0xee   : > { %v954_v51 = vpop.permute.xlu0 %953 }
  0xef   : > { %v952_v48 = vpop.permute.xlu1 %951  ;;  %1185 = vst.msk [vmem:[#allocation2 + $0xff] sm:$0x1] %vm1139_vm2, %v954_v51  ;;  %v15192_v51 = vld [vmem:[#allocation29_spill] sm:$0xff] }
  0xf0   : > { %1184 = vst.msk [vmem:[#allocation2 + $0xf7] sm:$0xff] %vm1137_vm4, %v952_v48  ;;  %v15190_v48 = vld [vmem:[#allocation14_spill] sm:$0xff] }
  0xf1   : > { %1256 = vrot.lane.b32.xlu1 %v15187_v52, %s8999_s25  ;;  %1258 = vrot.lane.b32.xlu0 %v15190_v48, %s8999_s25  ;;  %v15193_v48 = vld [vmem:[#allocation35_spill] sm:$0xff] }
  0xf2   : > { %v958_v37 = vpop.permute.xlu0 %957 }
  0xf3   : > { %v956_v29 = vpop.permute.xlu1 %955  ;;  %1187 = vst.msk [vmem:[#allocation2 + $0x107] sm:$0xff] %vm1137_vm4, %v958_v37  ;;  %1190 = vst.msk [vmem:[#allocation2 + $0x117] sm:$0xff] %vm1137_vm4, %v958_v37 }
  0xf4   : > { %1186 = vst.msk [vmem:[#allocation2 + $0xff] sm:$0xfe] %vm1135_vm3, %v956_v29  ;;  %1189 = vst.msk [vmem:[#allocation2 + $0x10f] sm:$0xfe] %vm1135_vm3, %v956_v29  ;;  %v15191_v29 = vld [vmem:[#allocation15_spill] sm:$0xff] }
  0xf5   : > { %1260 = vrot.lane.b32.xlu1 %v15189_v39, %s8999_s25  ;;  %1262 = vrot.lane.b32.xlu0 %v15192_v51, %s8999_s25  ;;  %v15195_v51 = vld [vmem:[#allocation18_spill] sm:$0xff] }
  0xf6   : > { %v962_v39 = vpop.permute.xlu0 %961 }
  0xf7   : > { %v960_v31 = vpop.permute.xlu1 %959  ;;  %1192 = vst.msk [vmem:[#allocation2 + $0x11f] sm:$0xfe] %vm1135_vm3, %v962_v39 }
  0xf8   : > { %1188 = vst.msk [vmem:[#allocation2 + $0x10f] sm:$0x1] %vm1139_vm2, %v960_v31  ;;  %1191 = vst.msk [vmem:[#allocation2 + $0x11f] sm:$0x1] %vm1139_vm2, %v960_v31  ;;  %v15194_v31 = vld [vmem:[#allocation17_spill] sm:$0xff] }
  0xf9   : > { %1264 = vrot.lane.b32.xlu1 %v15191_v29, %s8999_s25  ;;  %1266 = vrot.lane.b32.xlu0 %v15194_v31, %s8999_s25  ;;  %v15196_v29 = vld [vmem:[#allocation19_spill] sm:$0xff] }
  0xfa   : > { %v966_v37 = vpop.permute.xlu0 %965 }
  0xfb   : > { %v964_v52 = vpop.permute.xlu1 %963  ;;  %1194 = vst.msk [vmem:[#allocation2 + $0x12f] sm:$0x1] %vm1139_vm2, %v966_v37 }
  0xfc   : > { %1193 = vst.msk [vmem:[#allocation2 + $0x127] sm:$0xff] %vm1137_vm4, %v964_v52 }
  0xfd   : > { %1268 = vrot.lane.b32.xlu1 %v15193_v48, %s8999_s25  ;;  %1270 = vrot.lane.b32.xlu0 %v15196_v29, %s8999_s25  ;;  %v15197_v48 = vld [vmem:[#allocation36_spill] sm:$0xff] }
  0xfe   : > { %v970_v39 = vpop.permute.xlu0 %969 }
  0xff   : > { %v968_v43 = vpop.permute.xlu1 %967  ;;  %1196 = vst.msk [vmem:[#allocation2 + $0x137] sm:$0xff] %vm1137_vm4, %v970_v39 }
 0x100   : > { %1195 = vst.msk [vmem:[#allocation2 + $0x12f] sm:$0xfe] %vm1135_vm3, %v968_v43 }
 0x101   : > { %1272 = vrot.lane.b32.xlu1 %v15195_v51, %s8999_s25  ;;  %1274 = vrot.lane.b32.xlu0 %v15197_v48, %s8999_s25  ;;  %v15221_v48 = vld [vmem:[#allocation15_spill] sm:$0xff] }
 0x102   : > { %v974_v37 = vpop.permute.xlu0 %973 }
 0x103   : > { %v972_v52 = vpop.permute.xlu1 %971  ;;  %1198 = vst.msk [vmem:[#allocation2 + $0x13f] sm:$0xfe] %vm1135_vm3, %v974_v37 }
 0x104   : > { %1197 = vst.msk [vmem:[#allocation2 + $0x13f] sm:$0x1] %vm1139_vm2, %v972_v52 }
 0x105   : > { %1276 = vrot.lane.b32.xlu1 %v9199_v56, %s8999_s25  ;;  %1278 = vrot.lane.b32.xlu0 %v9204_v57, %s8999_s25 }
 0x106   : > { %v978_v39 = vpop.permute.xlu0 %977 }
 0x107   : > { %v976_v43 = vpop.permute.xlu1 %975  ;;  %1200 = vst.msk [vmem:[#allocation2 + $0x14f] sm:$0x1] %vm1139_vm2, %v978_v39 }
 0x108   : > { %1199 = vst.msk [vmem:[#allocation2 + $0x147] sm:$0xff] %vm1137_vm4, %v976_v43 }
 0x109   : > { %1280 = vrot.lane.b32.xlu1 %v9599_v3, %s8999_s25  ;;  %1282 = vrot.lane.b32.xlu0 %v9233_v5, %s8999_s25  ;;  %v15220_v3 = vld [vmem:[#allocation14_spill] sm:$0xff] }
 0x10a   : > { %v982_v37 = vpop.permute.xlu0 %981 }
 0x10b   : > { %v980_v52 = vpop.permute.xlu1 %979  ;;  %1202 = vst.msk [vmem:[#allocation2 + $0x157] sm:$0xff] %vm1137_vm4, %v982_v37 }
 0x10c   : > { %1201 = vst.msk [vmem:[#allocation2 + $0x14f] sm:$0xfe] %vm1135_vm3, %v980_v52 }
 0x10d   : > { %1284 = vrot.lane.b32.xlu1 %v9230_v4, %s8999_s25  ;;  %1286 = vrot.lane.b32.xlu0 %v9634_v50, %s8999_s25  ;;  %v15219_v50 = vld [vmem:[#allocation13_spill] sm:$0xff] }
 0x10e   : > { %v986_v39 = vpop.permute.xlu0 %985 }
 0x10f   : > { %v984_v43 = vpop.permute.xlu1 %983  ;;  %1204 = vst.msk [vmem:[#allocation2 + $0x15f] sm:$0xfe] %vm1135_vm3, %v986_v39 }
 0x110   : > { %1203 = vst.msk [vmem:[#allocation2 + $0x15f] sm:$0x1] %vm1139_vm2, %v984_v43 }
 0x111   : > { %1288 = vrot.lane.b32.xlu1 %v9236_v6, %s8999_s25  ;;  %1290 = vrot.lane.b32.xlu0 %v9255_v12, %s8999_s25 }
 0x112   : > { %v990_v37 = vpop.permute.xlu0 %989 }
 0x113   : > { %v988_v52 = vpop.permute.xlu1 %987  ;;  %1206 = vst.msk [vmem:[#allocation2 + $0x16f] sm:$0x1] %vm1139_vm2, %v990_v37 }
 0x114   : > { %1205 = vst.msk [vmem:[#allocation2 + $0x167] sm:$0xff] %vm1137_vm4, %v988_v52 }
 0x115   : > { %1292 = vrot.lane.b32.xlu1 %v9644_v15, %s8999_s25  ;;  %1294 = vrot.lane.b32.xlu0 %v9259_v20, %s8999_s25  ;;  %v15218_v15 = vld [vmem:[#allocation11_spill] sm:$0xff] }
 0x116   : > { %v994_v39 = vpop.permute.xlu0 %993 }
 0x117   : > { %v992_v43 = vpop.permute.xlu1 %991  ;;  %1208 = vst.msk [vmem:[#allocation2 + $0x177] sm:$0xff] %vm1137_vm4, %v994_v39 }
 0x118   : > { %1207 = vst.msk [vmem:[#allocation2 + $0x16f] sm:$0xfe] %vm1135_vm3, %v992_v43 }
 0x119   : > { %1296 = vrot.lane.b32.xlu1 %v9277_v28, %s8999_s25  ;;  %1298 = vrot.lane.b32.xlu0 %v9658_v53, %s8999_s25  ;;  %v15217_v53 = vld [vmem:[#allocation12_spill] sm:$0xff] }
 0x11a   : > { %v998_v37 = vpop.permute.xlu0 %997 }
 0x11b   : > { %v996_v52 = vpop.permute.xlu1 %995  ;;  %1210 = vst.msk [vmem:[#allocation2 + $0x17f] sm:$0xfe] %vm1135_vm3, %v998_v37 }
 0x11c   : > { %1209 = vst.msk [vmem:[#allocation2 + $0x17f] sm:$0x1] %vm1139_vm2, %v996_v52 }
 0x11d   : > { %1300 = vrot.lane.b32.xlu1 %v9296_v55, %s8999_s25  ;;  %1302 = vrot.lane.b32.xlu0 %v9301_v58, %s8999_s25 }
 0x11e   : > { %v1002_v39 = vpop.permute.xlu0 %1001 }
 0x11f   : > { %v1000_v43 = vpop.permute.xlu1 %999  ;;  %1212 = vst.msk [vmem:[#allocation2 + $0x18f] sm:$0x1] %vm1139_vm2, %v1002_v39 }
 0x120   : > { %1211 = vst.msk [vmem:[#allocation2 + $0x187] sm:$0xff] %vm1137_vm4, %v1000_v43 }
 0x121   : > { %1304 = vrot.lane.b32.xlu1 %v9668_v23, %s8999_s25  ;;  %1306 = vrot.lane.b32.xlu0 %v9317_v19, %s8999_s25  ;;  %v15216_v23 = vld [vmem:[#allocation9_spill] sm:$0xff] }
 0x122   : > { %v1006_v37 = vpop.permute.xlu0 %1005 }
 0x123   : > { %v1004_v52 = vpop.permute.xlu1 %1003  ;;  %1214 = vst.msk [vmem:[#allocation2 + $0x197] sm:$0xff] %vm1137_vm4, %v1006_v37 }
 0x124   : > { %1213 = vst.msk [vmem:[#allocation2 + $0x18f] sm:$0xfe] %vm1135_vm3, %v1004_v52 }
 0x125   : > { %1308 = vrot.lane.b32.xlu1 %v9314_v13, %s8999_s25  ;;  %1310 = vrot.lane.b32.xlu0 %v9682_v2, %s8999_s25  ;;  %v15215_v2 = vld [vmem:[#allocation10_spill] sm:$0xff] }
 0x126   : > { %v1010_v39 = vpop.permute.xlu0 %1009 }
 0x127   : > { %v1008_v43 = vpop.permute.xlu1 %1007  ;;  %1216 = vst.msk [vmem:[#allocation2 + $0x19f] sm:$0xfe] %vm1135_vm3, %v1010_v39 }
 0x128   : > { %1215 = vst.msk [vmem:[#allocation2 + $0x19f] sm:$0x1] %vm1139_vm2, %v1008_v43 }
 0x129   : > { %1312 = vrot.lane.b32.xlu1 %v9320_v26, %s8999_s25  ;;  %1314 = vrot.lane.b32.xlu0 %v9350_v25, %s8999_s25 }
 0x12a   : > { %v1014_v37 = vpop.permute.xlu0 %1013 }
 0x12b   : > { %v1012_v52 = vpop.permute.xlu1 %1011  ;;  %1218 = vst.msk [vmem:[#allocation2 + $0x1af] sm:$0x1] %vm1139_vm2, %v1014_v37 }
 0x12c   : > { %1217 = vst.msk [vmem:[#allocation2 + $0x1a7] sm:$0xff] %vm1137_vm4, %v1012_v52 }
 0x12d   : > { %1316 = vrot.lane.b32.xlu1 %v9692_v22, %s8999_s25  ;;  %1318 = vrot.lane.b32.xlu0 %v9356_v33, %s8999_s25 }
 0x12e   : > { %v1018_v39 = vpop.permute.xlu0 %1017 }
 0x12f   : > { %v1016_v43 = vpop.permute.xlu1 %1015  ;;  %1220 = vst.msk [vmem:[#allocation2 + $0x1b7] sm:$0xff] %vm1137_vm4, %v1018_v39 }
 0x130   : > { %1219 = vst.msk [vmem:[#allocation2 + $0x1af] sm:$0xfe] %vm1135_vm3, %v1016_v43 }
 0x131   : > { %1320 = vrot.lane.b32.xlu1 %v9353_v18, %s8999_s25  ;;  %1322 = vrot.lane.b32.xlu0 %v9368_v36, %s8999_s25  ;;  %v15203_v36 = vld [vmem:[#allocation55_spill] sm:$0xff] }
 0x132   : > { %v1022_v37 = vpop.permute.xlu0 %1021 }
 0x133   : > { %v1020_v52 = vpop.permute.xlu1 %1019  ;;  %1222 = vst.msk [vmem:[#allocation2 + $0x1bf] sm:$0xfe] %vm1135_vm3, %v1022_v37 }
 0x134   : > { %1221 = vst.msk [vmem:[#allocation2 + $0x1bf] sm:$0x1] %vm1139_vm2, %v1020_v52 }
 0x135   : > { %1324 = vrot.lane.b32.xlu1 %v9365_v47, %s8999_s25  ;;  %1326 = vrot.lane.b32.xlu0 %v9371_v63, %s8999_s25 }
 0x136   : > { %v1026_v39 = vpop.permute.xlu0 %1025 }
 0x137   : > { %v1024_v43 = vpop.permute.xlu1 %1023  ;;  %1224 = vst.msk [vmem:[#allocation2 + $0x1cf] sm:$0x1] %vm1139_vm2, %v1026_v39 }
 0x138   : > { %1223 = vst.msk [vmem:[#allocation2 + $0x1c7] sm:$0xff] %vm1137_vm4, %v1024_v43 }
 0x139   : > { %1328 = vrot.lane.b32.xlu1 %v9389_v42, %s8999_s25  ;;  %1330 = vrot.lane.b32.xlu0 %v9397_v49, %s8999_s25  ;;  %v15202_v42 = vld [vmem:[#allocation56_spill] sm:$0xff] }
 0x13a   : > { %v1030_v37 = vpop.permute.xlu0 %1029 }
 0x13b   : > { %v1028_v52 = vpop.permute.xlu1 %1027  ;;  %1226 = vst.msk [vmem:[#allocation2 + $0x1d7] sm:$0xff] %vm1137_vm4, %v1030_v37 }
 0x13c   : > { %1225 = vst.msk [vmem:[#allocation2 + $0x1cf] sm:$0xfe] %vm1135_vm3, %v1028_v52 }
 0x13d   : > { %1332 = vrot.lane.b32.xlu1 %v9394_v35, %s8999_s25  ;;  %1334 = vrot.lane.b32.xlu0 %v9403_v34, %s8999_s25 }
 0x13e   : > { %v1034_v39 = vpop.permute.xlu0 %1033 }
 0x13f   : > { %v1032_v43 = vpop.permute.xlu1 %1031  ;;  %1228 = vst.msk [vmem:[#allocation2 + $0x1df] sm:$0xfe] %vm1135_vm3, %v1034_v39 }
 0x140   : > { %1227 = vst.msk [vmem:[#allocation2 + $0x1df] sm:$0x1] %vm1139_vm2, %v1032_v43 }
 0x141   : > { %1336 = vrot.lane.b32.xlu1 %v9400_v11, %s8999_s25  ;;  %1338 = vrot.lane.b32.xlu0 %v9413_v44, %s8999_s25 }
 0x142   : > { %v1038_v37 = vpop.permute.xlu0 %1037 }
 0x143   : > { %v1036_v52 = vpop.permute.xlu1 %1035  ;;  %1230 = vst.msk [vmem:[#allocation2 + $0x1ef] sm:$0x1] %vm1139_vm2, %v1038_v37 }
 0x144   : > { %1229 = vst.msk [vmem:[#allocation2 + $0x1e7] sm:$0xff] %vm1137_vm4, %v1036_v52 }
 0x145   : > { %1340 = vrot.lane.b32.xlu1 %v9416_v10, %s8999_s25  ;;  %1342 = vrot.lane.b32.xlu0 %v9419_v45, %s8999_s25 }
 0x146   : > { %v1042_v39 = vpop.permute.xlu0 %1041 }
 0x147   : > { %v1040_v43 = vpop.permute.xlu1 %1039  ;;  %1232 = vst.msk [vmem:[#allocation2 + $0x1f7] sm:$0xff] %vm1137_vm4, %v1042_v39  ;;  %v15199_v39 = vld [vmem:[#allocation49_spill] sm:$0xff]  ;;  %vm3157_vm4 = vcmask 254176  }
 0x148   : > { %1231 = vst.msk [vmem:[#allocation2 + $0x1ef] sm:$0xfe] %vm1135_vm3, %v1040_v43  ;;  %vm3153_vm3 = vcmask 261345  }
 0x149   : > { %1344 = vrot.lane.b32.xlu1 %v9432_v7, %s8999_s25  ;;  %1346 = vrot.lane.b32.xlu0 %v9441_v14, %s8999_s25 }
 0x14b   : > { %v1044_v52 = vpop.permute.xlu1 %1043  ;;  %v1235_v37 = vpop.permute.xlu0 %1234 }
 0x14c   : > { %1233 = vst.msk [vmem:[#allocation2 + $0x1ff] sm:$0x1] %vm1139_vm2, %v1044_v52  ;;  %v15198_v52 = vld [vmem:[#allocation50_spill] sm:$0xff]  ;;  %vm3155_vm2 = vcmask 261344  }
 0x14d   : > { %1348 = vrot.lane.b32.xlu1 %v9438_v0, %s8999_s25  ;;  %1505 = vst.msk [vmem:[#allocation2 - $0x2] sm:$0xfc] %vm1504_vm6, %v1235_v37  ;;  %1510 = vst.msk [vmem:[#allocation2 + $0xe] sm:$0xfc] %vm1504_vm6, %v1235_v37  ;;  %1350 = vrot.lane.b32.xlu0 %v15199_v39, %s8999_s25 }
 0x14f   : > { %v1237_v43 = vpop.permute.xlu1 %1236  ;;  %v1239_v10 = vpop.permute.xlu0 %1238 }
 0x150   : > { %1507 = vst.msk [vmem:[#allocation2 + $0x6] sm:$0xff] %vm1506_vm5, %v1237_v43  ;;  %1511 = vst.msk [vmem:[#allocation2 + $0x16] sm:$0xff] %vm1506_vm5, %v1237_v43 }
 0x151   : > { %1352 = vrot.lane.b32.xlu1 %v15198_v52, %s8999_s25  ;;  %1509 = vst.msk [vmem:[#allocation2 + $0xe] sm:$0x3] %vm1508_vm7, %v1239_v10  ;;  %1512 = vst.msk [vmem:[#allocation2 + $0x1e] sm:$0x3] %vm1508_vm7, %v1239_v10  ;;  %1354 = vrot.lane.b32.xlu0 %v15168_v8, %s8999_s25  ;;  %v15200_v52 = vld [vmem:[#allocation53_spill] sm:$0xff] }
 0x153   : > { %v1241_v14 = vpop.permute.xlu1 %1240  ;;  %v1243_v37 = vpop.permute.xlu0 %1242 }
 0x154   : > { %1513 = vst.msk [vmem:[#allocation2 + $0x1e] sm:$0xfc] %vm1504_vm6, %v1241_v14  ;;  %v15201_v14 = vld [vmem:[#allocation54_spill] sm:$0xff] }
 0x155   : > { %1356 = vrot.lane.b32.xlu1 %v15167_v62, %s8999_s25  ;;  %1514 = vst.msk [vmem:[#allocation2 + $0x26] sm:$0xff] %vm1506_vm5, %v1243_v37  ;;  %1358 = vrot.lane.b32.xlu0 %v15201_v14, %s8999_s25  ;;  %v15204_v14 = vld [vmem:[#allocation58_spill] sm:$0xff] }
 0x157   : > { %v1245_v43 = vpop.permute.xlu1 %1244  ;;  %v1247_v10 = vpop.permute.xlu0 %1246 }
 0x158   : > { %1515 = vst.msk [vmem:[#allocation2 + $0x2e] sm:$0x3] %vm1508_vm7, %v1245_v43 }
 0x159   : > { %1360 = vrot.lane.b32.xlu1 %v15200_v52, %s8999_s25  ;;  %1516 = vst.msk [vmem:[#allocation2 + $0x2e] sm:$0xfc] %vm1504_vm6, %v1247_v10  ;;  %1362 = vrot.lane.b32.xlu0 %v15203_v36, %s8999_s25 }
 0x15b   : > { %v1249_v34 = vpop.permute.xlu1 %1248  ;;  %v1251_v37 = vpop.permute.xlu0 %1250 }
 0x15c   : > { %1517 = vst.msk [vmem:[#allocation2 + $0x36] sm:$0xff] %vm1506_vm5, %v1249_v34 }
 0x15d   : > { %1364 = vrot.lane.b32.xlu1 %v15202_v42, %s8999_s25  ;;  %1518 = vst.msk [vmem:[#allocation2 + $0x3e] sm:$0x3] %vm1508_vm7, %v1251_v37  ;;  %1366 = vrot.lane.b32.xlu0 %v15204_v14, %s8999_s25 }
 0x15f   : > { %v1253_v43 = vpop.permute.xlu1 %1252  ;;  %v1255_v10 = vpop.permute.xlu0 %1254 }
 0x160   : > { %1519 = vst.msk [vmem:[#allocation2 + $0x3e] sm:$0xfc] %vm1504_vm6, %v1253_v43 }
 0x161   : > { %1368 = vrot.lane.b32.xlu1 %v15170_v54, %s8999_s25  ;;  %1520 = vst.msk [vmem:[#allocation2 + $0x46] sm:$0xff] %vm1506_vm5, %v1255_v10  ;;  %1370 = vrot.lane.b32.xlu0 %v15173_v60, %s8999_s25  ;;  %v15205_v60 = vld [vmem:[#allocation64_spill] sm:$0xff] }
 0x163   : > { %v1257_v34 = vpop.permute.xlu1 %1256  ;;  %v1259_v37 = vpop.permute.xlu0 %1258 }
 0x164   : > { %1521 = vst.msk [vmem:[#allocation2 + $0x4e] sm:$0x3] %vm1508_vm7, %v1257_v34 }
 0x165   : > { %1372 = vrot.lane.b32.xlu1 %v15172_v30, %s8999_s25  ;;  %1522 = vst.msk [vmem:[#allocation2 + $0x4e] sm:$0xfc] %vm1504_vm6, %v1259_v37  ;;  %1374 = vrot.lane.b32.xlu0 %v15174_v61, %s8999_s25 }
 0x167   : > { %v1261_v43 = vpop.permute.xlu1 %1260  ;;  %v1263_v10 = vpop.permute.xlu0 %1262 }
 0x168   : > { %1523 = vst.msk [vmem:[#allocation2 + $0x56] sm:$0xff] %vm1506_vm5, %v1261_v43 }
 0x169   : > { %1376 = vrot.lane.b32.xlu1 %v9521_v27, %s8999_s25  ;;  %1524 = vst.msk [vmem:[#allocation2 + $0x5e] sm:$0x3] %vm1508_vm7, %v1263_v10  ;;  %1378 = vrot.lane.b32.xlu0 %v15205_v60, %s8999_s25  ;;  %v15206_v27 = vld [vmem:[#allocation66_spill] sm:$0xff] }
 0x16b   : > { %v1265_v34 = vpop.permute.xlu1 %1264  ;;  %v1267_v37 = vpop.permute.xlu0 %1266 }
 0x16c   : > { %1525 = vst.msk [vmem:[#allocation2 + $0x5e] sm:$0xfc] %vm1504_vm6, %v1265_v34 }
 0x16d   : > { %1380 = vrot.lane.b32.xlu1 %v9526_v21, %s8999_s25  ;;  %1526 = vst.msk [vmem:[#allocation2 + $0x66] sm:$0xff] %vm1506_vm5, %v1267_v37  ;;  %1382 = vrot.lane.b32.xlu0 %v15206_v27, %s8999_s25  ;;  %v15210_v27 = vld [vmem:[#allocation80_spill] sm:$0xff] }
 0x16f   : > { %v1269_v43 = vpop.permute.xlu1 %1268  ;;  %v1271_v10 = vpop.permute.xlu0 %1270 }
 0x170   : > { %1527 = vst.msk [vmem:[#allocation2 + $0x6e] sm:$0x3] %vm1508_vm7, %v1269_v43 }
 0x171   : > { %1384 = vrot.lane.b32.xlu1 %v9532_v59, %s8999_s25  ;;  %1528 = vst.msk [vmem:[#allocation2 + $0x6e] sm:$0xfc] %vm1504_vm6, %v1271_v10  ;;  %1386 = vrot.lane.b32.xlu0 %v15175_v41, %s8999_s25 }
 0x173   : > { %v1273_v34 = vpop.permute.xlu1 %1272  ;;  %v1275_v37 = vpop.permute.xlu0 %1274 }
 0x174   : > { %1529 = vst.msk [vmem:[#allocation2 + $0x76] sm:$0xff] %vm1506_vm5, %v1273_v34 }
 0x175   : > { %1388 = vrot.lane.b32.xlu1 %v9551_v40, %s8999_s25  ;;  %1530 = vst.msk [vmem:[#allocation2 + $0x7e] sm:$0x3] %vm1508_vm7, %v1275_v37  ;;  %1390 = vrot.lane.b32.xlu0 %v15176_v46, %s8999_s25  ;;  %v15209_v40 = vld [vmem:[#allocation81_spill] sm:$0xff] }
 0x177   : > { %v1277_v43 = vpop.permute.xlu1 %1276  ;;  %v1279_v10 = vpop.permute.xlu0 %1278 }
 0x178   : > { %1531 = vst.msk [vmem:[#allocation2 + $0x7e] sm:$0xfc] %vm1504_vm6, %v1277_v43 }
 0x179   : > { %1392 = vrot.lane.b32.xlu1 %v9563_v24, %s8999_s25  ;;  %1532 = vst.msk [vmem:[#allocation2 + $0x86] sm:$0xff] %vm1506_vm5, %v1279_v10  ;;  %1394 = vrot.lane.b32.xlu0 %v9571_v17, %s8999_s25  ;;  %v15208_v17 = vld [vmem:[#allocation79_spill] sm:$0xff] }
 0x17b   : > { %v1281_v34 = vpop.permute.xlu1 %1280  ;;  %v1283_v37 = vpop.permute.xlu0 %1282 }
 0x17c   : > { %1533 = vst.msk [vmem:[#allocation2 + $0x8e] sm:$0x3] %vm1508_vm7, %v1281_v34 }
 0x17d   : > { %1396 = vrot.lane.b32.xlu1 %v9568_v1, %s8999_s25  ;;  %1534 = vst.msk [vmem:[#allocation2 + $0x8e] sm:$0xfc] %vm1504_vm6, %v1283_v37  ;;  %1398 = vrot.lane.b32.xlu0 %v9574_v32, %s8999_s25 }
 0x17f   : > { %v1285_v43 = vpop.permute.xlu1 %1284  ;;  %v1287_v10 = vpop.permute.xlu0 %1286 }
 0x180   : > { %1535 = vst.msk [vmem:[#allocation2 + $0x96] sm:$0xff] %vm1506_vm5, %v1285_v43 }
 0x181   : > { %1400 = vrot.lane.b32.xlu1 %v9577_v16, %s8999_s25  ;;  %1536 = vst.msk [vmem:[#allocation2 + $0x9e] sm:$0x3] %vm1508_vm7, %v1287_v10  ;;  %1402 = vrot.lane.b32.xlu0 %v9591_v9, %s8999_s25  ;;  %v15207_v16 = vld [vmem:[#allocation78_spill] sm:$0xff] }
 0x183   : > { %v1289_v34 = vpop.permute.xlu1 %1288  ;;  %v1291_v37 = vpop.permute.xlu0 %1290 }
 0x184   : > { %1537 = vst.msk [vmem:[#allocation2 + $0x9e] sm:$0xfc] %vm1504_vm6, %v1289_v34 }
 0x185   : > { %1404 = vrot.lane.b32.xlu1 %v9588_v38, %s8999_s25  ;;  %1538 = vst.msk [vmem:[#allocation2 + $0xa6] sm:$0xff] %vm1506_vm5, %v1291_v37  ;;  %1406 = vrot.lane.b32.xlu0 %v15208_v17, %s8999_s25  ;;  %v15211_v17 = vld [vmem:[#allocation7_spill] sm:$0xff] }
 0x187   : > { %v1293_v43 = vpop.permute.xlu1 %1292  ;;  %v1295_v10 = vpop.permute.xlu0 %1294 }
 0x188   : > { %1539 = vst.msk [vmem:[#allocation2 + $0xae] sm:$0x3] %vm1508_vm7, %v1293_v43 }
 0x189   : > { %1408 = vrot.lane.b32.xlu1 %v15207_v16, %s8999_s25  ;;  %1540 = vst.msk [vmem:[#allocation2 + $0xae] sm:$0xfc] %vm1504_vm6, %v1295_v10  ;;  %1410 = vrot.lane.b32.xlu0 %v15210_v27, %s8999_s25 }
 0x18b   : > { %v1297_v34 = vpop.permute.xlu1 %1296  ;;  %v1299_v37 = vpop.permute.xlu0 %1298 }
 0x18c   : > { %1541 = vst.msk [vmem:[#allocation2 + $0xb6] sm:$0xff] %vm1506_vm5, %v1297_v34  ;;  %v15212_v34 = vld [vmem:[#allocation5_spill] sm:$0xff] }
 0x18d   : > { %1412 = vrot.lane.b32.xlu1 %v15209_v40, %s8999_s25  ;;  %1542 = vst.msk [vmem:[#allocation2 + $0xbe] sm:$0x3] %vm1508_vm7, %v1299_v37  ;;  %1605 = vrot.lane.b32.xlu0 %v15212_v34, %s9000_s26  ;;  %v15213_v40 = vld [vmem:[#allocation8_spill] sm:$0xff] }
 0x18f   : > { %v1301_v43 = vpop.permute.xlu1 %1300  ;;  %v1303_v42 = vpop.permute.xlu0 %1302 }
 0x190   : > { %1543 = vst.msk [vmem:[#allocation2 + $0xbe] sm:$0xfc] %vm1504_vm6, %v1301_v43  ;;  %v15214_v43 = vld [vmem:[#allocation6_spill] sm:$0xff] }
 0x191   : > { %1607 = vrot.lane.b32.xlu1 %v15211_v17, %s9000_s26  ;;  %1544 = vst.msk [vmem:[#allocation2 + $0xc6] sm:$0xff] %vm1506_vm5, %v1303_v42  ;;  %1609 = vrot.lane.b32.xlu0 %v15214_v43, %s9000_s26 }
 0x193   : > { %v1305_v10 = vpop.permute.xlu1 %1304  ;;  %v1307_v22 = vpop.permute.xlu0 %1306 }
 0x194   : > { %1545 = vst.msk [vmem:[#allocation2 + $0xce] sm:$0x3] %vm1508_vm7, %v1305_v10 }
 0x195   : > { %1611 = vrot.lane.b32.xlu1 %v15213_v40, %s9000_s26  ;;  %1546 = vst.msk [vmem:[#allocation2 + $0xce] sm:$0xfc] %vm1504_vm6, %v1307_v22  ;;  %1613 = vrot.lane.b32.xlu0 %v15216_v23, %s9000_s26 }
 0x197   : > { %v1309_v37 = vpop.permute.xlu1 %1308  ;;  %v1311_v42 = vpop.permute.xlu0 %1310 }
 0x198   : > { %1547 = vst.msk [vmem:[#allocation2 + $0xd6] sm:$0xff] %vm1506_vm5, %v1309_v37 }
 0x199   : > { %1615 = vrot.lane.b32.xlu1 %v15215_v2, %s9000_s26  ;;  %1548 = vst.msk [vmem:[#allocation2 + $0xde] sm:$0x3] %vm1508_vm7, %v1311_v42  ;;  %1617 = vrot.lane.b32.xlu0 %v15218_v15, %s9000_s26 }
 0x19b   : > { %v1313_v10 = vpop.permute.xlu1 %1312  ;;  %v1315_v22 = vpop.permute.xlu0 %1314 }
 0x19c   : > { %1549 = vst.msk [vmem:[#allocation2 + $0xde] sm:$0xfc] %vm1504_vm6, %v1313_v10 }
 0x19d   : > { %1619 = vrot.lane.b32.xlu1 %v15217_v53, %s9000_s26  ;;  %1550 = vst.msk [vmem:[#allocation2 + $0xe6] sm:$0xff] %vm1506_vm5, %v1315_v22  ;;  %1621 = vrot.lane.b32.xlu0 %v15220_v3, %s9000_s26 }
 0x19f   : > { %v1317_v37 = vpop.permute.xlu1 %1316  ;;  %v1319_v42 = vpop.permute.xlu0 %1318 }
 0x1a0   : > { %1551 = vst.msk [vmem:[#allocation2 + $0xee] sm:$0x3] %vm1508_vm7, %v1317_v37 }
 0x1a1   : > { %1623 = vrot.lane.b32.xlu1 %v15219_v50, %s9000_s26  ;;  %1552 = vst.msk [vmem:[#allocation2 + $0xee] sm:$0xfc] %vm1504_vm6, %v1319_v42  ;;  %1625 = vrot.lane.b32.xlu0 %v15221_v48, %s9000_s26 }
 0x1a3   : > { %v1321_v10 = vpop.permute.xlu1 %1320  ;;  %v1323_v22 = vpop.permute.xlu0 %1322 }
 0x1a4   : > { %1553 = vst.msk [vmem:[#allocation2 + $0xf6] sm:$0xff] %vm1506_vm5, %v1321_v10 }
 0x1a5   : > { %1627 = vrot.lane.b32.xlu1 %v15194_v31, %s9000_s26  ;;  %1554 = vst.msk [vmem:[#allocation2 + $0xfe] sm:$0x3] %vm1508_vm7, %v1323_v22  ;;  %1629 = vrot.lane.b32.xlu0 %v15196_v29, %s9000_s26 }
 0x1a7   : > { %v1325_v37 = vpop.permute.xlu1 %1324  ;;  %v1327_v42 = vpop.permute.xlu0 %1326 }
 0x1a8   : > { %1555 = vst.msk [vmem:[#allocation2 + $0xfe] sm:$0xfc] %vm1504_vm6, %v1325_v37  ;;  %1558 = vst.msk [vmem:[#allocation2 + $0x10e] sm:$0xfc] %vm1504_vm6, %v1325_v37 }
 0x1a9   : > { %1631 = vrot.lane.b32.xlu1 %v15195_v51, %s9000_s26  ;;  %1556 = vst.msk [vmem:[#allocation2 + $0x106] sm:$0xff] %vm1506_vm5, %v1327_v42  ;;  %1559 = vst.msk [vmem:[#allocation2 + $0x116] sm:$0xff] %vm1506_vm5, %v1327_v42  ;;  %1633 = vrot.lane.b32.xlu0 %v9199_v56, %s9000_s26 }
 0x1ab   : > { %v1329_v10 = vpop.permute.xlu1 %1328  ;;  %v1331_v22 = vpop.permute.xlu0 %1330 }
 0x1ac   : > { %1557 = vst.msk [vmem:[#allocation2 + $0x10e] sm:$0x3] %vm1508_vm7, %v1329_v10  ;;  %1560 = vst.msk [vmem:[#allocation2 + $0x11e] sm:$0x3] %vm1508_vm7, %v1329_v10 }
 0x1ad   : > { %1635 = vrot.lane.b32.xlu1 %v9204_v57, %s9000_s26  ;;  %1561 = vst.msk [vmem:[#allocation2 + $0x11e] sm:$0xfc] %vm1504_vm6, %v1331_v22  ;;  %1637 = vrot.lane.b32.xlu0 %v9233_v5, %s9000_s26 }
 0x1af   : > { %v1333_v37 = vpop.permute.xlu1 %1332  ;;  %v1335_v42 = vpop.permute.xlu0 %1334 }
 0x1b0   : > { %1562 = vst.msk [vmem:[#allocation2 + $0x126] sm:$0xff] %vm1506_vm5, %v1333_v37 }
 0x1b1   : > { %1639 = vrot.lane.b32.xlu1 %v9230_v4, %s9000_s26  ;;  %1563 = vst.msk [vmem:[#allocation2 + $0x12e] sm:$0x3] %vm1508_vm7, %v1335_v42  ;;  %1641 = vrot.lane.b32.xlu0 %v9236_v6, %s9000_s26 }
 0x1b3   : > { %v1337_v10 = vpop.permute.xlu1 %1336  ;;  %v1339_v22 = vpop.permute.xlu0 %1338 }
 0x1b4   : > { %1564 = vst.msk [vmem:[#allocation2 + $0x12e] sm:$0xfc] %vm1504_vm6, %v1337_v10 }
 0x1b5   : > { %1643 = vrot.lane.b32.xlu1 %v9255_v12, %s9000_s26  ;;  %1565 = vst.msk [vmem:[#allocation2 + $0x136] sm:$0xff] %vm1506_vm5, %v1339_v22  ;;  %1645 = vrot.lane.b32.xlu0 %v9259_v20, %s9000_s26  ;;  %v323_v20 = vld [vmem:[%s9056_s23 + $0xf0] sm:$0xff] }
 0x1b7   : > { %v1341_v37 = vpop.permute.xlu1 %1340  ;;  %v1343_v42 = vpop.permute.xlu0 %1342 }
 0x1b8   : > { %1566 = vst.msk [vmem:[#allocation2 + $0x13e] sm:$0x3] %vm1508_vm7, %v1341_v37 }
 0x1b9   : > { %1647 = vrot.lane.b32.xlu1 %v9277_v28, %s9000_s26  ;;  %1567 = vst.msk [vmem:[#allocation2 + $0x13e] sm:$0xfc] %vm1504_vm6, %v1343_v42  ;;  %1649 = vrot.lane.b32.xlu0 %v9296_v55, %s9000_s26  ;;  %v10188_v28 = vld [vmem:[%s9056_s23 + $0xf8] sm:$0xff] }
 0x1bb   : > { %v1345_v10 = vpop.permute.xlu1 %1344  ;;  %v1347_v22 = vpop.permute.xlu0 %1346 }
 0x1bc   : > { %1568 = vst.msk [vmem:[#allocation2 + $0x146] sm:$0xff] %vm1506_vm5, %v1345_v10 }
 0x1bd   : > { %1651 = vrot.lane.b32.xlu1 %v9301_v58, %s9000_s26  ;;  %1569 = vst.msk [vmem:[#allocation2 + $0x14e] sm:$0x3] %vm1508_vm7, %v1347_v22  ;;  %1653 = vrot.lane.b32.xlu0 %v9317_v19, %s9000_s26  ;;  %v14773_v22 = vrot.slane %v10188_v28, 7 }
 0x1bf   : > { %v1349_v37 = vpop.permute.xlu1 %1348  ;;  %v1351_v42 = vpop.permute.xlu0 %1350 }
 0x1c0   : > { %1570 = vst.msk [vmem:[#allocation2 + $0x14e] sm:$0xfc] %vm1504_vm6, %v1349_v37  ;;  %v467_v37 = vrot.slane %v323_v20, 7 }
 0x1c1   : > { %1655 = vrot.lane.b32.xlu1 %v9314_v13, %s9000_s26  ;;  %1571 = vst.msk [vmem:[#allocation2 + $0x156] sm:$0xff] %vm1506_vm5, %v1351_v42  ;;  %1657 = vrot.lane.b32.xlu0 %v9320_v26, %s9000_s26 }
 0x1c2   : > { %v10209_v42 = vsel %vm421_vm0, %v323_v20, %v467_v37 }
 0x1c3   : > { %v1353_v10 = vpop.permute.xlu1 %1352  ;;  %v1355_v19 = vpop.permute.xlu0 %1354  ;;  %15222 = vst [vmem:[#allocation69_spill] sm:$0xff] %v10209_v42 }
 0x1c4   : > { %1572 = vst.msk [vmem:[#allocation2 + $0x15e] sm:$0x3] %vm1508_vm7, %v1353_v10  ;;  %v10206_v10 = vsel %vm421_vm0, %v467_v37, %v14773_v22 }
 0x1c5   : > { %1659 = vrot.lane.b32.xlu1 %v9350_v25, %s9000_s26  ;;  %1573 = vst.msk [vmem:[#allocation2 + $0x15e] sm:$0xfc] %vm1504_vm6, %v1355_v19  ;;  %1661 = vrot.lane.b32.xlu0 %v9356_v33, %s9000_s26 }
 0x1c7   : > { %v1357_v13 = vpop.permute.xlu1 %1356  ;;  %v1359_v26 = vpop.permute.xlu0 %1358 }
 0x1c8   : > { %1574 = vst.msk [vmem:[#allocation2 + $0x166] sm:$0xff] %vm1506_vm5, %v1357_v13 }
 0x1c9   : > { %1663 = vrot.lane.b32.xlu1 %v9353_v18, %s9000_s26  ;;  %1575 = vst.msk [vmem:[#allocation2 + $0x16e] sm:$0x3] %vm1508_vm7, %v1359_v26  ;;  %1665 = vrot.lane.b32.xlu0 %v10209_v42, %s9000_s26 }
 0x1cb   : > { %v1361_v25 = vpop.permute.xlu1 %1360  ;;  %v1363_v19 = vpop.permute.xlu0 %1362 }
 0x1cc   : > { %1576 = vst.msk [vmem:[#allocation2 + $0x16e] sm:$0xfc] %vm1504_vm6, %v1361_v25 }
 0x1cd   : > { %1667 = vrot.lane.b32.xlu1 %v10206_v10, %s9000_s26  ;;  %1577 = vst.msk [vmem:[#allocation2 + $0x176] sm:$0xff] %vm1506_vm5, %v1363_v19  ;;  %1669 = vrot.lane.b32.xlu0 %v9365_v47, %s9000_s26 }
 0x1cf   : > { %v1365_v13 = vpop.permute.xlu1 %1364  ;;  %v1367_v25 = vpop.permute.xlu0 %1366 }
 0x1d0   : > { %1578 = vst.msk [vmem:[#allocation2 + $0x17e] sm:$0x3] %vm1508_vm7, %v1365_v13 }
 0x1d1   : > { %1671 = vrot.lane.b32.xlu1 %v9371_v63, %s9000_s26  ;;  %1579 = vst.msk [vmem:[#allocation2 + $0x17e] sm:$0xfc] %vm1504_vm6, %v1367_v25  ;;  %1673 = vrot.lane.b32.xlu0 %v9397_v49, %s9000_s26 }
 0x1d3   : > { %v1369_v20 = vpop.permute.xlu1 %1368  ;;  %v1371_v37 = vpop.permute.xlu0 %1370 }
 0x1d4   : > { %1580 = vst.msk [vmem:[#allocation2 + $0x186] sm:$0xff] %vm1506_vm5, %v1369_v20 }
 0x1d5   : > { %1675 = vrot.lane.b32.xlu1 %v9394_v35, %s9000_s26  ;;  %1581 = vst.msk [vmem:[#allocation2 + $0x18e] sm:$0x3] %vm1508_vm7, %v1371_v37  ;;  %1677 = vrot.lane.b32.xlu0 %v9400_v11, %s9000_s26 }
 0x1d7   : > { %v1373_v26 = vpop.permute.xlu1 %1372  ;;  %v1375_v19 = vpop.permute.xlu0 %1374 }
 0x1d8   : > { %1582 = vst.msk [vmem:[#allocation2 + $0x18e] sm:$0xfc] %vm1504_vm6, %v1373_v26 }
 0x1d9   : > { %1679 = vrot.lane.b32.xlu1 %v9413_v44, %s9000_s26  ;;  %1583 = vst.msk [vmem:[#allocation2 + $0x196] sm:$0xff] %vm1506_vm5, %v1375_v19  ;;  %1681 = vrot.lane.b32.xlu0 %v9419_v45, %s9000_s26 }
 0x1db   : > { %v1377_v13 = vpop.permute.xlu1 %1376  ;;  %v1379_v25 = vpop.permute.xlu0 %1378 }
 0x1dc   : > { %1584 = vst.msk [vmem:[#allocation2 + $0x19e] sm:$0x3] %vm1508_vm7, %v1377_v13 }
 0x1dd   : > { %1683 = vrot.lane.b32.xlu1 %v9432_v7, %s9000_s26  ;;  %1585 = vst.msk [vmem:[#allocation2 + $0x19e] sm:$0xfc] %vm1504_vm6, %v1379_v25  ;;  %1685 = vrot.lane.b32.xlu0 %v9438_v0, %s9000_s26 }
 0x1df   : > { %v1381_v20 = vpop.permute.xlu1 %1380  ;;  %v1383_v37 = vpop.permute.xlu0 %1382 }
 0x1e0   : > { %1586 = vst.msk [vmem:[#allocation2 + $0x1a6] sm:$0xff] %vm1506_vm5, %v1381_v20 }
 0x1e1   : > { %1687 = vrot.lane.b32.xlu1 %v15199_v39, %s9000_s26  ;;  %1587 = vst.msk [vmem:[#allocation2 + $0x1ae] sm:$0x3] %vm1508_vm7, %v1383_v37  ;;  %1689 = vrot.lane.b32.xlu0 %v15168_v8, %s9000_s26 }
 0x1e3   : > { %v1385_v26 = vpop.permute.xlu1 %1384  ;;  %v1387_v19 = vpop.permute.xlu0 %1386 }
 0x1e4   : > { %1588 = vst.msk [vmem:[#allocation2 + $0x1ae] sm:$0xfc] %vm1504_vm6, %v1385_v26 }
 0x1e5   : > { %1691 = vrot.lane.b32.xlu1 %v15167_v62, %s9000_s26  ;;  %1589 = vst.msk [vmem:[#allocation2 + $0x1b6] sm:$0xff] %vm1506_vm5, %v1387_v19  ;;  %1693 = vrot.lane.b32.xlu0 %v15200_v52, %s9000_s26 }
 0x1e7   : > { %v1389_v13 = vpop.permute.xlu1 %1388  ;;  %v1391_v25 = vpop.permute.xlu0 %1390 }
 0x1e8   : > { %1590 = vst.msk [vmem:[#allocation2 + $0x1be] sm:$0x3] %vm1508_vm7, %v1389_v13 }
 0x1e9   : > { %1695 = vrot.lane.b32.xlu1 %v15203_v36, %s9000_s26  ;;  %1591 = vst.msk [vmem:[#allocation2 + $0x1be] sm:$0xfc] %vm1504_vm6, %v1391_v25  ;;  %1697 = vrot.lane.b32.xlu0 %v15204_v14, %s9000_s26 }
 0x1eb   : > { %v1393_v20 = vpop.permute.xlu1 %1392  ;;  %v1395_v37 = vpop.permute.xlu0 %1394 }
 0x1ec   : > { %1592 = vst.msk [vmem:[#allocation2 + $0x1c6] sm:$0xff] %vm1506_vm5, %v1393_v20 }
 0x1ed   : > { %1699 = vrot.lane.b32.xlu1 %v15170_v54, %s9000_s26  ;;  %1593 = vst.msk [vmem:[#allocation2 + $0x1ce] sm:$0x3] %vm1508_vm7, %v1395_v37  ;;  %1701 = vrot.lane.b32.xlu0 %v15172_v30, %s9000_s26 }
 0x1ef   : > { %v1397_v26 = vpop.permute.xlu1 %1396  ;;  %v1399_v19 = vpop.permute.xlu0 %1398 }
 0x1f0   : > { %1594 = vst.msk [vmem:[#allocation2 + $0x1ce] sm:$0xfc] %vm1504_vm6, %v1397_v26 }
 0x1f1   : > { %1703 = vrot.lane.b32.xlu1 %v15174_v61, %s9000_s26  ;;  %1595 = vst.msk [vmem:[#allocation2 + $0x1d6] sm:$0xff] %vm1506_vm5, %v1399_v19  ;;  %1705 = vrot.lane.b32.xlu0 %v15205_v60, %s9000_s26 }
 0x1f3   : > { %v1401_v13 = vpop.permute.xlu1 %1400  ;;  %v1403_v25 = vpop.permute.xlu0 %1402 }
 0x1f4   : > { %1596 = vst.msk [vmem:[#allocation2 + $0x1de] sm:$0x3] %vm1508_vm7, %v1401_v13 }
 0x1f5   : > { %1707 = vrot.lane.b32.xlu1 %v9526_v21, %s9000_s26  ;;  %1597 = vst.msk [vmem:[#allocation2 + $0x1de] sm:$0xfc] %vm1504_vm6, %v1403_v25  ;;  %1709 = vrot.lane.b32.xlu0 %v9532_v59, %s9000_s26 }
 0x1f7   : > { %v1405_v20 = vpop.permute.xlu1 %1404  ;;  %v1407_v37 = vpop.permute.xlu0 %1406 }
 0x1f8   : > { %1598 = vst.msk [vmem:[#allocation2 + $0x1e6] sm:$0xff] %vm1506_vm5, %v1405_v20 }
 0x1f9   : > { %1711 = vrot.lane.b32.xlu1 %v15175_v41, %s9000_s26  ;;  %1599 = vst.msk [vmem:[#allocation2 + $0x1ee] sm:$0x3] %vm1508_vm7, %v1407_v37  ;;  %1713 = vrot.lane.b32.xlu0 %v15176_v46, %s9000_s26  ;;  %v10297_v37 = vld [vmem:[%s9056_s23 + $0x1f8] sm:$0xff] }
 0x1fb   : > { %v1409_v26 = vpop.permute.xlu1 %1408  ;;  %v1411_v19 = vpop.permute.xlu0 %1410 }
 0x1fc   : > { %1600 = vst.msk [vmem:[#allocation2 + $0x1ee] sm:$0xfc] %vm1504_vm6, %v1409_v26  ;;  %v355_v26 = vld [vmem:[%s9056_s23 + $0x1f0] sm:$0xff]  ;;  %vm3524_vm6 = vcmask 294144   ;;  %s9008_s23 = smov 56  }
 0x1fd   : > { %1715 = vrot.lane.b32.xlu1 %v9563_v24, %s9000_s26  ;;  %1601 = vst.msk [vmem:[#allocation2 + $0x1f6] sm:$0xff] %vm1506_vm5, %v1411_v19  ;;  %1717 = vrot.lane.b32.xlu0 %v9568_v1, %s9000_s26  ;;  %v14780_v19 = vrot.slane %v10297_v37, 7  ;;  %vm3890_vm5 = vcmask 1043456  }
 0x1ff   : > { %v1413_v13 = vpop.permute.xlu1 %1412  ;;  %v1606_v25 = vpop.permute.xlu0 %1605 }
 0x200   : > { %1602 = vst.msk [vmem:[#allocation2 + $0x1fe] sm:$0x3] %vm1508_vm7, %v1413_v13  ;;  %v515_v13 = vrot.slane %v355_v26, 7  ;;  %vm3522_vm7 = vcmask 294146  }
 0x201   : > { %1719 = vrot.lane.b32.xlu1 %v9574_v32, %s9000_s26  ;;  %1798 = vst.msk [vmem:[#allocation2] sm:$0xff] %vm1797_vm8, %v1606_v25  ;;  %1721 = vrot.lane.b32.xlu0 %v9591_v9, %s9000_s26 }
 0x202   : > { %v10318_v25 = vsel %vm421_vm0, %v355_v26, %v515_v13  ;;  %v15224_v26 = vld [vmem:[#allocation4_spill] sm:$0xff] }
 0x203   : > { %v1608_v20 = vpop.permute.xlu1 %1607  ;;  %v1610_v1 = vpop.permute.xlu0 %1609 }
 0x204   : > { %1799 = vst.msk [vmem:[#allocation2 + $0x8] sm:$0xff] %vm1797_vm8, %v1608_v20  ;;  %1800 = vst.msk [vmem:[#allocation2 + $0x10] sm:$0xff] %vm1797_vm8, %v1610_v1  ;;  %v10315_v20 = vsel %vm421_vm0, %v515_v13, %v14780_v19  ;;  %v15226_v19 = vld [vmem:[#allocation24_spill] sm:$0xff] }
 0x205   : > { %1723 = vrot.lane.b32.xlu1 %v9588_v38, %s9000_s26  ;;  %1725 = vrot.lane.b32.xlu0 %v15207_v16, %s9000_s26  ;;  %15223 = vst [vmem:[#allocation58_spill] sm:$0xff] %v10315_v20 }
 0x207   : > { %v1612_v22 = vpop.permute.xlu1 %1611  ;;  %v1614_v9 = vpop.permute.xlu0 %1613 }
 0x208   : > { %1801 = vst.msk [vmem:[#allocation2 + $0x18] sm:$0xff] %vm1797_vm8, %v1612_v22  ;;  %1802 = vst.msk [vmem:[#allocation2 + $0x20] sm:$0xff] %vm1797_vm8, %v1614_v9 }
 0x209   : > { %1727 = vrot.lane.b32.xlu1 %v15210_v27, %s9000_s26  ;;  %1729 = vrot.lane.b32.xlu0 %v10318_v25, %s9000_s26 }
 0x20b   : > { %v1616_v38 = vpop.permute.xlu1 %1615  ;;  %v1618_v22 = vpop.permute.xlu0 %1617 }
 0x20c   : > { %1803 = vst.msk [vmem:[#allocation2 + $0x28] sm:$0xff] %vm1797_vm8, %v1616_v38  ;;  %1804 = vst.msk [vmem:[#allocation2 + $0x30] sm:$0xff] %vm1797_vm8, %v1618_v22  ;;  %v15225_v22 = vld [vmem:[#allocation16_spill] sm:$0xff] }
 0x20d   : > { %1731 = vrot.lane.b32.xlu1 %v10315_v20, %s9000_s26  ;;  %1864 = vrot.lane.b32.xlu0 %v15212_v34, %s9001_s27 }
 0x20f   : > { %v1620_v1 = vpop.permute.xlu1 %1619  ;;  %v1622_v9 = vpop.permute.xlu0 %1621 }
 0x210   : > { %1805 = vst.msk [vmem:[#allocation2 + $0x38] sm:$0xff] %vm1797_vm8, %v1620_v1  ;;  %1806 = vst.msk [vmem:[#allocation2 + $0x40] sm:$0xff] %vm1797_vm8, %v1622_v9 }
 0x211   : > { %1866 = vrot.lane.b32.xlu1 %v15211_v17, %s9001_s27  ;;  %1868 = vrot.lane.b32.xlu0 %v15224_v26, %s9001_s27 }
 0x213   : > { %v1624_v38 = vpop.permute.xlu1 %1623  ;;  %v1626_v1 = vpop.permute.xlu0 %1625 }
 0x214   : > { %1807 = vst.msk [vmem:[#allocation2 + $0x48] sm:$0xff] %vm1797_vm8, %v1624_v38  ;;  %1808 = vst.msk [vmem:[#allocation2 + $0x50] sm:$0xff] %vm1797_vm8, %v1626_v1 }
 0x215   : > { %1870 = vrot.lane.b32.xlu1 %v15214_v43, %s9001_s27  ;;  %1872 = vrot.lane.b32.xlu0 %v15213_v40, %s9001_s27 }
 0x217   : > { %v1628_v13 = vpop.permute.xlu1 %1627  ;;  %v1630_v9 = vpop.permute.xlu0 %1629 }
 0x218   : > { %1809 = vst.msk [vmem:[#allocation2 + $0x58] sm:$0xff] %vm1797_vm8, %v1628_v13  ;;  %1810 = vst.msk [vmem:[#allocation2 + $0x60] sm:$0xff] %vm1797_vm8, %v1630_v9 }
 0x219   : > { %1874 = vrot.lane.b32.xlu1 %v15225_v22, %s9001_s27  ;;  %1876 = vrot.lane.b32.xlu0 %v15216_v23, %s9001_s27  ;;  %v15227_v23 = vld [vmem:[#allocation28_spill] sm:$0xff] }
 0x21b   : > { %v1632_v38 = vpop.permute.xlu1 %1631  ;;  %v1634_v1 = vpop.permute.xlu0 %1633 }
 0x21c   : > { %1811 = vst.msk [vmem:[#allocation2 + $0x68] sm:$0xff] %vm1797_vm8, %v1632_v38  ;;  %1812 = vst.msk [vmem:[#allocation2 + $0x70] sm:$0xff] %vm1797_vm8, %v1634_v1 }
 0x21d   : > { %1878 = vrot.lane.b32.xlu1 %v15215_v2, %s9001_s27  ;;  %1880 = vrot.lane.b32.xlu0 %v15226_v19, %s9001_s27 }
 0x21f   : > { %v1636_v13 = vpop.permute.xlu1 %1635  ;;  %v1638_v9 = vpop.permute.xlu0 %1637 }
 0x220   : > { %1813 = vst.msk [vmem:[#allocation2 + $0x78] sm:$0xff] %vm1797_vm8, %v1636_v13  ;;  %1814 = vst.msk [vmem:[#allocation2 + $0x80] sm:$0xff] %vm1797_vm8, %v1638_v9 }
 0x221   : > { %1882 = vrot.lane.b32.xlu1 %v15218_v15, %s9001_s27  ;;  %1884 = vrot.lane.b32.xlu0 %v15217_v53, %s9001_s27  ;;  %v15228_v53 = vld [vmem:[#allocation29_spill] sm:$0xff] }
 0x223   : > { %v1640_v38 = vpop.permute.xlu1 %1639  ;;  %v1642_v1 = vpop.permute.xlu0 %1641 }
 0x224   : > { %1815 = vst.msk [vmem:[#allocation2 + $0x88] sm:$0xff] %vm1797_vm8, %v1640_v38  ;;  %1816 = vst.msk [vmem:[#allocation2 + $0x90] sm:$0xff] %vm1797_vm8, %v1642_v1 }
 0x225   : > { %1886 = vrot.lane.b32.xlu1 %v15227_v23, %s9001_s27  ;;  %1888 = vrot.lane.b32.xlu0 %v15220_v3, %s9001_s27  ;;  %v15229_v3 = vld [vmem:[#allocation35_spill] sm:$0xff] }
 0x227   : > { %v1644_v13 = vpop.permute.xlu1 %1643  ;;  %v1646_v9 = vpop.permute.xlu0 %1645 }
 0x228   : > { %1817 = vst.msk [vmem:[#allocation2 + $0x98] sm:$0xff] %vm1797_vm8, %v1644_v13  ;;  %1818 = vst.msk [vmem:[#allocation2 + $0xa0] sm:$0xff] %vm1797_vm8, %v1646_v9 }
 0x229   : > { %1890 = vrot.lane.b32.xlu1 %v15219_v50, %s9001_s27  ;;  %1892 = vrot.lane.b32.xlu0 %v15228_v53, %s9001_s27 }
 0x22b   : > { %v1648_v38 = vpop.permute.xlu1 %1647  ;;  %v1650_v1 = vpop.permute.xlu0 %1649 }
 0x22c   : > { %1819 = vst.msk [vmem:[#allocation2 + $0xa8] sm:$0xff] %vm1797_vm8, %v1648_v38  ;;  %1820 = vst.msk [vmem:[#allocation2 + $0xb0] sm:$0xff] %vm1797_vm8, %v1650_v1 }
 0x22d   : > { %1894 = vrot.lane.b32.xlu1 %v15221_v48, %s9001_s27  ;;  %1896 = vrot.lane.b32.xlu0 %v15194_v31, %s9001_s27  ;;  %v15230_v31 = vld [vmem:[#allocation36_spill] sm:$0xff] }
 0x22f   : > { %v1652_v13 = vpop.permute.xlu1 %1651  ;;  %v1654_v9 = vpop.permute.xlu0 %1653 }
 0x230   : > { %1821 = vst.msk [vmem:[#allocation2 + $0xb8] sm:$0xff] %vm1797_vm8, %v1652_v13  ;;  %1822 = vst.msk [vmem:[#allocation2 + $0xc0] sm:$0xff] %vm1797_vm8, %v1654_v9 }
 0x231   : > { %1898 = vrot.lane.b32.xlu1 %v15229_v3, %s9001_s27  ;;  %1900 = vrot.lane.b32.xlu0 %v15196_v29, %s9001_s27  ;;  %v15231_v29 = vld [vmem:[#allocation77_spill] sm:$0xff] }
 0x233   : > { %v1656_v38 = vpop.permute.xlu1 %1655  ;;  %v1658_v1 = vpop.permute.xlu0 %1657 }
 0x234   : > { %1823 = vst.msk [vmem:[#allocation2 + $0xc8] sm:$0xff] %vm1797_vm8, %v1656_v38  ;;  %1824 = vst.msk [vmem:[#allocation2 + $0xd0] sm:$0xff] %vm1797_vm8, %v1658_v1 }
 0x235   : > { %1902 = vrot.lane.b32.xlu1 %v15195_v51, %s9001_s27  ;;  %1904 = vrot.lane.b32.xlu0 %v15230_v31, %s9001_s27 }
 0x237   : > { %v1660_v13 = vpop.permute.xlu1 %1659  ;;  %v1662_v9 = vpop.permute.xlu0 %1661 }
 0x238   : > { %1825 = vst.msk [vmem:[#allocation2 + $0xd8] sm:$0xff] %vm1797_vm8, %v1660_v13  ;;  %1826 = vst.msk [vmem:[#allocation2 + $0xe0] sm:$0xff] %vm1797_vm8, %v1662_v9 }
 0x239   : > { %1906 = vrot.lane.b32.xlu1 %v9199_v56, %s9001_s27  ;;  %1908 = vrot.lane.b32.xlu0 %v9204_v57, %s9001_s27  ;;  %v15232_v57 = vld [vmem:[#allocation82_spill] sm:$0xff] }
 0x23b   : > { %v1664_v38 = vpop.permute.xlu1 %1663  ;;  %v1666_v1 = vpop.permute.xlu0 %1665 }
 0x23c   : > { %1827 = vst.msk [vmem:[#allocation2 + $0xe8] sm:$0xff] %vm1797_vm8, %v1664_v38  ;;  %1828 = vst.msk [vmem:[#allocation2 + $0xf0] sm:$0xff] %vm1797_vm8, %v1666_v1 }
 0x23d   : > { %1910 = vrot.lane.b32.xlu1 %v15231_v29, %s9001_s27  ;;  %1912 = vrot.lane.b32.xlu0 %v9233_v5, %s9001_s27  ;;  %v15233_v5 = vld [vmem:[#allocation83_spill] sm:$0xff] }
 0x23f   : > { %v1668_v13 = vpop.permute.xlu1 %1667  ;;  %v1670_v9 = vpop.permute.xlu0 %1669 }
 0x240   : > { %1829 = vst.msk [vmem:[#allocation2 + $0xf8] sm:$0xff] %vm1797_vm8, %v1668_v13  ;;  %1830 = vst.msk [vmem:[#allocation2 + $0x100] sm:$0xff] %vm1797_vm8, %v1670_v9 }
 0x241   : > { %1914 = vrot.lane.b32.xlu1 %v9230_v4, %s9001_s27  ;;  %1916 = vrot.lane.b32.xlu0 %v15232_v57, %s9001_s27  ;;  %v15234_v57 = vld [vmem:[#allocation27_spill] sm:$0xff] }
 0x243   : > { %v1672_v38 = vpop.permute.xlu1 %1671  ;;  %v1674_v1 = vpop.permute.xlu0 %1673 }
 0x244   : > { %1831 = vst.msk [vmem:[#allocation2 + $0x108] sm:$0xff] %vm1797_vm8, %v1672_v38  ;;  %1832 = vst.msk [vmem:[#allocation2 + $0x110] sm:$0xff] %vm1797_vm8, %v1674_v1 }
 0x245   : > { %1918 = vrot.lane.b32.xlu1 %v9236_v6, %s9001_s27  ;;  %1920 = vrot.lane.b32.xlu0 %v9255_v12, %s9001_s27  ;;  %v15235_v6 = vld [vmem:[#allocation26_spill] sm:$0xff]  ;;  %v15236_v12 = vld [vmem:[#allocation84_spill] sm:$0xff] }
 0x247   : > { %v1676_v13 = vpop.permute.xlu1 %1675  ;;  %v1678_v9 = vpop.permute.xlu0 %1677 }
 0x248   : > { %1833 = vst.msk [vmem:[#allocation2 + $0x118] sm:$0xff] %vm1797_vm8, %v1676_v13  ;;  %1834 = vst.msk [vmem:[#allocation2 + $0x120] sm:$0xff] %vm1797_vm8, %v1678_v9 }
 0x249   : > { %1922 = vrot.lane.b32.xlu1 %v15233_v5, %s9001_s27  ;;  %1924 = vrot.lane.b32.xlu0 %v15235_v6, %s9001_s27  ;;  %v15237_v6 = vld [vmem:[#allocation85_spill] sm:$0xff] }
 0x24b   : > { %v1680_v38 = vpop.permute.xlu1 %1679  ;;  %v1682_v1 = vpop.permute.xlu0 %1681 }
 0x24c   : > { %1835 = vst.msk [vmem:[#allocation2 + $0x128] sm:$0xff] %vm1797_vm8, %v1680_v38  ;;  %1836 = vst.msk [vmem:[#allocation2 + $0x130] sm:$0xff] %vm1797_vm8, %v1682_v1 }
 0x24d   : > { %1926 = vrot.lane.b32.xlu1 %v15234_v57, %s9001_s27  ;;  %1928 = vrot.lane.b32.xlu0 %v15236_v12, %s9001_s27  ;;  %v15238_v12 = vld [vmem:[#allocation32_spill] sm:$0xff] }
 0x24f   : > { %v1684_v13 = vpop.permute.xlu1 %1683  ;;  %v1686_v9 = vpop.permute.xlu0 %1685 }
 0x250   : > { %1837 = vst.msk [vmem:[#allocation2 + $0x138] sm:$0xff] %vm1797_vm8, %v1684_v13  ;;  %1838 = vst.msk [vmem:[#allocation2 + $0x140] sm:$0xff] %vm1797_vm8, %v1686_v9 }
 0x251   : > { %1930 = vrot.lane.b32.xlu1 %v9296_v55, %s9001_s27  ;;  %1932 = vrot.lane.b32.xlu0 %v9301_v58, %s9001_s27  ;;  %v15239_v55 = vld [vmem:[#allocation33_spill] sm:$0xff]  ;;  %v15240_v58 = vld [vmem:[#allocation34_spill] sm:$0xff] }
 0x253   : > { %v1688_v38 = vpop.permute.xlu1 %1687  ;;  %v1690_v1 = vpop.permute.xlu0 %1689 }
 0x254   : > { %1839 = vst.msk [vmem:[#allocation2 + $0x148] sm:$0xff] %vm1797_vm8, %v1688_v38  ;;  %1840 = vst.msk [vmem:[#allocation2 + $0x150] sm:$0xff] %vm1797_vm8, %v1690_v1 }
 0x255   : > { %1934 = vrot.lane.b32.xlu1 %v15237_v6, %s9001_s27  ;;  %1936 = vrot.lane.b32.xlu0 %v15239_v55, %s9001_s27  ;;  %v15241_v6 = vld [vmem:[#allocation86_spill] sm:$0xff]  ;;  %v15242_v55 = vld [vmem:[#allocation87_spill] sm:$0xff] }
 0x257   : > { %v1692_v13 = vpop.permute.xlu1 %1691  ;;  %v1694_v9 = vpop.permute.xlu0 %1693 }
 0x258   : > { %1841 = vst.msk [vmem:[#allocation2 + $0x158] sm:$0xff] %vm1797_vm8, %v1692_v13  ;;  %1842 = vst.msk [vmem:[#allocation2 + $0x160] sm:$0xff] %vm1797_vm8, %v1694_v9 }
 0x259   : > { %1938 = vrot.lane.b32.xlu1 %v15238_v12, %s9001_s27  ;;  %1940 = vrot.lane.b32.xlu0 %v15241_v6, %s9001_s27  ;;  %v15243_v12 = vld [vmem:[#allocation37_spill] sm:$0xff] }
 0x25b   : > { %v1696_v38 = vpop.permute.xlu1 %1695  ;;  %v1698_v1 = vpop.permute.xlu0 %1697 }
 0x25c   : > { %1843 = vst.msk [vmem:[#allocation2 + $0x168] sm:$0xff] %vm1797_vm8, %v1696_v38  ;;  %1844 = vst.msk [vmem:[#allocation2 + $0x170] sm:$0xff] %vm1797_vm8, %v1698_v1 }
 0x25d   : > { %1942 = vrot.lane.b32.xlu1 %v15240_v58, %s9001_s27  ;;  %1944 = vrot.lane.b32.xlu0 %v15243_v12, %s9001_s27 }
 0x25f   : > { %v1700_v13 = vpop.permute.xlu1 %1699  ;;  %v1702_v9 = vpop.permute.xlu0 %1701 }
 0x260   : > { %1845 = vst.msk [vmem:[#allocation2 + $0x178] sm:$0xff] %vm1797_vm8, %v1700_v13  ;;  %1846 = vst.msk [vmem:[#allocation2 + $0x180] sm:$0xff] %vm1797_vm8, %v1702_v9  ;;  %v627_v13 = vrot.slane %v10188_v28, 6  ;;  %v15245_v9 = vrot.slane %v10188_v28, 7 }
 0x261   : > { %1946 = vrot.lane.b32.xlu1 %v15242_v55, %s9001_s27  ;;  %1948 = vrot.lane.b32.xlu0 %v9356_v33, %s9001_s27 }
 0x263   : > { %v1704_v38 = vpop.permute.xlu1 %1703  ;;  %v1706_v6 = vpop.permute.xlu0 %1705 }
 0x264   : > { %1847 = vst.msk [vmem:[#allocation2 + $0x188] sm:$0xff] %vm1797_vm8, %v1704_v38  ;;  %1848 = vst.msk [vmem:[#allocation2 + $0x190] sm:$0xff] %vm1797_vm8, %v1706_v6  ;;  %v15244_v38 = vld [vmem:[#allocation40_spill] sm:$0xff] }
 0x265   : > { %1950 = vrot.lane.b32.xlu1 %v9353_v18, %s9001_s27  ;;  %1952 = vrot.lane.b32.xlu0 %v15244_v38, %s9001_s27  ;;  %v10468_v18 = vsel %vm421_vm0, %v15245_v9, %v627_v13 }
 0x266   : > { %15246 = vst [vmem:[#allocation64_spill] sm:$0xff] %v10468_v18 }
 0x267   : > { %v1708_v1 = vpop.permute.xlu1 %1707  ;;  %v1710_v12 = vpop.permute.xlu0 %1709 }
 0x268   : > { %1849 = vst.msk [vmem:[#allocation2 + $0x198] sm:$0xff] %vm1797_vm8, %v1708_v1  ;;  %1850 = vst.msk [vmem:[#allocation2 + $0x1a0] sm:$0xff] %vm1797_vm8, %v1710_v12 }
 0x269   : > { %1954 = vrot.lane.b32.xlu1 %v10209_v42, %s9001_s27  ;;  %1956 = vrot.lane.b32.xlu0 %v10206_v10, %s9001_s27 }
 0x26b   : > { %v1712_v33 = vpop.permute.xlu1 %1711  ;;  %v1714_v1 = vpop.permute.xlu0 %1713 }
 0x26c   : > { %1851 = vst.msk [vmem:[#allocation2 + $0x1a8] sm:$0xff] %vm1797_vm8, %v1712_v33  ;;  %1852 = vst.msk [vmem:[#allocation2 + $0x1b0] sm:$0xff] %vm1797_vm8, %v1714_v1  ;;  %v15247_v33 = vld [vmem:[#allocation41_spill] sm:$0xff] }
 0x26d   : > { %1958 = vrot.lane.b32.xlu1 %v10468_v18, %s9001_s27  ;;  %1960 = vrot.lane.b32.xlu0 %v9365_v47, %s9001_s27 }
 0x26f   : > { %v1716_v6 = vpop.permute.xlu1 %1715  ;;  %v1718_v12 = vpop.permute.xlu0 %1717 }
 0x270   : > { %1853 = vst.msk [vmem:[#allocation2 + $0x1b8] sm:$0xff] %vm1797_vm8, %v1716_v6  ;;  %1854 = vst.msk [vmem:[#allocation2 + $0x1c0] sm:$0xff] %vm1797_vm8, %v1718_v12  ;;  %v15248_v6 = vld [vmem:[#allocation43_spill] sm:$0xff] }
 0x271   : > { %1962 = vrot.lane.b32.xlu1 %v9371_v63, %s9001_s27  ;;  %1964 = vrot.lane.b32.xlu0 %v15247_v33, %s9001_s27 }
 0x273   : > { %v1720_v28 = vpop.permute.xlu1 %1719  ;;  %v1722_v9 = vpop.permute.xlu0 %1721 }
 0x274   : > { %1855 = vst.msk [vmem:[#allocation2 + $0x1c8] sm:$0xff] %vm1797_vm8, %v1720_v28  ;;  %1856 = vst.msk [vmem:[#allocation2 + $0x1d0] sm:$0xff] %vm1797_vm8, %v1722_v9  ;;  %v15249_v9 = vld [vmem:[#allocation45_spill] sm:$0xff] }
 0x275   : > { %1966 = vrot.lane.b32.xlu1 %v9397_v49, %s9001_s27  ;;  %1968 = vrot.lane.b32.xlu0 %v9394_v35, %s9001_s27 }
 0x277   : > { %v1724_v13 = vpop.permute.xlu1 %1723  ;;  %v1726_v28 = vpop.permute.xlu0 %1725 }
 0x278   : > { %1857 = vst.msk [vmem:[#allocation2 + $0x1d8] sm:$0xff] %vm1797_vm8, %v1724_v13  ;;  %1858 = vst.msk [vmem:[#allocation2 + $0x1e0] sm:$0xff] %vm1797_vm8, %v1726_v28 }
 0x279   : > { %1970 = vrot.lane.b32.xlu1 %v15248_v6, %s9001_s27  ;;  %1972 = vrot.lane.b32.xlu0 %v9400_v11, %s9001_s27  ;;  %v15250_v11 = vld [vmem:[#allocation48_spill] sm:$0xff] }
 0x27b   : > { %v1728_v1 = vpop.permute.xlu1 %1727  ;;  %v1730_v13 = vpop.permute.xlu0 %1729 }
 0x27c   : > { %1859 = vst.msk [vmem:[#allocation2 + $0x1e8] sm:$0xff] %vm1797_vm8, %v1728_v1  ;;  %1860 = vst.msk [vmem:[#allocation2 + $0x1f0] sm:$0xff] %vm1797_vm8, %v1730_v13 }
 0x27d   : > { %1974 = vrot.lane.b32.xlu1 %v9413_v44, %s9001_s27  ;;  %1976 = vrot.lane.b32.xlu0 %v15249_v9, %s9001_s27 }
 0x27f   : > { %v1732_v12 = vpop.permute.xlu1 %1731  ;;  %v1865_v28 = vpop.permute.xlu0 %1864 }
 0x280   : > { %1861 = vst.msk [vmem:[#allocation2 + $0x1f8] sm:$0xff] %vm1797_vm8, %v1732_v12  ;;  %vm3526_vm8 = vcmask 288000  }
 0x281   : > { %1978 = vrot.lane.b32.xlu1 %v9419_v45, %s9001_s27  ;;  %2153 = vst.msk [vmem:[#allocation2 - $0x1] sm:$0xfe] %vm2152_vm10, %v1865_v28  ;;  %1980 = vrot.lane.b32.xlu0 %v9432_v7, %s9001_s27  ;;  %v15251_v7 = vld [vmem:[#allocation50_spill] sm:$0xff] }
 0x283   : > { %v1867_v1 = vpop.permute.xlu1 %1866  ;;  %v1869_v13 = vpop.permute.xlu0 %1868 }
 0x284   : > { %2155 = vst.msk [vmem:[#allocation2 + $0x7] sm:$0xff] %vm2154_vm9, %v1867_v1 }
 0x285   : > { %1982 = vrot.lane.b32.xlu1 %v15250_v11, %s9001_s27  ;;  %2157 = vst.msk [vmem:[#allocation2 + $0xf] sm:$0x1] %vm2156_vm11, %v1869_v13  ;;  %1984 = vrot.lane.b32.xlu0 %v9438_v0, %s9001_s27  ;;  %v15252_v0 = vld [vmem:[#allocation54_spill] sm:$0xff] }
 0x287   : > { %v1871_v12 = vpop.permute.xlu1 %1870  ;;  %v1873_v28 = vpop.permute.xlu0 %1872 }
 0x288   : > { %2158 = vst.msk [vmem:[#allocation2 + $0xf] sm:$0xfe] %vm2152_vm10, %v1871_v12 }
 0x289   : > { %1986 = vrot.lane.b32.xlu1 %v15199_v39, %s9001_s27  ;;  %2159 = vst.msk [vmem:[#allocation2 + $0x17] sm:$0xff] %vm2154_vm9, %v1873_v28  ;;  %1988 = vrot.lane.b32.xlu0 %v15251_v7, %s9001_s27 }
 0x28b   : > { %v1875_v1 = vpop.permute.xlu1 %1874  ;;  %v1877_v13 = vpop.permute.xlu0 %1876 }
 0x28c   : > { %2160 = vst.msk [vmem:[#allocation2 + $0x1f] sm:$0x1] %vm2156_vm11, %v1875_v1 }
 0x28d   : > { %1990 = vrot.lane.b32.xlu1 %v15168_v8, %s9001_s27  ;;  %2161 = vst.msk [vmem:[#allocation2 + $0x1f] sm:$0xfe] %vm2152_vm10, %v1877_v13  ;;  %1992 = vrot.lane.b32.xlu0 %v15167_v62, %s9001_s27  ;;  %v15253_v62 = vld [vmem:[#allocation56_spill] sm:$0xff] }
 0x28f   : > { %v1879_v12 = vpop.permute.xlu1 %1878  ;;  %v1881_v28 = vpop.permute.xlu0 %1880 }
 0x290   : > { %2162 = vst.msk [vmem:[#allocation2 + $0x27] sm:$0xff] %vm2154_vm9, %v1879_v12 }
 0x291   : > { %1994 = vrot.lane.b32.xlu1 %v15252_v0, %s9001_s27  ;;  %2163 = vst.msk [vmem:[#allocation2 + $0x2f] sm:$0x1] %vm2156_vm11, %v1881_v28  ;;  %1996 = vrot.lane.b32.xlu0 %v15200_v52, %s9001_s27  ;;  %v15254_v52 = vld [vmem:[#allocation60_spill] sm:$0xff] }
 0x293   : > { %v1883_v1 = vpop.permute.xlu1 %1882  ;;  %v1885_v13 = vpop.permute.xlu0 %1884 }
 0x294   : > { %2164 = vst.msk [vmem:[#allocation2 + $0x2f] sm:$0xfe] %vm2152_vm10, %v1883_v1 }
 0x295   : > { %1998 = vrot.lane.b32.xlu1 %v15203_v36, %s9001_s27  ;;  %2165 = vst.msk [vmem:[#allocation2 + $0x37] sm:$0xff] %vm2154_vm9, %v1885_v13  ;;  %2000 = vrot.lane.b32.xlu0 %v15253_v62, %s9001_s27 }
 0x297   : > { %v1887_v12 = vpop.permute.xlu1 %1886  ;;  %v1889_v28 = vpop.permute.xlu0 %1888 }
 0x298   : > { %2166 = vst.msk [vmem:[#allocation2 + $0x3f] sm:$0x1] %vm2156_vm11, %v1887_v12 }
 0x299   : > { %2002 = vrot.lane.b32.xlu1 %v15204_v14, %s9001_s27  ;;  %2167 = vst.msk [vmem:[#allocation2 + $0x3f] sm:$0xfe] %vm2152_vm10, %v1889_v28  ;;  %2004 = vrot.lane.b32.xlu0 %v15170_v54, %s9001_s27  ;;  %v15255_v54 = vld [vmem:[#allocation62_spill] sm:$0xff] }
 0x29b   : > { %v1891_v1 = vpop.permute.xlu1 %1890  ;;  %v1893_v13 = vpop.permute.xlu0 %1892 }
 0x29c   : > { %2168 = vst.msk [vmem:[#allocation2 + $0x47] sm:$0xff] %vm2154_vm9, %v1891_v1 }
 0x29d   : > { %2006 = vrot.lane.b32.xlu1 %v15254_v52, %s9001_s27  ;;  %2169 = vst.msk [vmem:[#allocation2 + $0x4f] sm:$0x1] %vm2156_vm11, %v1893_v13  ;;  %2008 = vrot.lane.b32.xlu0 %v15172_v30, %s9001_s27  ;;  %v15256_v30 = vld [vmem:[#allocation66_spill] sm:$0xff] }
 0x29f   : > { %v1895_v12 = vpop.permute.xlu1 %1894  ;;  %v1897_v28 = vpop.permute.xlu0 %1896 }
 0x2a0   : > { %2170 = vst.msk [vmem:[#allocation2 + $0x4f] sm:$0xfe] %vm2152_vm10, %v1895_v12 }
 0x2a1   : > { %2010 = vrot.lane.b32.xlu1 %v15174_v61, %s9001_s27  ;;  %2171 = vst.msk [vmem:[#allocation2 + $0x57] sm:$0xff] %vm2154_vm9, %v1897_v28  ;;  %2012 = vrot.lane.b32.xlu0 %v15255_v54, %s9001_s27 }
 0x2a3   : > { %v1899_v1 = vpop.permute.xlu1 %1898  ;;  %v1901_v13 = vpop.permute.xlu0 %1900 }
 0x2a4   : > { %2172 = vst.msk [vmem:[#allocation2 + $0x5f] sm:$0x1] %vm2156_vm11, %v1899_v1 }
 0x2a5   : > { %2014 = vrot.lane.b32.xlu1 %v15205_v60, %s9001_s27  ;;  %2173 = vst.msk [vmem:[#allocation2 + $0x5f] sm:$0xfe] %vm2152_vm10, %v1901_v13  ;;  %2016 = vrot.lane.b32.xlu0 %v9526_v21, %s9001_s27  ;;  %v15257_v21 = vld [vmem:[#allocation68_spill] sm:$0xff] }
 0x2a7   : > { %v1903_v12 = vpop.permute.xlu1 %1902  ;;  %v1905_v28 = vpop.permute.xlu0 %1904 }
 0x2a8   : > { %2174 = vst.msk [vmem:[#allocation2 + $0x67] sm:$0xff] %vm2154_vm9, %v1903_v12 }
 0x2a9   : > { %2018 = vrot.lane.b32.xlu1 %v15256_v30, %s9001_s27  ;;  %2175 = vst.msk [vmem:[#allocation2 + $0x6f] sm:$0x1] %vm2156_vm11, %v1905_v28  ;;  %2020 = vrot.lane.b32.xlu0 %v9532_v59, %s9001_s27  ;;  %v15258_v59 = vld [vmem:[#allocation72_spill] sm:$0xff] }
 0x2ab   : > { %v1907_v1 = vpop.permute.xlu1 %1906  ;;  %v1909_v13 = vpop.permute.xlu0 %1908 }
 0x2ac   : > { %2176 = vst.msk [vmem:[#allocation2 + $0x6f] sm:$0xfe] %vm2152_vm10, %v1907_v1 }
 0x2ad   : > { %2022 = vrot.lane.b32.xlu1 %v15175_v41, %s9001_s27  ;;  %2177 = vst.msk [vmem:[#allocation2 + $0x77] sm:$0xff] %vm2154_vm9, %v1909_v13  ;;  %2024 = vrot.lane.b32.xlu0 %v15257_v21, %s9001_s27  ;;  %v15259_v21 = vld [vmem:[#allocation71_spill] sm:$0xff] }
 0x2af   : > { %v1911_v12 = vpop.permute.xlu1 %1910  ;;  %v1913_v28 = vpop.permute.xlu0 %1912 }
 0x2b0   : > { %2178 = vst.msk [vmem:[#allocation2 + $0x7f] sm:$0x1] %vm2156_vm11, %v1911_v12 }
 0x2b1   : > { %2026 = vrot.lane.b32.xlu1 %v15176_v46, %s9001_s27  ;;  %2179 = vst.msk [vmem:[#allocation2 + $0x7f] sm:$0xfe] %vm2152_vm10, %v1913_v28  ;;  %2028 = vrot.lane.b32.xlu0 %v9563_v24, %s9001_s27  ;;  %v15260_v24 = vld [vmem:[#allocation76_spill] sm:$0xff] }
 0x2b3   : > { %v1915_v1 = vpop.permute.xlu1 %1914  ;;  %v1917_v13 = vpop.permute.xlu0 %1916 }
 0x2b4   : > { %2180 = vst.msk [vmem:[#allocation2 + $0x87] sm:$0xff] %vm2154_vm9, %v1915_v1 }
 0x2b5   : > { %2030 = vrot.lane.b32.xlu1 %v15258_v59, %s9001_s27  ;;  %2181 = vst.msk [vmem:[#allocation2 + $0x8f] sm:$0x1] %vm2156_vm11, %v1917_v13  ;;  %2032 = vrot.lane.b32.xlu0 %v15259_v21, %s9001_s27  ;;  %v15261_v59 = vld [vmem:[#allocation74_spill] sm:$0xff]  ;;  %v15262_v21 = vld [vmem:[#allocation79_spill] sm:$0xff] }
 0x2b7   : > { %v1919_v12 = vpop.permute.xlu1 %1918  ;;  %v1921_v28 = vpop.permute.xlu0 %1920 }
 0x2b8   : > { %2182 = vst.msk [vmem:[#allocation2 + $0x8f] sm:$0xfe] %vm2152_vm10, %v1919_v12 }
 0x2b9   : > { %2034 = vrot.lane.b32.xlu1 %v9574_v32, %s9001_s27  ;;  %2183 = vst.msk [vmem:[#allocation2 + $0x97] sm:$0xff] %vm2154_vm9, %v1921_v28  ;;  %2036 = vrot.lane.b32.xlu0 %v15261_v59, %s9001_s27  ;;  %v15263_v32 = vld [vmem:[#allocation75_spill] sm:$0xff] }
 0x2bb   : > { %v1923_v1 = vpop.permute.xlu1 %1922  ;;  %v1925_v13 = vpop.permute.xlu0 %1924 }
 0x2bc   : > { %2184 = vst.msk [vmem:[#allocation2 + $0x9f] sm:$0x1] %vm2156_vm11, %v1923_v1 }
 0x2bd   : > { %2038 = vrot.lane.b32.xlu1 %v15260_v24, %s9001_s27  ;;  %2185 = vst.msk [vmem:[#allocation2 + $0x9f] sm:$0xfe] %vm2152_vm10, %v1925_v13  ;;  %2040 = vrot.lane.b32.xlu0 %v15263_v32, %s9001_s27 }
 0x2bf   : > { %v1927_v12 = vpop.permute.xlu1 %1926  ;;  %v1929_v28 = vpop.permute.xlu0 %1928 }
 0x2c0   : > { %2186 = vst.msk [vmem:[#allocation2 + $0xa7] sm:$0xff] %vm2154_vm9, %v1927_v12  ;;  %v643_v12 = vrot.slane %v10297_v37, 6 }
 0x2c1   : > { %2042 = vrot.lane.b32.xlu1 %v15262_v21, %s9001_s27  ;;  %2187 = vst.msk [vmem:[#allocation2 + $0xaf] sm:$0x1] %vm2156_vm11, %v1929_v28  ;;  %2044 = vrot.lane.b32.xlu0 %v15207_v16, %s9001_s27  ;;  %v15265_v28 = vrot.slane %v10297_v37, 7 }
 0x2c3   : > { %v1931_v1 = vpop.permute.xlu1 %1930  ;;  %v1933_v59 = vpop.permute.xlu0 %1932 }
 0x2c4   : > { %2188 = vst.msk [vmem:[#allocation2 + $0xaf] sm:$0xfe] %vm2152_vm10, %v1931_v1  ;;  %v15264_v1 = vld [vmem:[#allocation81_spill] sm:$0xff] }
 0x2c5   : > { %2046 = vrot.lane.b32.xlu1 %v15210_v27, %s9001_s27  ;;  %2189 = vst.msk [vmem:[#allocation2 + $0xb7] sm:$0xff] %vm2154_vm9, %v1933_v59  ;;  %2048 = vrot.lane.b32.xlu0 %v15264_v1, %s9001_s27  ;;  %v10618_v27 = vsel %vm421_vm0, %v15265_v28, %v643_v12 }
 0x2c6   : > { %15266 = vst [vmem:[#allocation7_spill] sm:$0xff] %v10618_v27 }
 0x2c7   : > { %v1935_v13 = vpop.permute.xlu1 %1934  ;;  %v1937_v32 = vpop.permute.xlu0 %1936 }
 0x2c8   : > { %2190 = vst.msk [vmem:[#allocation2 + $0xbf] sm:$0x1] %vm2156_vm11, %v1935_v13 }
 0x2c9   : > { %2050 = vrot.lane.b32.xlu1 %v10318_v25, %s9001_s27  ;;  %2191 = vst.msk [vmem:[#allocation2 + $0xbf] sm:$0xfe] %vm2152_vm10, %v1937_v32  ;;  %2052 = vrot.lane.b32.xlu0 %v10315_v20, %s9001_s27 }
 0x2cb   : > { %v1939_v16 = vpop.permute.xlu1 %1938  ;;  %v1941_v13 = vpop.permute.xlu0 %1940 }
 0x2cc   : > { %2192 = vst.msk [vmem:[#allocation2 + $0xc7] sm:$0xff] %vm2154_vm9, %v1939_v16 }
 0x2cd   : > { %2054 = vrot.lane.b32.xlu1 %v10618_v27, %s9001_s27  ;;  %2193 = vst.msk [vmem:[#allocation2 + $0xcf] sm:$0x1] %vm2156_vm11, %v1941_v13  ;;  %2251 = vrot.lane.b32.xlu0 %v15212_v34, %s9002_s28 }
 0x2cf   : > { %v1943_v59 = vpop.permute.xlu1 %1942  ;;  %v1945_v16 = vpop.permute.xlu0 %1944 }
 0x2d0   : > { %2194 = vst.msk [vmem:[#allocation2 + $0xcf] sm:$0xfe] %vm2152_vm10, %v1943_v59 }
 0x2d1   : > { %2253 = vrot.lane.b32.xlu1 %v15211_v17, %s9002_s28  ;;  %2195 = vst.msk [vmem:[#allocation2 + $0xd7] sm:$0xff] %vm2154_vm9, %v1945_v16  ;;  %2255 = vrot.lane.b32.xlu0 %v15224_v26, %s9002_s28  ;;  %v15267_v26 = vld [vmem:[#allocation9_spill] sm:$0xff]  ;;  %v15268_v16 = vld [vmem:[#allocation12_spill] sm:$0xff] }
 0x2d3   : > { %v1947_v32 = vpop.permute.xlu1 %1946  ;;  %v1949_v12 = vpop.permute.xlu0 %1948 }
 0x2d4   : > { %2196 = vst.msk [vmem:[#allocation2 + $0xdf] sm:$0x1] %vm2156_vm11, %v1947_v32 }
 0x2d5   : > { %2257 = vrot.lane.b32.xlu1 %v15214_v43, %s9002_s28  ;;  %2197 = vst.msk [vmem:[#allocation2 + $0xdf] sm:$0xfe] %vm2152_vm10, %v1949_v12  ;;  %2259 = vrot.lane.b32.xlu0 %v15213_v40, %s9002_s28 }
 0x2d7   : > { %v1951_v37 = vpop.permute.xlu1 %1950  ;;  %v1953_v34 = vpop.permute.xlu0 %1952 }
 0x2d8   : > { %2198 = vst.msk [vmem:[#allocation2 + $0xe7] sm:$0xff] %vm2154_vm9, %v1951_v37 }
 0x2d9   : > { %2261 = vrot.lane.b32.xlu1 %v15225_v22, %s9002_s28  ;;  %2199 = vst.msk [vmem:[#allocation2 + $0xef] sm:$0x1] %vm2156_vm11, %v1953_v34  ;;  %2263 = vrot.lane.b32.xlu0 %v15267_v26, %s9002_s28  ;;  %v15281_v22 = vld [vmem:[#allocation31_spill] sm:$0xff] }
 0x2db   : > { %v1955_v17 = vpop.permute.xlu1 %1954  ;;  %v1957_v59 = vpop.permute.xlu0 %1956 }
 0x2dc   : > { %2200 = vst.msk [vmem:[#allocation2 + $0xef] sm:$0xfe] %vm2152_vm10, %v1955_v17  ;;  %v15269_v17 = vld [vmem:[#allocation14_spill] sm:$0xff] }
 0x2dd   : > { %2265 = vrot.lane.b32.xlu1 %v15215_v2, %s9002_s28  ;;  %2201 = vst.msk [vmem:[#allocation2 + $0xf7] sm:$0xff] %vm2154_vm9, %v1957_v59  ;;  %2267 = vrot.lane.b32.xlu0 %v15226_v19, %s9002_s28  ;;  %v15280_v19 = vld [vmem:[#allocation85_spill] sm:$0xff] }
 0x2df   : > { %v1959_v28 = vpop.permute.xlu1 %1958  ;;  %v1961_v32 = vpop.permute.xlu0 %1960 }
 0x2e0   : > { %2202 = vst.msk [vmem:[#allocation2 + $0xff] sm:$0x1] %vm2156_vm11, %v1959_v28 }
 0x2e1   : > { %2269 = vrot.lane.b32.xlu1 %v15218_v15, %s9002_s28  ;;  %2203 = vst.msk [vmem:[#allocation2 + $0xff] sm:$0xfe] %vm2152_vm10, %v1961_v32  ;;  %2271 = vrot.lane.b32.xlu0 %v15268_v16, %s9002_s28  ;;  %v15270_v32 = vld [vmem:[#allocation17_spill] sm:$0xff] }
 0x2e3   : > { %v1963_v13 = vpop.permute.xlu1 %1962  ;;  %v1965_v12 = vpop.permute.xlu0 %1964 }
 0x2e4   : > { %2204 = vst.msk [vmem:[#allocation2 + $0x107] sm:$0xff] %vm2154_vm9, %v1963_v13 }
 0x2e5   : > { %2273 = vrot.lane.b32.xlu1 %v15227_v23, %s9002_s28  ;;  %2205 = vst.msk [vmem:[#allocation2 + $0x10f] sm:$0x1] %vm2156_vm11, %v1965_v12  ;;  %2275 = vrot.lane.b32.xlu0 %v15269_v17, %s9002_s28  ;;  %v15279_v23 = vld [vmem:[#allocation84_spill] sm:$0xff] }
 0x2e7   : > { %v1967_v37 = vpop.permute.xlu1 %1966  ;;  %v1969_v28 = vpop.permute.xlu0 %1968 }
 0x2e8   : > { %2206 = vst.msk [vmem:[#allocation2 + $0x10f] sm:$0xfe] %vm2152_vm10, %v1967_v37 }
 0x2e9   : > { %2277 = vrot.lane.b32.xlu1 %v15219_v50, %s9002_s28  ;;  %2207 = vst.msk [vmem:[#allocation2 + $0x117] sm:$0xff] %vm2154_vm9, %v1969_v28  ;;  %2279 = vrot.lane.b32.xlu0 %v15228_v53, %s9002_s28  ;;  %v15276_v53 = vld [vmem:[#allocation25_spill] sm:$0xff] }
 0x2eb   : > { %v1971_v34 = vpop.permute.xlu1 %1970  ;;  %v1973_v13 = vpop.permute.xlu0 %1972 }
 0x2ec   : > { %2208 = vst.msk [vmem:[#allocation2 + $0x11f] sm:$0x1] %vm2156_vm11, %v1971_v34  ;;  %v15271_v34 = vld [vmem:[#allocation19_spill] sm:$0xff] }
 0x2ed   : > { %2281 = vrot.lane.b32.xlu1 %v15221_v48, %s9002_s28  ;;  %2209 = vst.msk [vmem:[#allocation2 + $0x11f] sm:$0xfe] %vm2152_vm10, %v1973_v13  ;;  %2283 = vrot.lane.b32.xlu0 %v15270_v32, %s9002_s28 }
 0x2ef   : > { %v1975_v59 = vpop.permute.xlu1 %1974  ;;  %v1977_v12 = vpop.permute.xlu0 %1976 }
 0x2f0   : > { %2210 = vst.msk [vmem:[#allocation2 + $0x127] sm:$0xff] %vm2154_vm9, %v1975_v59 }
 0x2f1   : > { %2285 = vrot.lane.b32.xlu1 %v15229_v3, %s9002_s28  ;;  %2211 = vst.msk [vmem:[#allocation2 + $0x12f] sm:$0x1] %vm2156_vm11, %v1977_v12  ;;  %2287 = vrot.lane.b32.xlu0 %v15271_v34, %s9002_s28  ;;  %v15272_v12 = vld [vmem:[#allocation21_spill] sm:$0xff]  ;;  %v15275_v3 = vld [vmem:[#allocation82_spill] sm:$0xff] }
 0x2f3   : > { %v1979_v37 = vpop.permute.xlu1 %1978  ;;  %v1981_v59 = vpop.permute.xlu0 %1980 }
 0x2f4   : > { %2212 = vst.msk [vmem:[#allocation2 + $0x12f] sm:$0xfe] %vm2152_vm10, %v1979_v37 }
 0x2f5   : > { %2289 = vrot.lane.b32.xlu1 %v15195_v51, %s9002_s28  ;;  %2213 = vst.msk [vmem:[#allocation2 + $0x137] sm:$0xff] %vm2154_vm9, %v1981_v59  ;;  %2291 = vrot.lane.b32.xlu0 %v15230_v31, %s9002_s28  ;;  %v15273_v31 = vld [vmem:[#allocation22_spill] sm:$0xff] }
 0x2f7   : > { %v1983_v28 = vpop.permute.xlu1 %1982  ;;  %v1985_v37 = vpop.permute.xlu0 %1984 }
 0x2f8   : > { %2214 = vst.msk [vmem:[#allocation2 + $0x13f] sm:$0x1] %vm2156_vm11, %v1983_v28 }
 0x2f9   : > { %2293 = vrot.lane.b32.xlu1 %v9199_v56, %s9002_s28  ;;  %2215 = vst.msk [vmem:[#allocation2 + $0x13f] sm:$0xfe] %vm2152_vm10, %v1985_v37  ;;  %2295 = vrot.lane.b32.xlu0 %v15272_v12, %s9002_s28 }
 0x2fb   : > { %v1987_v13 = vpop.permute.xlu1 %1986  ;;  %v1989_v59 = vpop.permute.xlu0 %1988 }
 0x2fc   : > { %2216 = vst.msk [vmem:[#allocation2 + $0x147] sm:$0xff] %vm2154_vm9, %v1987_v13 }
 0x2fd   : > { %2297 = vrot.lane.b32.xlu1 %v15231_v29, %s9002_s28  ;;  %2217 = vst.msk [vmem:[#allocation2 + $0x14f] sm:$0x1] %vm2156_vm11, %v1989_v59  ;;  %2299 = vrot.lane.b32.xlu0 %v15273_v31, %s9002_s28  ;;  %v15274_v29 = vld [vmem:[#allocation23_spill] sm:$0xff] }
 0x2ff   : > { %v1991_v28 = vpop.permute.xlu1 %1990  ;;  %v1993_v37 = vpop.permute.xlu0 %1992 }
 0x300   : > { %2218 = vst.msk [vmem:[#allocation2 + $0x14f] sm:$0xfe] %vm2152_vm10, %v1991_v28 }
 0x301   : > { %2301 = vrot.lane.b32.xlu1 %v9230_v4, %s9002_s28  ;;  %2219 = vst.msk [vmem:[#allocation2 + $0x157] sm:$0xff] %vm2154_vm9, %v1993_v37  ;;  %2303 = vrot.lane.b32.xlu0 %v15275_v3, %s9002_s28  ;;  %v15277_v3 = vld [vmem:[#allocation26_spill] sm:$0xff] }
 0x303   : > { %v1995_v13 = vpop.permute.xlu1 %1994  ;;  %v1997_v59 = vpop.permute.xlu0 %1996 }
 0x304   : > { %2220 = vst.msk [vmem:[#allocation2 + $0x15f] sm:$0x1] %vm2156_vm11, %v1995_v13 }
 0x305   : > { %2305 = vrot.lane.b32.xlu1 %v15274_v29, %s9002_s28  ;;  %2221 = vst.msk [vmem:[#allocation2 + $0x15f] sm:$0xfe] %vm2152_vm10, %v1997_v59  ;;  %2307 = vrot.lane.b32.xlu0 %v15276_v53, %s9002_s28 }
 0x307   : > { %v1999_v28 = vpop.permute.xlu1 %1998  ;;  %v2001_v37 = vpop.permute.xlu0 %2000 }
 0x308   : > { %2222 = vst.msk [vmem:[#allocation2 + $0x167] sm:$0xff] %vm2154_vm9, %v1999_v28 }
 0x309   : > { %2309 = vrot.lane.b32.xlu1 %v15233_v5, %s9002_s28  ;;  %2223 = vst.msk [vmem:[#allocation2 + $0x16f] sm:$0x1] %vm2156_vm11, %v2001_v37  ;;  %2311 = vrot.lane.b32.xlu0 %v15277_v3, %s9002_s28  ;;  %v15278_v5 = vld [vmem:[#allocation30_spill] sm:$0xff] }
 0x30b   : > { %v2003_v13 = vpop.permute.xlu1 %2002  ;;  %v2005_v59 = vpop.permute.xlu0 %2004 }
 0x30c   : > { %2224 = vst.msk [vmem:[#allocation2 + $0x16f] sm:$0xfe] %vm2152_vm10, %v2003_v13 }
 0x30d   : > { %2313 = vrot.lane.b32.xlu1 %v15234_v57, %s9002_s28  ;;  %2225 = vst.msk [vmem:[#allocation2 + $0x177] sm:$0xff] %vm2154_vm9, %v2005_v59  ;;  %2315 = vrot.lane.b32.xlu0 %v15279_v23, %s9002_s28  ;;  %v15282_v23 = vld [vmem:[#allocation32_spill] sm:$0xff] }
 0x30f   : > { %v2007_v28 = vpop.permute.xlu1 %2006  ;;  %v2009_v37 = vpop.permute.xlu0 %2008 }
 0x310   : > { %2226 = vst.msk [vmem:[#allocation2 + $0x17f] sm:$0x1] %vm2156_vm11, %v2007_v28 }
 0x311   : > { %2317 = vrot.lane.b32.xlu1 %v15278_v5, %s9002_s28  ;;  %2227 = vst.msk [vmem:[#allocation2 + $0x17f] sm:$0xfe] %vm2152_vm10, %v2009_v37  ;;  %2319 = vrot.lane.b32.xlu0 %v15281_v22, %s9002_s28  ;;  %v15283_v5 = vld [vmem:[#allocation33_spill] sm:$0xff] }
 0x313   : > { %v2011_v13 = vpop.permute.xlu1 %2010  ;;  %v2013_v59 = vpop.permute.xlu0 %2012 }
 0x314   : > { %2228 = vst.msk [vmem:[#allocation2 + $0x187] sm:$0xff] %vm2154_vm9, %v2011_v13 }
 0x315   : > { %2321 = vrot.lane.b32.xlu1 %v15280_v19, %s9002_s28  ;;  %2229 = vst.msk [vmem:[#allocation2 + $0x18f] sm:$0x1] %vm2156_vm11, %v2013_v59  ;;  %2323 = vrot.lane.b32.xlu0 %v15283_v5, %s9002_s28  ;;  %v15284_v19 = vld [vmem:[#allocation86_spill] sm:$0xff]  ;;  %v15285_v5 = vld [vmem:[#allocation37_spill] sm:$0xff] }
 0x317   : > { %v2015_v28 = vpop.permute.xlu1 %2014  ;;  %v2017_v37 = vpop.permute.xlu0 %2016 }
 0x318   : > { %2230 = vst.msk [vmem:[#allocation2 + $0x18f] sm:$0xfe] %vm2152_vm10, %v2015_v28 }
 0x319   : > { %2325 = vrot.lane.b32.xlu1 %v15282_v23, %s9002_s28  ;;  %2231 = vst.msk [vmem:[#allocation2 + $0x197] sm:$0xff] %vm2154_vm9, %v2017_v37  ;;  %2327 = vrot.lane.b32.xlu0 %v15284_v19, %s9002_s28  ;;  %v15286_v19 = vld [vmem:[#allocation38_spill] sm:$0xff] }
 0x31b   : > { %v2019_v13 = vpop.permute.xlu1 %2018  ;;  %v2021_v59 = vpop.permute.xlu0 %2020 }
 0x31c   : > { %2232 = vst.msk [vmem:[#allocation2 + $0x19f] sm:$0x1] %vm2156_vm11, %v2019_v13 }
 0x31d   : > { %2329 = vrot.lane.b32.xlu1 %v15240_v58, %s9002_s28  ;;  %2233 = vst.msk [vmem:[#allocation2 + $0x19f] sm:$0xfe] %vm2152_vm10, %v2021_v59  ;;  %2331 = vrot.lane.b32.xlu0 %v15285_v5, %s9002_s28  ;;  %v15287_v58 = vld [vmem:[#allocation39_spill] sm:$0xff] }
 0x31f   : > { %v2023_v28 = vpop.permute.xlu1 %2022  ;;  %v2025_v37 = vpop.permute.xlu0 %2024 }
 0x320   : > { %2234 = vst.msk [vmem:[#allocation2 + $0x1a7] sm:$0xff] %vm2154_vm9, %v2023_v28 }
 0x321   : > { %2333 = vrot.lane.b32.xlu1 %v15242_v55, %s9002_s28  ;;  %2235 = vst.msk [vmem:[#allocation2 + $0x1af] sm:$0x1] %vm2156_vm11, %v2025_v37  ;;  %2335 = vrot.lane.b32.xlu0 %v15287_v58, %s9002_s28  ;;  %v15305_v55 = vld [vmem:[#allocation78_spill] sm:$0xff] }
 0x323   : > { %v2027_v13 = vpop.permute.xlu1 %2026  ;;  %v2029_v59 = vpop.permute.xlu0 %2028 }
 0x324   : > { %2236 = vst.msk [vmem:[#allocation2 + $0x1af] sm:$0xfe] %vm2152_vm10, %v2027_v13 }
 0x325   : > { %2337 = vrot.lane.b32.xlu1 %v15286_v19, %s9002_s28  ;;  %2237 = vst.msk [vmem:[#allocation2 + $0x1b7] sm:$0xff] %vm2154_vm9, %v2029_v59  ;;  %2339 = vrot.lane.b32.xlu0 %v15244_v38, %s9002_s28  ;;  %v15303_v38 = vld [vmem:[#allocation75_spill] sm:$0xff] }
 0x327   : > { %v2031_v28 = vpop.permute.xlu1 %2030  ;;  %v2033_v37 = vpop.permute.xlu0 %2032 }
 0x328   : > { %2238 = vst.msk [vmem:[#allocation2 + $0x1bf] sm:$0x1] %vm2156_vm11, %v2031_v28 }
 0x329   : > { %2341 = vrot.lane.b32.xlu1 %v10209_v42, %s9002_s28  ;;  %2239 = vst.msk [vmem:[#allocation2 + $0x1bf] sm:$0xfe] %vm2152_vm10, %v2033_v37  ;;  %2343 = vrot.lane.b32.xlu0 %v10206_v10, %s9002_s28 }
 0x32b   : > { %v2035_v13 = vpop.permute.xlu1 %2034  ;;  %v2037_v59 = vpop.permute.xlu0 %2036 }
 0x32c   : > { %2240 = vst.msk [vmem:[#allocation2 + $0x1c7] sm:$0xff] %vm2154_vm9, %v2035_v13 }
 0x32d   : > { %2345 = vrot.lane.b32.xlu1 %v10468_v18, %s9002_s28  ;;  %2241 = vst.msk [vmem:[#allocation2 + $0x1cf] sm:$0x1] %vm2156_vm11, %v2037_v59  ;;  %2347 = vrot.lane.b32.xlu0 %v9365_v47, %s9002_s28  ;;  %v15301_v18 = vld [vmem:[#allocation71_spill] sm:$0xff] }
 0x32f   : > { %v2039_v28 = vpop.permute.xlu1 %2038  ;;  %v2041_v37 = vpop.permute.xlu0 %2040 }
 0x330   : > { %2242 = vst.msk [vmem:[#allocation2 + $0x1cf] sm:$0xfe] %vm2152_vm10, %v2039_v28 }
 0x331   : > { %2349 = vrot.lane.b32.xlu1 %v9371_v63, %s9002_s28  ;;  %2243 = vst.msk [vmem:[#allocation2 + $0x1d7] sm:$0xff] %vm2154_vm9, %v2041_v37  ;;  %2351 = vrot.lane.b32.xlu0 %v15247_v33, %s9002_s28  ;;  %v15288_v33 = vld [vmem:[#allocation42_spill] sm:$0xff] }
 0x333   : > { %v2043_v13 = vpop.permute.xlu1 %2042  ;;  %v2045_v59 = vpop.permute.xlu0 %2044 }
 0x334   : > { %2244 = vst.msk [vmem:[#allocation2 + $0x1df] sm:$0x1] %vm2156_vm11, %v2043_v13 }
 0x335   : > { %2353 = vrot.lane.b32.xlu1 %v9397_v49, %s9002_s28  ;;  %2245 = vst.msk [vmem:[#allocation2 + $0x1df] sm:$0xfe] %vm2152_vm10, %v2045_v59  ;;  %2355 = vrot.lane.b32.xlu0 %v9394_v35, %s9002_s28 }
 0x337   : > { %v2047_v28 = vpop.permute.xlu1 %2046  ;;  %v2049_v47 = vpop.permute.xlu0 %2048 }
 0x338   : > { %2246 = vst.msk [vmem:[#allocation2 + $0x1e7] sm:$0xff] %vm2154_vm9, %v2047_v28 }
 0x339   : > { %2357 = vrot.lane.b32.xlu1 %v15248_v6, %s9002_s28  ;;  %2247 = vst.msk [vmem:[#allocation2 + $0x1ef] sm:$0x1] %vm2156_vm11, %v2049_v47  ;;  %2359 = vrot.lane.b32.xlu0 %v15288_v33, %s9002_s28  ;;  %v15299_v6 = vld [vmem:[#allocation70_spill] sm:$0xff] }
 0x33b   : > { %v2051_v63 = vpop.permute.xlu1 %2050  ;;  %v2053_v37 = vpop.permute.xlu0 %2052 }
 0x33c   : > { %2248 = vst.msk [vmem:[#allocation2 + $0x1ef] sm:$0xfe] %vm2152_vm10, %v2051_v63  ;;  %v15289_v63 = vld [vmem:[#allocation46_spill] sm:$0xff]  ;;  %vm4725_vm10 = vcmask 64512  }
 0x33d   : > { %2361 = vrot.lane.b32.xlu1 %v9413_v44, %s9002_s28  ;;  %2249 = vst.msk [vmem:[#allocation2 + $0x1f7] sm:$0xff] %vm2154_vm9, %v2053_v37  ;;  %2363 = vrot.lane.b32.xlu0 %v15249_v9, %s9002_s28  ;;  %v15290_v37 = vld [vmem:[#allocation47_spill] sm:$0xff]  ;;  %v15298_v9 = vld [vmem:[#allocation72_spill] sm:$0xff]  ;;  %vm3697_vm9 = vcmask 293888  }
 0x33f   : > { %v2055_v13 = vpop.permute.xlu1 %2054  ;;  %v2252_v59 = vpop.permute.xlu0 %2251 }
 0x340   : > { %2250 = vst.msk [vmem:[#allocation2 + $0x1ff] sm:$0x1] %vm2156_vm11, %v2055_v13  ;;  %vm5120_vm11 = vcmask 130113  }
 0x341   : > { %2365 = vrot.lane.b32.xlu1 %v9419_v45, %s9002_s28  ;;  %2540 = vst.msk [vmem:[#allocation2 - $0x2] sm:$0xfc] %vm2539_vm13, %v2252_v59  ;;  %2367 = vrot.lane.b32.xlu0 %v15289_v63, %s9002_s28 }
 0x343   : > { %v2254_v28 = vpop.permute.xlu1 %2253  ;;  %v2256_v13 = vpop.permute.xlu0 %2255 }
 0x344   : > { %2542 = vst.msk [vmem:[#allocation2 + $0x6] sm:$0xff] %vm2541_vm12, %v2254_v28 }
 0x345   : > { %2369 = vrot.lane.b32.xlu1 %v15250_v11, %s9002_s28  ;;  %2544 = vst.msk [vmem:[#allocation2 + $0xe] sm:$0x3] %vm2543_vm14, %v2256_v13  ;;  %2371 = vrot.lane.b32.xlu0 %v15290_v37, %s9002_s28  ;;  %v15291_v11 = vld [vmem:[#allocation51_spill] sm:$0xff] }
 0x347   : > { %v2258_v47 = vpop.permute.xlu1 %2257  ;;  %v2260_v59 = vpop.permute.xlu0 %2259 }
 0x348   : > { %2545 = vst.msk [vmem:[#allocation2 + $0xe] sm:$0xfc] %vm2539_vm13, %v2258_v47 }
 0x349   : > { %2373 = vrot.lane.b32.xlu1 %v15199_v39, %s9002_s28  ;;  %2546 = vst.msk [vmem:[#allocation2 + $0x16] sm:$0xff] %vm2541_vm12, %v2260_v59  ;;  %2375 = vrot.lane.b32.xlu0 %v15251_v7, %s9002_s28  ;;  %v15292_v7 = vld [vmem:[#allocation53_spill] sm:$0xff] }
 0x34b   : > { %v2262_v28 = vpop.permute.xlu1 %2261  ;;  %v2264_v13 = vpop.permute.xlu0 %2263 }
 0x34c   : > { %2547 = vst.msk [vmem:[#allocation2 + $0x1e] sm:$0x3] %vm2543_vm14, %v2262_v28 }
 0x34d   : > { %2377 = vrot.lane.b32.xlu1 %v15168_v8, %s9002_s28  ;;  %2548 = vst.msk [vmem:[#allocation2 + $0x1e] sm:$0xfc] %vm2539_vm13, %v2264_v13  ;;  %2379 = vrot.lane.b32.xlu0 %v15291_v11, %s9002_s28 }
 0x34f   : > { %v2266_v47 = vpop.permute.xlu1 %2265  ;;  %v2268_v59 = vpop.permute.xlu0 %2267 }
 0x350   : > { %2549 = vst.msk [vmem:[#allocation2 + $0x26] sm:$0xff] %vm2541_vm12, %v2266_v47 }
 0x351   : > { %2381 = vrot.lane.b32.xlu1 %v15252_v0, %s9002_s28  ;;  %2550 = vst.msk [vmem:[#allocation2 + $0x2e] sm:$0x3] %vm2543_vm14, %v2268_v59  ;;  %2383 = vrot.lane.b32.xlu0 %v15292_v7, %s9002_s28  ;;  %v15293_v0 = vld [vmem:[#allocation57_spill] sm:$0xff] }
 0x353   : > { %v2270_v28 = vpop.permute.xlu1 %2269  ;;  %v2272_v13 = vpop.permute.xlu0 %2271 }
 0x354   : > { %2551 = vst.msk [vmem:[#allocation2 + $0x2e] sm:$0xfc] %vm2539_vm13, %v2270_v28 }
 0x355   : > { %2385 = vrot.lane.b32.xlu1 %v15203_v36, %s9002_s28  ;;  %2552 = vst.msk [vmem:[#allocation2 + $0x36] sm:$0xff] %vm2541_vm12, %v2272_v13  ;;  %2387 = vrot.lane.b32.xlu0 %v15253_v62, %s9002_s28  ;;  %v15294_v62 = vld [vmem:[#allocation59_spill] sm:$0xff] }
 0x357   : > { %v2274_v47 = vpop.permute.xlu1 %2273  ;;  %v2276_v59 = vpop.permute.xlu0 %2275 }
 0x358   : > { %2553 = vst.msk [vmem:[#allocation2 + $0x3e] sm:$0x3] %vm2543_vm14, %v2274_v47 }
 0x359   : > { %2389 = vrot.lane.b32.xlu1 %v15204_v14, %s9002_s28  ;;  %2554 = vst.msk [vmem:[#allocation2 + $0x3e] sm:$0xfc] %vm2539_vm13, %v2276_v59  ;;  %2391 = vrot.lane.b32.xlu0 %v15293_v0, %s9002_s28 }
 0x35b   : > { %v2278_v28 = vpop.permute.xlu1 %2277  ;;  %v2280_v13 = vpop.permute.xlu0 %2279 }
 0x35c   : > { %2555 = vst.msk [vmem:[#allocation2 + $0x46] sm:$0xff] %vm2541_vm12, %v2278_v28 }
 0x35d   : > { %2393 = vrot.lane.b32.xlu1 %v15254_v52, %s9002_s28  ;;  %2556 = vst.msk [vmem:[#allocation2 + $0x4e] sm:$0x3] %vm2543_vm14, %v2280_v13  ;;  %2395 = vrot.lane.b32.xlu0 %v15294_v62, %s9002_s28  ;;  %v15295_v52 = vld [vmem:[#allocation63_spill] sm:$0xff] }
 0x35f   : > { %v2282_v47 = vpop.permute.xlu1 %2281  ;;  %v2284_v59 = vpop.permute.xlu0 %2283 }
 0x360   : > { %2557 = vst.msk [vmem:[#allocation2 + $0x4e] sm:$0xfc] %vm2539_vm13, %v2282_v47 }
 0x361   : > { %2397 = vrot.lane.b32.xlu1 %v15174_v61, %s9002_s28  ;;  %2558 = vst.msk [vmem:[#allocation2 + $0x56] sm:$0xff] %vm2541_vm12, %v2284_v59  ;;  %2399 = vrot.lane.b32.xlu0 %v15255_v54, %s9002_s28  ;;  %v15296_v54 = vld [vmem:[#allocation65_spill] sm:$0xff] }
 0x363   : > { %v2286_v28 = vpop.permute.xlu1 %2285  ;;  %v2288_v13 = vpop.permute.xlu0 %2287 }
 0x364   : > { %2559 = vst.msk [vmem:[#allocation2 + $0x5e] sm:$0x3] %vm2543_vm14, %v2286_v28 }
 0x365   : > { %2401 = vrot.lane.b32.xlu1 %v15205_v60, %s9002_s28  ;;  %2560 = vst.msk [vmem:[#allocation2 + $0x5e] sm:$0xfc] %vm2539_vm13, %v2288_v13  ;;  %2403 = vrot.lane.b32.xlu0 %v15295_v52, %s9002_s28 }
 0x367   : > { %v2290_v47 = vpop.permute.xlu1 %2289  ;;  %v2292_v59 = vpop.permute.xlu0 %2291 }
 0x368   : > { %2561 = vst.msk [vmem:[#allocation2 + $0x66] sm:$0xff] %vm2541_vm12, %v2290_v47 }
 0x369   : > { %2405 = vrot.lane.b32.xlu1 %v15256_v30, %s9002_s28  ;;  %2562 = vst.msk [vmem:[#allocation2 + $0x6e] sm:$0x3] %vm2543_vm14, %v2292_v59  ;;  %2407 = vrot.lane.b32.xlu0 %v15296_v54, %s9002_s28  ;;  %v15297_v30 = vld [vmem:[#allocation68_spill] sm:$0xff] }
 0x36b   : > { %v2294_v28 = vpop.permute.xlu1 %2293  ;;  %v2296_v13 = vpop.permute.xlu0 %2295 }
 0x36c   : > { %2563 = vst.msk [vmem:[#allocation2 + $0x6e] sm:$0xfc] %vm2539_vm13, %v2294_v28 }
 0x36d   : > { %2409 = vrot.lane.b32.xlu1 %v15175_v41, %s9002_s28  ;;  %2564 = vst.msk [vmem:[#allocation2 + $0x76] sm:$0xff] %vm2541_vm12, %v2296_v13  ;;  %2411 = vrot.lane.b32.xlu0 %v15297_v30, %s9002_s28  ;;  %v15300_v30 = vld [vmem:[#allocation73_spill] sm:$0xff] }
 0x36f   : > { %v2298_v47 = vpop.permute.xlu1 %2297  ;;  %v2300_v59 = vpop.permute.xlu0 %2299 }
 0x370   : > { %2565 = vst.msk [vmem:[#allocation2 + $0x7e] sm:$0x3] %vm2543_vm14, %v2298_v47 }
 0x371   : > { %2413 = vrot.lane.b32.xlu1 %v15176_v46, %s9002_s28  ;;  %2566 = vst.msk [vmem:[#allocation2 + $0x7e] sm:$0xfc] %vm2539_vm13, %v2300_v59  ;;  %2415 = vrot.lane.b32.xlu0 %v15299_v6, %s9002_s28 }
 0x373   : > { %v2302_v28 = vpop.permute.xlu1 %2301  ;;  %v2304_v13 = vpop.permute.xlu0 %2303 }
 0x374   : > { %2567 = vst.msk [vmem:[#allocation2 + $0x86] sm:$0xff] %vm2541_vm12, %v2302_v28 }
 0x375   : > { %2417 = vrot.lane.b32.xlu1 %v15298_v9, %s9002_s28  ;;  %2568 = vst.msk [vmem:[#allocation2 + $0x8e] sm:$0x3] %vm2543_vm14, %v2304_v13  ;;  %2419 = vrot.lane.b32.xlu0 %v15301_v18, %s9002_s28  ;;  %v15302_v9 = vld [vmem:[#allocation74_spill] sm:$0xff] }
 0x377   : > { %v2306_v47 = vpop.permute.xlu1 %2305  ;;  %v2308_v59 = vpop.permute.xlu0 %2307 }
 0x378   : > { %2569 = vst.msk [vmem:[#allocation2 + $0x8e] sm:$0xfc] %vm2539_vm13, %v2306_v47 }
 0x379   : > { %2421 = vrot.lane.b32.xlu1 %v15300_v30, %s9002_s28  ;;  %2570 = vst.msk [vmem:[#allocation2 + $0x96] sm:$0xff] %vm2541_vm12, %v2308_v59  ;;  %2423 = vrot.lane.b32.xlu0 %v15302_v9, %s9002_s28  ;;  %v15304_v9 = vld [vmem:[#allocation80_spill] sm:$0xff] }
 0x37b   : > { %v2310_v28 = vpop.permute.xlu1 %2309  ;;  %v2312_v13 = vpop.permute.xlu0 %2311 }
 0x37c   : > { %2571 = vst.msk [vmem:[#allocation2 + $0x9e] sm:$0x3] %vm2543_vm14, %v2310_v28 }
 0x37d   : > { %2425 = vrot.lane.b32.xlu1 %v15260_v24, %s9002_s28  ;;  %2572 = vst.msk [vmem:[#allocation2 + $0x9e] sm:$0xfc] %vm2539_vm13, %v2312_v13  ;;  %2427 = vrot.lane.b32.xlu0 %v15303_v38, %s9002_s28 }
 0x37f   : > { %v2314_v47 = vpop.permute.xlu1 %2313  ;;  %v2316_v59 = vpop.permute.xlu0 %2315 }
 0x380   : > { %2573 = vst.msk [vmem:[#allocation2 + $0xa6] sm:$0xff] %vm2541_vm12, %v2314_v47 }
 0x381   : > { %2429 = vrot.lane.b32.xlu1 %v15262_v21, %s9002_s28  ;;  %2574 = vst.msk [vmem:[#allocation2 + $0xae] sm:$0x3] %vm2543_vm14, %v2316_v59  ;;  %2431 = vrot.lane.b32.xlu0 %v15305_v55, %s9002_s28  ;;  %v15308_v21 = vld [vmem:[#allocation34_spill] sm:$0xff] }
 0x383   : > { %v2318_v28 = vpop.permute.xlu1 %2317  ;;  %v2320_v13 = vpop.permute.xlu0 %2319 }
 0x384   : > { %2575 = vst.msk [vmem:[#allocation2 + $0xae] sm:$0xfc] %vm2539_vm13, %v2318_v28 }
 0x385   : > { %2433 = vrot.lane.b32.xlu1 %v15304_v9, %s9002_s28  ;;  %2576 = vst.msk [vmem:[#allocation2 + $0xb6] sm:$0xff] %vm2541_vm12, %v2320_v13  ;;  %2435 = vrot.lane.b32.xlu0 %v15264_v1, %s9002_s28  ;;  %v15307_v1 = vld [vmem:[#allocation33_spill] sm:$0xff] }
 0x387   : > { %v2322_v47 = vpop.permute.xlu1 %2321  ;;  %v2324_v59 = vpop.permute.xlu0 %2323 }
 0x388   : > { %2577 = vst.msk [vmem:[#allocation2 + $0xbe] sm:$0x3] %vm2543_vm14, %v2322_v47 }
 0x389   : > { %2437 = vrot.lane.b32.xlu1 %v10318_v25, %s9002_s28  ;;  %2578 = vst.msk [vmem:[#allocation2 + $0xbe] sm:$0xfc] %vm2539_vm13, %v2324_v59  ;;  %2439 = vrot.lane.b32.xlu0 %v10315_v20, %s9002_s28 }
 0x38b   : > { %v2326_v28 = vpop.permute.xlu1 %2325  ;;  %v2328_v13 = vpop.permute.xlu0 %2327 }
 0x38c   : > { %2579 = vst.msk [vmem:[#allocation2 + $0xc6] sm:$0xff] %vm2541_vm12, %v2326_v28 }
 0x38d   : > { %2441 = vrot.lane.b32.xlu1 %v10618_v27, %s9002_s28  ;;  %2580 = vst.msk [vmem:[#allocation2 + $0xce] sm:$0x3] %vm2543_vm14, %v2328_v13  ;;  %2638 = vrot.lane.b32.xlu0 %v15214_v43, %s9003_s29  ;;  %v15306_v27 = vld [vmem:[#allocation30_spill] sm:$0xff] }
 0x38f   : > { %v2330_v47 = vpop.permute.xlu1 %2329  ;;  %v2332_v59 = vpop.permute.xlu0 %2331 }
 0x390   : > { %2581 = vst.msk [vmem:[#allocation2 + $0xce] sm:$0xfc] %vm2539_vm13, %v2330_v47 }
 0x391   : > { %2640 = vrot.lane.b32.xlu1 %v15213_v40, %s9003_s29  ;;  %2582 = vst.msk [vmem:[#allocation2 + $0xd6] sm:$0xff] %vm2541_vm12, %v2332_v59  ;;  %2642 = vrot.lane.b32.xlu0 %v15267_v26, %s9003_s29 }
 0x393   : > { %v2334_v28 = vpop.permute.xlu1 %2333  ;;  %v2336_v13 = vpop.permute.xlu0 %2335 }
 0x394   : > { %2583 = vst.msk [vmem:[#allocation2 + $0xde] sm:$0x3] %vm2543_vm14, %v2334_v28 }
 0x395   : > { %2644 = vrot.lane.b32.xlu1 %v15215_v2, %s9003_s29  ;;  %2584 = vst.msk [vmem:[#allocation2 + $0xde] sm:$0xfc] %vm2539_vm13, %v2336_v13  ;;  %2646 = vrot.lane.b32.xlu0 %v15218_v15, %s9003_s29 }
 0x397   : > { %v2338_v47 = vpop.permute.xlu1 %2337  ;;  %v2340_v59 = vpop.permute.xlu0 %2339 }
 0x398   : > { %2585 = vst.msk [vmem:[#allocation2 + $0xe6] sm:$0xff] %vm2541_vm12, %v2338_v47 }
 0x399   : > { %2648 = vrot.lane.b32.xlu1 %v15268_v16, %s9003_s29  ;;  %2586 = vst.msk [vmem:[#allocation2 + $0xee] sm:$0x3] %vm2543_vm14, %v2340_v59  ;;  %2650 = vrot.lane.b32.xlu0 %v15269_v17, %s9003_s29 }
 0x39b   : > { %v2342_v28 = vpop.permute.xlu1 %2341  ;;  %v2344_v13 = vpop.permute.xlu0 %2343 }
 0x39c   : > { %2587 = vst.msk [vmem:[#allocation2 + $0xee] sm:$0xfc] %vm2539_vm13, %v2342_v28 }
 0x39d   : > { %2652 = vrot.lane.b32.xlu1 %v15219_v50, %s9003_s29  ;;  %2588 = vst.msk [vmem:[#allocation2 + $0xf6] sm:$0xff] %vm2541_vm12, %v2344_v13  ;;  %2654 = vrot.lane.b32.xlu0 %v15221_v48, %s9003_s29 }
 0x39f   : > { %v2346_v47 = vpop.permute.xlu1 %2345  ;;  %v2348_v59 = vpop.permute.xlu0 %2347 }
 0x3a0   : > { %2589 = vst.msk [vmem:[#allocation2 + $0xfe] sm:$0x3] %vm2543_vm14, %v2346_v47 }
 0x3a1   : > { %2656 = vrot.lane.b32.xlu1 %v15270_v32, %s9003_s29  ;;  %2590 = vst.msk [vmem:[#allocation2 + $0xfe] sm:$0xfc] %vm2539_vm13, %v2348_v59  ;;  %2658 = vrot.lane.b32.xlu0 %v15271_v34, %s9003_s29 }
 0x3a3   : > { %v2350_v28 = vpop.permute.xlu1 %2349  ;;  %v2352_v13 = vpop.permute.xlu0 %2351 }
 0x3a4   : > { %2591 = vst.msk [vmem:[#allocation2 + $0x106] sm:$0xff] %vm2541_vm12, %v2350_v28 }
 0x3a5   : > { %2660 = vrot.lane.b32.xlu1 %v15195_v51, %s9003_s29  ;;  %2592 = vst.msk [vmem:[#allocation2 + $0x10e] sm:$0x3] %vm2543_vm14, %v2352_v13  ;;  %2662 = vrot.lane.b32.xlu0 %v9199_v56, %s9003_s29 }
 0x3a7   : > { %v2354_v47 = vpop.permute.xlu1 %2353  ;;  %v2356_v59 = vpop.permute.xlu0 %2355 }
 0x3a8   : > { %2593 = vst.msk [vmem:[#allocation2 + $0x10e] sm:$0xfc] %vm2539_vm13, %v2354_v47 }
 0x3a9   : > { %2664 = vrot.lane.b32.xlu1 %v15272_v12, %s9003_s29  ;;  %2594 = vst.msk [vmem:[#allocation2 + $0x116] sm:$0xff] %vm2541_vm12, %v2356_v59  ;;  %2666 = vrot.lane.b32.xlu0 %v15273_v31, %s9003_s29 }
 0x3ab   : > { %v2358_v28 = vpop.permute.xlu1 %2357  ;;  %v2360_v13 = vpop.permute.xlu0 %2359 }
 0x3ac   : > { %2595 = vst.msk [vmem:[#allocation2 + $0x11e] sm:$0x3] %vm2543_vm14, %v2358_v28 }
 0x3ad   : > { %2668 = vrot.lane.b32.xlu1 %v9230_v4, %s9003_s29  ;;  %2596 = vst.msk [vmem:[#allocation2 + $0x11e] sm:$0xfc] %vm2539_vm13, %v2360_v13  ;;  %2670 = vrot.lane.b32.xlu0 %v15274_v29, %s9003_s29 }
 0x3af   : > { %v2362_v47 = vpop.permute.xlu1 %2361  ;;  %v2364_v59 = vpop.permute.xlu0 %2363 }
 0x3b0   : > { %2597 = vst.msk [vmem:[#allocation2 + $0x126] sm:$0xff] %vm2541_vm12, %v2362_v47 }
 0x3b1   : > { %2672 = vrot.lane.b32.xlu1 %v15276_v53, %s9003_s29  ;;  %2598 = vst.msk [vmem:[#allocation2 + $0x12e] sm:$0x3] %vm2543_vm14, %v2364_v59  ;;  %2674 = vrot.lane.b32.xlu0 %v15277_v3, %s9003_s29 }
 0x3b3   : > { %v2366_v28 = vpop.permute.xlu1 %2365  ;;  %v2368_v13 = vpop.permute.xlu0 %2367 }
 0x3b4   : > { %2599 = vst.msk [vmem:[#allocation2 + $0x12e] sm:$0xfc] %vm2539_vm13, %v2366_v28 }
 0x3b5   : > { %2676 = vrot.lane.b32.xlu1 %v15234_v57, %s9003_s29  ;;  %2600 = vst.msk [vmem:[#allocation2 + $0x136] sm:$0xff] %vm2541_vm12, %v2368_v13  ;;  %2678 = vrot.lane.b32.xlu0 %v15306_v27, %s9003_s29 }
 0x3b7   : > { %v2370_v47 = vpop.permute.xlu1 %2369  ;;  %v2372_v59 = vpop.permute.xlu0 %2371 }
 0x3b8   : > { %2601 = vst.msk [vmem:[#allocation2 + $0x13e] sm:$0x3] %vm2543_vm14, %v2370_v47 }
 0x3b9   : > { %2680 = vrot.lane.b32.xlu1 %v15281_v22, %s9003_s29  ;;  %2602 = vst.msk [vmem:[#allocation2 + $0x13e] sm:$0xfc] %vm2539_vm13, %v2372_v59  ;;  %2682 = vrot.lane.b32.xlu0 %v15307_v1, %s9003_s29 }
 0x3bb   : > { %v2374_v28 = vpop.permute.xlu1 %2373  ;;  %v2376_v13 = vpop.permute.xlu0 %2375 }
 0x3bc   : > { %2603 = vst.msk [vmem:[#allocation2 + $0x146] sm:$0xff] %vm2541_vm12, %v2374_v28 }
 0x3bd   : > { %2684 = vrot.lane.b32.xlu1 %v15282_v23, %s9003_s29  ;;  %2604 = vst.msk [vmem:[#allocation2 + $0x14e] sm:$0x3] %vm2543_vm14, %v2376_v13  ;;  %2686 = vrot.lane.b32.xlu0 %v15308_v21, %s9003_s29 }
 0x3bf   : > { %v2378_v47 = vpop.permute.xlu1 %2377  ;;  %v2380_v59 = vpop.permute.xlu0 %2379 }
 0x3c0   : > { %2605 = vst.msk [vmem:[#allocation2 + $0x14e] sm:$0xfc] %vm2539_vm13, %v2378_v47 }
 0x3c1   : > { %2688 = vrot.lane.b32.xlu1 %v15285_v5, %s9003_s29  ;;  %2606 = vst.msk [vmem:[#allocation2 + $0x156] sm:$0xff] %vm2541_vm12, %v2380_v59  ;;  %2690 = vrot.lane.b32.xlu0 %v15287_v58, %s9003_s29 }
 0x3c3   : > { %v2382_v28 = vpop.permute.xlu1 %2381  ;;  %v2384_v13 = vpop.permute.xlu0 %2383 }
 0x3c4   : > { %2607 = vst.msk [vmem:[#allocation2 + $0x15e] sm:$0x3] %vm2543_vm14, %v2382_v28 }
 0x3c5   : > { %2692 = vrot.lane.b32.xlu1 %v15286_v19, %s9003_s29  ;;  %2608 = vst.msk [vmem:[#allocation2 + $0x15e] sm:$0xfc] %vm2539_vm13, %v2384_v13  ;;  %2694 = vrot.lane.b32.xlu0 %v10209_v42, %s9003_s29 }
 0x3c7   : > { %v2386_v47 = vpop.permute.xlu1 %2385  ;;  %v2388_v59 = vpop.permute.xlu0 %2387 }
 0x3c8   : > { %2609 = vst.msk [vmem:[#allocation2 + $0x166] sm:$0xff] %vm2541_vm12, %v2386_v47 }
 0x3c9   : > { %2696 = vrot.lane.b32.xlu1 %v10206_v10, %s9003_s29  ;;  %2610 = vst.msk [vmem:[#allocation2 + $0x16e] sm:$0x3] %vm2543_vm14, %v2388_v59  ;;  %2698 = vrot.lane.b32.xlu0 %v9397_v49, %s9003_s29 }
 0x3cb   : > { %v2390_v28 = vpop.permute.xlu1 %2389  ;;  %v2392_v13 = vpop.permute.xlu0 %2391 }
 0x3cc   : > { %2611 = vst.msk [vmem:[#allocation2 + $0x16e] sm:$0xfc] %vm2539_vm13, %v2390_v28 }
 0x3cd   : > { %2700 = vrot.lane.b32.xlu1 %v9394_v35, %s9003_s29  ;;  %2612 = vst.msk [vmem:[#allocation2 + $0x176] sm:$0xff] %vm2541_vm12, %v2392_v13  ;;  %2702 = vrot.lane.b32.xlu0 %v15288_v33, %s9003_s29 }
 0x3cf   : > { %v2394_v47 = vpop.permute.xlu1 %2393  ;;  %v2396_v59 = vpop.permute.xlu0 %2395 }
 0x3d0   : > { %2613 = vst.msk [vmem:[#allocation2 + $0x17e] sm:$0x3] %vm2543_vm14, %v2394_v47 }
 0x3d1   : > { %2704 = vrot.lane.b32.xlu1 %v9413_v44, %s9003_s29  ;;  %2614 = vst.msk [vmem:[#allocation2 + $0x17e] sm:$0xfc] %vm2539_vm13, %v2396_v59  ;;  %2706 = vrot.lane.b32.xlu0 %v9419_v45, %s9003_s29 }
 0x3d3   : > { %v2398_v28 = vpop.permute.xlu1 %2397  ;;  %v2400_v13 = vpop.permute.xlu0 %2399 }
 0x3d4   : > { %2615 = vst.msk [vmem:[#allocation2 + $0x186] sm:$0xff] %vm2541_vm12, %v2398_v28 }
 0x3d5   : > { %2708 = vrot.lane.b32.xlu1 %v15289_v63, %s9003_s29  ;;  %2616 = vst.msk [vmem:[#allocation2 + $0x18e] sm:$0x3] %vm2543_vm14, %v2400_v13  ;;  %2710 = vrot.lane.b32.xlu0 %v15290_v37, %s9003_s29 }
 0x3d7   : > { %v2402_v47 = vpop.permute.xlu1 %2401  ;;  %v2404_v59 = vpop.permute.xlu0 %2403 }
 0x3d8   : > { %2617 = vst.msk [vmem:[#allocation2 + $0x18e] sm:$0xfc] %vm2539_vm13, %v2402_v47 }
 0x3d9   : > { %2712 = vrot.lane.b32.xlu1 %v15199_v39, %s9003_s29  ;;  %2618 = vst.msk [vmem:[#allocation2 + $0x196] sm:$0xff] %vm2541_vm12, %v2404_v59  ;;  %2714 = vrot.lane.b32.xlu0 %v15168_v8, %s9003_s29 }
 0x3db   : > { %v2406_v28 = vpop.permute.xlu1 %2405  ;;  %v2408_v13 = vpop.permute.xlu0 %2407 }
 0x3dc   : > { %2619 = vst.msk [vmem:[#allocation2 + $0x19e] sm:$0x3] %vm2543_vm14, %v2406_v28 }
 0x3dd   : > { %2716 = vrot.lane.b32.xlu1 %v15291_v11, %s9003_s29  ;;  %2620 = vst.msk [vmem:[#allocation2 + $0x19e] sm:$0xfc] %vm2539_vm13, %v2408_v13  ;;  %2718 = vrot.lane.b32.xlu0 %v15292_v7, %s9003_s29 }
 0x3df   : > { %v2410_v47 = vpop.permute.xlu1 %2409  ;;  %v2412_v59 = vpop.permute.xlu0 %2411 }
 0x3e0   : > { %2621 = vst.msk [vmem:[#allocation2 + $0x1a6] sm:$0xff] %vm2541_vm12, %v2410_v47 }
 0x3e1   : > { %2720 = vrot.lane.b32.xlu1 %v15203_v36, %s9003_s29  ;;  %2622 = vst.msk [vmem:[#allocation2 + $0x1ae] sm:$0x3] %vm2543_vm14, %v2412_v59  ;;  %2722 = vrot.lane.b32.xlu0 %v15204_v14, %s9003_s29 }
 0x3e3   : > { %v2414_v28 = vpop.permute.xlu1 %2413  ;;  %v2416_v13 = vpop.permute.xlu0 %2415 }
 0x3e4   : > { %2623 = vst.msk [vmem:[#allocation2 + $0x1ae] sm:$0xfc] %vm2539_vm13, %v2414_v28 }
 0x3e5   : > { %2724 = vrot.lane.b32.xlu1 %v15293_v0, %s9003_s29  ;;  %2624 = vst.msk [vmem:[#allocation2 + $0x1b6] sm:$0xff] %vm2541_vm12, %v2416_v13  ;;  %2726 = vrot.lane.b32.xlu0 %v15294_v62, %s9003_s29 }
 0x3e7   : > { %v2418_v47 = vpop.permute.xlu1 %2417  ;;  %v2420_v59 = vpop.permute.xlu0 %2419 }
 0x3e8   : > { %2625 = vst.msk [vmem:[#allocation2 + $0x1be] sm:$0x3] %vm2543_vm14, %v2418_v47 }
 0x3e9   : > { %2728 = vrot.lane.b32.xlu1 %v15174_v61, %s9003_s29  ;;  %2626 = vst.msk [vmem:[#allocation2 + $0x1be] sm:$0xfc] %vm2539_vm13, %v2420_v59  ;;  %2730 = vrot.lane.b32.xlu0 %v15205_v60, %s9003_s29 }
 0x3eb   : > { %v2422_v28 = vpop.permute.xlu1 %2421  ;;  %v2424_v13 = vpop.permute.xlu0 %2423 }
 0x3ec   : > { %2627 = vst.msk [vmem:[#allocation2 + $0x1c6] sm:$0xff] %vm2541_vm12, %v2422_v28 }
 0x3ed   : > { %2732 = vrot.lane.b32.xlu1 %v15295_v52, %s9003_s29  ;;  %2628 = vst.msk [vmem:[#allocation2 + $0x1ce] sm:$0x3] %vm2543_vm14, %v2424_v13  ;;  %2734 = vrot.lane.b32.xlu0 %v15296_v54, %s9003_s29 }
 0x3ef   : > { %v2426_v47 = vpop.permute.xlu1 %2425  ;;  %v2428_v59 = vpop.permute.xlu0 %2427 }
 0x3f0   : > { %2629 = vst.msk [vmem:[#allocation2 + $0x1ce] sm:$0xfc] %vm2539_vm13, %v2426_v47 }
 0x3f1   : > { %2736 = vrot.lane.b32.xlu1 %v15175_v41, %s9003_s29  ;;  %2630 = vst.msk [vmem:[#allocation2 + $0x1d6] sm:$0xff] %vm2541_vm12, %v2428_v59  ;;  %2738 = vrot.lane.b32.xlu0 %v15176_v46, %s9003_s29 }
 0x3f3   : > { %v2430_v28 = vpop.permute.xlu1 %2429  ;;  %v2432_v13 = vpop.permute.xlu0 %2431 }
 0x3f4   : > { %2631 = vst.msk [vmem:[#allocation2 + $0x1de] sm:$0x3] %vm2543_vm14, %v2430_v28 }
 0x3f5   : > { %2740 = vrot.lane.b32.xlu1 %v15299_v6, %s9003_s29  ;;  %2632 = vst.msk [vmem:[#allocation2 + $0x1de] sm:$0xfc] %vm2539_vm13, %v2432_v13  ;;  %2742 = vrot.lane.b32.xlu0 %v15301_v18, %s9003_s29 }
 0x3f7   : > { %v2434_v47 = vpop.permute.xlu1 %2433  ;;  %v2436_v59 = vpop.permute.xlu0 %2435 }
 0x3f8   : > { %2633 = vst.msk [vmem:[#allocation2 + $0x1e6] sm:$0xff] %vm2541_vm12, %v2434_v47 }
 0x3f9   : > { %2744 = vrot.lane.b32.xlu1 %v15300_v30, %s9003_s29  ;;  %2634 = vst.msk [vmem:[#allocation2 + $0x1ee] sm:$0x3] %vm2543_vm14, %v2436_v59  ;;  %2746 = vrot.lane.b32.xlu0 %v15260_v24, %s9003_s29 }
 0x3fb   : > { %v2438_v28 = vpop.permute.xlu1 %2437  ;;  %v2440_v13 = vpop.permute.xlu0 %2439 }
 0x3fc   : > { %2635 = vst.msk [vmem:[#allocation2 + $0x1ee] sm:$0xfc] %vm2539_vm13, %v2438_v28  ;;  %vm5124_vm13 = vcmask 122944  }
 0x3fd   : > { %2748 = vrot.lane.b32.xlu1 %v15303_v38, %s9003_s29  ;;  %2636 = vst.msk [vmem:[#allocation2 + $0x1f6] sm:$0xff] %vm2541_vm12, %v2440_v13  ;;  %2750 = vrot.lane.b32.xlu0 %v15305_v55, %s9003_s29  ;;  %vm5122_vm12 = vcmask 130112  }
 0x3ff   : > { %v2442_v47 = vpop.permute.xlu1 %2441  ;;  %v2639_v59 = vpop.permute.xlu0 %2638 }
 0x400   : > { %2637 = vst.msk [vmem:[#allocation2 + $0x1fe] sm:$0x3] %vm2543_vm14, %v2442_v47  ;;  %vm5489_vm14 = vcmask 195714  }
 0x401   : > { %2752 = vrot.lane.b32.xlu1 %v15304_v9, %s9003_s29  ;;  %2819 = vst.msk [vmem:[#allocation2] sm:$0xff] %vm2818_vm15, %v2639_v59  ;;  %2754 = vrot.lane.b32.xlu0 %v10318_v25, %s9003_s29 }
 0x403   : > { %v2641_v28 = vpop.permute.xlu1 %2640  ;;  %v2643_v13 = vpop.permute.xlu0 %2642 }
 0x404   : > { %2820 = vst.msk [vmem:[#allocation2 + $0x8] sm:$0xff] %vm2818_vm15, %v2641_v28  ;;  %2821 = vst.msk [vmem:[#allocation2 + $0x10] sm:$0xff] %vm2818_vm15, %v2643_v13 }
 0x405   : > { %2756 = vrot.lane.b32.xlu1 %v10315_v20, %s9003_s29  ;;  %2883 = vrot.lane.b32.xlu0 %v15214_v43, %s9004_s30  ;;  %v15310_v43 = vld [vmem:[#allocation24_spill] sm:$0xff] }
 0x407   : > { %v2645_v47 = vpop.permute.xlu1 %2644  ;;  %v2647_v59 = vpop.permute.xlu0 %2646 }
 0x408   : > { %2822 = vst.msk [vmem:[#allocation2 + $0x18] sm:$0xff] %vm2818_vm15, %v2645_v47  ;;  %2823 = vst.msk [vmem:[#allocation2 + $0x20] sm:$0xff] %vm2818_vm15, %v2647_v59  ;;  %v15309_v47 = vld [vmem:[#allocation16_spill] sm:$0xff] }
 0x409   : > { %2885 = vrot.lane.b32.xlu1 %v15213_v40, %s9004_s30  ;;  %2887 = vrot.lane.b32.xlu0 %v15309_v47, %s9004_s30 }
 0x40b   : > { %v2649_v28 = vpop.permute.xlu1 %2648  ;;  %v2651_v20 = vpop.permute.xlu0 %2650 }
 0x40c   : > { %2824 = vst.msk [vmem:[#allocation2 + $0x28] sm:$0xff] %vm2818_vm15, %v2649_v28  ;;  %2825 = vst.msk [vmem:[#allocation2 + $0x30] sm:$0xff] %vm2818_vm15, %v2651_v20 }
 0x40d   : > { %2889 = vrot.lane.b32.xlu1 %v15267_v26, %s9004_s30  ;;  %2891 = vrot.lane.b32.xlu0 %v15215_v2, %s9004_s30  ;;  %v15311_v2 = vld [vmem:[#allocation28_spill] sm:$0xff] }
 0x40f   : > { %v2653_v13 = vpop.permute.xlu1 %2652  ;;  %v2655_v59 = vpop.permute.xlu0 %2654 }
 0x410   : > { %2826 = vst.msk [vmem:[#allocation2 + $0x38] sm:$0xff] %vm2818_vm15, %v2653_v13  ;;  %2827 = vst.msk [vmem:[#allocation2 + $0x40] sm:$0xff] %vm2818_vm15, %v2655_v59 }
 0x411   : > { %2893 = vrot.lane.b32.xlu1 %v15310_v43, %s9004_s30  ;;  %2895 = vrot.lane.b32.xlu0 %v15218_v15, %s9004_s30  ;;  %v15312_v15 = vld [vmem:[#allocation29_spill] sm:$0xff] }
 0x413   : > { %v2657_v28 = vpop.permute.xlu1 %2656  ;;  %v2659_v20 = vpop.permute.xlu0 %2658 }
 0x414   : > { %2828 = vst.msk [vmem:[#allocation2 + $0x48] sm:$0xff] %vm2818_vm15, %v2657_v28  ;;  %2829 = vst.msk [vmem:[#allocation2 + $0x50] sm:$0xff] %vm2818_vm15, %v2659_v20 }
 0x415   : > { %2897 = vrot.lane.b32.xlu1 %v15268_v16, %s9004_s30  ;;  %2899 = vrot.lane.b32.xlu0 %v15311_v2, %s9004_s30 }
 0x417   : > { %v2661_v13 = vpop.permute.xlu1 %2660  ;;  %v2663_v59 = vpop.permute.xlu0 %2662 }
 0x418   : > { %2830 = vst.msk [vmem:[#allocation2 + $0x58] sm:$0xff] %vm2818_vm15, %v2661_v13  ;;  %2831 = vst.msk [vmem:[#allocation2 + $0x60] sm:$0xff] %vm2818_vm15, %v2663_v59 }
 0x419   : > { %2901 = vrot.lane.b32.xlu1 %v15269_v17, %s9004_s30  ;;  %2903 = vrot.lane.b32.xlu0 %v15219_v50, %s9004_s30  ;;  %v15313_v50 = vld [vmem:[#allocation35_spill] sm:$0xff] }
 0x41b   : > { %v2665_v28 = vpop.permute.xlu1 %2664  ;;  %v2667_v20 = vpop.permute.xlu0 %2666 }
 0x41c   : > { %2832 = vst.msk [vmem:[#allocation2 + $0x68] sm:$0xff] %vm2818_vm15, %v2665_v28  ;;  %2833 = vst.msk [vmem:[#allocation2 + $0x70] sm:$0xff] %vm2818_vm15, %v2667_v20 }
 0x41d   : > { %2905 = vrot.lane.b32.xlu1 %v15312_v15, %s9004_s30  ;;  %2907 = vrot.lane.b32.xlu0 %v15221_v48, %s9004_s30  ;;  %v15314_v48 = vld [vmem:[#allocation36_spill] sm:$0xff] }
 0x41f   : > { %v2669_v13 = vpop.permute.xlu1 %2668  ;;  %v2671_v59 = vpop.permute.xlu0 %2670 }
 0x420   : > { %2834 = vst.msk [vmem:[#allocation2 + $0x78] sm:$0xff] %vm2818_vm15, %v2669_v13  ;;  %2835 = vst.msk [vmem:[#allocation2 + $0x80] sm:$0xff] %vm2818_vm15, %v2671_v59 }
 0x421   : > { %2909 = vrot.lane.b32.xlu1 %v15270_v32, %s9004_s30  ;;  %2911 = vrot.lane.b32.xlu0 %v15313_v50, %s9004_s30 }
 0x423   : > { %v2673_v28 = vpop.permute.xlu1 %2672  ;;  %v2675_v20 = vpop.permute.xlu0 %2674 }
 0x424   : > { %2836 = vst.msk [vmem:[#allocation2 + $0x88] sm:$0xff] %vm2818_vm15, %v2673_v28  ;;  %2837 = vst.msk [vmem:[#allocation2 + $0x90] sm:$0xff] %vm2818_vm15, %v2675_v20 }
 0x425   : > { %2913 = vrot.lane.b32.xlu1 %v15271_v34, %s9004_s30  ;;  %2915 = vrot.lane.b32.xlu0 %v15195_v51, %s9004_s30  ;;  %v15315_v51 = vld [vmem:[#allocation77_spill] sm:$0xff] }
 0x427   : > { %v2677_v13 = vpop.permute.xlu1 %2676  ;;  %v2679_v59 = vpop.permute.xlu0 %2678 }
 0x428   : > { %2838 = vst.msk [vmem:[#allocation2 + $0x98] sm:$0xff] %vm2818_vm15, %v2677_v13  ;;  %2839 = vst.msk [vmem:[#allocation2 + $0xa0] sm:$0xff] %vm2818_vm15, %v2679_v59 }
 0x429   : > { %2917 = vrot.lane.b32.xlu1 %v15314_v48, %s9004_s30  ;;  %2919 = vrot.lane.b32.xlu0 %v9199_v56, %s9004_s30  ;;  %v15316_v56 = vld [vmem:[#allocation82_spill] sm:$0xff] }
 0x42b   : > { %v2681_v28 = vpop.permute.xlu1 %2680  ;;  %v2683_v20 = vpop.permute.xlu0 %2682 }
 0x42c   : > { %2840 = vst.msk [vmem:[#allocation2 + $0xa8] sm:$0xff] %vm2818_vm15, %v2681_v28  ;;  %2841 = vst.msk [vmem:[#allocation2 + $0xb0] sm:$0xff] %vm2818_vm15, %v2683_v20 }
 0x42d   : > { %2921 = vrot.lane.b32.xlu1 %v15272_v12, %s9004_s30  ;;  %2923 = vrot.lane.b32.xlu0 %v15315_v51, %s9004_s30 }
 0x42f   : > { %v2685_v13 = vpop.permute.xlu1 %2684  ;;  %v2687_v59 = vpop.permute.xlu0 %2686 }
 0x430   : > { %2842 = vst.msk [vmem:[#allocation2 + $0xb8] sm:$0xff] %vm2818_vm15, %v2685_v13  ;;  %2843 = vst.msk [vmem:[#allocation2 + $0xc0] sm:$0xff] %vm2818_vm15, %v2687_v59 }
 0x431   : > { %2925 = vrot.lane.b32.xlu1 %v15273_v31, %s9004_s30  ;;  %2927 = vrot.lane.b32.xlu0 %v9230_v4, %s9004_s30 }
 0x433   : > { %v2689_v28 = vpop.permute.xlu1 %2688  ;;  %v2691_v20 = vpop.permute.xlu0 %2690 }
 0x434   : > { %2844 = vst.msk [vmem:[#allocation2 + $0xc8] sm:$0xff] %vm2818_vm15, %v2689_v28  ;;  %2845 = vst.msk [vmem:[#allocation2 + $0xd0] sm:$0xff] %vm2818_vm15, %v2691_v20 }
 0x435   : > { %2929 = vrot.lane.b32.xlu1 %v15316_v56, %s9004_s30  ;;  %2931 = vrot.lane.b32.xlu0 %v15274_v29, %s9004_s30  ;;  %v15318_v29 = vld [vmem:[#allocation84_spill] sm:$0xff] }
 0x437   : > { %v2693_v13 = vpop.permute.xlu1 %2692  ;;  %v2695_v59 = vpop.permute.xlu0 %2694 }
 0x438   : > { %2846 = vst.msk [vmem:[#allocation2 + $0xd8] sm:$0xff] %vm2818_vm15, %v2693_v13  ;;  %2847 = vst.msk [vmem:[#allocation2 + $0xe0] sm:$0xff] %vm2818_vm15, %v2695_v59  ;;  %v15317_v13 = vld [vmem:[#allocation83_spill] sm:$0xff] }
 0x439   : > { %2933 = vrot.lane.b32.xlu1 %v15276_v53, %s9004_s30  ;;  %2849 = vst.msk [vmem:[#allocation2 + $0xf0] sm:$0xff] %vm2818_vm15, %v2695_v59  ;;  %2935 = vrot.lane.b32.xlu0 %v15317_v13, %s9004_s30 }
 0x43b   : > { %v2697_v28 = vpop.permute.xlu1 %2696  ;;  %v2699_v53 = vpop.permute.xlu0 %2698 }
 0x43c   : > { %2848 = vst.msk [vmem:[#allocation2 + $0xe8] sm:$0xff] %vm2818_vm15, %v2697_v28  ;;  %2850 = vst.msk [vmem:[#allocation2 + $0xf8] sm:$0xff] %vm2818_vm15, %v2697_v28 }
 0x43d   : > { %2937 = vrot.lane.b32.xlu1 %v15277_v3, %s9004_s30  ;;  %2851 = vst.msk [vmem:[#allocation2 + $0x100] sm:$0xff] %vm2818_vm15, %v2699_v53  ;;  %2939 = vrot.lane.b32.xlu0 %v15234_v57, %s9004_s30  ;;  %v15319_v57 = vld [vmem:[#allocation85_spill] sm:$0xff] }
 0x43f   : > { %v2701_v20 = vpop.permute.xlu1 %2700  ;;  %v2703_v59 = vpop.permute.xlu0 %2702 }
 0x440   : > { %2852 = vst.msk [vmem:[#allocation2 + $0x108] sm:$0xff] %vm2818_vm15, %v2701_v20  ;;  %2853 = vst.msk [vmem:[#allocation2 + $0x110] sm:$0xff] %vm2818_vm15, %v2703_v59 }
 0x441   : > { %2941 = vrot.lane.b32.xlu1 %v15318_v29, %s9004_s30  ;;  %2943 = vrot.lane.b32.xlu0 %v15306_v27, %s9004_s30  ;;  %v15320_v27 = vld [vmem:[#allocation86_spill] sm:$0xff] }
 0x443   : > { %v2705_v28 = vpop.permute.xlu1 %2704  ;;  %v2707_v53 = vpop.permute.xlu0 %2706 }
 0x444   : > { %2854 = vst.msk [vmem:[#allocation2 + $0x118] sm:$0xff] %vm2818_vm15, %v2705_v28  ;;  %2855 = vst.msk [vmem:[#allocation2 + $0x120] sm:$0xff] %vm2818_vm15, %v2707_v53 }
 0x445   : > { %2945 = vrot.lane.b32.xlu1 %v15281_v22, %s9004_s30  ;;  %2947 = vrot.lane.b32.xlu0 %v15319_v57, %s9004_s30 }
 0x447   : > { %v2709_v20 = vpop.permute.xlu1 %2708  ;;  %v2711_v59 = vpop.permute.xlu0 %2710 }
 0x448   : > { %2856 = vst.msk [vmem:[#allocation2 + $0x128] sm:$0xff] %vm2818_vm15, %v2709_v20  ;;  %2857 = vst.msk [vmem:[#allocation2 + $0x130] sm:$0xff] %vm2818_vm15, %v2711_v59 }
 0x449   : > { %2949 = vrot.lane.b32.xlu1 %v15307_v1, %s9004_s30  ;;  %2951 = vrot.lane.b32.xlu0 %v15282_v23, %s9004_s30  ;;  %v15321_v23 = vld [vmem:[#allocation87_spill] sm:$0xff] }
 0x44b   : > { %v2713_v28 = vpop.permute.xlu1 %2712  ;;  %v2715_v53 = vpop.permute.xlu0 %2714 }
 0x44c   : > { %2858 = vst.msk [vmem:[#allocation2 + $0x138] sm:$0xff] %vm2818_vm15, %v2713_v28  ;;  %2859 = vst.msk [vmem:[#allocation2 + $0x140] sm:$0xff] %vm2818_vm15, %v2715_v53 }
 0x44d   : > { %2953 = vrot.lane.b32.xlu1 %v15320_v27, %s9004_s30  ;;  %2955 = vrot.lane.b32.xlu0 %v15308_v21, %s9004_s30  ;;  %v15322_v21 = vld [vmem:[#allocation40_spill] sm:$0xff] }
 0x44f   : > { %v2717_v20 = vpop.permute.xlu1 %2716  ;;  %v2719_v59 = vpop.permute.xlu0 %2718 }
 0x450   : > { %2860 = vst.msk [vmem:[#allocation2 + $0x148] sm:$0xff] %vm2818_vm15, %v2717_v20  ;;  %2861 = vst.msk [vmem:[#allocation2 + $0x150] sm:$0xff] %vm2818_vm15, %v2719_v59 }
 0x451   : > { %2957 = vrot.lane.b32.xlu1 %v15285_v5, %s9004_s30  ;;  %2959 = vrot.lane.b32.xlu0 %v15321_v23, %s9004_s30 }
 0x453   : > { %v2721_v28 = vpop.permute.xlu1 %2720  ;;  %v2723_v53 = vpop.permute.xlu0 %2722 }
 0x454   : > { %2862 = vst.msk [vmem:[#allocation2 + $0x158] sm:$0xff] %vm2818_vm15, %v2721_v28  ;;  %2863 = vst.msk [vmem:[#allocation2 + $0x160] sm:$0xff] %vm2818_vm15, %v2723_v53 }
 0x455   : > { %2961 = vrot.lane.b32.xlu1 %v15287_v58, %s9004_s30  ;;  %2963 = vrot.lane.b32.xlu0 %v15286_v19, %s9004_s30  ;;  %v15323_v19 = vld [vmem:[#allocation64_spill] sm:$0xff] }
 0x457   : > { %v2725_v20 = vpop.permute.xlu1 %2724  ;;  %v2727_v59 = vpop.permute.xlu0 %2726 }
 0x458   : > { %2864 = vst.msk [vmem:[#allocation2 + $0x168] sm:$0xff] %vm2818_vm15, %v2725_v20  ;;  %2865 = vst.msk [vmem:[#allocation2 + $0x170] sm:$0xff] %vm2818_vm15, %v2727_v59 }
 0x459   : > { %2965 = vrot.lane.b32.xlu1 %v15322_v21, %s9004_s30  ;;  %2967 = vrot.lane.b32.xlu0 %v10209_v42, %s9004_s30  ;;  %v15324_v42 = vld [vmem:[#allocation43_spill] sm:$0xff] }
 0x45b   : > { %v2729_v28 = vpop.permute.xlu1 %2728  ;;  %v2731_v53 = vpop.permute.xlu0 %2730 }
 0x45c   : > { %2866 = vst.msk [vmem:[#allocation2 + $0x178] sm:$0xff] %vm2818_vm15, %v2729_v28  ;;  %2867 = vst.msk [vmem:[#allocation2 + $0x180] sm:$0xff] %vm2818_vm15, %v2731_v53 }
 0x45d   : > { %2969 = vrot.lane.b32.xlu1 %v10206_v10, %s9004_s30  ;;  %2971 = vrot.lane.b32.xlu0 %v15323_v19, %s9004_s30 }
 0x45f   : > { %v2733_v20 = vpop.permute.xlu1 %2732  ;;  %v2735_v59 = vpop.permute.xlu0 %2734 }
 0x460   : > { %2868 = vst.msk [vmem:[#allocation2 + $0x188] sm:$0xff] %vm2818_vm15, %v2733_v20  ;;  %2869 = vst.msk [vmem:[#allocation2 + $0x190] sm:$0xff] %vm2818_vm15, %v2735_v59 }
 0x461   : > { %2973 = vrot.lane.b32.xlu1 %v9397_v49, %s9004_s30  ;;  %2975 = vrot.lane.b32.xlu0 %v9394_v35, %s9004_s30 }
 0x463   : > { %v2737_v28 = vpop.permute.xlu1 %2736  ;;  %v2739_v53 = vpop.permute.xlu0 %2738 }
 0x464   : > { %2870 = vst.msk [vmem:[#allocation2 + $0x198] sm:$0xff] %vm2818_vm15, %v2737_v28  ;;  %2871 = vst.msk [vmem:[#allocation2 + $0x1a0] sm:$0xff] %vm2818_vm15, %v2739_v53 }
 0x465   : > { %2977 = vrot.lane.b32.xlu1 %v15324_v42, %s9004_s30  ;;  %2979 = vrot.lane.b32.xlu0 %v15288_v33, %s9004_s30  ;;  %v15325_v42 = vld [vmem:[#allocation45_spill] sm:$0xff] }
 0x467   : > { %v2741_v20 = vpop.permute.xlu1 %2740  ;;  %v2743_v59 = vpop.permute.xlu0 %2742 }
 0x468   : > { %2872 = vst.msk [vmem:[#allocation2 + $0x1a8] sm:$0xff] %vm2818_vm15, %v2741_v20  ;;  %2873 = vst.msk [vmem:[#allocation2 + $0x1b0] sm:$0xff] %vm2818_vm15, %v2743_v59 }
 0x469   : > { %2981 = vrot.lane.b32.xlu1 %v9413_v44, %s9004_s30  ;;  %2983 = vrot.lane.b32.xlu0 %v15325_v42, %s9004_s30  ;;  %v15326_v44 = vld [vmem:[#allocation48_spill] sm:$0xff] }
 0x46b   : > { %v2745_v28 = vpop.permute.xlu1 %2744  ;;  %v2747_v53 = vpop.permute.xlu0 %2746 }
 0x46c   : > { %2874 = vst.msk [vmem:[#allocation2 + $0x1b8] sm:$0xff] %vm2818_vm15, %v2745_v28  ;;  %2875 = vst.msk [vmem:[#allocation2 + $0x1c0] sm:$0xff] %vm2818_vm15, %v2747_v53 }
 0x46d   : > { %2985 = vrot.lane.b32.xlu1 %v9419_v45, %s9004_s30  ;;  %2987 = vrot.lane.b32.xlu0 %v15289_v63, %s9004_s30 }
 0x46f   : > { %v2749_v20 = vpop.permute.xlu1 %2748  ;;  %v2751_v59 = vpop.permute.xlu0 %2750 }
 0x470   : > { %2876 = vst.msk [vmem:[#allocation2 + $0x1c8] sm:$0xff] %vm2818_vm15, %v2749_v20  ;;  %2877 = vst.msk [vmem:[#allocation2 + $0x1d0] sm:$0xff] %vm2818_vm15, %v2751_v59 }
 0x471   : > { %2989 = vrot.lane.b32.xlu1 %v15326_v44, %s9004_s30  ;;  %2991 = vrot.lane.b32.xlu0 %v15290_v37, %s9004_s30 }
 0x473   : > { %v2753_v28 = vpop.permute.xlu1 %2752  ;;  %v2755_v53 = vpop.permute.xlu0 %2754 }
 0x474   : > { %2878 = vst.msk [vmem:[#allocation2 + $0x1d8] sm:$0xff] %vm2818_vm15, %v2753_v28  ;;  %2879 = vst.msk [vmem:[#allocation2 + $0x1e0] sm:$0xff] %vm2818_vm15, %v2755_v53  ;;  %v15327_v28 = vld [vmem:[#allocation50_spill] sm:$0xff] }
 0x475   : > { %2993 = vrot.lane.b32.xlu1 %v15199_v39, %s9004_s30  ;;  %2881 = vst.msk [vmem:[#allocation2 + $0x1f0] sm:$0xff] %vm2818_vm15, %v2755_v53  ;;  %2995 = vrot.lane.b32.xlu0 %v15327_v28, %s9004_s30 }
 0x477   : > { %v2757_v20 = vpop.permute.xlu1 %2756  ;;  %v2884_v39 = vpop.permute.xlu0 %2883 }
 0x478   : > { %2880 = vst.msk [vmem:[#allocation2 + $0x1e8] sm:$0xff] %vm2818_vm15, %v2757_v20  ;;  %2882 = vst.msk [vmem:[#allocation2 + $0x1f8] sm:$0xff] %vm2818_vm15, %v2757_v20  ;;  %v15328_v20 = vld [vmem:[#allocation54_spill] sm:$0xff]  ;;  %vm5493_vm15 = vcmask 189568  }
 0x479   : > { %2997 = vrot.lane.b32.xlu1 %v15168_v8, %s9004_s30  ;;  %3154 = vst.msk [vmem:[#allocation2 - $0x1] sm:$0xfe] %vm3153_vm3, %v2884_v39  ;;  %2999 = vrot.lane.b32.xlu0 %v15291_v11, %s9004_s30 }
 0x47b   : > { %v2886_v59 = vpop.permute.xlu1 %2885  ;;  %v2888_v8 = vpop.permute.xlu0 %2887 }
 0x47c   : > { %3156 = vst.msk [vmem:[#allocation2 + $0x7] sm:$0xff] %vm3155_vm2, %v2886_v59 }
 0x47d   : > { %3001 = vrot.lane.b32.xlu1 %v15328_v20, %s9004_s30  ;;  %3158 = vst.msk [vmem:[#allocation2 + $0xf] sm:$0x1] %vm3157_vm4, %v2888_v8  ;;  %3003 = vrot.lane.b32.xlu0 %v15292_v7, %s9004_s30  ;;  %v15329_v20 = vld [vmem:[#allocation56_spill] sm:$0xff] }
 0x47f   : > { %v2890_v53 = vpop.permute.xlu1 %2889  ;;  %v2892_v59 = vpop.permute.xlu0 %2891 }
 0x480   : > { %3159 = vst.msk [vmem:[#allocation2 + $0xf] sm:$0xfe] %vm3153_vm3, %v2890_v53 }
 0x481   : > { %3005 = vrot.lane.b32.xlu1 %v15203_v36, %s9004_s30  ;;  %3160 = vst.msk [vmem:[#allocation2 + $0x17] sm:$0xff] %vm3155_vm2, %v2892_v59  ;;  %3007 = vrot.lane.b32.xlu0 %v15329_v20, %s9004_s30  ;;  %v15330_v36 = vld [vmem:[#allocation60_spill] sm:$0xff] }
 0x483   : > { %v2894_v39 = vpop.permute.xlu1 %2893  ;;  %v2896_v8 = vpop.permute.xlu0 %2895 }
 0x484   : > { %3161 = vst.msk [vmem:[#allocation2 + $0x1f] sm:$0x1] %vm3157_vm4, %v2894_v39 }
 0x485   : > { %3009 = vrot.lane.b32.xlu1 %v15204_v14, %s9004_s30  ;;  %3162 = vst.msk [vmem:[#allocation2 + $0x1f] sm:$0xfe] %vm3153_vm3, %v2896_v8  ;;  %3011 = vrot.lane.b32.xlu0 %v15293_v0, %s9004_s30 }
 0x487   : > { %v2898_v53 = vpop.permute.xlu1 %2897  ;;  %v2900_v59 = vpop.permute.xlu0 %2899 }
 0x488   : > { %3163 = vst.msk [vmem:[#allocation2 + $0x27] sm:$0xff] %vm3155_vm2, %v2898_v53 }
 0x489   : > { %3013 = vrot.lane.b32.xlu1 %v15330_v36, %s9004_s30  ;;  %3164 = vst.msk [vmem:[#allocation2 + $0x2f] sm:$0x1] %vm3157_vm4, %v2900_v59  ;;  %3015 = vrot.lane.b32.xlu0 %v15294_v62, %s9004_s30  ;;  %v15331_v36 = vld [vmem:[#allocation62_spill] sm:$0xff] }
 0x48b   : > { %v2902_v39 = vpop.permute.xlu1 %2901  ;;  %v2904_v8 = vpop.permute.xlu0 %2903 }
 0x48c   : > { %3165 = vst.msk [vmem:[#allocation2 + $0x2f] sm:$0xfe] %vm3153_vm3, %v2902_v39 }
 0x48d   : > { %3017 = vrot.lane.b32.xlu1 %v15174_v61, %s9004_s30  ;;  %3166 = vst.msk [vmem:[#allocation2 + $0x37] sm:$0xff] %vm3155_vm2, %v2904_v8  ;;  %3019 = vrot.lane.b32.xlu0 %v15331_v36, %s9004_s30  ;;  %v15332_v61 = vld [vmem:[#allocation66_spill] sm:$0xff] }
 0x48f   : > { %v2906_v53 = vpop.permute.xlu1 %2905  ;;  %v2908_v59 = vpop.permute.xlu0 %2907 }
 0x490   : > { %3167 = vst.msk [vmem:[#allocation2 + $0x3f] sm:$0x1] %vm3157_vm4, %v2906_v53 }
 0x491   : > { %3021 = vrot.lane.b32.xlu1 %v15205_v60, %s9004_s30  ;;  %3168 = vst.msk [vmem:[#allocation2 + $0x3f] sm:$0xfe] %vm3153_vm3, %v2908_v59  ;;  %3023 = vrot.lane.b32.xlu0 %v15295_v52, %s9004_s30 }
 0x493   : > { %v2910_v39 = vpop.permute.xlu1 %2909  ;;  %v2912_v8 = vpop.permute.xlu0 %2911 }
 0x494   : > { %3169 = vst.msk [vmem:[#allocation2 + $0x47] sm:$0xff] %vm3155_vm2, %v2910_v39 }
 0x495   : > { %3025 = vrot.lane.b32.xlu1 %v15332_v61, %s9004_s30  ;;  %3170 = vst.msk [vmem:[#allocation2 + $0x4f] sm:$0x1] %vm3157_vm4, %v2912_v8  ;;  %3027 = vrot.lane.b32.xlu0 %v15296_v54, %s9004_s30  ;;  %v15333_v61 = vld [vmem:[#allocation68_spill] sm:$0xff] }
 0x497   : > { %v2914_v53 = vpop.permute.xlu1 %2913  ;;  %v2916_v59 = vpop.permute.xlu0 %2915 }
 0x498   : > { %3171 = vst.msk [vmem:[#allocation2 + $0x4f] sm:$0xfe] %vm3153_vm3, %v2914_v53 }
 0x499   : > { %3029 = vrot.lane.b32.xlu1 %v15175_v41, %s9004_s30  ;;  %3172 = vst.msk [vmem:[#allocation2 + $0x57] sm:$0xff] %vm3155_vm2, %v2916_v59  ;;  %3031 = vrot.lane.b32.xlu0 %v15333_v61, %s9004_s30  ;;  %v15334_v41 = vld [vmem:[#allocation72_spill] sm:$0xff] }
 0x49b   : > { %v2918_v39 = vpop.permute.xlu1 %2917  ;;  %v2920_v8 = vpop.permute.xlu0 %2919 }
 0x49c   : > { %3173 = vst.msk [vmem:[#allocation2 + $0x5f] sm:$0x1] %vm3157_vm4, %v2918_v39 }
 0x49d   : > { %3033 = vrot.lane.b32.xlu1 %v15176_v46, %s9004_s30  ;;  %3174 = vst.msk [vmem:[#allocation2 + $0x5f] sm:$0xfe] %vm3153_vm3, %v2920_v8  ;;  %3035 = vrot.lane.b32.xlu0 %v15299_v6, %s9004_s30 }
 0x49f   : > { %v2922_v53 = vpop.permute.xlu1 %2921  ;;  %v2924_v59 = vpop.permute.xlu0 %2923 }
 0x4a0   : > { %3175 = vst.msk [vmem:[#allocation2 + $0x67] sm:$0xff] %vm3155_vm2, %v2922_v53 }
 0x4a1   : > { %3037 = vrot.lane.b32.xlu1 %v15334_v41, %s9004_s30  ;;  %3176 = vst.msk [vmem:[#allocation2 + $0x6f] sm:$0x1] %vm3157_vm4, %v2924_v59  ;;  %3039 = vrot.lane.b32.xlu0 %v15301_v18, %s9004_s30  ;;  %v15335_v41 = vld [vmem:[#allocation74_spill] sm:$0xff]  ;;  %v3688_v18 = vld [vmem:[%s276_s9 + $0x18] sm:$0xff] }
 0x4a3   : > { %v2926_v39 = vpop.permute.xlu1 %2925  ;;  %v2928_v8 = vpop.permute.xlu0 %2927 }
 0x4a4   : > { %3177 = vst.msk [vmem:[#allocation2 + $0x6f] sm:$0xfe] %vm3153_vm3, %v2926_v39 }
 0x4a5   : > { %3041 = vrot.lane.b32.xlu1 %v15300_v30, %s9004_s30  ;;  %3178 = vst.msk [vmem:[#allocation2 + $0x77] sm:$0xff] %vm3155_vm2, %v2928_v8  ;;  %3043 = vrot.lane.b32.xlu0 %v15335_v41, %s9004_s30  ;;  %v15336_v30 = vld [vmem:[#allocation79_spill] sm:$0xff]  ;;  %v3686_v41 = vld [vmem:[%s276_s9 + $0x8] sm:$0xff] }
 0x4a7   : > { %v2930_v53 = vpop.permute.xlu1 %2929  ;;  %v2932_v59 = vpop.permute.xlu0 %2931 }
 0x4a8   : > { %3179 = vst.msk [vmem:[#allocation2 + $0x7f] sm:$0x1] %vm3157_vm4, %v2930_v53 }
 0x4a9   : > { %3045 = vrot.lane.b32.xlu1 %v15260_v24, %s9004_s30  ;;  %3180 = vst.msk [vmem:[#allocation2 + $0x7f] sm:$0xfe] %vm3153_vm3, %v2932_v59  ;;  %3047 = vrot.lane.b32.xlu0 %v15303_v38, %s9004_s30  ;;  %v3685_v24 = vld [vmem:[%s276_s9] sm:$0xff]  ;;  %v3687_v38 = vld [vmem:[%s276_s9 + $0x10] sm:$0xff] }
 0x4ab   : > { %v2934_v39 = vpop.permute.xlu1 %2933  ;;  %v2936_v8 = vpop.permute.xlu0 %2935 }
 0x4ac   : > { %3181 = vst.msk [vmem:[#allocation2 + $0x87] sm:$0xff] %vm3155_vm2, %v2934_v39  ;;  %v8933_v39 = vpack.c.bf16 %v3686_v41, %v3685_v24  ;;  %v15337_v41 = vld [vmem:[#allocation81_spill] sm:$0xff] }
 0x4ad   : > { %3049 = vrot.lane.b32.xlu1 %v15336_v30, %s9004_s30  ;;  %3182 = vst.msk [vmem:[#allocation2 + $0x8f] sm:$0x1] %vm3157_vm4, %v2936_v8  ;;  %3051 = vrot.lane.b32.xlu0 %v15305_v55, %s9004_s30 }
 0x4ae   : > { %8934 = vmatprep.subr.bf16.mxu0 %v8933_v39 }
 0x4af   : > { %v2938_v53 = vpop.permute.xlu1 %2937  ;;  %v2940_v30 = vpop.permute.xlu0 %2939  ;;  %8936 = vmatpush3.bf16.msra.mxu0 %v8933_v39  ;;  %v15338_v39 = vld [vmem:[#allocation7_spill] sm:$0xff] }
 0x4b0   : > { %3183 = vst.msk [vmem:[#allocation2 + $0x8f] sm:$0xfe] %vm3153_vm3, %v2938_v53  ;;  %v8937_v53 = vpack.c.bf16 %v3688_v18, %v3687_v38  ;;  %v3689_v18 = vld [vmem:[%s276_s9 + $0x20] sm:$0xf] }
 0x4b1   : > { %3053 = vrot.lane.b32.xlu1 %v15304_v9, %s9004_s30  ;;  %3184 = vst.msk [vmem:[#allocation2 + $0x97] sm:$0xff] %vm3155_vm2, %v2940_v30  ;;  %3055 = vrot.lane.b32.xlu0 %v15337_v41, %s9004_s30  ;;  %v15339_v30 = vld [vmem:[#allocation58_spill] sm:$0xff] }
 0x4b2   : > { %8938 = vmatprep.subr.bf16.mxu0 %v8937_v53 }
 0x4b3   : > { %v2942_v59 = vpop.permute.xlu1 %2941  ;;  %v2944_v8 = vpop.permute.xlu0 %2943  ;;  %8940 = vmatpush3.bf16.msra.mxu0 %v8937_v53  ;;  %v15340_v53 = vld [vmem:[#allocation6_spill] sm:$0xff] }
 0x4b4   : > { %3185 = vst.msk [vmem:[#allocation2 + $0x9f] sm:$0x1] %vm3157_vm4, %v2942_v59  ;;  %8721 = vmatprep.subr.msk.mxu0 %vm3890_vm5, %v3689_v18 }
 0x4b5   : > { %3057 = vrot.lane.b32.xlu1 %v10318_v25, %s9004_s30  ;;  %3186 = vst.msk [vmem:[#allocation2 + $0x9f] sm:$0xfe] %vm3153_vm3, %v2944_v8  ;;  %3059 = vrot.lane.b32.xlu0 %v15339_v30, %s9004_s30 }
 0x4b7   : > { %v2946_v24 = vpop.permute.xlu1 %2945  ;;  %v2948_v59 = vpop.permute.xlu0 %2947  ;;  %8722 = vmatpush3.msk.msra.mxu0 %vm3890_vm5, %v3689_v18  ;;  %vm6139_vm5 = vcmask 326912  }
 0x4b8   : > { %3187 = vst.msk [vmem:[#allocation2 + $0xa7] sm:$0xff] %vm3155_vm2, %v2946_v24 }
 0x4b9   : > { %3061 = vrot.lane.b32.xlu1 %v15338_v39, %s9004_s30  ;;  %3188 = vst.msk [vmem:[#allocation2 + $0xaf] sm:$0x1] %vm3157_vm4, %v2948_v59  ;;  %3252 = vrot.lane.b32.xlu0 %v15340_v53, %s9005_s10  ;;  %s14259_s30 = scalar_lea.vmem %s14638_s5, %s8569_s20 }
 0x4bb   : > { %v2950_v38 = vpop.permute.xlu1 %2949  ;;  %v2952_v8 = vpop.permute.xlu0 %2951 }
 0x4bc   : > { %3189 = vst.msk [vmem:[#allocation2 + $0xaf] sm:$0xfe] %vm3153_vm3, %v2950_v38 }
 0x4bd   : > { %3254 = vrot.lane.b32.xlu1 %v15213_v40, %s9005_s10  ;;  %3190 = vst.msk [vmem:[#allocation2 + $0xb7] sm:$0xff] %vm3155_vm2, %v2952_v8  ;;  %3256 = vrot.lane.b32.xlu0 %v15309_v47, %s9005_s10  ;;  %v15341_v40 = vld [vmem:[#allocation10_spill] sm:$0xff] }
 0x4bf   : > { %v2954_v24 = vpop.permute.xlu1 %2953  ;;  %v2956_v38 = vpop.permute.xlu0 %2955 }
 0x4c0   : > { %3191 = vst.msk [vmem:[#allocation2 + $0xbf] sm:$0x1] %vm3157_vm4, %v2954_v24 }
 0x4c1   : > { %3258 = vrot.lane.b32.xlu1 %v15267_v26, %s9005_s10  ;;  %3192 = vst.msk [vmem:[#allocation2 + $0xbf] sm:$0xfe] %vm3153_vm3, %v2956_v38  ;;  %3260 = vrot.lane.b32.xlu0 %v15341_v40, %s9005_s10  ;;  %v15342_v26 = vld [vmem:[#allocation11_spill] sm:$0xff] }
 0x4c3   : > { %v2958_v18 = vpop.permute.xlu1 %2957  ;;  %v2960_v53 = vpop.permute.xlu0 %2959 }
 0x4c4   : > { %3193 = vst.msk [vmem:[#allocation2 + $0xc7] sm:$0xff] %vm3155_vm2, %v2958_v18 }
 0x4c5   : > { %3262 = vrot.lane.b32.xlu1 %v15310_v43, %s9005_s10  ;;  %3194 = vst.msk [vmem:[#allocation2 + $0xcf] sm:$0x1] %vm3157_vm4, %v2960_v53  ;;  %3264 = vrot.lane.b32.xlu0 %v15342_v26, %s9005_s10 }
 0x4c7   : > { %v2962_v59 = vpop.permute.xlu1 %2961  ;;  %v2964_v24 = vpop.permute.xlu0 %2963 }
 0x4c8   : > { %3195 = vst.msk [vmem:[#allocation2 + $0xcf] sm:$0xfe] %vm3153_vm3, %v2962_v59 }
 0x4c9   : > { %3266 = vrot.lane.b32.xlu1 %v15268_v16, %s9005_s10  ;;  %3196 = vst.msk [vmem:[#allocation2 + $0xd7] sm:$0xff] %vm3155_vm2, %v2964_v24  ;;  %3268 = vrot.lane.b32.xlu0 %v15311_v2, %s9005_s10  ;;  %v15343_v16 = vld [vmem:[#allocation13_spill] sm:$0xff]  ;;  %v15344_v2 = vld [vmem:[#allocation15_spill] sm:$0xff] }
 0x4cb   : > { %v2966_v47 = vpop.permute.xlu1 %2965  ;;  %v2968_v8 = vpop.permute.xlu0 %2967 }
 0x4cc   : > { %3197 = vst.msk [vmem:[#allocation2 + $0xdf] sm:$0x1] %vm3157_vm4, %v2966_v47 }
 0x4cd   : > { %3270 = vrot.lane.b32.xlu1 %v15269_v17, %s9005_s10  ;;  %3198 = vst.msk [vmem:[#allocation2 + $0xdf] sm:$0xfe] %vm3153_vm3, %v2968_v8  ;;  %3201 = vst.msk [vmem:[#allocation2 + $0xef] sm:$0xfe] %vm3153_vm3, %v2968_v8  ;;  %3272 = vrot.lane.b32.xlu0 %v15343_v16, %s9005_s10 }
 0x4cf   : > { %v2970_v43 = vpop.permute.xlu1 %2969  ;;  %v2972_v18 = vpop.permute.xlu0 %2971 }
 0x4d0   : > { %3199 = vst.msk [vmem:[#allocation2 + $0xe7] sm:$0xff] %vm3155_vm2, %v2970_v43  ;;  %3202 = vst.msk [vmem:[#allocation2 + $0xf7] sm:$0xff] %vm3155_vm2, %v2970_v43 }
 0x4d1   : > { %3274 = vrot.lane.b32.xlu1 %v15312_v15, %s9005_s10  ;;  %3200 = vst.msk [vmem:[#allocation2 + $0xef] sm:$0x1] %vm3157_vm4, %v2972_v18  ;;  %3203 = vst.msk [vmem:[#allocation2 + $0xff] sm:$0x1] %vm3157_vm4, %v2972_v18  ;;  %3276 = vrot.lane.b32.xlu0 %v15344_v2, %s9005_s10 }
 0x4d3   : > { %v2974_v17 = vpop.permute.xlu1 %2973  ;;  %v2976_v40 = vpop.permute.xlu0 %2975 }
 0x4d4   : > { %3204 = vst.msk [vmem:[#allocation2 + $0xff] sm:$0xfe] %vm3153_vm3, %v2974_v17  ;;  %v15349_v17 = vld [vmem:[#allocation27_spill] sm:$0xff] }
 0x4d5   : > { %3278 = vrot.lane.b32.xlu1 %v15270_v32, %s9005_s10  ;;  %3205 = vst.msk [vmem:[#allocation2 + $0x107] sm:$0xff] %vm3155_vm2, %v2976_v40  ;;  %3280 = vrot.lane.b32.xlu0 %v15313_v50, %s9005_s10  ;;  %v15345_v32 = vld [vmem:[#allocation18_spill] sm:$0xff]  ;;  %v15346_v50 = vld [vmem:[#allocation20_spill] sm:$0xff] }
 0x4d7   : > { %v2978_v38 = vpop.permute.xlu1 %2977  ;;  %v2980_v59 = vpop.permute.xlu0 %2979 }
 0x4d8   : > { %3206 = vst.msk [vmem:[#allocation2 + $0x10f] sm:$0x1] %vm3157_vm4, %v2978_v38 }
 0x4d9   : > { %3282 = vrot.lane.b32.xlu1 %v15271_v34, %s9005_s10  ;;  %3207 = vst.msk [vmem:[#allocation2 + $0x10f] sm:$0xfe] %vm3153_vm3, %v2980_v59  ;;  %3284 = vrot.lane.b32.xlu0 %v15345_v32, %s9005_s10 }
 0x4db   : > { %v2982_v15 = vpop.permute.xlu1 %2981  ;;  %v2984_v26 = vpop.permute.xlu0 %2983 }
 0x4dc   : > { %3208 = vst.msk [vmem:[#allocation2 + $0x117] sm:$0xff] %vm3155_vm2, %v2982_v15 }
 0x4dd   : > { %3286 = vrot.lane.b32.xlu1 %v15314_v48, %s9005_s10  ;;  %3209 = vst.msk [vmem:[#allocation2 + $0x11f] sm:$0x1] %vm3157_vm4, %v2984_v26  ;;  %3288 = vrot.lane.b32.xlu0 %v15346_v50, %s9005_s10 }
 0x4df   : > { %v2986_v53 = vpop.permute.xlu1 %2985  ;;  %v2988_v47 = vpop.permute.xlu0 %2987 }
 0x4e0   : > { %3210 = vst.msk [vmem:[#allocation2 + $0x11f] sm:$0xfe] %vm3153_vm3, %v2986_v53 }
 0x4e1   : > { %3290 = vrot.lane.b32.xlu1 %v15272_v12, %s9005_s10  ;;  %3211 = vst.msk [vmem:[#allocation2 + $0x127] sm:$0xff] %vm3155_vm2, %v2988_v47  ;;  %3292 = vrot.lane.b32.xlu0 %v15315_v51, %s9005_s10  ;;  %v15347_v51 = vld [vmem:[#allocation25_spill] sm:$0xff] }
 0x4e3   : > { %v2990_v34 = vpop.permute.xlu1 %2989  ;;  %v2992_v24 = vpop.permute.xlu0 %2991 }
 0x4e4   : > { %3212 = vst.msk [vmem:[#allocation2 + $0x12f] sm:$0x1] %vm3157_vm4, %v2990_v34 }
 0x4e5   : > { %3294 = vrot.lane.b32.xlu1 %v15273_v31, %s9005_s10  ;;  %3213 = vst.msk [vmem:[#allocation2 + $0x12f] sm:$0xfe] %vm3153_vm3, %v2992_v24  ;;  %3296 = vrot.lane.b32.xlu0 %v9230_v4, %s9005_s10  ;;  %v15348_v31 = vld [vmem:[#allocation23_spill] sm:$0xff] }
 0x4e7   : > { %v2994_v48 = vpop.permute.xlu1 %2993  ;;  %v2996_v43 = vpop.permute.xlu0 %2995 }
 0x4e8   : > { %3214 = vst.msk [vmem:[#allocation2 + $0x137] sm:$0xff] %vm3155_vm2, %v2994_v48 }
 0x4e9   : > { %3298 = vrot.lane.b32.xlu1 %v15316_v56, %s9005_s10  ;;  %3215 = vst.msk [vmem:[#allocation2 + $0x13f] sm:$0x1] %vm3157_vm4, %v2996_v43  ;;  %3300 = vrot.lane.b32.xlu0 %v15348_v31, %s9005_s10 }
 0x4eb   : > { %v2998_v12 = vpop.permute.xlu1 %2997  ;;  %v3000_v16 = vpop.permute.xlu0 %2999 }
 0x4ec   : > { %3216 = vst.msk [vmem:[#allocation2 + $0x13f] sm:$0xfe] %vm3153_vm3, %v2998_v12 }
 0x4ed   : > { %3302 = vrot.lane.b32.xlu1 %v15347_v51, %s9005_s10  ;;  %3217 = vst.msk [vmem:[#allocation2 + $0x147] sm:$0xff] %vm3155_vm2, %v3000_v16  ;;  %3304 = vrot.lane.b32.xlu0 %v15317_v13, %s9005_s10 }
 0x4ef   : > { %v3002_v8 = vpop.permute.xlu1 %3001  ;;  %v3004_v4 = vpop.permute.xlu0 %3003 }
 0x4f0   : > { %3218 = vst.msk [vmem:[#allocation2 + $0x14f] sm:$0x1] %vm3157_vm4, %v3002_v8  ;;  %v15359_v8 = vld [vmem:[#allocation54_spill] sm:$0xff] }
 0x4f1   : > { %3306 = vrot.lane.b32.xlu1 %v15277_v3, %s9005_s10  ;;  %3219 = vst.msk [vmem:[#allocation2 + $0x14f] sm:$0xfe] %vm3153_vm3, %v3004_v4  ;;  %3308 = vrot.lane.b32.xlu0 %v15349_v17, %s9005_s10  ;;  %v15350_v3 = vld [vmem:[#allocation30_spill] sm:$0xff] }
 0x4f3   : > { %v3006_v56 = vpop.permute.xlu1 %3005  ;;  %v3008_v2 = vpop.permute.xlu0 %3007 }
 0x4f4   : > { %3220 = vst.msk [vmem:[#allocation2 + $0x157] sm:$0xff] %vm3155_vm2, %v3006_v56  ;;  %v15360_v56 = vld [vmem:[#allocation55_spill] sm:$0xff] }
 0x4f5   : > { %3310 = vrot.lane.b32.xlu1 %v15318_v29, %s9005_s10  ;;  %3221 = vst.msk [vmem:[#allocation2 + $0x15f] sm:$0x1] %vm3157_vm4, %v3008_v2  ;;  %3312 = vrot.lane.b32.xlu0 %v15350_v3, %s9005_s10  ;;  %v15361_v3 = vld [vmem:[#allocation60_spill] sm:$0xff] }
 0x4f7   : > { %v3010_v18 = vpop.permute.xlu1 %3009  ;;  %v3012_v38 = vpop.permute.xlu0 %3011 }
 0x4f8   : > { %3222 = vst.msk [vmem:[#allocation2 + $0x15f] sm:$0xfe] %vm3153_vm3, %v3010_v18 }
 0x4f9   : > { %3314 = vrot.lane.b32.xlu1 %v15281_v22, %s9005_s10  ;;  %3223 = vst.msk [vmem:[#allocation2 + $0x167] sm:$0xff] %vm3155_vm2, %v3012_v38  ;;  %3316 = vrot.lane.b32.xlu0 %v15319_v57, %s9005_s10  ;;  %v15351_v22 = vld [vmem:[#allocation32_spill] sm:$0xff]  ;;  %v15352_v57 = vld [vmem:[#allocation34_spill] sm:$0xff] }
 0x4fb   : > { %v3014_v13 = vpop.permute.xlu1 %3013  ;;  %v3016_v40 = vpop.permute.xlu0 %3015 }
 0x4fc   : > { %3224 = vst.msk [vmem:[#allocation2 + $0x16f] sm:$0x1] %vm3157_vm4, %v3014_v13 }
 0x4fd   : > { %3318 = vrot.lane.b32.xlu1 %v15307_v1, %s9005_s10  ;;  %3225 = vst.msk [vmem:[#allocation2 + $0x16f] sm:$0xfe] %vm3153_vm3, %v3016_v40  ;;  %3320 = vrot.lane.b32.xlu0 %v15351_v22, %s9005_s10 }
 0x4ff   : > { %v3018_v29 = vpop.permute.xlu1 %3017  ;;  %v3020_v59 = vpop.permute.xlu0 %3019 }
 0x500   : > { %3226 = vst.msk [vmem:[#allocation2 + $0x177] sm:$0xff] %vm3155_vm2, %v3018_v29 }
 0x501   : > { %3322 = vrot.lane.b32.xlu1 %v15320_v27, %s9005_s10  ;;  %3227 = vst.msk [vmem:[#allocation2 + $0x17f] sm:$0x1] %vm3157_vm4, %v3020_v59  ;;  %3324 = vrot.lane.b32.xlu0 %v15352_v57, %s9005_s10  ;;  %v15363_v57 = vld [vmem:[#allocation66_spill] sm:$0xff] }
 0x503   : > { %v3022_v15 = vpop.permute.xlu1 %3021  ;;  %v3024_v32 = vpop.permute.xlu0 %3023 }
 0x504   : > { %3228 = vst.msk [vmem:[#allocation2 + $0x17f] sm:$0xfe] %vm3153_vm3, %v3022_v15 }
 0x505   : > { %3326 = vrot.lane.b32.xlu1 %v15285_v5, %s9005_s10  ;;  %3229 = vst.msk [vmem:[#allocation2 + $0x187] sm:$0xff] %vm3155_vm2, %v3024_v32  ;;  %3328 = vrot.lane.b32.xlu0 %v15321_v23, %s9005_s10  ;;  %v15353_v5 = vld [vmem:[#allocation38_spill] sm:$0xff] }
 0x507   : > { %v3026_v1 = vpop.permute.xlu1 %3025  ;;  %v3028_v53 = vpop.permute.xlu0 %3027 }
 0x508   : > { %3230 = vst.msk [vmem:[#allocation2 + $0x18f] sm:$0x1] %vm3157_vm4, %v3026_v1 }
 0x509   : > { %3330 = vrot.lane.b32.xlu1 %v15287_v58, %s9005_s10  ;;  %3231 = vst.msk [vmem:[#allocation2 + $0x18f] sm:$0xfe] %vm3153_vm3, %v3028_v53  ;;  %3332 = vrot.lane.b32.xlu0 %v15353_v5, %s9005_s10  ;;  %v15354_v58 = vld [vmem:[#allocation69_spill] sm:$0xff] }
 0x50b   : > { %v3030_v27 = vpop.permute.xlu1 %3029  ;;  %v3032_v50 = vpop.permute.xlu0 %3031 }
 0x50c   : > { %3232 = vst.msk [vmem:[#allocation2 + $0x197] sm:$0xff] %vm3155_vm2, %v3030_v27 }
 0x50d   : > { %3334 = vrot.lane.b32.xlu1 %v15322_v21, %s9005_s10  ;;  %3233 = vst.msk [vmem:[#allocation2 + $0x19f] sm:$0x1] %vm3157_vm4, %v3032_v50  ;;  %3336 = vrot.lane.b32.xlu0 %v15354_v58, %s9005_s10  ;;  %v15365_v58 = vld [vmem:[#allocation72_spill] sm:$0xff] }
 0x50f   : > { %v3034_v26 = vpop.permute.xlu1 %3033  ;;  %v3036_v34 = vpop.permute.xlu0 %3035 }
 0x510   : > { %3234 = vst.msk [vmem:[#allocation2 + $0x19f] sm:$0xfe] %vm3153_vm3, %v3034_v26 }
 0x511   : > { %3338 = vrot.lane.b32.xlu1 %v10206_v10, %s9005_s10  ;;  %3235 = vst.msk [vmem:[#allocation2 + $0x1a7] sm:$0xff] %vm3155_vm2, %v3036_v34  ;;  %3340 = vrot.lane.b32.xlu0 %v15323_v19, %s9005_s10  ;;  %v15355_v10 = vld [vmem:[#allocation43_spill] sm:$0xff] }
 0x513   : > { %v3038_v23 = vpop.permute.xlu1 %3037  ;;  %v3040_v47 = vpop.permute.xlu0 %3039 }
 0x514   : > { %3236 = vst.msk [vmem:[#allocation2 + $0x1af] sm:$0x1] %vm3157_vm4, %v3038_v23 }
 0x515   : > { %3342 = vrot.lane.b32.xlu1 %v9397_v49, %s9005_s10  ;;  %3237 = vst.msk [vmem:[#allocation2 + $0x1af] sm:$0xfe] %vm3153_vm3, %v3040_v47  ;;  %3344 = vrot.lane.b32.xlu0 %v9394_v35, %s9005_s10  ;;  %v15356_v49 = vld [vmem:[#allocation44_spill] sm:$0xff] }
 0x517   : > { %v3042_v21 = vpop.permute.xlu1 %3041  ;;  %v3044_v24 = vpop.permute.xlu0 %3043 }
 0x518   : > { %3238 = vst.msk [vmem:[#allocation2 + $0x1b7] sm:$0xff] %vm3155_vm2, %v3042_v21 }
 0x519   : > { %3346 = vrot.lane.b32.xlu1 %v15355_v10, %s9005_s10  ;;  %3239 = vst.msk [vmem:[#allocation2 + $0x1bf] sm:$0x1] %vm3157_vm4, %v3044_v24  ;;  %3348 = vrot.lane.b32.xlu0 %v15288_v33, %s9005_s10  ;;  %v15368_v24 = vld [vmem:[#allocation74_spill] sm:$0xff] }
 0x51b   : > { %v3046_v48 = vpop.permute.xlu1 %3045  ;;  %v3048_v12 = vpop.permute.xlu0 %3047 }
 0x51c   : > { %3240 = vst.msk [vmem:[#allocation2 + $0x1bf] sm:$0xfe] %vm3153_vm3, %v3046_v48 }
 0x51d   : > { %3350 = vrot.lane.b32.xlu1 %v15356_v49, %s9005_s10  ;;  %3241 = vst.msk [vmem:[#allocation2 + $0x1c7] sm:$0xff] %vm3155_vm2, %v3048_v12  ;;  %3352 = vrot.lane.b32.xlu0 %v15325_v42, %s9005_s10  ;;  %v15369_v49 = vld [vmem:[#allocation76_spill] sm:$0xff] }
 0x51f   : > { %v3050_v19 = vpop.permute.xlu1 %3049  ;;  %v3052_v43 = vpop.permute.xlu0 %3051 }
 0x520   : > { %3242 = vst.msk [vmem:[#allocation2 + $0x1cf] sm:$0x1] %vm3157_vm4, %v3050_v19 }
 0x521   : > { %3354 = vrot.lane.b32.xlu1 %v9419_v45, %s9005_s10  ;;  %3243 = vst.msk [vmem:[#allocation2 + $0x1cf] sm:$0xfe] %vm3153_vm3, %v3052_v43  ;;  %3356 = vrot.lane.b32.xlu0 %v15289_v63, %s9005_s10  ;;  %v15357_v45 = vld [vmem:[#allocation49_spill] sm:$0xff]  ;;  %v15370_v43 = vld [vmem:[#allocation75_spill] sm:$0xff] }
 0x523   : > { %v3054_v35 = vpop.permute.xlu1 %3053  ;;  %v3056_v51 = vpop.permute.xlu0 %3055 }
 0x524   : > { %3244 = vst.msk [vmem:[#allocation2 + $0x1d7] sm:$0xff] %vm3155_vm2, %v3054_v35 }
 0x525   : > { %3358 = vrot.lane.b32.xlu1 %v15326_v44, %s9005_s10  ;;  %3245 = vst.msk [vmem:[#allocation2 + $0x1df] sm:$0x1] %vm3157_vm4, %v3056_v51  ;;  %3360 = vrot.lane.b32.xlu0 %v15290_v37, %s9005_s10  ;;  %v15358_v44 = vld [vmem:[#allocation52_spill] sm:$0xff] }
 0x527   : > { %v3058_v33 = vpop.permute.xlu1 %3057  ;;  %v3060_v31 = vpop.permute.xlu0 %3059 }
 0x528   : > { %3246 = vst.msk [vmem:[#allocation2 + $0x1df] sm:$0xfe] %vm3153_vm3, %v3058_v33  ;;  %3249 = vst.msk [vmem:[#allocation2 + $0x1ef] sm:$0xfe] %vm3153_vm3, %v3058_v33  ;;  %v15371_v33 = vld [vmem:[#allocation79_spill] sm:$0xff]  ;;  %vm5782_vm3 = vcmask 261312  }
 0x529   : > { %3362 = vrot.lane.b32.xlu1 %v15357_v45, %s9005_s10  ;;  %3247 = vst.msk [vmem:[#allocation2 + $0x1e7] sm:$0xff] %vm3155_vm2, %v3060_v31  ;;  %3250 = vst.msk [vmem:[#allocation2 + $0x1f7] sm:$0xff] %vm3155_vm2, %v3060_v31  ;;  %3364 = vrot.lane.b32.xlu0 %v15327_v28, %s9005_s10  ;;  %vm5491_vm2 = vcmask 195712  }
 0x52b   : > { %v3062_v42 = vpop.permute.xlu1 %3061  ;;  %v3253_v37 = vpop.permute.xlu0 %3252 }
 0x52c   : > { %3248 = vst.msk [vmem:[#allocation2 + $0x1ef] sm:$0x1] %vm3157_vm4, %v3062_v42  ;;  %3251 = vst.msk [vmem:[#allocation2 + $0x1ff] sm:$0x1] %vm3157_vm4, %v3062_v42  ;;  %vm6141_vm4 = vcmask 319744  }
 0x52d   : > { %3366 = vrot.lane.b32.xlu1 %v15358_v44, %s9005_s10  ;;  %3523 = vst.msk [vmem:[#allocation2 - $0x2] sm:$0xfc] %vm3522_vm7, %v3253_v37  ;;  %3368 = vrot.lane.b32.xlu0 %v15291_v11, %s9005_s10 }
 0x52f   : > { %v3255_v63 = vpop.permute.xlu1 %3254  ;;  %v3257_v28 = vpop.permute.xlu0 %3256 }
 0x530   : > { %3525 = vst.msk [vmem:[#allocation2 + $0x6] sm:$0xff] %vm3524_vm6, %v3255_v63 }
 0x531   : > { %3370 = vrot.lane.b32.xlu1 %v15359_v8, %s9005_s10  ;;  %3527 = vst.msk [vmem:[#allocation2 + $0xe] sm:$0x3] %vm3526_vm8, %v3257_v28  ;;  %3372 = vrot.lane.b32.xlu0 %v15292_v7, %s9005_s10 }
 0x533   : > { %v3259_v16 = vpop.permute.xlu1 %3258  ;;  %v3261_v17 = vpop.permute.xlu0 %3260 }
 0x534   : > { %3528 = vst.msk [vmem:[#allocation2 + $0xe] sm:$0xfc] %vm3522_vm7, %v3259_v16 }
 0x535   : > { %3374 = vrot.lane.b32.xlu1 %v15360_v56, %s9005_s10  ;;  %3529 = vst.msk [vmem:[#allocation2 + $0x16] sm:$0xff] %vm3524_vm6, %v3261_v17  ;;  %3376 = vrot.lane.b32.xlu0 %v15329_v20, %s9005_s10 }
 0x537   : > { %v3263_v4 = vpop.permute.xlu1 %3262  ;;  %v3621_v11 = vld [vmem:[#allocation2] sm:$0xff]  ;;  %v3265_v18 = vpop.permute.xlu0 %3264 }
 0x538   : > { %3530 = vst.msk [vmem:[#allocation2 + $0x1e] sm:$0x3] %vm3526_vm8, %v3263_v4  ;;  %8723 = vmatprep.mubr.msk.f32.mxu0 %vm3697_vm9, %v3621_v11  ;;  %v3622_v2 = vld [vmem:[#allocation2 + $0x8] sm:$0xff] }
 0x539   : > { %3378 = vrot.lane.b32.xlu1 %v15204_v14, %s9005_s10  ;;  %3531 = vst.msk [vmem:[#allocation2 + $0x1e] sm:$0xfc] %vm3522_vm7, %v3265_v18  ;;  %8724 = vmatmul.mubr.msk.f32.vlgmr.msra.gmra.mrb[0].mxu0 %vm3697_vm9, %v3622_v2 }
 0x53a   : > { %3380 = vrot.lane.b32.xlu0 %v15293_v0, %s9005_s10  ;;  %v15362_v0 = vld [vmem:[#allocation61_spill] sm:$0xff] }
 0x53b   : > { %v3267_v7 = vpop.permute.xlu1 %3266  ;;  %v3269_v20 = vpop.permute.xlu0 %3268 }
 0x53c   : > { %3532 = vst.msk [vmem:[#allocation2 + $0x26] sm:$0xff] %vm3524_vm6, %v3267_v7  ;;  %v3623_v38 = vld [vmem:[#allocation2 + $0x10] sm:$0xff] }
 0x53d   : > { %3382 = vrot.lane.b32.xlu1 %v15361_v3, %s9005_s10  ;;  %3533 = vst.msk [vmem:[#allocation2 + $0x2e] sm:$0x3] %vm3526_vm8, %v3269_v20  ;;  %8726 = vmatprep.mubr.msk.f32.mxu0 %vm3697_vm9, %v3623_v38 }
 0x53e   : > { %3384 = vrot.lane.b32.xlu0 %v15294_v62, %s9005_s10 }
 0x53f   : > { %v3271_v13 = vpop.permute.xlu1 %3270  ;;  %v3624_v29 = vld [vmem:[#allocation2 + $0x18] sm:$0xff]  ;;  %v3273_v40 = vpop.permute.xlu0 %3272 }
 0x540   : > { %3534 = vst.msk [vmem:[#allocation2 + $0x2e] sm:$0xfc] %vm3522_vm7, %v3271_v13  ;;  %8727 = vmatmul.mubr.msk.f32.gmra.mrb[2].mxu0 %vm3697_vm9, %v3624_v29 }
 0x541   : > { %3386 = vrot.lane.b32.xlu1 %v15362_v0, %s9005_s10  ;;  %3535 = vst.msk [vmem:[#allocation2 + $0x36] sm:$0xff] %vm3524_vm6, %v3273_v40 }
 0x542   : > { %3388 = vrot.lane.b32.xlu0 %v15331_v36, %s9005_s10 }
 0x543   : > { %v3275_v14 = vpop.permute.xlu1 %3274  ;;  %v3625_v22 = vld [vmem:[#allocation2 + $0x20] sm:$0xff]  ;;  %v3277_v15 = vpop.permute.xlu0 %3276 }
 0x544   : > { %3536 = vst.msk [vmem:[#allocation2 + $0x3e] sm:$0x3] %vm3526_vm8, %v3275_v14  ;;  %8729 = vmatprep.mubr.msk.f32.mxu0 %vm3697_vm9, %v3625_v22  ;;  %v3626_v59 = vld [vmem:[#allocation2 + $0x28] sm:$0xff] }
 0x545   : > { %3390 = vrot.lane.b32.xlu1 %v15205_v60, %s9005_s10  ;;  %3537 = vst.msk [vmem:[#allocation2 + $0x3e] sm:$0xfc] %vm3522_vm7, %v3277_v15  ;;  %8730 = vmatmul.mubr.msk.f32.gmra.mrb[4].mxu0 %vm3697_vm9, %v3626_v59  ;;  %v15364_v60 = vld [vmem:[#allocation67_spill] sm:$0xff] }
 0x546   : > { %3392 = vrot.lane.b32.xlu0 %v15295_v52, %s9005_s10 }
 0x547   : > { %v3279_v62 = vpop.permute.xlu1 %3278  ;;  %v3281_v36 = vpop.permute.xlu0 %3280 }
 0x548   : > { %3538 = vst.msk [vmem:[#allocation2 + $0x46] sm:$0xff] %vm3524_vm6, %v3279_v62  ;;  %v3627_v32 = vld [vmem:[#allocation2 + $0x30] sm:$0xff] }
 0x549   : > { %3394 = vrot.lane.b32.xlu1 %v15363_v57, %s9005_s10  ;;  %3539 = vst.msk [vmem:[#allocation2 + $0x4e] sm:$0x3] %vm3526_vm8, %v3281_v36  ;;  %8732 = vmatprep.mubr.msk.f32.mxu0 %vm3697_vm9, %v3627_v32 }
 0x54a   : > { %3396 = vrot.lane.b32.xlu0 %v15296_v54, %s9005_s10 }
 0x54b   : > { %v3283_v1 = vpop.permute.xlu1 %3282  ;;  %v3628_v27 = vld [vmem:[#allocation2 + $0x38] sm:$0xff]  ;;  %v3285_v53 = vpop.permute.xlu0 %3284 }
 0x54c   : > { %3540 = vst.msk [vmem:[#allocation2 + $0x4e] sm:$0xfc] %vm3522_vm7, %v3283_v1  ;;  %8733 = vmatmul.mubr.msk.f32.gmra.mrb[6].mxu0 %vm3697_vm9, %v3628_v27 }
 0x54d   : > { %3398 = vrot.lane.b32.xlu1 %v15364_v60, %s9005_s10  ;;  %3541 = vst.msk [vmem:[#allocation2 + $0x56] sm:$0xff] %vm3524_vm6, %v3285_v53 }
 0x54e   : > { %3400 = vrot.lane.b32.xlu0 %v15333_v61, %s9005_s10 }
 0x54f   : > { %v3287_v52 = vpop.permute.xlu1 %3286  ;;  %v3629_v5 = vld [vmem:[#allocation2 + $0x40] sm:$0xff]  ;;  %v3289_v26 = vpop.permute.xlu0 %3288 }
 0x550   : > { %3542 = vst.msk [vmem:[#allocation2 + $0x5e] sm:$0x3] %vm3526_vm8, %v3287_v52  ;;  %8735 = vmatprep.mubr.msk.f32.mxu0 %vm3697_vm9, %v3629_v5  ;;  %v3630_v50 = vld [vmem:[#allocation2 + $0x48] sm:$0xff] }
 0x551   : > { %3402 = vrot.lane.b32.xlu1 %v15176_v46, %s9005_s10  ;;  %3543 = vst.msk [vmem:[#allocation2 + $0x5e] sm:$0xfc] %vm3522_vm7, %v3289_v26  ;;  %8736 = vmatmul.mubr.msk.f32.gmra.mrb[8].mxu0 %vm3697_vm9, %v3630_v50  ;;  %v15366_v46 = vld [vmem:[#allocation71_spill] sm:$0xff] }
 0x552   : > { %3404 = vrot.lane.b32.xlu0 %v15299_v6, %s9005_s10  ;;  %v15367_v6 = vld [vmem:[#allocation73_spill] sm:$0xff] }
 0x553   : > { %v3291_v54 = vpop.permute.xlu1 %3290  ;;  %v3293_v61 = vpop.permute.xlu0 %3292 }
 0x554   : > { %3544 = vst.msk [vmem:[#allocation2 + $0x66] sm:$0xff] %vm3524_vm6, %v3291_v54  ;;  %v3631_v34 = vld [vmem:[#allocation2 + $0x50] sm:$0xff] }
 0x555   : > { %3406 = vrot.lane.b32.xlu1 %v15365_v58, %s9005_s10  ;;  %3545 = vst.msk [vmem:[#allocation2 + $0x6e] sm:$0x3] %vm3526_vm8, %v3293_v61  ;;  %8738 = vmatprep.mubr.msk.f32.mxu0 %vm3697_vm9, %v3631_v34 }
 0x556   : > { %3408 = vrot.lane.b32.xlu0 %v15366_v46, %s9005_s10 }
 0x557   : > { %v3295_v23 = vpop.permute.xlu1 %3294  ;;  %v3632_v21 = vld [vmem:[#allocation2 + $0x58] sm:$0xff]  ;;  %v3297_v10 = vpop.permute.xlu0 %3296 }
 0x558   : > { %3546 = vst.msk [vmem:[#allocation2 + $0x6e] sm:$0xfc] %vm3522_vm7, %v3295_v23  ;;  %8739 = vmatmul.mubr.msk.f32.gmra.mrb[10].mxu0 %vm3697_vm9, %v3632_v21 }
 0x559   : > { %3410 = vrot.lane.b32.xlu1 %v15367_v6, %s9005_s10  ;;  %3547 = vst.msk [vmem:[#allocation2 + $0x76] sm:$0xff] %vm3524_vm6, %v3297_v10 }
 0x55a   : > { %3412 = vrot.lane.b32.xlu0 %v15368_v24, %s9005_s10 }
 0x55b   : > { %v3299_v47 = vpop.permute.xlu1 %3298  ;;  %v3633_v48 = vld [vmem:[#allocation2 + $0x60] sm:$0xff]  ;;  %v3301_v12 = vpop.permute.xlu0 %3300 }
 0x55c   : > { %3548 = vst.msk [vmem:[#allocation2 + $0x7e] sm:$0x3] %vm3526_vm8, %v3299_v47  ;;  %8741 = vmatprep.mubr.msk.f32.mxu0 %vm3697_vm9, %v3633_v48  ;;  %v3634_v35 = vld [vmem:[#allocation2 + $0x68] sm:$0xff] }
 0x55d   : > { %3414 = vrot.lane.b32.xlu1 %v15369_v49, %s9005_s10  ;;  %3549 = vst.msk [vmem:[#allocation2 + $0x7e] sm:$0xfc] %vm3522_vm7, %v3301_v12  ;;  %8742 = vmatmul.mubr.msk.f32.gmra.mrb[12].mxu0 %vm3697_vm9, %v3634_v35 }
 0x55e   : > { %3416 = vrot.lane.b32.xlu0 %v15370_v43, %s9005_s10 }
 0x55f   : > { %v3303_v19 = vpop.permute.xlu1 %3302  ;;  %v3305_v45 = vpop.permute.xlu0 %3304 }
 0x560   : > { %3550 = vst.msk [vmem:[#allocation2 + $0x86] sm:$0xff] %vm3524_vm6, %v3303_v19  ;;  %v3635_v42 = vld [vmem:[#allocation2 + $0x70] sm:$0xff] }
 0x561   : > { %3418 = vrot.lane.b32.xlu1 %v15371_v33, %s9005_s10  ;;  %3551 = vst.msk [vmem:[#allocation2 + $0x8e] sm:$0x3] %vm3526_vm8, %v3305_v45  ;;  %8744 = vmatprep.mubr.msk.f32.mxu0 %vm3697_vm9, %v3635_v42 }
 0x562   : > { %3420 = vrot.lane.b32.xlu0 %v15305_v55, %s9005_s10 }
 0x563   : > { %v3307_v51 = vpop.permute.xlu1 %3306  ;;  %v3636_v31 = vld [vmem:[#allocation2 + $0x78] sm:$0xff]  ;;  %v3309_v63 = vpop.permute.xlu0 %3308 }
 0x564   : > { %3552 = vst.msk [vmem:[#allocation2 + $0x8e] sm:$0xfc] %vm3522_vm7, %v3307_v51  ;;  %8745 = vmatmul.mubr.msk.f32.gmra.mrb[14].mxu0 %vm3697_vm9, %v3636_v31 }
 0x565   : > { %3422 = vrot.lane.b32.xlu1 %v15304_v9, %s9005_s10  ;;  %3553 = vst.msk [vmem:[#allocation2 + $0x96] sm:$0xff] %vm3524_vm6, %v3309_v63 }
 0x566   : > { %3424 = vrot.lane.b32.xlu0 %v15337_v41, %s9005_s10 }
 0x567   : > { %v3311_v44 = vpop.permute.xlu1 %3310  ;;  %v3637_v37 = vld [vmem:[#allocation2 + $0x80] sm:$0xff]  ;;  %v3313_v8 = vpop.permute.xlu0 %3312 }
 0x568   : > { %3554 = vst.msk [vmem:[#allocation2 + $0x9e] sm:$0x3] %vm3526_vm8, %v3311_v44  ;;  %8747 = vmatprep.mubr.msk.f32.mxu0 %vm3697_vm9, %v3637_v37  ;;  %v3638_v16 = vld [vmem:[#allocation2 + $0x88] sm:$0xff] }
 0x569   : > { %3426 = vrot.lane.b32.xlu1 %v10318_v25, %s9005_s10  ;;  %3555 = vst.msk [vmem:[#allocation2 + $0x9e] sm:$0xfc] %vm3522_vm7, %v3313_v8  ;;  %8748 = vmatmul.mubr.msk.f32.gmra.mrb[16].mxu0 %vm3697_vm9, %v3638_v16 }
 0x56a   : > { %3428 = vrot.lane.b32.xlu0 %v15339_v30, %s9005_s10 }
 0x56b   : > { %v3315_v55 = vpop.permute.xlu1 %3314  ;;  %v3317_v41 = vpop.permute.xlu0 %3316 }
 0x56c   : > { %3556 = vst.msk [vmem:[#allocation2 + $0xa6] sm:$0xff] %vm3524_vm6, %v3315_v55  ;;  %v3639_v28 = vld [vmem:[#allocation2 + $0x90] sm:$0xff] }
 0x56d   : > { %3430 = vrot.lane.b32.xlu1 %v15338_v39, %s9005_s10  ;;  %3557 = vst.msk [vmem:[#allocation2 + $0xae] sm:$0x3] %vm3526_vm8, %v3317_v41  ;;  %8750 = vmatprep.mubr.msk.f32.mxu0 %vm3697_vm9, %v3639_v28 }
 0x56f   : > { %v3319_v9 = vpop.permute.xlu1 %3318  ;;  %v3640_v56 = vld [vmem:[#allocation2 + $0x98] sm:$0xff]  ;;  %v3321_v4 = vpop.permute.xlu0 %3320 }
 0x570   : > { %3558 = vst.msk [vmem:[#allocation2 + $0xae] sm:$0xfc] %vm3522_vm7, %v3319_v9  ;;  %8751 = vmatmul.mubr.msk.f32.gmra.mrb[18].mxu0 %vm3697_vm9, %v3640_v56 }
 0x571   : > { %3559 = vst.msk [vmem:[#allocation2 + $0xb6] sm:$0xff] %vm3524_vm6, %v3321_v4 }
 0x573   : > { %v3323_v25 = vpop.permute.xlu1 %3322  ;;  %v3641_v17 = vld [vmem:[#allocation2 + $0xa0] sm:$0xff]  ;;  %v3325_v30 = vpop.permute.xlu0 %3324 }
 0x574   : > { %3560 = vst.msk [vmem:[#allocation2 + $0xbe] sm:$0x3] %vm3526_vm8, %v3323_v25  ;;  %8753 = vmatprep.mubr.msk.f32.mxu0 %vm3697_vm9, %v3641_v17  ;;  %v3642_v11 = vld [vmem:[#allocation2 + $0xa8] sm:$0xff] }
 0x575   : > { %3561 = vst.msk [vmem:[#allocation2 + $0xbe] sm:$0xfc] %vm3522_vm7, %v3325_v30  ;;  %8754 = vmatmul.mubr.msk.f32.gmra.mrb[20].mxu0 %vm3697_vm9, %v3642_v11 }
 0x577   : > { %v3327_v39 = vpop.permute.xlu1 %3326  ;;  %v3329_v18 = vpop.permute.xlu0 %3328 }
 0x578   : > { %3562 = vst.msk [vmem:[#allocation2 + $0xc6] sm:$0xff] %vm3524_vm6, %v3327_v39  ;;  %v3643_v2 = vld [vmem:[#allocation2 + $0xb0] sm:$0xff] }
 0x579   : > { %3563 = vst.msk [vmem:[#allocation2 + $0xce] sm:$0x3] %vm3526_vm8, %v3329_v18  ;;  %8756 = vmatprep.mubr.msk.f32.mxu0 %vm3697_vm9, %v3643_v2 }
 0x57b   : > { %v3331_v7 = vpop.permute.xlu1 %3330  ;;  %v3644_v3 = vld [vmem:[#allocation2 + $0xb8] sm:$0xff]  ;;  %v3333_v20 = vpop.permute.xlu0 %3332 }
 0x57c   : > { %3564 = vst.msk [vmem:[#allocation2 + $0xce] sm:$0xfc] %vm3522_vm7, %v3331_v7  ;;  %8757 = vmatmul.mubr.msk.f32.gmra.mrb[22].mxu0 %vm3697_vm9, %v3644_v3 }
 0x57d   : > { %3565 = vst.msk [vmem:[#allocation2 + $0xd6] sm:$0xff] %vm3524_vm6, %v3333_v20 }
 0x57f   : > { %v3335_v13 = vpop.permute.xlu1 %3334  ;;  %v3645_v38 = vld [vmem:[#allocation2 + $0xc0] sm:$0xff]  ;;  %v3337_v0 = vpop.permute.xlu0 %3336 }
 0x580   : > { %3566 = vst.msk [vmem:[#allocation2 + $0xde] sm:$0x3] %vm3526_vm8, %v3335_v13  ;;  %8759 = vmatprep.mubr.msk.f32.mxu0 %vm3697_vm9, %v3645_v38  ;;  %v3646_v14 = vld [vmem:[#allocation2 + $0xc8] sm:$0xff] }
 0x581   : > { %3567 = vst.msk [vmem:[#allocation2 + $0xde] sm:$0xfc] %vm3522_vm7, %v3337_v0  ;;  %3570 = vst.msk [vmem:[#allocation2 + $0xee] sm:$0xfc] %vm3522_vm7, %v3337_v0  ;;  %8760 = vmatmul.mubr.msk.f32.gmra.mrb[24].mxu0 %vm3697_vm9, %v3646_v14 }
 0x583   : > { %v3339_v29 = vpop.permute.xlu1 %3338  ;;  %v3341_v40 = vpop.permute.xlu0 %3340 }
 0x584   : > { %3568 = vst.msk [vmem:[#allocation2 + $0xe6] sm:$0xff] %vm3524_vm6, %v3339_v29  ;;  %3571 = vst.msk [vmem:[#allocation2 + $0xf6] sm:$0xff] %vm3524_vm6, %v3339_v29  ;;  %v3647_v62 = vld [vmem:[#allocation2 + $0xd0] sm:$0xff] }
 0x585   : > { %3569 = vst.msk [vmem:[#allocation2 + $0xee] sm:$0x3] %vm3526_vm8, %v3341_v40  ;;  %3572 = vst.msk [vmem:[#allocation2 + $0xfe] sm:$0x3] %vm3526_vm8, %v3341_v40  ;;  %8762 = vmatprep.mubr.msk.f32.mxu0 %vm3697_vm9, %v3647_v62 }
 0x587   : > { %v3343_v22 = vpop.permute.xlu1 %3342  ;;  %v3648_v15 = vld [vmem:[#allocation2 + $0xd8] sm:$0xff]  ;;  %v3345_v59 = vpop.permute.xlu0 %3344 }
 0x588   : > { %3573 = vst.msk [vmem:[#allocation2 + $0xfe] sm:$0xfc] %vm3522_vm7, %v3343_v22  ;;  %8763 = vmatmul.mubr.msk.f32.gmra.mrb[26].mxu0 %vm3697_vm9, %v3648_v15 }
 0x589   : > { %3574 = vst.msk [vmem:[#allocation2 + $0x106] sm:$0xff] %vm3524_vm6, %v3345_v59 }
 0x58b   : > { %v3347_v57 = vpop.permute.xlu1 %3346  ;;  %v3649_v1 = vld [vmem:[#allocation2 + $0xe0] sm:$0xff]  ;;  %v3349_v36 = vpop.permute.xlu0 %3348  ;;  %v3651_v60 = vld [vmem:[#allocation2 + $0xf0] sm:$0xff] }
 0x58c   : > { %3575 = vst.msk [vmem:[#allocation2 + $0x10e] sm:$0x3] %vm3526_vm8, %v3347_v57  ;;  %8765 = vmatprep.mubr.msk.f32.mxu0 %vm3697_vm9, %v3649_v1  ;;  %v3650_v27 = vld [vmem:[#allocation2 + $0xe8] sm:$0xff]  ;;  %v3652_v5 = vld [vmem:[#allocation2 + $0xf8] sm:$0xff] }
 0x58d   : > { %3576 = vst.msk [vmem:[#allocation2 + $0x10e] sm:$0xfc] %vm3522_vm7, %v3349_v36  ;;  %8766 = vmatmul.mubr.msk.f32.gmra.mrb[28].mxu0 %vm3697_vm9, %v3650_v27 }
 0x58e   : > { %8768 = vmatprep.mubr.msk.f32.mxu0 %vm3697_vm9, %v3651_v60 }
 0x58f   : > { %v3351_v32 = vpop.permute.xlu1 %3350  ;;  %v3353_v52 = vpop.permute.xlu0 %3352 }
 0x590   : > { %3577 = vst.msk [vmem:[#allocation2 + $0x116] sm:$0xff] %vm3524_vm6, %v3351_v32  ;;  %v3653_v54 = vld [vmem:[#allocation2 + $0x100] sm:$0xff] }
 0x591   : > { %3578 = vst.msk [vmem:[#allocation2 + $0x11e] sm:$0x3] %vm3526_vm8, %v3353_v52  ;;  %8769 = vmatmul.mubr.msk.f32.gmra.mrb[30].mxu0 %vm3697_vm9, %v3652_v5 }
 0x592   : > { %8771 = vmatprep.mubr.msk.f32.mxu0 %vm3697_vm9, %v3653_v54 }
 0x593   : > { %v3355_v53 = vpop.permute.xlu1 %3354  ;;  %v3654_v26 = vld [vmem:[#allocation2 + $0x108] sm:$0xff]  ;;  %v3357_v50 = vpop.permute.xlu0 %3356 }
 0x594   : > { %3579 = vst.msk [vmem:[#allocation2 + $0x11e] sm:$0xfc] %vm3522_vm7, %v3355_v53 }
 0x595   : > { %3580 = vst.msk [vmem:[#allocation2 + $0x126] sm:$0xff] %vm3524_vm6, %v3357_v50  ;;  %8772 = vmatmul.mubr.msk.f32.gmra.mrb[32].mxu0 %vm3697_vm9, %v3654_v26 }
 0x597   : > { %v3359_v58 = vpop.permute.xlu1 %3358  ;;  %v3655_v23 = vld [vmem:[#allocation2 + $0x110] sm:$0xff]  ;;  %v3361_v61 = vpop.permute.xlu0 %3360 }
 0x598   : > { %3581 = vst.msk [vmem:[#allocation2 + $0x12e] sm:$0x3] %vm3526_vm8, %v3359_v58  ;;  %8774 = vmatprep.mubr.msk.f32.mxu0 %vm3697_vm9, %v3655_v23  ;;  %v3656_v21 = vld [vmem:[#allocation2 + $0x118] sm:$0xff] }
 0x599   : > { %3582 = vst.msk [vmem:[#allocation2 + $0x12e] sm:$0xfc] %vm3522_vm7, %v3361_v61  ;;  %8775 = vmatmul.mubr.msk.f32.gmra.mrb[34].mxu0 %vm3697_vm9, %v3656_v21 }
 0x59b   : > { %v3363_v34 = vpop.permute.xlu1 %3362  ;;  %v3365_v46 = vpop.permute.xlu0 %3364 }
 0x59c   : > { %3583 = vst.msk [vmem:[#allocation2 + $0x136] sm:$0xff] %vm3524_vm6, %v3363_v34  ;;  %v3657_v47 = vld [vmem:[#allocation2 + $0x120] sm:$0xff] }
 0x59d   : > { %3584 = vst.msk [vmem:[#allocation2 + $0x13e] sm:$0x3] %vm3526_vm8, %v3365_v46  ;;  %8777 = vmatprep.mubr.msk.f32.mxu0 %vm3697_vm9, %v3657_v47  ;;  %v11783_v34 = vld [vmem:[%s11780_s13] ss:$0 sm:$0xff] }
 0x59f   : > { %v3367_v6 = vpop.permute.xlu1 %3366  ;;  %v3658_v10 = vld [vmem:[#allocation2 + $0x128] sm:$0xff]  ;;  %v3369_v48 = vpop.permute.xlu0 %3368 }
 0x5a0   : > { %3585 = vst.msk [vmem:[#allocation2 + $0x13e] sm:$0xfc] %vm3522_vm7, %v3367_v6  ;;  %8778 = vmatmul.mubr.msk.f32.gmra.mrb[36].mxu0 %vm3697_vm9, %v3658_v10 }
 0x5a1   : > { %3586 = vst.msk [vmem:[#allocation2 + $0x146] sm:$0xff] %vm3524_vm6, %v3369_v48 }
 0x5a3   : > { %v3371_v24 = vpop.permute.xlu1 %3370  ;;  %v3659_v49 = vld [vmem:[#allocation2 + $0x130] sm:$0xff]  ;;  %v3373_v19 = vpop.permute.xlu0 %3372 }
 0x5a4   : > { %3587 = vst.msk [vmem:[#allocation2 + $0x14e] sm:$0x3] %vm3526_vm8, %v3371_v24  ;;  %8780 = vmatprep.mubr.msk.f32.mxu0 %vm3697_vm9, %v3659_v49  ;;  %v3660_v35 = vld [vmem:[#allocation2 + $0x138] sm:$0xff] }
 0x5a5   : > { %3588 = vst.msk [vmem:[#allocation2 + $0x14e] sm:$0xfc] %vm3522_vm7, %v3373_v19  ;;  %8781 = vmatmul.mubr.msk.f32.gmra.mrb[38].mxu0 %vm3697_vm9, %v3660_v35 }
 0x5a7   : > { %v3375_v12 = vpop.permute.xlu1 %3374  ;;  %v3377_v43 = vpop.permute.xlu0 %3376 }
 0x5a8   : > { %3589 = vst.msk [vmem:[#allocation2 + $0x156] sm:$0xff] %vm3524_vm6, %v3375_v12  ;;  %v3661_v51 = vld [vmem:[#allocation2 + $0x140] sm:$0xff] }
 0x5a9   : > { %3590 = vst.msk [vmem:[#allocation2 + $0x15e] sm:$0x3] %vm3526_vm8, %v3377_v43  ;;  %8783 = vmatprep.mubr.msk.f32.mxu0 %vm3697_vm9, %v3661_v51 }
 0x5ab   : > { %v3379_v33 = vpop.permute.xlu1 %3378  ;;  %v3662_v45 = vld [vmem:[#allocation2 + $0x148] sm:$0xff] }
 0x5ac   : > { %3591 = vst.msk [vmem:[#allocation2 + $0x15e] sm:$0xfc] %vm3522_vm7, %v3379_v33  ;;  %8784 = vmatmul.mubr.msk.f32.gmra.mrb[40].mxu0 %vm3697_vm9, %v3662_v45  ;;  %v3381_v42 = vpop.permute.xlu0 %3380 }
 0x5ad   : > { %3592 = vst.msk [vmem:[#allocation2 + $0x166] sm:$0xff] %vm3524_vm6, %v3381_v42 }
 0x5af   : > { %v3383_v31 = vpop.permute.xlu1 %3382  ;;  %v3663_v44 = vld [vmem:[#allocation2 + $0x150] sm:$0xff] }
 0x5b0   : > { %3593 = vst.msk [vmem:[#allocation2 + $0x16e] sm:$0x3] %vm3526_vm8, %v3383_v31  ;;  %8786 = vmatprep.mubr.msk.f32.mxu0 %vm3697_vm9, %v3663_v44  ;;  %v3385_v63 = vpop.permute.xlu0 %3384  ;;  %v3664_v37 = vld [vmem:[#allocation2 + $0x158] sm:$0xff] }
 0x5b1   : > { %3594 = vst.msk [vmem:[#allocation2 + $0x16e] sm:$0xfc] %vm3522_vm7, %v3385_v63  ;;  %8787 = vmatmul.mubr.msk.f32.gmra.mrb[42].mxu0 %vm3697_vm9, %v3664_v37 }
 0x5b3   : > { %v3387_v55 = vpop.permute.xlu1 %3386 }
 0x5b4   : > { %3595 = vst.msk [vmem:[#allocation2 + $0x176] sm:$0xff] %vm3524_vm6, %v3387_v55  ;;  %v3389_v8 = vpop.permute.xlu0 %3388  ;;  %v3665_v16 = vld [vmem:[#allocation2 + $0x160] sm:$0xff] }
 0x5b5   : > { %3596 = vst.msk [vmem:[#allocation2 + $0x17e] sm:$0x3] %vm3526_vm8, %v3389_v8  ;;  %8789 = vmatprep.mubr.msk.f32.mxu0 %vm3697_vm9, %v3665_v16 }
 0x5b7   : > { %v3666_v9 = vld [vmem:[#allocation2 + $0x168] sm:$0xff]  ;;  %v3391_v41 = vpop.permute.xlu1 %3390 }
 0x5b8   : > { %3597 = vst.msk [vmem:[#allocation2 + $0x17e] sm:$0xfc] %vm3522_vm7, %v3391_v41  ;;  %8790 = vmatmul.mubr.msk.f32.gmra.mrb[44].mxu0 %vm3697_vm9, %v3666_v9  ;;  %v3393_v28 = vpop.permute.xlu0 %3392 }
 0x5b9   : > { %3598 = vst.msk [vmem:[#allocation2 + $0x186] sm:$0xff] %vm3524_vm6, %v3393_v28 }
 0x5bb   : > { %v3395_v56 = vpop.permute.xlu1 %3394  ;;  %v3667_v25 = vld [vmem:[#allocation2 + $0x170] sm:$0xff] }
 0x5bc   : > { %3599 = vst.msk [vmem:[#allocation2 + $0x18e] sm:$0x3] %vm3526_vm8, %v3395_v56  ;;  %8792 = vmatprep.mubr.msk.f32.mxu0 %vm3697_vm9, %v3667_v25  ;;  %v3397_v4 = vpop.permute.xlu0 %3396  ;;  %v3668_v17 = vld [vmem:[#allocation2 + $0x178] sm:$0xff] }
 0x5bd   : > { %3600 = vst.msk [vmem:[#allocation2 + $0x18e] sm:$0xfc] %vm3522_vm7, %v3397_v4  ;;  %8793 = vmatmul.mubr.msk.f32.gmra.mrb[46].mxu0 %vm3697_vm9, %v3668_v17 }
 0x5bf   : > { %v3399_v39 = vpop.permute.xlu1 %3398 }
 0x5c0   : > { %3601 = vst.msk [vmem:[#allocation2 + $0x196] sm:$0xff] %vm3524_vm6, %v3399_v39  ;;  %v3401_v30 = vpop.permute.xlu0 %3400  ;;  %v3669_v11 = vld [vmem:[#allocation2 + $0x180] sm:$0xff] }
 0x5c1   : > { %3602 = vst.msk [vmem:[#allocation2 + $0x19e] sm:$0x3] %vm3526_vm8, %v3401_v30  ;;  %8795 = vmatprep.mubr.msk.f32.mxu0 %vm3697_vm9, %v3669_v11 }
 0x5c3   : > { %v3403_v7 = vpop.permute.xlu1 %3402  ;;  %v3670_v18 = vld [vmem:[#allocation2 + $0x188] sm:$0xff] }
 0x5c4   : > { %3603 = vst.msk [vmem:[#allocation2 + $0x19e] sm:$0xfc] %vm3522_vm7, %v3403_v7  ;;  %8796 = vmatmul.mubr.msk.f32.gmra.mrb[48].mxu0 %vm3697_vm9, %v3670_v18  ;;  %v3405_v2 = vpop.permute.xlu0 %3404 }
 0x5c5   : > { %3604 = vst.msk [vmem:[#allocation2 + $0x1a6] sm:$0xff] %vm3524_vm6, %v3405_v2 }
 0x5c7   : > { %v3407_v3 = vpop.permute.xlu1 %3406  ;;  %v3671_v13 = vld [vmem:[#allocation2 + $0x190] sm:$0xff] }
 0x5c8   : > { %3605 = vst.msk [vmem:[#allocation2 + $0x1ae] sm:$0x3] %vm3526_vm8, %v3407_v3  ;;  %8798 = vmatprep.mubr.msk.f32.mxu0 %vm3697_vm9, %v3671_v13  ;;  %v3409_v20 = vpop.permute.xlu0 %3408  ;;  %v3672_v38 = vld [vmem:[#allocation2 + $0x198] sm:$0xff] }
 0x5c9   : > { %3606 = vst.msk [vmem:[#allocation2 + $0x1ae] sm:$0xfc] %vm3522_vm7, %v3409_v20  ;;  %8799 = vmatmul.mubr.msk.f32.gmra.mrb[50].mxu0 %vm3697_vm9, %v3672_v38 }
 0x5cb   : > { %v3411_v29 = vpop.permute.xlu1 %3410 }
 0x5cc   : > { %3607 = vst.msk [vmem:[#allocation2 + $0x1b6] sm:$0xff] %vm3524_vm6, %v3411_v29  ;;  %v3413_v0 = vpop.permute.xlu0 %3412  ;;  %v3673_v14 = vld [vmem:[#allocation2 + $0x1a0] sm:$0xff] }
 0x5cd   : > { %3608 = vst.msk [vmem:[#allocation2 + $0x1be] sm:$0x3] %vm3526_vm8, %v3413_v0  ;;  %8801 = vmatprep.mubr.msk.f32.mxu0 %vm3697_vm9, %v3673_v14 }
 0x5cf   : > { %v3415_v40 = vpop.permute.xlu1 %3414  ;;  %v3674_v22 = vld [vmem:[#allocation2 + $0x1a8] sm:$0xff] }
 0x5d0   : > { %3609 = vst.msk [vmem:[#allocation2 + $0x1be] sm:$0xfc] %vm3522_vm7, %v3415_v40  ;;  %8802 = vmatmul.mubr.msk.f32.gmra.mrb[52].mxu0 %vm3697_vm9, %v3674_v22  ;;  %v3417_v62 = vpop.permute.xlu0 %3416 }
 0x5d1   : > { %3610 = vst.msk [vmem:[#allocation2 + $0x1c6] sm:$0xff] %vm3524_vm6, %v3417_v62 }
 0x5d3   : > { %v3419_v15 = vpop.permute.xlu1 %3418  ;;  %v3675_v59 = vld [vmem:[#allocation2 + $0x1b0] sm:$0xff] }
 0x5d4   : > { %3611 = vst.msk [vmem:[#allocation2 + $0x1ce] sm:$0x3] %vm3526_vm8, %v3419_v15  ;;  %8804 = vmatprep.mubr.msk.f32.mxu0 %vm3697_vm9, %v3675_v59  ;;  %v3421_v57 = vpop.permute.xlu0 %3420  ;;  %v3676_v1 = vld [vmem:[#allocation2 + $0x1b8] sm:$0xff] }
 0x5d5   : > { %3612 = vst.msk [vmem:[#allocation2 + $0x1ce] sm:$0xfc] %vm3522_vm7, %v3421_v57  ;;  %8805 = vmatmul.mubr.msk.f32.gmra.mrb[54].mxu0 %vm3697_vm9, %v3676_v1 }
 0x5d7   : > { %v3423_v36 = vpop.permute.xlu1 %3422 }
 0x5d8   : > { %3613 = vst.msk [vmem:[#allocation2 + $0x1d6] sm:$0xff] %vm3524_vm6, %v3423_v36  ;;  %v3425_v32 = vpop.permute.xlu0 %3424  ;;  %v3677_v27 = vld [vmem:[#allocation2 + $0x1c0] sm:$0xff] }
 0x5d9   : > { %3614 = vst.msk [vmem:[#allocation2 + $0x1de] sm:$0x3] %vm3526_vm8, %v3425_v32  ;;  %8807 = vmatprep.mubr.msk.f32.mxu0 %vm3697_vm9, %v3677_v27 }
 0x5db   : > { %v3427_v60 = vpop.permute.xlu1 %3426  ;;  %v3678_v52 = vld [vmem:[#allocation2 + $0x1c8] sm:$0xff] }
 0x5dc   : > { %3615 = vst.msk [vmem:[#allocation2 + $0x1de] sm:$0xfc] %vm3522_vm7, %v3427_v60  ;;  %3618 = vst.msk [vmem:[#allocation2 + $0x1ee] sm:$0xfc] %vm3522_vm7, %v3427_v60  ;;  %8808 = vmatmul.mubr.msk.f32.gmra.mrb[56].mxu0 %vm3697_vm9, %v3678_v52  ;;  %v3429_v53 = vpop.permute.xlu0 %3428  ;;  %vm6528_vm7 = vcmask 386368  }
 0x5dd   : > { %3616 = vst.msk [vmem:[#allocation2 + $0x1e6] sm:$0xff] %vm3524_vm6, %v3429_v53  ;;  %3619 = vst.msk [vmem:[#allocation2 + $0x1f6] sm:$0xff] %vm3524_vm6, %v3429_v53  ;;  %vm6524_vm6 = vcmask 392514  }
 0x5df   : > { %v3431_v5 = vpop.permute.xlu1 %3430  ;;  %v3679_v54 = vld [vmem:[#allocation2 + $0x1d0] sm:$0xff] }
 0x5e0   : > { %3617 = vst.msk [vmem:[#allocation2 + $0x1ee] sm:$0x3] %vm3526_vm8, %v3431_v5  ;;  %3620 = vst.msk [vmem:[#allocation2 + $0x1fe] sm:$0x3] %vm3526_vm8, %v3431_v5  ;;  %8810 = vmatprep.mubr.msk.f32.mxu0 %vm3697_vm9, %v3679_v54  ;;  %v3680_v26 = vld [vmem:[#allocation2 + $0x1d8] sm:$0xff]  ;;  %vm6526_vm8 = vcmask 392512  }
 0x5e1   : > { %8811 = vmatmul.mubr.msk.f32.gmra.mrb[58].mxu0 %vm3697_vm9, %v3680_v26 }
 0x5e4   : > { %v3681_v50 = vld [vmem:[#allocation2 + $0x1e0] sm:$0xff]  ;;  %v3683_v23 = vld [vmem:[#allocation2 + $0x1f0] sm:$0xff] }
 0x5e5   : > { %8813 = vmatprep.mubr.msk.f32.mxu0 %vm3697_vm9, %v3681_v50 }
 0x5e7   : > { %v3682_v58 = vld [vmem:[#allocation2 + $0x1e8] sm:$0xff]  ;;  %v3684_v61 = vld [vmem:[#allocation2 + $0x1f8] sm:$0xff] }
 0x5e8   : > { %8814 = vmatmul.mubr.msk.f32.gmra.mrb[60].mxu0 %vm3697_vm9, %v3682_v58 }
 0x5e9   : > { %8816 = vmatprep.mubr.msk.f32.mxu0 %vm3697_vm9, %v3683_v23 }
 0x5ec   : > { %8817 = vmatmul.mubr.msk.f32.gmra.mrb[62].mxu0 %vm3697_vm9, %v3684_v61  ;;  %vm6803_vm9 = vcmask 458112  }
 0x60c   : > { %v8725_v21 = vpop.f32.mrb[0].mxu0 }
 0x60d   : > { %v3966_v46 = vadd.f32 %v8725_v21, %v11783_v34  ;;  %v3960_v6 = vpop.f32.mrb[1].mxu0 }
 0x60e   : > { %v3961_v47 = vadd.f32 %v11783_v34, %v3960_v6 }
 0x60f   : > { %v4280_v10 = vmax.f32 %v3966_v46, 0.0 }
 0x610   : > { %v4279_v48 = vmax.f32 %v3961_v47, 0.0 }
 0x611   : > { %v4408_v24 = vrot.slane %v4280_v10, 7  ;;  %v4597_v33 = vrot.slane %v4280_v10, 6 }
 0x612   : > { %v4407_v19 = vrot.slane %v4279_v48, 7 }
 0x613   : > { %v8728_v49 = vpop.f32.mrb[2].mxu0  ;;  %v11808_v55 = vsel %vm421_vm0, %v4408_v24, %v4597_v33 }
 0x614   : > { %v3976_v12 = vadd.f32 %v8728_v49, %v11783_v34  ;;  %v3970_v35 = vpop.f32.mrb[3].mxu0  ;;  %v11790_v51 = vsel %vm421_vm0, %v4407_v19, %v4408_v24  ;;  %v11793_v45 = vsel %vm421_vm0, %v4279_v48, %v4407_v19  ;;  %15372 = vst [vmem:[#allocation5_spill] sm:$0xff] %v11808_v55 }
 0x615   : > { %v3971_v43 = vadd.f32 %v11783_v34, %v3970_v35  ;;  %4850 = vrot.lane.b32.xlu0 %v11793_v45, %s8999_s25  ;;  %4852 = vrot.lane.b32.xlu1 %v11790_v51, %s8999_s25  ;;  %4726 = vst.msk [vmem:[#allocation3] sm:$0xff] %vm4725_vm10, %v11793_v45  ;;  %4728 = vst.msk [vmem:[#allocation3 + $0x10] sm:$0xff] %vm4725_vm10, %v11793_v45 }
 0x616   : > { %v4282_v42 = vmax.f32 %v3976_v12, 0.0  ;;  %4727 = vst.msk [vmem:[#allocation3 + $0x8] sm:$0xff] %vm4725_vm10, %v11790_v51  ;;  %4729 = vst.msk [vmem:[#allocation3 + $0x18] sm:$0xff] %vm4725_vm10, %v11790_v51 }
 0x617   : > { %v4281_v31 = vmax.f32 %v3971_v43, 0.0 }
 0x618   : > { %v4411_v44 = vrot.slane %v4282_v42, 7  ;;  %v8731_v37 = vpop.f32.mrb[4].mxu0  ;;  %v4598_v8 = vrot.slane %v4282_v42, 6 }
 0x619   : > { %v4410_v63 = vrot.slane %v4281_v31, 7  ;;  %v3986_v41 = vadd.f32 %v8731_v37, %v11783_v34  ;;  %v3980_v28 = vpop.f32.mrb[5].mxu0  ;;  %4854 = vrot.lane.b32.xlu0 %v11808_v55, %s8999_s25 }
 0x61a   : > { %v3981_v56 = vadd.f32 %v11783_v34, %v3980_v28  ;;  %v11827_v17 = vsel %vm421_vm0, %v4411_v44, %v4598_v8 }
 0x61b   : > { %v11811_v16 = vsel %vm421_vm0, %v4410_v63, %v4411_v44  ;;  %v11814_v9 = vsel %vm421_vm0, %v4281_v31, %v4410_v63  ;;  %v4284_v25 = vmax.f32 %v3986_v41, 0.0  ;;  %15375 = vst [vmem:[#allocation41_spill] sm:$0xff] %v11827_v17 }
 0x61c   : > { %15373 = vst [vmem:[#allocation8_spill] sm:$0xff] %v11811_v16  ;;  %15374 = vst [vmem:[#allocation4_spill] sm:$0xff] %v11814_v9  ;;  %4856 = vrot.lane.b32.xlu1 %v11814_v9, %s8999_s25  ;;  %v4283_v4 = vmax.f32 %v3981_v56, 0.0 }
 0x61d   : > { %4730 = vst.msk [vmem:[#allocation3 + $0x20] sm:$0xff] %vm4725_vm10, %v11814_v9  ;;  %4731 = vst.msk [vmem:[#allocation3 + $0x28] sm:$0xff] %vm4725_vm10, %v11811_v16  ;;  %v4414_v39 = vrot.slane %v4284_v25, 7  ;;  %4858 = vrot.lane.b32.xlu0 %v11811_v16, %s8999_s25  ;;  %v4599_v3 = vrot.slane %v4284_v25, 6 }
 0x61e   : > { %v4413_v11 = vrot.slane %v4283_v4, 7 }
 0x61f   : > { %v8734_v30 = vpop.f32.mrb[6].mxu0  ;;  %v11850_v40 = vsel %vm421_vm0, %v4414_v39, %v4599_v3 }
 0x620   : > { %v3996_v7 = vadd.f32 %v8734_v30, %v11783_v34  ;;  %v3990_v18 = vpop.f32.mrb[7].mxu0  ;;  %4860 = vrot.lane.b32.xlu1 %v11827_v17, %s8999_s25  ;;  %v11836_v13 = vsel %vm421_vm0, %v4413_v11, %v4414_v39  ;;  %v11839_v20 = vsel %vm421_vm0, %v4283_v4, %v4413_v11  ;;  %15377 = vst [vmem:[#allocation12_spill] sm:$0xff] %v11850_v40 }
 0x621   : > { %v3991_v2 = vadd.f32 %v11783_v34, %v3990_v18  ;;  %15376 = vst [vmem:[#allocation9_spill] sm:$0xff] %v11836_v13  ;;  %4862 = vrot.lane.b32.xlu0 %v11839_v20, %s8999_s25  ;;  %4732 = vst.msk [vmem:[#allocation3 + $0x30] sm:$0xff] %vm4725_vm10, %v11839_v20 }
 0x622   : > { %v4286_v38 = vmax.f32 %v3996_v7, 0.0  ;;  %4733 = vst.msk [vmem:[#allocation3 + $0x38] sm:$0xff] %vm4725_vm10, %v11836_v13 }
 0x623   : > { %v4285_v29 = vmax.f32 %v3991_v2, 0.0 }
 0x624   : > { %v4417_v0 = vrot.slane %v4286_v38, 7  ;;  %4864 = vrot.lane.b32.xlu1 %v11836_v13, %s8999_s25  ;;  %v8737_v22 = vpop.f32.mrb[8].mxu0  ;;  %v4600_v62 = vrot.slane %v4286_v38, 6 }
 0x625   : > { %v4416_v14 = vrot.slane %v4285_v29, 7  ;;  %v4006_v57 = vadd.f32 %v8737_v22, %v11783_v34  ;;  %v4000_v1 = vpop.f32.mrb[9].mxu0  ;;  %4866 = vrot.lane.b32.xlu0 %v11850_v40, %s8999_s25 }
 0x626   : > { %v4001_v36 = vadd.f32 %v11783_v34, %v4000_v1  ;;  %v11869_v60 = vsel %vm421_vm0, %v4417_v0, %v4600_v62 }
 0x627   : > { %v11853_v15 = vsel %vm421_vm0, %v4416_v14, %v4417_v0  ;;  %v11856_v59 = vsel %vm421_vm0, %v4285_v29, %v4416_v14  ;;  %v4288_v32 = vmax.f32 %v4006_v57, 0.0  ;;  %15379 = vst [vmem:[#allocation17_spill] sm:$0xff] %v11869_v60 }
 0x628   : > { %15378 = vst [vmem:[#allocation14_spill] sm:$0xff] %v11856_v59  ;;  %4868 = vrot.lane.b32.xlu1 %v11856_v59, %s8999_s25  ;;  %4734 = vst.msk [vmem:[#allocation3 + $0x40] sm:$0xff] %vm4725_vm10, %v11856_v59  ;;  %v4287_v27 = vmax.f32 %v4001_v36, 0.0 }
 0x629   : > { %4735 = vst.msk [vmem:[#allocation3 + $0x48] sm:$0xff] %vm4725_vm10, %v11853_v15  ;;  %v4420_v52 = vrot.slane %v4288_v32, 7  ;;  %4870 = vrot.lane.b32.xlu0 %v11853_v15, %s8999_s25  ;;  %v4601_v58 = vrot.slane %v4288_v32, 6 }
 0x62a   : > { %v4419_v5 = vrot.slane %v4287_v27, 7 }
 0x62b   : > { %v8740_v53 = vpop.f32.mrb[10].mxu0  ;;  %v11892_v10 = vsel %vm421_vm0, %v4420_v52, %v4601_v58 }
 0x62c   : > { %v4016_v54 = vadd.f32 %v8740_v53, %v11783_v34  ;;  %v4010_v26 = vpop.f32.mrb[11].mxu0  ;;  %4872 = vrot.lane.b32.xlu1 %v11869_v60, %s8999_s25  ;;  %v11878_v23 = vsel %vm421_vm0, %v4419_v5, %v4420_v52  ;;  %v11881_v61 = vsel %vm421_vm0, %v4287_v27, %v4419_v5  ;;  %15381 = vst [vmem:[#allocation21_spill] sm:$0xff] %v11892_v10 }
 0x62d   : > { %v4011_v50 = vadd.f32 %v11783_v34, %v4010_v26  ;;  %15380 = vst [vmem:[#allocation19_spill] sm:$0xff] %v11878_v23  ;;  %4874 = vrot.lane.b32.xlu0 %v11881_v61, %s8999_s25  ;;  %4736 = vst.msk [vmem:[#allocation3 + $0x50] sm:$0xff] %vm4725_vm10, %v11881_v61 }
 0x62e   : > { %v4290_v21 = vmax.f32 %v4016_v54, 0.0  ;;  %4737 = vst.msk [vmem:[#allocation3 + $0x58] sm:$0xff] %vm4725_vm10, %v11878_v23 }
 0x62f   : > { %v4289_v46 = vmax.f32 %v4011_v50, 0.0 }
 0x630   : > { %v4423_v6 = vrot.slane %v4290_v21, 7  ;;  %4876 = vrot.lane.b32.xlu1 %v11878_v23, %s8999_s25  ;;  %v8743_v48 = vpop.f32.mrb[12].mxu0  ;;  %v4602_v24 = vrot.slane %v4290_v21, 6 }
 0x631   : > { %v4422_v47 = vrot.slane %v4289_v46, 7  ;;  %v4026_v12 = vadd.f32 %v8743_v48, %v11783_v34  ;;  %v4020_v35 = vpop.f32.mrb[13].mxu0  ;;  %4878 = vrot.lane.b32.xlu0 %v11892_v10, %s8999_s25 }
 0x632   : > { %v4021_v43 = vadd.f32 %v11783_v34, %v4020_v35  ;;  %v11911_v31 = vsel %vm421_vm0, %v4423_v6, %v4602_v24 }
 0x633   : > { %v11895_v49 = vsel %vm421_vm0, %v4422_v47, %v4423_v6  ;;  %v11898_v19 = vsel %vm421_vm0, %v4289_v46, %v4422_v47  ;;  %v4292_v33 = vmax.f32 %v4026_v12, 0.0  ;;  %15383 = vst [vmem:[#allocation26_spill] sm:$0xff] %v11911_v31 }
 0x634   : > { %15382 = vst [vmem:[#allocation22_spill] sm:$0xff] %v11898_v19  ;;  %4880 = vrot.lane.b32.xlu1 %v11898_v19, %s8999_s25  ;;  %4738 = vst.msk [vmem:[#allocation3 + $0x60] sm:$0xff] %vm4725_vm10, %v11898_v19  ;;  %v4291_v42 = vmax.f32 %v4021_v43, 0.0 }
 0x635   : > { %4739 = vst.msk [vmem:[#allocation3 + $0x68] sm:$0xff] %vm4725_vm10, %v11895_v49  ;;  %v4426_v44 = vrot.slane %v4292_v33, 7  ;;  %4882 = vrot.lane.b32.xlu0 %v11895_v49, %s8999_s25  ;;  %v4603_v56 = vrot.slane %v4292_v33, 6 }
 0x636   : > { %v4425_v37 = vrot.slane %v4291_v42, 7 }
 0x637   : > { %v8746_v63 = vpop.f32.mrb[14].mxu0  ;;  %v11934_v18 = vsel %vm421_vm0, %v4426_v44, %v4603_v56 }
 0x638   : > { %v4036_v8 = vadd.f32 %v8746_v63, %v11783_v34  ;;  %v4030_v41 = vpop.f32.mrb[15].mxu0  ;;  %4884 = vrot.lane.b32.xlu1 %v11911_v31, %s8999_s25  ;;  %v11920_v25 = vsel %vm421_vm0, %v4425_v37, %v4426_v44  ;;  %v11923_v4 = vsel %vm421_vm0, %v4291_v42, %v4425_v37  ;;  %15385 = vst [vmem:[#allocation37_spill] sm:$0xff] %v11934_v18 }
 0x639   : > { %v4031_v28 = vadd.f32 %v11783_v34, %v4030_v41  ;;  %15384 = vst [vmem:[#allocation31_spill] sm:$0xff] %v11920_v25  ;;  %4886 = vrot.lane.b32.xlu0 %v11923_v4, %s8999_s25  ;;  %4740 = vst.msk [vmem:[#allocation3 + $0x70] sm:$0xff] %vm4725_vm10, %v11923_v4 }
 0x63a   : > { %v4294_v39 = vmax.f32 %v4036_v8, 0.0  ;;  %4741 = vst.msk [vmem:[#allocation3 + $0x78] sm:$0xff] %vm4725_vm10, %v11920_v25 }
 0x63b   : > { %v4293_v30 = vmax.f32 %v4031_v28, 0.0 }
 0x63c   : > { %v4429_v11 = vrot.slane %v4294_v39, 7  ;;  %4888 = vrot.lane.b32.xlu1 %v11920_v25, %s8999_s25  ;;  %v8749_v2 = vpop.f32.mrb[16].mxu0  ;;  %v4604_v3 = vrot.slane %v4294_v39, 6 }
 0x63d   : > { %v4428_v7 = vrot.slane %v4293_v30, 7  ;;  %v4046_v0 = vadd.f32 %v8749_v2, %v11783_v34  ;;  %v4040_v14 = vpop.f32.mrb[17].mxu0  ;;  %4890 = vrot.lane.b32.xlu0 %v11934_v18, %s8999_s25 }
 0x63e   : > { %v4041_v22 = vadd.f32 %v11783_v34, %v4040_v14  ;;  %v11953_v1 = vsel %vm421_vm0, %v4429_v11, %v4604_v3 }
 0x63f   : > { %v11937_v38 = vsel %vm421_vm0, %v4428_v7, %v4429_v11  ;;  %v11940_v29 = vsel %vm421_vm0, %v4293_v30, %v4428_v7  ;;  %v4296_v62 = vmax.f32 %v4046_v0, 0.0  ;;  %15387 = vst [vmem:[#allocation42_spill] sm:$0xff] %v11953_v1 }
 0x640   : > { %15386 = vst [vmem:[#allocation39_spill] sm:$0xff] %v11940_v29  ;;  %4892 = vrot.lane.b32.xlu1 %v11940_v29, %s8999_s25  ;;  %4742 = vst.msk [vmem:[#allocation3 + $0x80] sm:$0xff] %vm4725_vm10, %v11940_v29  ;;  %v4295_v57 = vmax.f32 %v4041_v22, 0.0 }
 0x641   : > { %4743 = vst.msk [vmem:[#allocation3 + $0x88] sm:$0xff] %vm4725_vm10, %v11937_v38  ;;  %v4432_v36 = vrot.slane %v4296_v62, 7  ;;  %4894 = vrot.lane.b32.xlu0 %v11937_v38, %s8999_s25  ;;  %v4605_v54 = vrot.slane %v4296_v62, 6 }
 0x642   : > { %v4431_v27 = vrot.slane %v4295_v57, 7 }
 0x643   : > { %v8752_v32 = vpop.f32.mrb[18].mxu0  ;;  %v11976_v47 = vsel %vm421_vm0, %v4432_v36, %v4605_v54 }
 0x644   : > { %v4056_v52 = vadd.f32 %v8752_v32, %v11783_v34  ;;  %v4050_v53 = vpop.f32.mrb[19].mxu0  ;;  %4896 = vrot.lane.b32.xlu1 %v11953_v1, %s8999_s25  ;;  %v11962_v26 = vsel %vm421_vm0, %v4431_v27, %v4432_v36  ;;  %v11965_v50 = vsel %vm421_vm0, %v4295_v57, %v4431_v27  ;;  %15389 = vst [vmem:[#allocation47_spill] sm:$0xff] %v11976_v47 }
 0x645   : > { %v4051_v5 = vadd.f32 %v11783_v34, %v4050_v53  ;;  %15388 = vst [vmem:[#allocation46_spill] sm:$0xff] %v11962_v26  ;;  %4898 = vrot.lane.b32.xlu0 %v11965_v50, %s8999_s25  ;;  %4744 = vst.msk [vmem:[#allocation3 + $0x90] sm:$0xff] %vm4725_vm10, %v11965_v50 }
 0x646   : > { %v4298_v58 = vmax.f32 %v4056_v52, 0.0  ;;  %4745 = vst.msk [vmem:[#allocation3 + $0x98] sm:$0xff] %vm4725_vm10, %v11962_v26 }
 0x647   : > { %v4297_v21 = vmax.f32 %v4051_v5, 0.0 }
 0x648   : > { %v4435_v46 = vrot.slane %v4298_v58, 7  ;;  %4900 = vrot.lane.b32.xlu1 %v11962_v26, %s8999_s25  ;;  %v8755_v48 = vpop.f32.mrb[20].mxu0  ;;  %v4606_v24 = vrot.slane %v4298_v58, 6 }
 0x649   : > { %v4434_v6 = vrot.slane %v4297_v21, 7  ;;  %v4066_v43 = vadd.f32 %v8755_v48, %v11783_v34  ;;  %v4060_v33 = vpop.f32.mrb[21].mxu0  ;;  %4902 = vrot.lane.b32.xlu0 %v11976_v47, %s8999_s25 }
 0x64a   : > { %v4061_v42 = vadd.f32 %v11783_v34, %v4060_v33  ;;  %v11995_v37 = vsel %vm421_vm0, %v4435_v46, %v4606_v24 }
 0x64b   : > { %v11979_v12 = vsel %vm421_vm0, %v4434_v6, %v4435_v46  ;;  %v11982_v35 = vsel %vm421_vm0, %v4297_v21, %v4434_v6  ;;  %v4300_v44 = vmax.f32 %v4066_v43, 0.0  ;;  %15391 = vst [vmem:[#allocation53_spill] sm:$0xff] %v11995_v37 }
 0x64c   : > { %15390 = vst [vmem:[#allocation51_spill] sm:$0xff] %v11982_v35  ;;  %4904 = vrot.lane.b32.xlu1 %v11982_v35, %s8999_s25  ;;  %4746 = vst.msk [vmem:[#allocation3 + $0xa0] sm:$0xff] %vm4725_vm10, %v11982_v35  ;;  %v4299_v63 = vmax.f32 %v4061_v42, 0.0 }
 0x64d   : > { %4747 = vst.msk [vmem:[#allocation3 + $0xa8] sm:$0xff] %vm4725_vm10, %v11979_v12  ;;  %v4438_v8 = vrot.slane %v4300_v44, 7  ;;  %4906 = vrot.lane.b32.xlu0 %v11979_v12, %s8999_s25  ;;  %v4607_v11 = vrot.slane %v4300_v44, 6 }
 0x64e   : > { %v4437_v28 = vrot.slane %v4299_v63, 7 }
 0x64f   : > { %v8758_v41 = vpop.f32.mrb[22].mxu0  ;;  %v12018_v62 = vsel %vm421_vm0, %v4438_v8, %v4607_v11 }
 0x650   : > { %v4076_v56 = vadd.f32 %v8758_v41, %v11783_v34  ;;  %v4070_v39 = vpop.f32.mrb[23].mxu0  ;;  %4908 = vrot.lane.b32.xlu1 %v11995_v37, %s8999_s25  ;;  %v12004_v7 = vsel %vm421_vm0, %v4437_v28, %v4438_v8  ;;  %v12007_v2 = vsel %vm421_vm0, %v4299_v63, %v4437_v28  ;;  %15393 = vst [vmem:[#allocation59_spill] sm:$0xff] %v12018_v62 }
 0x651   : > { %v4071_v30 = vadd.f32 %v11783_v34, %v4070_v39  ;;  %15392 = vst [vmem:[#allocation57_spill] sm:$0xff] %v12004_v7  ;;  %4910 = vrot.lane.b32.xlu0 %v12007_v2, %s8999_s25  ;;  %4748 = vst.msk [vmem:[#allocation3 + $0xb0] sm:$0xff] %vm4725_vm10, %v12007_v2 }
 0x652   : > { %v4302_v3 = vmax.f32 %v4076_v56, 0.0  ;;  %4749 = vst.msk [vmem:[#allocation3 + $0xb8] sm:$0xff] %vm4725_vm10, %v12004_v7 }
 0x653   : > { %v4301_v0 = vmax.f32 %v4071_v30, 0.0 }
 0x654   : > { %v4441_v14 = vrot.slane %v4302_v3, 7  ;;  %4912 = vrot.lane.b32.xlu1 %v12004_v7, %s8999_s25  ;;  %v8761_v57 = vpop.f32.mrb[24].mxu0  ;;  %v4608_v36 = vrot.slane %v4302_v3, 6 }
 0x655   : > { %v4440_v22 = vrot.slane %v4301_v0, 7  ;;  %v4086_v52 = vadd.f32 %v8761_v57, %v11783_v34  ;;  %v4080_v53 = vpop.f32.mrb[25].mxu0  ;;  %4914 = vrot.lane.b32.xlu0 %v12018_v62, %s8999_s25 }
 0x656   : > { %v4081_v5 = vadd.f32 %v11783_v34, %v4080_v53  ;;  %v12037_v21 = vsel %vm421_vm0, %v4441_v14, %v4608_v36 }
 0x657   : > { %v12021_v32 = vsel %vm421_vm0, %v4440_v22, %v4441_v14  ;;  %v12024_v27 = vsel %vm421_vm0, %v4301_v0, %v4440_v22  ;;  %v4304_v54 = vmax.f32 %v4086_v52, 0.0  ;;  %15395 = vst [vmem:[#allocation65_spill] sm:$0xff] %v12037_v21 }
 0x658   : > { %15394 = vst [vmem:[#allocation63_spill] sm:$0xff] %v12024_v27  ;;  %4916 = vrot.lane.b32.xlu1 %v12024_v27, %s8999_s25  ;;  %4750 = vst.msk [vmem:[#allocation3 + $0xc0] sm:$0xff] %vm4725_vm10, %v12024_v27  ;;  %v4303_v58 = vmax.f32 %v4081_v5, 0.0 }
 0x659   : > { %4751 = vst.msk [vmem:[#allocation3 + $0xc8] sm:$0xff] %vm4725_vm10, %v12021_v32  ;;  %v4444_v46 = vrot.slane %v4304_v54, 7  ;;  %4918 = vrot.lane.b32.xlu0 %v12021_v32, %s8999_s25  ;;  %v4609_v42 = vrot.slane %v4304_v54, 6 }
 0x65a   : > { %v4443_v48 = vrot.slane %v4303_v58, 7 }
 0x65b   : > { %v8764_v6 = vpop.f32.mrb[26].mxu0  ;;  %v12060_v39 = vsel %vm421_vm0, %v4444_v46, %v4609_v42 }
 0x65c   : > { %v4096_v24 = vadd.f32 %v8764_v6, %v11783_v34  ;;  %v4090_v43 = vpop.f32.mrb[27].mxu0  ;;  %4920 = vrot.lane.b32.xlu1 %v12037_v21, %s8999_s25  ;;  %v12046_v44 = vsel %vm421_vm0, %v4443_v48, %v4444_v46  ;;  %v12049_v63 = vsel %vm421_vm0, %v4303_v58, %v4443_v48  ;;  %15397 = vst [vmem:[#allocation80_spill] sm:$0xff] %v12060_v39 }
 0x65d   : > { %v4091_v33 = vadd.f32 %v11783_v34, %v4090_v43  ;;  %15396 = vst [vmem:[#allocation70_spill] sm:$0xff] %v12046_v44  ;;  %4922 = vrot.lane.b32.xlu0 %v12049_v63, %s8999_s25  ;;  %4752 = vst.msk [vmem:[#allocation3 + $0xd0] sm:$0xff] %vm4725_vm10, %v12049_v63 }
 0x65e   : > { %v4306_v8 = vmax.f32 %v4096_v24, 0.0  ;;  %4753 = vst.msk [vmem:[#allocation3 + $0xd8] sm:$0xff] %vm4725_vm10, %v12046_v44 }
 0x65f   : > { %v4305_v41 = vmax.f32 %v4091_v33, 0.0 }
 0x660   : > { %v4447_v28 = vrot.slane %v4306_v8, 7  ;;  %4924 = vrot.lane.b32.xlu1 %v12046_v44, %s8999_s25  ;;  %v8767_v30 = vpop.f32.mrb[28].mxu0  ;;  %v4610_v11 = vrot.slane %v4306_v8, 6 }
 0x661   : > { %v4446_v56 = vrot.slane %v4305_v41, 7  ;;  %v4106_v14 = vadd.f32 %v8767_v30, %v11783_v34  ;;  %v4100_v22 = vpop.f32.mrb[29].mxu0  ;;  %4926 = vrot.lane.b32.xlu0 %v12060_v39, %s8999_s25 }
 0x662   : > { %v4101_v57 = vadd.f32 %v11783_v34, %v4100_v22  ;;  %v12079_v5 = vsel %vm421_vm0, %v4447_v28, %v4610_v11 }
 0x663   : > { %v12063_v3 = vsel %vm421_vm0, %v4446_v56, %v4447_v28  ;;  %v12066_v0 = vsel %vm421_vm0, %v4305_v41, %v4446_v56  ;;  %v4308_v36 = vmax.f32 %v4106_v14, 0.0  ;;  %15399 = vst [vmem:[#allocation33_spill] sm:$0xff] %v12079_v5 }
 0x664   : > { %15398 = vst [vmem:[#allocation78_spill] sm:$0xff] %v12066_v0  ;;  %4928 = vrot.lane.b32.xlu1 %v12066_v0, %s8999_s25  ;;  %4754 = vst.msk [vmem:[#allocation3 + $0xe0] sm:$0xff] %vm4725_vm10, %v12066_v0  ;;  %v4307_v52 = vmax.f32 %v4101_v57, 0.0  ;;  %v8770_v53 = vpop.f32.mrb[30].mxu0 }
 0x665   : > { %4755 = vst.msk [vmem:[#allocation3 + $0xe8] sm:$0xff] %vm4725_vm10, %v12063_v3  ;;  %v4450_v54 = vrot.slane %v4308_v36, 7  ;;  %v4116_v58 = vadd.f32 %v8770_v53, %v11783_v34  ;;  %v4110_v46 = vpop.f32.mrb[31].mxu0  ;;  %4930 = vrot.lane.b32.xlu0 %v12063_v3, %s8999_s25  ;;  %v4611_v43 = vrot.slane %v4308_v36, 6 }
 0x666   : > { %v4449_v6 = vrot.slane %v4307_v52, 7  ;;  %v12085_v48 = vadd.f32 %v11783_v34, %v4110_v46 }
 0x667   : > { %v4310_v24 = vmax.f32 %v4116_v58, 0.0 }
 0x668   : > { %15400 = vst [vmem:[#allocation16_spill] sm:$0xff] %v12085_v48  ;;  %4932 = vrot.lane.b32.xlu1 %v12079_v5, %s8999_s25  ;;  %v12090_v33 = vsel %vm421_vm0, %v4449_v6, %v4450_v54  ;;  %v12093_v42 = vsel %vm421_vm0, %v4307_v52, %v4449_v6  ;;  %v14875_v8 = vmax.f32 %v12085_v48, 0.0  ;;  %v8773_v41 = vpop.f32.mrb[32].mxu0  ;;  %v12114_v52 = vsel %vm421_vm0, %v4450_v54, %v4611_v43 }
 0x669   : > { %15401 = vst [vmem:[#allocation24_spill] sm:$0xff] %v12090_v33  ;;  %v4453_v28 = vrot.slane %v4310_v24, 7  ;;  %v4612_v56 = vrot.slane %v4310_v24, 6  ;;  %v4126_v30 = vadd.f32 %v8773_v41, %v11783_v34  ;;  %v4120_v11 = vpop.f32.mrb[33].mxu0  ;;  %4934 = vrot.lane.b32.xlu0 %v12093_v42, %s8999_s25  ;;  %4756 = vst.msk [vmem:[#allocation3 + $0xf0] sm:$0xff] %vm4725_vm10, %v12093_v42 }
 0x66a   : > { %4757 = vst.msk [vmem:[#allocation3 + $0xf8] sm:$0xff] %vm4725_vm10, %v12090_v33  ;;  %v12105_v14 = vrot.slane %v14875_v8, 7  ;;  %v4121_v22 = vadd.f32 %v11783_v34, %v4120_v11  ;;  %15404 = vst [vmem:[#allocation35_spill] sm:$0xff] %v12114_v52 }
 0x66b   : > { %v4312_v57 = vmax.f32 %v4126_v30, 0.0  ;;  %v12111_v36 = vsel %vm421_vm0, %v4453_v28, %v4612_v56 }
 0x66c   : > { %15402 = vst [vmem:[#allocation28_spill] sm:$0xff] %v12105_v14  ;;  %4936 = vrot.lane.b32.xlu1 %v12090_v33, %s8999_s25  ;;  %15403 = vst [vmem:[#allocation29_spill] sm:$0xff] %v12111_v36  ;;  %v12118_v53 = vsel %vm421_vm0, %v12105_v14, %v4453_v28  ;;  %v4311_v58 = vmax.f32 %v4121_v22, 0.0  ;;  %v8776_v46 = vpop.f32.mrb[34].mxu0 }
 0x66d   : > { %15405 = vst [vmem:[#allocation36_spill] sm:$0xff] %v12118_v53  ;;  %v4456_v6 = vrot.slane %v4312_v57, 7  ;;  %v4136_v24 = vadd.f32 %v8776_v46, %v11783_v34  ;;  %v4130_v41 = vpop.f32.mrb[35].mxu0  ;;  %4938 = vrot.lane.b32.xlu0 %v12114_v52, %s8999_s25  ;;  %v4613_v11 = vrot.slane %v4312_v57, 6 }
 0x66e   : > { %v4455_v30 = vrot.slane %v4311_v58, 7  ;;  %v4131_v56 = vadd.f32 %v11783_v34, %v4130_v41 }
 0x66f   : > { %v4314_v8 = vmax.f32 %v4136_v24, 0.0  ;;  %v12145_v41 = vsel %vm421_vm0, %v4456_v6, %v4613_v11 }
 0x670   : > { %v12125_v54 = vsel %vm421_vm0, %v4455_v30, %v4456_v6  ;;  %v12128_v43 = vsel %vm421_vm0, %v4311_v58, %v4455_v30  ;;  %v4313_v28 = vmax.f32 %v4131_v56, 0.0  ;;  %15408 = vst [vmem:[#allocation83_spill] sm:$0xff] %v12145_v41 }
 0x671   : > { %15406 = vst [vmem:[#allocation77_spill] sm:$0xff] %v12125_v54  ;;  %15407 = vst [vmem:[#allocation82_spill] sm:$0xff] %v12128_v43  ;;  %v4459_v22 = vrot.slane %v4314_v8, 7  ;;  %4942 = vrot.lane.b32.xlu0 %v12125_v54, %s8999_s25  ;;  %4940 = vrot.lane.b32.xlu1 %v12128_v43, %s8999_s25  ;;  %v4614_v30 = vrot.slane %v4314_v8, 6 }
 0x672   : > { %4758 = vst.msk [vmem:[#allocation3 + $0x100] sm:$0xff] %vm4725_vm10, %v12128_v43  ;;  %4759 = vst.msk [vmem:[#allocation3 + $0x108] sm:$0xff] %vm4725_vm10, %v12125_v54  ;;  %v4458_v57 = vrot.slane %v4313_v28, 7 }
 0x673   : > { %v8779_v36 = vpop.f32.mrb[36].mxu0  ;;  %4760 = vst.msk [vmem:[#allocation3 + $0x110] sm:$0xff] %vm4725_vm10, %v12128_v43  ;;  %4761 = vst.msk [vmem:[#allocation3 + $0x118] sm:$0xff] %vm4725_vm10, %v12125_v54  ;;  %v12162_v6 = vsel %vm421_vm0, %v4459_v22, %v4614_v30 }
 0x674   : > { %v4146_v58 = vadd.f32 %v8779_v36, %v11783_v34  ;;  %v4140_v46 = vpop.f32.mrb[37].mxu0  ;;  %v12148_v56 = vsel %vm421_vm0, %v4458_v57, %v4459_v22  ;;  %v12151_v53 = vsel %vm421_vm0, %v4313_v28, %v4458_v57  ;;  %15411 = vst [vmem:[#allocation86_spill] sm:$0xff] %v12162_v6 }
 0x675   : > { %v4141_v24 = vadd.f32 %v11783_v34, %v4140_v46  ;;  %15409 = vst [vmem:[#allocation84_spill] sm:$0xff] %v12148_v56  ;;  %15410 = vst [vmem:[#allocation85_spill] sm:$0xff] %v12151_v53  ;;  %4946 = vrot.lane.b32.xlu0 %v12151_v53, %s8999_s25  ;;  %4944 = vrot.lane.b32.xlu1 %v12145_v41, %s8999_s25 }
 0x676   : > { %v4316_v48 = vmax.f32 %v4146_v58, 0.0  ;;  %4762 = vst.msk [vmem:[#allocation3 + $0x120] sm:$0xff] %vm4725_vm10, %v12151_v53  ;;  %4763 = vst.msk [vmem:[#allocation3 + $0x128] sm:$0xff] %vm4725_vm10, %v12148_v56 }
 0x677   : > { %v4315_v14 = vmax.f32 %v4141_v24, 0.0 }
 0x678   : > { %v4462_v8 = vrot.slane %v4316_v48, 7  ;;  %v8782_v11 = vpop.f32.mrb[38].mxu0  ;;  %v4615_v22 = vrot.slane %v4316_v48, 6 }
 0x679   : > { %v4461_v36 = vrot.slane %v4315_v14, 7  ;;  %v4156_v58 = vadd.f32 %v8782_v11, %v11783_v34  ;;  %v4150_v46 = vpop.f32.mrb[39].mxu0  ;;  %4950 = vrot.lane.b32.xlu0 %v12162_v6, %s8999_s25  ;;  %4948 = vrot.lane.b32.xlu1 %v12148_v56, %s8999_s25 }
 0x67a   : > { %v4151_v24 = vadd.f32 %v11783_v34, %v4150_v46  ;;  %v12186_v41 = vsel %vm421_vm0, %v4462_v8, %v4615_v22 }
 0x67b   : > { %v12165_v28 = vsel %vm421_vm0, %v4461_v36, %v4462_v8  ;;  %v12168_v57 = vsel %vm421_vm0, %v4315_v14, %v4461_v36  ;;  %v4318_v14 = vmax.f32 %v4156_v58, 0.0  ;;  %15414 = vst [vmem:[#allocation64_spill] sm:$0xff] %v12186_v41 }
 0x67c   : > { %15412 = vst [vmem:[#allocation87_spill] sm:$0xff] %v12165_v28  ;;  %15413 = vst [vmem:[#allocation40_spill] sm:$0xff] %v12168_v57  ;;  %v4317_v30 = vmax.f32 %v4151_v24, 0.0 }
 0x67d   : > { %4764 = vst.msk [vmem:[#allocation3 + $0x130] sm:$0xff] %vm4725_vm10, %v12168_v57  ;;  %4765 = vst.msk [vmem:[#allocation3 + $0x138] sm:$0xff] %vm4725_vm10, %v12165_v28  ;;  %v4465_v36 = vrot.slane %v4318_v14, 7  ;;  %4954 = vrot.lane.b32.xlu0 %v12165_v28, %s8999_s25  ;;  %4952 = vrot.lane.b32.xlu1 %v12168_v57, %s8999_s25  ;;  %v4616_v48 = vrot.slane %v4318_v14, 6 }
 0x67e   : > { %v4464_v56 = vrot.slane %v4317_v30, 7 }
 0x67f   : > { %v8785_v11 = vpop.f32.mrb[40].mxu0  ;;  %v12204_v22 = vsel %vm421_vm0, %v4465_v36, %v4616_v48 }
 0x680   : > { %v4166_v46 = vadd.f32 %v8785_v11, %v11783_v34  ;;  %v4160_v6 = vpop.f32.mrb[41].mxu0  ;;  %v12190_v58 = vsel %vm421_vm0, %v4464_v56, %v4465_v36  ;;  %v12193_v24 = vsel %vm421_vm0, %v4317_v30, %v4464_v56  ;;  %15417 = vst [vmem:[#allocation50_spill] sm:$0xff] %v12204_v22 }
 0x681   : > { %v4161_v53 = vadd.f32 %v11783_v34, %v4160_v6  ;;  %15415 = vst [vmem:[#allocation45_spill] sm:$0xff] %v12190_v58  ;;  %15416 = vst [vmem:[#allocation48_spill] sm:$0xff] %v12193_v24  ;;  %4958 = vrot.lane.b32.xlu0 %v12193_v24, %s8999_s25  ;;  %4956 = vrot.lane.b32.xlu1 %v12186_v41, %s8999_s25 }
 0x682   : > { %v4320_v28 = vmax.f32 %v4166_v46, 0.0  ;;  %4766 = vst.msk [vmem:[#allocation3 + $0x140] sm:$0xff] %vm4725_vm10, %v12193_v24  ;;  %4767 = vst.msk [vmem:[#allocation3 + $0x148] sm:$0xff] %vm4725_vm10, %v12190_v58 }
 0x683   : > { %v4319_v43 = vmax.f32 %v4161_v53, 0.0 }
 0x684   : > { %v4468_v8 = vrot.slane %v4320_v28, 7  ;;  %v8788_v56 = vpop.f32.mrb[42].mxu0 }
 0x685   : > { %v4467_v6 = vrot.slane %v4319_v43, 7  ;;  %v4176_v30 = vadd.f32 %v8788_v56, %v11783_v34  ;;  %v4170_v11 = vpop.f32.mrb[43].mxu0  ;;  %4962 = vrot.lane.b32.xlu0 %v12204_v22, %s8999_s25  ;;  %4960 = vrot.lane.b32.xlu1 %v12190_v58, %s8999_s25 }
 0x686   : > { %v4171_v36 = vadd.f32 %v11783_v34, %v4170_v11 }
 0x687   : > { %v12207_v53 = vsel %vm421_vm0, %v4467_v6, %v4468_v8  ;;  %v12210_v14 = vsel %vm421_vm0, %v4319_v43, %v4467_v6  ;;  %v4617_v43 = vrot.slane %v4320_v28, 6  ;;  %v4322_v46 = vmax.f32 %v4176_v30, 0.0  ;;  %v4851_v48 = vpop.permute.xlu0 %4850  ;;  %v4853_v6 = vpop.permute.xlu1 %4852 }
 0x688   : > { %15418 = vst [vmem:[#allocation56_spill] sm:$0xff] %v12207_v53  ;;  %15419 = vst [vmem:[#allocation62_spill] sm:$0xff] %v12210_v14  ;;  %v4321_v56 = vmax.f32 %v4171_v36, 0.0 }
 0x689   : > { %4768 = vst.msk [vmem:[#allocation3 + $0x150] sm:$0xff] %vm4725_vm10, %v12210_v14  ;;  %4769 = vst.msk [vmem:[#allocation3 + $0x158] sm:$0xff] %vm4725_vm10, %v12207_v53  ;;  %v4471_v11 = vrot.slane %v4322_v46, 7  ;;  %4966 = vrot.lane.b32.xlu0 %v12207_v53, %s8999_s25  ;;  %4964 = vrot.lane.b32.xlu1 %v12210_v14, %s8999_s25  ;;  %v12232_v22 = vsel %vm421_vm0, %v4468_v8, %v4617_v43 }
 0x68a   : > { %5121 = vst.msk [vmem:[#allocation3 - $0x1] sm:$0xfe] %vm5120_vm11, %v4851_v48  ;;  %5126 = vst.msk [vmem:[#allocation3 + $0xf] sm:$0xfe] %vm5120_vm11, %v4851_v48  ;;  %v4470_v28 = vrot.slane %v4321_v56, 7 }
 0x68b   : > { %5123 = vst.msk [vmem:[#allocation3 + $0x7] sm:$0xff] %vm5122_vm12, %v4853_v6  ;;  %5127 = vst.msk [vmem:[#allocation3 + $0x17] sm:$0xff] %vm5122_vm12, %v4853_v6  ;;  %v8791_v58 = vpop.f32.mrb[44].mxu0  ;;  %v4855_v41 = vpop.permute.xlu0 %4854  ;;  %v4618_v6 = vrot.slane %v4322_v46, 6 }
 0x68c   : > { %v4186_v30 = vadd.f32 %v8791_v58, %v11783_v34  ;;  %v4180_v36 = vpop.f32.mrb[45].mxu0  ;;  %15420 = vst [vmem:[#allocation68_spill] sm:$0xff] %v12232_v22  ;;  %v12236_v24 = vsel %vm421_vm0, %v4470_v28, %v4471_v11  ;;  %v12239_v53 = vsel %vm421_vm0, %v4321_v56, %v4470_v28  ;;  %5125 = vst.msk [vmem:[#allocation3 + $0xf] sm:$0x1] %vm5124_vm13, %v4855_v41 }
 0x68d   : > { %v4181_v48 = vadd.f32 %v11783_v34, %v4180_v36  ;;  %15421 = vst [vmem:[#allocation81_spill] sm:$0xff] %v12236_v24  ;;  %15422 = vst [vmem:[#allocation7_spill] sm:$0xff] %v12239_v53  ;;  %4970 = vrot.lane.b32.xlu0 %v12239_v53, %s8999_s25  ;;  %4968 = vrot.lane.b32.xlu1 %v12232_v22, %s8999_s25 }
 0x68e   : > { %v4324_v57 = vmax.f32 %v4186_v30, 0.0  ;;  %5128 = vst.msk [vmem:[#allocation3 + $0x1f] sm:$0x1] %vm5124_vm13, %v4855_v41  ;;  %v4857_v58 = vpop.permute.xlu1 %4856  ;;  %v12253_v41 = vsel %vm421_vm0, %v4471_v11, %v4618_v6 }
 0x68f   : > { %4770 = vst.msk [vmem:[#allocation3 + $0x160] sm:$0xff] %vm4725_vm10, %v12239_v53  ;;  %4771 = vst.msk [vmem:[#allocation3 + $0x168] sm:$0xff] %vm4725_vm10, %v12236_v24  ;;  %v4323_v8 = vmax.f32 %v4181_v48, 0.0  ;;  %v4859_v56 = vpop.permute.xlu0 %4858 }
 0x690   : > { %5129 = vst.msk [vmem:[#allocation3 + $0x1f] sm:$0xfe] %vm5120_vm11, %v4857_v58  ;;  %v4474_v43 = vrot.slane %v4324_v57, 7  ;;  %15423 = vst [vmem:[#allocation58_spill] sm:$0xff] %v12253_v41  ;;  %v8794_v28 = vpop.f32.mrb[46].mxu0  ;;  %v4619_v6 = vrot.slane %v4324_v57, 6 }
 0x691   : > { %v4473_v46 = vrot.slane %v4323_v8, 7  ;;  %5130 = vst.msk [vmem:[#allocation3 + $0x27] sm:$0xff] %vm5122_vm12, %v4859_v56  ;;  %v4196_v58 = vadd.f32 %v8794_v28, %v11783_v34  ;;  %v4190_v22 = vpop.f32.mrb[47].mxu0  ;;  %4974 = vrot.lane.b32.xlu0 %v12253_v41, %s8999_s25  ;;  %4972 = vrot.lane.b32.xlu1 %v12236_v24, %s8999_s25 }
 0x692   : > { %v4861_v30 = vpop.permute.xlu1 %4860  ;;  %v4191_v11 = vadd.f32 %v11783_v34, %v4190_v22 }
 0x693   : > { %v12257_v36 = vsel %vm421_vm0, %v4473_v46, %v4474_v43  ;;  %v12260_v48 = vsel %vm421_vm0, %v4323_v8, %v4473_v46  ;;  %5131 = vst.msk [vmem:[#allocation3 + $0x2f] sm:$0x1] %vm5124_vm13, %v4861_v30  ;;  %v4326_v8 = vmax.f32 %v4196_v58, 0.0  ;;  %v4863_v46 = vpop.permute.xlu0 %4862  ;;  %v12281_v58 = vsel %vm421_vm0, %v4474_v43, %v4619_v6 }
 0x694   : > { %15424 = vst [vmem:[#allocation6_spill] sm:$0xff] %v12257_v36  ;;  %15425 = vst [vmem:[#allocation10_spill] sm:$0xff] %v12260_v48  ;;  %v4325_v56 = vmax.f32 %v4191_v11, 0.0 }
 0x695   : > { %4772 = vst.msk [vmem:[#allocation3 + $0x170] sm:$0xff] %vm4725_vm10, %v12260_v48  ;;  %4773 = vst.msk [vmem:[#allocation3 + $0x178] sm:$0xff] %vm4725_vm10, %v12257_v36  ;;  %v4477_v30 = vrot.slane %v4326_v8, 7  ;;  %4978 = vrot.lane.b32.xlu0 %v12257_v36, %s8999_s25  ;;  %4976 = vrot.lane.b32.xlu1 %v12260_v48, %s8999_s25  ;;  %v4620_v53 = vrot.slane %v4326_v8, 6 }
 0x696   : > { %5132 = vst.msk [vmem:[#allocation3 + $0x2f] sm:$0xfe] %vm5120_vm11, %v4863_v46  ;;  %v4865_v28 = vpop.permute.xlu1 %4864  ;;  %v4476_v24 = vrot.slane %v4325_v56, 7  ;;  %15426 = vst [vmem:[#allocation11_spill] sm:$0xff] %v12281_v58 }
 0x697   : > { %5133 = vst.msk [vmem:[#allocation3 + $0x37] sm:$0xff] %vm5122_vm12, %v4865_v28  ;;  %v8797_v41 = vpop.f32.mrb[48].mxu0  ;;  %v4867_v46 = vpop.permute.xlu0 %4866  ;;  %v12301_v8 = vsel %vm421_vm0, %v4477_v30, %v4620_v53 }
 0x698   : > { %v4206_v22 = vadd.f32 %v8797_v41, %v11783_v34  ;;  %v4200_v57 = vpop.f32.mrb[49].mxu0  ;;  %v12285_v28 = vsel %vm421_vm0, %v4476_v24, %v4477_v30  ;;  %v12288_v14 = vsel %vm421_vm0, %v4325_v56, %v4476_v24  ;;  %5134 = vst.msk [vmem:[#allocation3 + $0x3f] sm:$0x1] %vm5124_vm13, %v4867_v46  ;;  %15429 = vst [vmem:[#allocation18_spill] sm:$0xff] %v12301_v8 }
 0x699   : > { %v4201_v11 = vadd.f32 %v11783_v34, %v4200_v57  ;;  %15427 = vst [vmem:[#allocation13_spill] sm:$0xff] %v12285_v28  ;;  %15428 = vst [vmem:[#allocation15_spill] sm:$0xff] %v12288_v14  ;;  %4982 = vrot.lane.b32.xlu0 %v12288_v14, %s8999_s25  ;;  %4980 = vrot.lane.b32.xlu1 %v12281_v58, %s8999_s25 }
 0x69a   : > { %v4328_v36 = vmax.f32 %v4206_v22, 0.0  ;;  %v4869_v48 = vpop.permute.xlu1 %4868  ;;  %4774 = vst.msk [vmem:[#allocation3 + $0x180] sm:$0xff] %vm4725_vm10, %v12288_v14  ;;  %4775 = vst.msk [vmem:[#allocation3 + $0x188] sm:$0xff] %vm4725_vm10, %v12285_v28 }
 0x69b   : > { %v4327_v43 = vmax.f32 %v4201_v11, 0.0  ;;  %5135 = vst.msk [vmem:[#allocation3 + $0x3f] sm:$0xfe] %vm5120_vm11, %v4869_v48  ;;  %v4871_v6 = vpop.permute.xlu0 %4870 }
 0x69c   : > { %v4480_v24 = vrot.slane %v4328_v36, 7  ;;  %5136 = vst.msk [vmem:[#allocation3 + $0x47] sm:$0xff] %vm5122_vm12, %v4871_v6  ;;  %v8800_v56 = vpop.f32.mrb[50].mxu0  ;;  %v4621_v30 = vrot.slane %v4328_v36, 6 }
 0x69d   : > { %v4479_v41 = vrot.slane %v4327_v43, 7  ;;  %v4216_v11 = vadd.f32 %v8800_v56, %v11783_v34  ;;  %v4210_v46 = vpop.f32.mrb[51].mxu0  ;;  %4986 = vrot.lane.b32.xlu0 %v12301_v8, %s8999_s25  ;;  %4984 = vrot.lane.b32.xlu1 %v12285_v28, %s8999_s25 }
 0x69e   : > { %v4873_v22 = vpop.permute.xlu1 %4872  ;;  %v4211_v53 = vadd.f32 %v11783_v34, %v4210_v46 }
 0x69f   : > { %v12305_v57 = vsel %vm421_vm0, %v4479_v41, %v4480_v24  ;;  %v12308_v48 = vsel %vm421_vm0, %v4327_v43, %v4479_v41  ;;  %5137 = vst.msk [vmem:[#allocation3 + $0x4f] sm:$0x1] %vm5124_vm13, %v4873_v22  ;;  %v4330_v43 = vmax.f32 %v4216_v11, 0.0  ;;  %v4875_v41 = vpop.permute.xlu0 %4874  ;;  %v12329_v11 = vsel %vm421_vm0, %v4480_v24, %v4621_v30 }
 0x6a0   : > { %15430 = vst [vmem:[#allocation20_spill] sm:$0xff] %v12305_v57  ;;  %15431 = vst [vmem:[#allocation25_spill] sm:$0xff] %v12308_v48  ;;  %v4329_v6 = vmax.f32 %v4211_v53, 0.0 }
 0x6a1   : > { %4776 = vst.msk [vmem:[#allocation3 + $0x190] sm:$0xff] %vm4725_vm10, %v12308_v48  ;;  %4777 = vst.msk [vmem:[#allocation3 + $0x198] sm:$0xff] %vm4725_vm10, %v12305_v57  ;;  %v4483_v22 = vrot.slane %v4330_v43, 7  ;;  %4990 = vrot.lane.b32.xlu0 %v12305_v57, %s8999_s25  ;;  %4988 = vrot.lane.b32.xlu1 %v12308_v48, %s8999_s25  ;;  %v4622_v58 = vrot.slane %v4330_v43, 6 }
 0x6a2   : > { %5138 = vst.msk [vmem:[#allocation3 + $0x4f] sm:$0xfe] %vm5120_vm11, %v4875_v41  ;;  %v4877_v56 = vpop.permute.xlu1 %4876  ;;  %v4482_v28 = vrot.slane %v4329_v6, 7  ;;  %15432 = vst [vmem:[#allocation23_spill] sm:$0xff] %v12329_v11 }
 0x6a3   : > { %5139 = vst.msk [vmem:[#allocation3 + $0x57] sm:$0xff] %vm5122_vm12, %v4877_v56  ;;  %v8803_v8 = vpop.f32.mrb[52].mxu0  ;;  %v4879_v41 = vpop.permute.xlu0 %4878  ;;  %v12349_v43 = vsel %vm421_vm0, %v4483_v22, %v4622_v58 }
 0x6a4   : > { %v4226_v46 = vadd.f32 %v8803_v8, %v11783_v34  ;;  %v4220_v36 = vpop.f32.mrb[53].mxu0  ;;  %v12333_v56 = vsel %vm421_vm0, %v4482_v28, %v4483_v22  ;;  %v12336_v14 = vsel %vm421_vm0, %v4329_v6, %v4482_v28  ;;  %5140 = vst.msk [vmem:[#allocation3 + $0x5f] sm:$0x1] %vm5124_vm13, %v4879_v41  ;;  %15435 = vst [vmem:[#allocation32_spill] sm:$0xff] %v12349_v43 }
 0x6a5   : > { %v4221_v53 = vadd.f32 %v11783_v34, %v4220_v36  ;;  %15433 = vst [vmem:[#allocation27_spill] sm:$0xff] %v12333_v56  ;;  %15434 = vst [vmem:[#allocation30_spill] sm:$0xff] %v12336_v14  ;;  %4994 = vrot.lane.b32.xlu0 %v12336_v14, %s8999_s25  ;;  %4992 = vrot.lane.b32.xlu1 %v12329_v11, %s8999_s25  ;;  %v12376_v11 = vld [vmem:[%s11780_s13] ss:$0 sm:$0xff] }
 0x6a6   : > { %v4332_v57 = vmax.f32 %v4226_v46, 0.0  ;;  %v4881_v48 = vpop.permute.xlu1 %4880  ;;  %4778 = vst.msk [vmem:[#allocation3 + $0x1a0] sm:$0xff] %vm4725_vm10, %v12336_v14  ;;  %4779 = vst.msk [vmem:[#allocation3 + $0x1a8] sm:$0xff] %vm4725_vm10, %v12333_v56 }
 0x6a7   : > { %v4331_v24 = vmax.f32 %v4221_v53, 0.0  ;;  %5141 = vst.msk [vmem:[#allocation3 + $0x5f] sm:$0xfe] %vm5120_vm11, %v4881_v48  ;;  %v4883_v30 = vpop.permute.xlu0 %4882 }
 0x6a8   : > { %v4486_v28 = vrot.slane %v4332_v57, 7  ;;  %5142 = vst.msk [vmem:[#allocation3 + $0x67] sm:$0xff] %vm5122_vm12, %v4883_v30  ;;  %v8806_v6 = vpop.f32.mrb[54].mxu0  ;;  %v4623_v22 = vrot.slane %v4332_v57, 6 }
 0x6a9   : > { %v4485_v8 = vrot.slane %v4331_v24, 7  ;;  %v4236_v53 = vadd.f32 %v8806_v6, %v11783_v34  ;;  %v4230_v41 = vpop.f32.mrb[55].mxu0  ;;  %4998 = vrot.lane.b32.xlu0 %v12349_v43, %s8999_s25  ;;  %4996 = vrot.lane.b32.xlu1 %v12333_v56, %s8999_s25 }
 0x6aa   : > { %v4885_v46 = vpop.permute.xlu1 %4884  ;;  %v4231_v58 = vadd.f32 %v11783_v34, %v4230_v41 }
 0x6ab   : > { %v12353_v36 = vsel %vm421_vm0, %v4485_v8, %v4486_v28  ;;  %v12356_v48 = vsel %vm421_vm0, %v4331_v24, %v4485_v8  ;;  %5143 = vst.msk [vmem:[#allocation3 + $0x6f] sm:$0x1] %vm5124_vm13, %v4885_v46  ;;  %v4334_v24 = vmax.f32 %v4236_v53, 0.0  ;;  %v4887_v8 = vpop.permute.xlu0 %4886  ;;  %v12380_v53 = vsel %vm421_vm0, %v4486_v28, %v4623_v22 }
 0x6ac   : > { %15436 = vst [vmem:[#allocation34_spill] sm:$0xff] %v12353_v36  ;;  %15437 = vst [vmem:[#allocation38_spill] sm:$0xff] %v12356_v48  ;;  %v4333_v30 = vmax.f32 %v4231_v58, 0.0 }
 0x6ad   : > { %4780 = vst.msk [vmem:[#allocation3 + $0x1b0] sm:$0xff] %vm4725_vm10, %v12356_v48  ;;  %4781 = vst.msk [vmem:[#allocation3 + $0x1b8] sm:$0xff] %vm4725_vm10, %v12353_v36  ;;  %v4489_v46 = vrot.slane %v4334_v24, 7  ;;  %5002 = vrot.lane.b32.xlu0 %v12353_v36, %s8999_s25  ;;  %5000 = vrot.lane.b32.xlu1 %v12356_v48, %s8999_s25 }
 0x6ae   : > { %5144 = vst.msk [vmem:[#allocation3 + $0x6f] sm:$0xfe] %vm5120_vm11, %v4887_v8  ;;  %v4889_v6 = vpop.permute.xlu1 %4888  ;;  %v4488_v43 = vrot.slane %v4333_v30, 7  ;;  %15438 = vst [vmem:[#allocation69_spill] sm:$0xff] %v12380_v53  ;;  %v4624_v8 = vrot.slane %v4334_v24, 6 }
 0x6af   : > { %5145 = vst.msk [vmem:[#allocation3 + $0x77] sm:$0xff] %vm5122_vm12, %v4889_v6  ;;  %v8809_v56 = vpop.f32.mrb[56].mxu0  ;;  %v4891_v58 = vpop.permute.xlu0 %4890 }
 0x6b0   : > { %v4246_v34 = vadd.f32 %v12376_v11, %v8809_v56  ;;  %v4240_v57 = vpop.f32.mrb[57].mxu0  ;;  %v12384_v6 = vsel %vm421_vm0, %v4488_v43, %v4489_v46  ;;  %v12387_v36 = vsel %vm421_vm0, %v4333_v30, %v4488_v43  ;;  %5146 = vst.msk [vmem:[#allocation3 + $0x7f] sm:$0x1] %vm5124_vm13, %v4891_v58  ;;  %v12400_v24 = vsel %vm421_vm0, %v4489_v46, %v4624_v8 }
 0x6b1   : > { %v4241_v41 = vadd.f32 %v12376_v11, %v4240_v57  ;;  %15439 = vst [vmem:[#allocation43_spill] sm:$0xff] %v12384_v6  ;;  %15440 = vst [vmem:[#allocation44_spill] sm:$0xff] %v12387_v36  ;;  %5006 = vrot.lane.b32.xlu0 %v12387_v36, %s8999_s25  ;;  %5004 = vrot.lane.b32.xlu1 %v12380_v53, %s8999_s25 }
 0x6b2   : > { %v4336_v48 = vmax.f32 %v4246_v34, 0.0  ;;  %v4893_v14 = vpop.permute.xlu1 %4892  ;;  %4782 = vst.msk [vmem:[#allocation3 + $0x1c0] sm:$0xff] %vm4725_vm10, %v12387_v36  ;;  %4783 = vst.msk [vmem:[#allocation3 + $0x1c8] sm:$0xff] %vm4725_vm10, %v12384_v6 }
 0x6b3   : > { %v4335_v56 = vmax.f32 %v4241_v41, 0.0  ;;  %5147 = vst.msk [vmem:[#allocation3 + $0x7f] sm:$0xfe] %vm5120_vm11, %v4893_v14  ;;  %v4895_v22 = vpop.permute.xlu0 %4894  ;;  %15441 = vst [vmem:[#allocation49_spill] sm:$0xff] %v12400_v24 }
 0x6b4   : > { %v4492_v28 = vrot.slane %v4336_v48, 7  ;;  %5148 = vst.msk [vmem:[#allocation3 + $0x87] sm:$0xff] %vm5122_vm12, %v4895_v22  ;;  %v8812_v30 = vpop.f32.mrb[58].mxu0  ;;  %v4625_v8 = vrot.slane %v4336_v48, 6 }
 0x6b5   : > { %v4491_v43 = vrot.slane %v4335_v56, 7  ;;  %v4256_v41 = vadd.f32 %v12376_v11, %v8812_v30  ;;  %v4250_v58 = vpop.f32.mrb[59].mxu0  ;;  %5010 = vrot.lane.b32.xlu0 %v12400_v24, %s8999_s25  ;;  %5008 = vrot.lane.b32.xlu1 %v12384_v6, %s8999_s25 }
 0x6b6   : > { %v4897_v34 = vpop.permute.xlu1 %4896  ;;  %v4251_v46 = vadd.f32 %v12376_v11, %v4250_v58 }
 0x6b7   : > { %v12404_v57 = vsel %vm421_vm0, %v4491_v43, %v4492_v28  ;;  %v12407_v14 = vsel %vm421_vm0, %v4335_v56, %v4491_v43  ;;  %5149 = vst.msk [vmem:[#allocation3 + $0x8f] sm:$0x1] %vm5124_vm13, %v4897_v34  ;;  %v4338_v56 = vmax.f32 %v4256_v41, 0.0  ;;  %v4899_v43 = vpop.permute.xlu0 %4898  ;;  %v12428_v41 = vsel %vm421_vm0, %v4492_v28, %v4625_v8 }
 0x6b8   : > { %15442 = vst [vmem:[#allocation52_spill] sm:$0xff] %v12404_v57  ;;  %15443 = vst [vmem:[#allocation54_spill] sm:$0xff] %v12407_v14  ;;  %v4337_v22 = vmax.f32 %v4251_v46, 0.0 }
 0x6b9   : > { %4784 = vst.msk [vmem:[#allocation3 + $0x1d0] sm:$0xff] %vm4725_vm10, %v12407_v14  ;;  %4785 = vst.msk [vmem:[#allocation3 + $0x1d8] sm:$0xff] %vm4725_vm10, %v12404_v57  ;;  %v4495_v34 = vrot.slane %v4338_v56, 7  ;;  %5014 = vrot.lane.b32.xlu0 %v12404_v57, %s8999_s25  ;;  %5012 = vrot.lane.b32.xlu1 %v12407_v14, %s8999_s25  ;;  %v4626_v53 = vrot.slane %v4338_v56, 6 }
 0x6ba   : > { %5150 = vst.msk [vmem:[#allocation3 + $0x8f] sm:$0xfe] %vm5120_vm11, %v4899_v43  ;;  %v4901_v30 = vpop.permute.xlu1 %4900  ;;  %v4494_v6 = vrot.slane %v4337_v22, 7  ;;  %15444 = vst [vmem:[#allocation55_spill] sm:$0xff] %v12428_v41 }
 0x6bb   : > { %5151 = vst.msk [vmem:[#allocation3 + $0x97] sm:$0xff] %vm5122_vm12, %v4901_v30  ;;  %v8815_v24 = vpop.f32.mrb[60].mxu0  ;;  %v4903_v43 = vpop.permute.xlu0 %4902 }
 0x6bc   : > { %v4266_v58 = vadd.f32 %v12376_v11, %v8815_v24  ;;  %v4260_v48 = vpop.f32.mrb[61].mxu0  ;;  %v12432_v30 = vsel %vm421_vm0, %v4494_v6, %v4495_v34  ;;  %v12435_v36 = vsel %vm421_vm0, %v4337_v22, %v4494_v6  ;;  %5152 = vst.msk [vmem:[#allocation3 + $0x9f] sm:$0x1] %vm5124_vm13, %v4903_v43 }
 0x6bd   : > { %v4261_v46 = vadd.f32 %v12376_v11, %v4260_v48  ;;  %15445 = vst [vmem:[#allocation60_spill] sm:$0xff] %v12432_v30  ;;  %15446 = vst [vmem:[#allocation61_spill] sm:$0xff] %v12435_v36  ;;  %5018 = vrot.lane.b32.xlu0 %v12435_v36, %s8999_s25  ;;  %5016 = vrot.lane.b32.xlu1 %v12428_v41, %s8999_s25 }
 0x6be   : > { %v4340_v57 = vmax.f32 %v4266_v58, 0.0  ;;  %v4905_v14 = vpop.permute.xlu1 %4904  ;;  %4786 = vst.msk [vmem:[#allocation3 + $0x1e0] sm:$0xff] %vm4725_vm10, %v12435_v36  ;;  %4787 = vst.msk [vmem:[#allocation3 + $0x1e8] sm:$0xff] %vm4725_vm10, %v12432_v30 }
 0x6bf   : > { %v4339_v28 = vmax.f32 %v4261_v46, 0.0  ;;  %5153 = vst.msk [vmem:[#allocation3 + $0x9f] sm:$0xfe] %vm5120_vm11, %v4905_v14  ;;  %v8818_v24 = vpop.f32.mrb[62].mxu0  ;;  %v4907_v48 = vpop.permute.xlu0 %4906  ;;  %v12452_v46 = vsel %vm421_vm0, %v4495_v34, %v4626_v53 }
 0x6c0   : > { %v4498_v6 = vrot.slane %v4340_v57, 7  ;;  %v4276_v8 = vadd.f32 %v12376_v11, %v8818_v24  ;;  %v4270_v56 = vpop.f32.mrb[63].mxu0  ;;  %15448 = vst [vmem:[#allocation67_spill] sm:$0xff] %v12452_v46  ;;  %5154 = vst.msk [vmem:[#allocation3 + $0xa7] sm:$0xff] %vm5122_vm12, %v4907_v48 }
 0x6c1   : > { %v4497_v22 = vrot.slane %v4339_v28, 7  ;;  %v12449_v58 = vadd.f32 %v12376_v11, %v4270_v56  ;;  %5022 = vrot.lane.b32.xlu0 %v12452_v46, %s8999_s25  ;;  %5020 = vrot.lane.b32.xlu1 %v12432_v30, %s8999_s25 }
 0x6c2   : > { %v4342_v14 = vmax.f32 %v4276_v8, 0.0  ;;  %v4909_v43 = vpop.permute.xlu1 %4908  ;;  %v4627_v8 = vrot.slane %v4340_v57, 6 }
 0x6c3   : > { %15447 = vst [vmem:[#allocation66_spill] sm:$0xff] %v12449_v58  ;;  %v12456_v36 = vsel %vm421_vm0, %v4497_v22, %v4498_v6  ;;  %v12459_v41 = vsel %vm421_vm0, %v4339_v28, %v4497_v22  ;;  %v14958_v24 = vmax.f32 %v12449_v58, 0.0  ;;  %5155 = vst.msk [vmem:[#allocation3 + $0xaf] sm:$0x1] %vm5124_vm13, %v4909_v43  ;;  %v4911_v28 = vpop.permute.xlu0 %4910  ;;  %v15486_v58 = vld [vmem:[#allocation69_spill] sm:$0xff] }
 0x6c4   : > { %15449 = vst [vmem:[#allocation72_spill] sm:$0xff] %v12456_v36  ;;  %4788 = vst.msk [vmem:[#allocation3 + $0x1f0] sm:$0xff] %vm4725_vm10, %v12459_v41  ;;  %v4501_v11 = vrot.slane %v4342_v14, 7  ;;  %v4628_v53 = vrot.slane %v4342_v14, 6  ;;  %v12489_v57 = vsel %vm421_vm0, %v4498_v6, %v4627_v8 }
 0x6c5   : > { %4789 = vst.msk [vmem:[#allocation3 + $0x1f8] sm:$0xff] %vm4725_vm10, %v12456_v36  ;;  %v12473_v34 = vrot.slane %v14958_v24, 7  ;;  %5026 = vrot.lane.b32.xlu0 %v12456_v36, %s8999_s25  ;;  %5024 = vrot.lane.b32.xlu1 %v12459_v41, %s8999_s25  ;;  %15453 = vst [vmem:[#allocation76_spill] sm:$0xff] %v12489_v57  ;;  %v15458_v24 = vld [vmem:[#allocation84_spill] sm:$0xff]  ;;  %vm7140_vm10 = vcmask 523712  }
 0x6c6   : > { %5156 = vst.msk [vmem:[#allocation3 + $0xaf] sm:$0xfe] %vm5120_vm11, %v4911_v28  ;;  %v4913_v56 = vpop.permute.xlu1 %4912  ;;  %v12477_v22 = vsel %vm421_vm0, %v4501_v11, %v4628_v53 }
 0x6c7   : > { %15450 = vst [vmem:[#allocation71_spill] sm:$0xff] %v12473_v34  ;;  %15451 = vst [vmem:[#allocation73_spill] sm:$0xff] %v12477_v22  ;;  %v12481_v48 = vsel %vm421_vm0, %v12473_v34, %v4501_v11  ;;  %v4915_v14 = vpop.permute.xlu0 %4914  ;;  %v15459_v22 = vld [vmem:[#allocation87_spill] sm:$0xff]  ;;  %v15487_v34 = vld [vmem:[#allocation49_spill] sm:$0xff] }
 0x6c8   : > { %15452 = vst [vmem:[#allocation74_spill] sm:$0xff] %v12481_v48  ;;  %5157 = vst.msk [vmem:[#allocation3 + $0xb7] sm:$0xff] %vm5122_vm12, %v4913_v56  ;;  %v15484_v48 = vld [vmem:[#allocation38_spill] sm:$0xff] }
 0x6c9   : > { %5158 = vst.msk [vmem:[#allocation3 + $0xbf] sm:$0x1] %vm5124_vm13, %v4915_v14  ;;  %5219 = vrot.lane.b32.xlu0 %v11793_v45, %s9001_s27  ;;  %5028 = vrot.lane.b32.xlu1 %v12489_v57, %s8999_s25 }
 0x6ca   : > { %v4917_v43 = vpop.permute.xlu1 %4916 }
 0x6cb   : > { %5159 = vst.msk [vmem:[#allocation3 + $0xbf] sm:$0xfe] %vm5120_vm11, %v4917_v43  ;;  %v4919_v11 = vpop.permute.xlu0 %4918 }
 0x6cc   : > { %5160 = vst.msk [vmem:[#allocation3 + $0xc7] sm:$0xff] %vm5122_vm12, %v4919_v11 }
 0x6cd   : > { %5223 = vrot.lane.b32.xlu0 %v11808_v55, %s9001_s27  ;;  %5221 = vrot.lane.b32.xlu1 %v11790_v51, %s9001_s27  ;;  %v15482_v55 = vld [vmem:[#allocation27_spill] sm:$0xff] }
 0x6ce   : > { %v4921_v53 = vpop.permute.xlu1 %4920 }
 0x6cf   : > { %5161 = vst.msk [vmem:[#allocation3 + $0xcf] sm:$0x1] %vm5124_vm13, %v4921_v53  ;;  %v4923_v6 = vpop.permute.xlu0 %4922 }
 0x6d0   : > { %5162 = vst.msk [vmem:[#allocation3 + $0xcf] sm:$0xfe] %vm5120_vm11, %v4923_v6 }
 0x6d1   : > { %5227 = vrot.lane.b32.xlu0 %v11811_v16, %s9001_s27  ;;  %5225 = vrot.lane.b32.xlu1 %v11814_v9, %s9001_s27 }
 0x6d2   : > { %v4925_v28 = vpop.permute.xlu1 %4924 }
 0x6d3   : > { %5163 = vst.msk [vmem:[#allocation3 + $0xd7] sm:$0xff] %vm5122_vm12, %v4925_v28  ;;  %v4927_v8 = vpop.permute.xlu0 %4926 }
 0x6d4   : > { %5164 = vst.msk [vmem:[#allocation3 + $0xdf] sm:$0x1] %vm5124_vm13, %v4927_v8 }
 0x6d5   : > { %5231 = vrot.lane.b32.xlu0 %v11839_v20, %s9001_s27  ;;  %5229 = vrot.lane.b32.xlu1 %v11827_v17, %s9001_s27  ;;  %v15481_v17 = vld [vmem:[#allocation32_spill] sm:$0xff] }
 0x6d6   : > { %v4929_v56 = vpop.permute.xlu1 %4928 }
 0x6d7   : > { %5165 = vst.msk [vmem:[#allocation3 + $0xdf] sm:$0xfe] %vm5120_vm11, %v4929_v56  ;;  %v4931_v14 = vpop.permute.xlu0 %4930 }
 0x6d8   : > { %5166 = vst.msk [vmem:[#allocation3 + $0xe7] sm:$0xff] %vm5122_vm12, %v4931_v14 }
 0x6d9   : > { %5235 = vrot.lane.b32.xlu0 %v11850_v40, %s9001_s27  ;;  %5233 = vrot.lane.b32.xlu1 %v11836_v13, %s9001_s27  ;;  %v15480_v40 = vld [vmem:[#allocation23_spill] sm:$0xff] }
 0x6da   : > { %v4933_v43 = vpop.permute.xlu1 %4932 }
 0x6db   : > { %5167 = vst.msk [vmem:[#allocation3 + $0xef] sm:$0x1] %vm5124_vm13, %v4933_v43  ;;  %v4935_v11 = vpop.permute.xlu0 %4934 }
 0x6dc   : > { %5168 = vst.msk [vmem:[#allocation3 + $0xef] sm:$0xfe] %vm5120_vm11, %v4935_v11 }
 0x6dd   : > { %5239 = vrot.lane.b32.xlu0 %v11853_v15, %s9001_s27  ;;  %5237 = vrot.lane.b32.xlu1 %v11856_v59, %s9001_s27 }
 0x6de   : > { %v4937_v53 = vpop.permute.xlu1 %4936 }
 0x6df   : > { %5169 = vst.msk [vmem:[#allocation3 + $0xf7] sm:$0xff] %vm5122_vm12, %v4937_v53  ;;  %v4939_v6 = vpop.permute.xlu0 %4938 }
 0x6e0   : > { %5170 = vst.msk [vmem:[#allocation3 + $0xff] sm:$0x1] %vm5124_vm13, %v4939_v6 }
 0x6e1   : > { %5243 = vrot.lane.b32.xlu0 %v11881_v61, %s9001_s27  ;;  %5241 = vrot.lane.b32.xlu1 %v11869_v60, %s9001_s27  ;;  %v15478_v60 = vld [vmem:[#allocation25_spill] sm:$0xff] }
 0x6e3   : > { %v4943_v28 = vpop.permute.xlu0 %4942  ;;  %v4941_v8 = vpop.permute.xlu1 %4940 }
 0x6e4   : > { %5172 = vst.msk [vmem:[#allocation3 + $0x107] sm:$0xff] %vm5122_vm12, %v4943_v28  ;;  %5175 = vst.msk [vmem:[#allocation3 + $0x117] sm:$0xff] %vm5122_vm12, %v4943_v28 }
 0x6e5   : > { %5171 = vst.msk [vmem:[#allocation3 + $0xff] sm:$0xfe] %vm5120_vm11, %v4941_v8  ;;  %5174 = vst.msk [vmem:[#allocation3 + $0x10f] sm:$0xfe] %vm5120_vm11, %v4941_v8  ;;  %5247 = vrot.lane.b32.xlu0 %v11892_v10, %s9001_s27  ;;  %5245 = vrot.lane.b32.xlu1 %v11878_v23, %s9001_s27  ;;  %v15476_v10 = vld [vmem:[#allocation13_spill] sm:$0xff] }
 0x6e7   : > { %v4947_v56 = vpop.permute.xlu0 %4946  ;;  %v4945_v14 = vpop.permute.xlu1 %4944 }
 0x6e8   : > { %5177 = vst.msk [vmem:[#allocation3 + $0x11f] sm:$0xfe] %vm5120_vm11, %v4947_v56 }
 0x6e9   : > { %5173 = vst.msk [vmem:[#allocation3 + $0x10f] sm:$0x1] %vm5124_vm13, %v4945_v14  ;;  %5176 = vst.msk [vmem:[#allocation3 + $0x11f] sm:$0x1] %vm5124_vm13, %v4945_v14  ;;  %5251 = vrot.lane.b32.xlu0 %v11895_v49, %s9001_s27  ;;  %5249 = vrot.lane.b32.xlu1 %v11898_v19, %s9001_s27 }
 0x6eb   : > { %v4951_v43 = vpop.permute.xlu0 %4950  ;;  %v4949_v11 = vpop.permute.xlu1 %4948 }
 0x6ec   : > { %5179 = vst.msk [vmem:[#allocation3 + $0x12f] sm:$0x1] %vm5124_vm13, %v4951_v43 }
 0x6ed   : > { %5178 = vst.msk [vmem:[#allocation3 + $0x127] sm:$0xff] %vm5122_vm12, %v4949_v11  ;;  %5255 = vrot.lane.b32.xlu0 %v11923_v4, %s9001_s27  ;;  %5253 = vrot.lane.b32.xlu1 %v11911_v31, %s9001_s27  ;;  %v15475_v31 = vld [vmem:[#allocation18_spill] sm:$0xff] }
 0x6ef   : > { %v4955_v53 = vpop.permute.xlu0 %4954  ;;  %v4953_v6 = vpop.permute.xlu1 %4952 }
 0x6f0   : > { %5181 = vst.msk [vmem:[#allocation3 + $0x137] sm:$0xff] %vm5122_vm12, %v4955_v53 }
 0x6f1   : > { %5180 = vst.msk [vmem:[#allocation3 + $0x12f] sm:$0xfe] %vm5120_vm11, %v4953_v6  ;;  %5259 = vrot.lane.b32.xlu0 %v11934_v18, %s9001_s27  ;;  %5257 = vrot.lane.b32.xlu1 %v11920_v25, %s9001_s27  ;;  %v15474_v18 = vld [vmem:[#allocation11_spill] sm:$0xff] }
 0x6f3   : > { %v4959_v28 = vpop.permute.xlu0 %4958  ;;  %v4957_v8 = vpop.permute.xlu1 %4956 }
 0x6f4   : > { %5183 = vst.msk [vmem:[#allocation3 + $0x13f] sm:$0xfe] %vm5120_vm11, %v4959_v28 }
 0x6f5   : > { %5182 = vst.msk [vmem:[#allocation3 + $0x13f] sm:$0x1] %vm5124_vm13, %v4957_v8  ;;  %5263 = vrot.lane.b32.xlu0 %v11937_v38, %s9001_s27  ;;  %5261 = vrot.lane.b32.xlu1 %v11940_v29, %s9001_s27 }
 0x6f7   : > { %v4963_v56 = vpop.permute.xlu0 %4962  ;;  %v4961_v14 = vpop.permute.xlu1 %4960 }
 0x6f8   : > { %5185 = vst.msk [vmem:[#allocation3 + $0x14f] sm:$0x1] %vm5124_vm13, %v4963_v56 }
 0x6f9   : > { %5184 = vst.msk [vmem:[#allocation3 + $0x147] sm:$0xff] %vm5122_vm12, %v4961_v14  ;;  %5267 = vrot.lane.b32.xlu0 %v11965_v50, %s9001_s27  ;;  %5265 = vrot.lane.b32.xlu1 %v11953_v1, %s9001_s27  ;;  %v15472_v1 = vld [vmem:[#allocation10_spill] sm:$0xff] }
 0x6fb   : > { %v4967_v43 = vpop.permute.xlu0 %4966  ;;  %v4965_v11 = vpop.permute.xlu1 %4964 }
 0x6fc   : > { %5187 = vst.msk [vmem:[#allocation3 + $0x157] sm:$0xff] %vm5122_vm12, %v4967_v43 }
 0x6fd   : > { %5186 = vst.msk [vmem:[#allocation3 + $0x14f] sm:$0xfe] %vm5120_vm11, %v4965_v11  ;;  %5271 = vrot.lane.b32.xlu0 %v11976_v47, %s9001_s27  ;;  %5269 = vrot.lane.b32.xlu1 %v11962_v26, %s9001_s27 }
 0x6ff   : > { %v4971_v53 = vpop.permute.xlu0 %4970  ;;  %v4969_v6 = vpop.permute.xlu1 %4968 }
 0x700   : > { %5189 = vst.msk [vmem:[#allocation3 + $0x15f] sm:$0xfe] %vm5120_vm11, %v4971_v53 }
 0x701   : > { %5188 = vst.msk [vmem:[#allocation3 + $0x15f] sm:$0x1] %vm5124_vm13, %v4969_v6  ;;  %5275 = vrot.lane.b32.xlu0 %v11979_v12, %s9001_s27  ;;  %5273 = vrot.lane.b32.xlu1 %v11982_v35, %s9001_s27 }
 0x703   : > { %v4975_v28 = vpop.permute.xlu0 %4974  ;;  %v4973_v8 = vpop.permute.xlu1 %4972 }
 0x704   : > { %5191 = vst.msk [vmem:[#allocation3 + $0x16f] sm:$0x1] %vm5124_vm13, %v4975_v28 }
 0x705   : > { %5190 = vst.msk [vmem:[#allocation3 + $0x167] sm:$0xff] %vm5122_vm12, %v4973_v8  ;;  %5279 = vrot.lane.b32.xlu0 %v12007_v2, %s9001_s27  ;;  %5277 = vrot.lane.b32.xlu1 %v11995_v37, %s9001_s27  ;;  %v15469_v37 = vld [vmem:[#allocation58_spill] sm:$0xff] }
 0x707   : > { %v4979_v56 = vpop.permute.xlu0 %4978  ;;  %v4977_v14 = vpop.permute.xlu1 %4976 }
 0x708   : > { %5193 = vst.msk [vmem:[#allocation3 + $0x177] sm:$0xff] %vm5122_vm12, %v4979_v56 }
 0x709   : > { %5192 = vst.msk [vmem:[#allocation3 + $0x16f] sm:$0xfe] %vm5120_vm11, %v4977_v14  ;;  %5283 = vrot.lane.b32.xlu0 %v12018_v62, %s9001_s27  ;;  %5281 = vrot.lane.b32.xlu1 %v12004_v7, %s9001_s27 }
 0x70b   : > { %v4983_v43 = vpop.permute.xlu0 %4982  ;;  %v4981_v11 = vpop.permute.xlu1 %4980 }
 0x70c   : > { %5195 = vst.msk [vmem:[#allocation3 + $0x17f] sm:$0xfe] %vm5120_vm11, %v4983_v43 }
 0x70d   : > { %5194 = vst.msk [vmem:[#allocation3 + $0x17f] sm:$0x1] %vm5124_vm13, %v4981_v11  ;;  %5287 = vrot.lane.b32.xlu0 %v12021_v32, %s9001_s27  ;;  %5285 = vrot.lane.b32.xlu1 %v12024_v27, %s9001_s27 }
 0x70f   : > { %v4987_v53 = vpop.permute.xlu0 %4986  ;;  %v4985_v6 = vpop.permute.xlu1 %4984 }
 0x710   : > { %5197 = vst.msk [vmem:[#allocation3 + $0x18f] sm:$0x1] %vm5124_vm13, %v4987_v53 }
 0x711   : > { %5196 = vst.msk [vmem:[#allocation3 + $0x187] sm:$0xff] %vm5122_vm12, %v4985_v6  ;;  %5291 = vrot.lane.b32.xlu0 %v12049_v63, %s9001_s27  ;;  %5289 = vrot.lane.b32.xlu1 %v12037_v21, %s9001_s27 }
 0x713   : > { %v4991_v28 = vpop.permute.xlu0 %4990  ;;  %v4989_v8 = vpop.permute.xlu1 %4988 }
 0x714   : > { %5199 = vst.msk [vmem:[#allocation3 + $0x197] sm:$0xff] %vm5122_vm12, %v4991_v28 }
 0x715   : > { %5198 = vst.msk [vmem:[#allocation3 + $0x18f] sm:$0xfe] %vm5120_vm11, %v4989_v8  ;;  %5295 = vrot.lane.b32.xlu0 %v12060_v39, %s9001_s27  ;;  %5293 = vrot.lane.b32.xlu1 %v12046_v44, %s9001_s27  ;;  %v15464_v39 = vld [vmem:[#allocation45_spill] sm:$0xff] }
 0x717   : > { %v4995_v56 = vpop.permute.xlu0 %4994  ;;  %v4993_v14 = vpop.permute.xlu1 %4992 }
 0x718   : > { %5201 = vst.msk [vmem:[#allocation3 + $0x19f] sm:$0xfe] %vm5120_vm11, %v4995_v56  ;;  %v15454_v56 = vld [vmem:[#allocation82_spill] sm:$0xff] }
 0x719   : > { %5200 = vst.msk [vmem:[#allocation3 + $0x19f] sm:$0x1] %vm5124_vm13, %v4993_v14  ;;  %5299 = vrot.lane.b32.xlu0 %v12063_v3, %s9001_s27  ;;  %5297 = vrot.lane.b32.xlu1 %v12066_v0, %s9001_s27 }
 0x71b   : > { %v4999_v43 = vpop.permute.xlu0 %4998  ;;  %v4997_v11 = vpop.permute.xlu1 %4996 }
 0x71c   : > { %5203 = vst.msk [vmem:[#allocation3 + $0x1af] sm:$0x1] %vm5124_vm13, %v4999_v43 }
 0x71d   : > { %5202 = vst.msk [vmem:[#allocation3 + $0x1a7] sm:$0xff] %vm5122_vm12, %v4997_v11  ;;  %5303 = vrot.lane.b32.xlu0 %v12093_v42, %s9001_s27  ;;  %5301 = vrot.lane.b32.xlu1 %v12079_v5, %s9001_s27  ;;  %v15455_v11 = vld [vmem:[#allocation85_spill] sm:$0xff]  ;;  %v15463_v5 = vld [vmem:[#allocation50_spill] sm:$0xff] }
 0x71f   : > { %v5003_v53 = vpop.permute.xlu0 %5002  ;;  %v5001_v6 = vpop.permute.xlu1 %5000 }
 0x720   : > { %5205 = vst.msk [vmem:[#allocation3 + $0x1b7] sm:$0xff] %vm5122_vm12, %v5003_v53  ;;  %v15456_v53 = vld [vmem:[#allocation83_spill] sm:$0xff] }
 0x721   : > { %5204 = vst.msk [vmem:[#allocation3 + $0x1af] sm:$0xfe] %vm5120_vm11, %v5001_v6  ;;  %5307 = vrot.lane.b32.xlu0 %v12114_v52, %s9001_s27  ;;  %5305 = vrot.lane.b32.xlu1 %v12090_v33, %s9001_s27  ;;  %v15462_v52 = vld [vmem:[#allocation64_spill] sm:$0xff] }
 0x723   : > { %v5007_v28 = vpop.permute.xlu0 %5006  ;;  %v5005_v8 = vpop.permute.xlu1 %5004 }
 0x724   : > { %5207 = vst.msk [vmem:[#allocation3 + $0x1bf] sm:$0xfe] %vm5120_vm11, %v5007_v28 }
 0x725   : > { %5206 = vst.msk [vmem:[#allocation3 + $0x1bf] sm:$0x1] %vm5124_vm13, %v5005_v8  ;;  %5311 = vrot.lane.b32.xlu0 %v12125_v54, %s9001_s27  ;;  %5309 = vrot.lane.b32.xlu1 %v15454_v56, %s9001_s27  ;;  %v15457_v8 = vld [vmem:[#allocation86_spill] sm:$0xff] }
 0x727   : > { %v5011_v14 = vpop.permute.xlu0 %5010  ;;  %v5009_v43 = vpop.permute.xlu1 %5008 }
 0x728   : > { %5209 = vst.msk [vmem:[#allocation3 + $0x1cf] sm:$0x1] %vm5124_vm13, %v5011_v14 }
 0x729   : > { %5208 = vst.msk [vmem:[#allocation3 + $0x1c7] sm:$0xff] %vm5122_vm12, %v5009_v43  ;;  %5315 = vrot.lane.b32.xlu0 %v15455_v11, %s9001_s27  ;;  %5313 = vrot.lane.b32.xlu1 %v15456_v53, %s9001_s27  ;;  %v15460_v53 = vld [vmem:[#allocation40_spill] sm:$0xff] }
 0x72b   : > { %v5015_v6 = vpop.permute.xlu0 %5014  ;;  %v5013_v28 = vpop.permute.xlu1 %5012 }
 0x72c   : > { %5211 = vst.msk [vmem:[#allocation3 + $0x1d7] sm:$0xff] %vm5122_vm12, %v5015_v6 }
 0x72d   : > { %5210 = vst.msk [vmem:[#allocation3 + $0x1cf] sm:$0xfe] %vm5120_vm11, %v5013_v28  ;;  %5319 = vrot.lane.b32.xlu0 %v15457_v8, %s9001_s27  ;;  %5317 = vrot.lane.b32.xlu1 %v15458_v24, %s9001_s27  ;;  %v15461_v8 = vld [vmem:[#allocation48_spill] sm:$0xff] }
 0x72f   : > { %v5019_v14 = vpop.permute.xlu0 %5018  ;;  %v5017_v43 = vpop.permute.xlu1 %5016 }
 0x730   : > { %5213 = vst.msk [vmem:[#allocation3 + $0x1df] sm:$0xfe] %vm5120_vm11, %v5019_v14 }
 0x731   : > { %5212 = vst.msk [vmem:[#allocation3 + $0x1df] sm:$0x1] %vm5124_vm13, %v5017_v43  ;;  %5323 = vrot.lane.b32.xlu0 %v15459_v22, %s9001_s27  ;;  %5321 = vrot.lane.b32.xlu1 %v15460_v53, %s9001_s27 }
 0x733   : > { %v5023_v6 = vpop.permute.xlu0 %5022  ;;  %v5021_v28 = vpop.permute.xlu1 %5020 }
 0x734   : > { %5215 = vst.msk [vmem:[#allocation3 + $0x1ef] sm:$0x1] %vm5124_vm13, %v5023_v6 }
 0x735   : > { %5214 = vst.msk [vmem:[#allocation3 + $0x1e7] sm:$0xff] %vm5122_vm12, %v5021_v28  ;;  %5327 = vrot.lane.b32.xlu0 %v15461_v8, %s9001_s27  ;;  %5325 = vrot.lane.b32.xlu1 %v15462_v52, %s9001_s27  ;;  %v15465_v52 = vld [vmem:[#allocation56_spill] sm:$0xff] }
 0x737   : > { %v5027_v14 = vpop.permute.xlu0 %5026  ;;  %v5025_v43 = vpop.permute.xlu1 %5024 }
 0x738   : > { %5217 = vst.msk [vmem:[#allocation3 + $0x1f7] sm:$0xff] %vm5122_vm12, %v5027_v14  ;;  %v15466_v14 = vld [vmem:[#allocation62_spill] sm:$0xff]  ;;  %vm7507_vm12 = vcmask 589314  }
 0x739   : > { %5216 = vst.msk [vmem:[#allocation3 + $0x1ef] sm:$0xfe] %vm5120_vm11, %v5025_v43  ;;  %5331 = vrot.lane.b32.xlu0 %v15463_v5, %s9001_s27  ;;  %5329 = vrot.lane.b32.xlu1 %v15464_v39, %s9001_s27  ;;  %vm7138_vm11 = vcmask 523713  }
 0x73b   : > { %v5220_v6 = vpop.permute.xlu0 %5219  ;;  %v5029_v28 = vpop.permute.xlu1 %5028 }
 0x73c   : > { %5490 = vst.msk [vmem:[#allocation3 - $0x2] sm:$0xfc] %vm5489_vm14, %v5220_v6  ;;  %5495 = vst.msk [vmem:[#allocation3 + $0xe] sm:$0xfc] %vm5489_vm14, %v5220_v6  ;;  %v15467_v6 = vld [vmem:[#allocation7_spill] sm:$0xff] }
 0x73d   : > { %5218 = vst.msk [vmem:[#allocation3 + $0x1ff] sm:$0x1] %vm5124_vm13, %v5029_v28  ;;  %5335 = vrot.lane.b32.xlu0 %v15465_v52, %s9001_s27  ;;  %5333 = vrot.lane.b32.xlu1 %v15466_v14, %s9001_s27  ;;  %v15468_v28 = vld [vmem:[#allocation68_spill] sm:$0xff]  ;;  %vm7142_vm13 = vcmask 516544  }
 0x73f   : > { %v5224_v43 = vpop.permute.xlu0 %5223  ;;  %v5222_v5 = vpop.permute.xlu1 %5221 }
 0x740   : > { %5494 = vst.msk [vmem:[#allocation3 + $0xe] sm:$0x3] %vm5493_vm15, %v5224_v43  ;;  %5497 = vst.msk [vmem:[#allocation3 + $0x1e] sm:$0x3] %vm5493_vm15, %v5224_v43  ;;  %v15470_v43 = vld [vmem:[#allocation81_spill] sm:$0xff] }
 0x741   : > { %5492 = vst.msk [vmem:[#allocation3 + $0x6] sm:$0xff] %vm5491_vm2, %v5222_v5  ;;  %5496 = vst.msk [vmem:[#allocation3 + $0x16] sm:$0xff] %vm5491_vm2, %v5222_v5  ;;  %5339 = vrot.lane.b32.xlu0 %v15467_v6, %s9001_s27  ;;  %5337 = vrot.lane.b32.xlu1 %v15468_v28, %s9001_s27  ;;  %v15471_v28 = vld [vmem:[#allocation6_spill] sm:$0xff] }
 0x743   : > { %v5228_v21 = vpop.permute.xlu0 %5227  ;;  %v5226_v62 = vpop.permute.xlu1 %5225 }
 0x744   : > { %5499 = vst.msk [vmem:[#allocation3 + $0x26] sm:$0xff] %vm5491_vm2, %v5228_v21 }
 0x745   : > { %5498 = vst.msk [vmem:[#allocation3 + $0x1e] sm:$0xfc] %vm5489_vm14, %v5226_v62  ;;  %5343 = vrot.lane.b32.xlu0 %v15469_v37, %s9001_s27  ;;  %5341 = vrot.lane.b32.xlu1 %v15470_v43, %s9001_s27  ;;  %v15473_v37 = vld [vmem:[#allocation15_spill] sm:$0xff] }
 0x747   : > { %v5232_v47 = vpop.permute.xlu0 %5231  ;;  %v5230_v5 = vpop.permute.xlu1 %5229 }
 0x748   : > { %5501 = vst.msk [vmem:[#allocation3 + $0x2e] sm:$0xfc] %vm5489_vm14, %v5232_v47 }
 0x749   : > { %5500 = vst.msk [vmem:[#allocation3 + $0x2e] sm:$0x3] %vm5493_vm15, %v5230_v5  ;;  %5347 = vrot.lane.b32.xlu0 %v15471_v28, %s9001_s27  ;;  %5345 = vrot.lane.b32.xlu1 %v15472_v1, %s9001_s27 }
 0x74b   : > { %v5236_v21 = vpop.permute.xlu0 %5235  ;;  %v5234_v62 = vpop.permute.xlu1 %5233 }
 0x74c   : > { %5503 = vst.msk [vmem:[#allocation3 + $0x3e] sm:$0x3] %vm5493_vm15, %v5236_v21 }
 0x74d   : > { %5502 = vst.msk [vmem:[#allocation3 + $0x36] sm:$0xff] %vm5491_vm2, %v5234_v62  ;;  %5351 = vrot.lane.b32.xlu0 %v15473_v37, %s9001_s27  ;;  %5349 = vrot.lane.b32.xlu1 %v15474_v18, %s9001_s27  ;;  %v15477_v18 = vld [vmem:[#allocation20_spill] sm:$0xff] }
 0x74f   : > { %v5240_v47 = vpop.permute.xlu0 %5239  ;;  %v5238_v5 = vpop.permute.xlu1 %5237 }
 0x750   : > { %5505 = vst.msk [vmem:[#allocation3 + $0x46] sm:$0xff] %vm5491_vm2, %v5240_v47 }
 0x751   : > { %5504 = vst.msk [vmem:[#allocation3 + $0x3e] sm:$0xfc] %vm5489_vm14, %v5238_v5  ;;  %5355 = vrot.lane.b32.xlu0 %v15475_v31, %s9001_s27  ;;  %5353 = vrot.lane.b32.xlu1 %v15476_v10, %s9001_s27  ;;  %v15479_v31 = vld [vmem:[#allocation30_spill] sm:$0xff] }
 0x753   : > { %v5244_v21 = vpop.permute.xlu0 %5243  ;;  %v5242_v62 = vpop.permute.xlu1 %5241 }
 0x754   : > { %5507 = vst.msk [vmem:[#allocation3 + $0x4e] sm:$0xfc] %vm5489_vm14, %v5244_v21 }
 0x755   : > { %5506 = vst.msk [vmem:[#allocation3 + $0x4e] sm:$0x3] %vm5493_vm15, %v5242_v62  ;;  %5359 = vrot.lane.b32.xlu0 %v15477_v18, %s9001_s27  ;;  %5357 = vrot.lane.b32.xlu1 %v15478_v60, %s9001_s27 }
 0x757   : > { %v5248_v47 = vpop.permute.xlu0 %5247  ;;  %v5246_v5 = vpop.permute.xlu1 %5245 }
 0x758   : > { %5509 = vst.msk [vmem:[#allocation3 + $0x5e] sm:$0x3] %vm5493_vm15, %v5248_v47 }
 0x759   : > { %5508 = vst.msk [vmem:[#allocation3 + $0x56] sm:$0xff] %vm5491_vm2, %v5246_v5  ;;  %5363 = vrot.lane.b32.xlu0 %v15479_v31, %s9001_s27  ;;  %5361 = vrot.lane.b32.xlu1 %v15480_v40, %s9001_s27  ;;  %v15483_v40 = vld [vmem:[#allocation34_spill] sm:$0xff] }
 0x75b   : > { %v5252_v21 = vpop.permute.xlu0 %5251  ;;  %v5250_v62 = vpop.permute.xlu1 %5249 }
 0x75c   : > { %5511 = vst.msk [vmem:[#allocation3 + $0x66] sm:$0xff] %vm5491_vm2, %v5252_v21 }
 0x75d   : > { %5510 = vst.msk [vmem:[#allocation3 + $0x5e] sm:$0xfc] %vm5489_vm14, %v5250_v62  ;;  %5367 = vrot.lane.b32.xlu0 %v15481_v17, %s9001_s27  ;;  %5365 = vrot.lane.b32.xlu1 %v15482_v55, %s9001_s27  ;;  %v15485_v17 = vld [vmem:[#allocation44_spill] sm:$0xff] }
 0x75f   : > { %v5256_v47 = vpop.permute.xlu0 %5255  ;;  %v5254_v5 = vpop.permute.xlu1 %5253 }
 0x760   : > { %5513 = vst.msk [vmem:[#allocation3 + $0x6e] sm:$0xfc] %vm5489_vm14, %v5256_v47 }
 0x761   : > { %5512 = vst.msk [vmem:[#allocation3 + $0x6e] sm:$0x3] %vm5493_vm15, %v5254_v5  ;;  %5371 = vrot.lane.b32.xlu0 %v15483_v40, %s9001_s27  ;;  %5369 = vrot.lane.b32.xlu1 %v15484_v48, %s9001_s27  ;;  %v15488_v40 = vld [vmem:[#allocation43_spill] sm:$0xff] }
 0x763   : > { %v5260_v21 = vpop.permute.xlu0 %5259  ;;  %v5258_v62 = vpop.permute.xlu1 %5257 }
 0x764   : > { %5515 = vst.msk [vmem:[#allocation3 + $0x7e] sm:$0x3] %vm5493_vm15, %v5260_v21 }
 0x765   : > { %5514 = vst.msk [vmem:[#allocation3 + $0x76] sm:$0xff] %vm5491_vm2, %v5258_v62  ;;  %5375 = vrot.lane.b32.xlu0 %v15485_v17, %s9001_s27  ;;  %5373 = vrot.lane.b32.xlu1 %v15486_v58, %s9001_s27  ;;  %v15489_v58 = vld [vmem:[#allocation52_spill] sm:$0xff]  ;;  %v15490_v17 = vld [vmem:[#allocation54_spill] sm:$0xff] }
 0x767   : > { %v5264_v47 = vpop.permute.xlu0 %5263  ;;  %v5262_v5 = vpop.permute.xlu1 %5261 }
 0x768   : > { %5517 = vst.msk [vmem:[#allocation3 + $0x86] sm:$0xff] %vm5491_vm2, %v5264_v47 }
 0x769   : > { %5516 = vst.msk [vmem:[#allocation3 + $0x7e] sm:$0xfc] %vm5489_vm14, %v5262_v5  ;;  %5379 = vrot.lane.b32.xlu0 %v15487_v34, %s9001_s27  ;;  %5377 = vrot.lane.b32.xlu1 %v15488_v40, %s9001_s27  ;;  %v15491_v34 = vld [vmem:[#allocation61_spill] sm:$0xff]  ;;  %v15492_v40 = vld [vmem:[#allocation55_spill] sm:$0xff] }
 0x76b   : > { %v5268_v21 = vpop.permute.xlu0 %5267  ;;  %v5266_v62 = vpop.permute.xlu1 %5265 }
 0x76c   : > { %5519 = vst.msk [vmem:[#allocation3 + $0x8e] sm:$0xfc] %vm5489_vm14, %v5268_v21 }
 0x76d   : > { %5518 = vst.msk [vmem:[#allocation3 + $0x8e] sm:$0x3] %vm5493_vm15, %v5266_v62  ;;  %5383 = vrot.lane.b32.xlu0 %v15489_v58, %s9001_s27  ;;  %5381 = vrot.lane.b32.xlu1 %v15490_v17, %s9001_s27 }
 0x76f   : > { %v5272_v47 = vpop.permute.xlu0 %5271  ;;  %v5270_v5 = vpop.permute.xlu1 %5269 }
 0x770   : > { %5521 = vst.msk [vmem:[#allocation3 + $0x9e] sm:$0x3] %vm5493_vm15, %v5272_v47 }
 0x771   : > { %5520 = vst.msk [vmem:[#allocation3 + $0x96] sm:$0xff] %vm5491_vm2, %v5270_v5  ;;  %5387 = vrot.lane.b32.xlu0 %v15491_v34, %s9001_s27  ;;  %5385 = vrot.lane.b32.xlu1 %v15492_v40, %s9001_s27 }
 0x773   : > { %v5276_v21 = vpop.permute.xlu0 %5275  ;;  %v5274_v62 = vpop.permute.xlu1 %5273 }
 0x774   : > { %5523 = vst.msk [vmem:[#allocation3 + $0xa6] sm:$0xff] %vm5491_vm2, %v5276_v21 }
 0x775   : > { %5522 = vst.msk [vmem:[#allocation3 + $0x9e] sm:$0xfc] %vm5489_vm14, %v5274_v62  ;;  %5391 = vrot.lane.b32.xlu0 %v12452_v46, %s9001_s27  ;;  %5389 = vrot.lane.b32.xlu1 %v12432_v30, %s9001_s27  ;;  %v15494_v46 = vld [vmem:[#allocation16_spill] sm:$0xff] }
 0x776   : > { %v15495_v40 = vmax.f32 %v15494_v46, 0.0 }
 0x777   : > { %v5280_v47 = vpop.permute.xlu0 %5279  ;;  %v5278_v5 = vpop.permute.xlu1 %5277 }
 0x778   : > { %5525 = vst.msk [vmem:[#allocation3 + $0xae] sm:$0xfc] %vm5489_vm14, %v5280_v47 }
 0x779   : > { %5524 = vst.msk [vmem:[#allocation3 + $0xae] sm:$0x3] %vm5493_vm15, %v5278_v5  ;;  %5395 = vrot.lane.b32.xlu0 %v12456_v36, %s9001_s27  ;;  %5393 = vrot.lane.b32.xlu1 %v12459_v41, %s9001_s27 }
 0x77b   : > { %v5284_v21 = vpop.permute.xlu0 %5283  ;;  %v5282_v62 = vpop.permute.xlu1 %5281 }
 0x77c   : > { %5527 = vst.msk [vmem:[#allocation3 + $0xbe] sm:$0x3] %vm5493_vm15, %v5284_v21 }
 0x77d   : > { %5526 = vst.msk [vmem:[#allocation3 + $0xb6] sm:$0xff] %vm5491_vm2, %v5282_v62  ;;  %5590 = vrot.lane.b32.xlu0 %v11793_v45, %s9003_s29  ;;  %5397 = vrot.lane.b32.xlu1 %v12489_v57, %s9001_s27  ;;  %v15493_v57 = vld [vmem:[#allocation28_spill] sm:$0xff]  ;;  %s287_s27 = scalar_lea.vmem %s14637_s4, %s15614_s19 }
 0x77f   : > { %v5288_v47 = vpop.permute.xlu0 %5287  ;;  %v5286_v5 = vpop.permute.xlu1 %5285 }
 0x780   : > { %5529 = vst.msk [vmem:[#allocation3 + $0xc6] sm:$0xff] %vm5491_vm2, %v5288_v47 }
 0x781   : > { %5528 = vst.msk [vmem:[#allocation3 + $0xbe] sm:$0xfc] %vm5489_vm14, %v5286_v5  ;;  %5594 = vrot.lane.b32.xlu0 %v11814_v9, %s9003_s29  ;;  %5592 = vrot.lane.b32.xlu1 %v11790_v51, %s9003_s29 }
 0x783   : > { %v5292_v21 = vpop.permute.xlu0 %5291  ;;  %v5290_v62 = vpop.permute.xlu1 %5289 }
 0x784   : > { %5531 = vst.msk [vmem:[#allocation3 + $0xce] sm:$0xfc] %vm5489_vm14, %v5292_v21 }
 0x785   : > { %5530 = vst.msk [vmem:[#allocation3 + $0xce] sm:$0x3] %vm5493_vm15, %v5290_v62  ;;  %5598 = vrot.lane.b32.xlu0 %v11839_v20, %s9003_s29  ;;  %5596 = vrot.lane.b32.xlu1 %v11811_v16, %s9003_s29 }
 0x787   : > { %v5296_v47 = vpop.permute.xlu0 %5295  ;;  %v5294_v5 = vpop.permute.xlu1 %5293 }
 0x788   : > { %5533 = vst.msk [vmem:[#allocation3 + $0xde] sm:$0x3] %vm5493_vm15, %v5296_v47 }
 0x789   : > { %5532 = vst.msk [vmem:[#allocation3 + $0xd6] sm:$0xff] %vm5491_vm2, %v5294_v5  ;;  %5602 = vrot.lane.b32.xlu0 %v11856_v59, %s9003_s29  ;;  %5600 = vrot.lane.b32.xlu1 %v11836_v13, %s9003_s29 }
 0x78b   : > { %v5300_v21 = vpop.permute.xlu0 %5299  ;;  %v5298_v62 = vpop.permute.xlu1 %5297 }
 0x78c   : > { %5535 = vst.msk [vmem:[#allocation3 + $0xe6] sm:$0xff] %vm5491_vm2, %v5300_v21 }
 0x78d   : > { %5534 = vst.msk [vmem:[#allocation3 + $0xde] sm:$0xfc] %vm5489_vm14, %v5298_v62  ;;  %5606 = vrot.lane.b32.xlu0 %v11881_v61, %s9003_s29  ;;  %5604 = vrot.lane.b32.xlu1 %v11853_v15, %s9003_s29 }
 0x78f   : > { %v5304_v47 = vpop.permute.xlu0 %5303  ;;  %v5302_v5 = vpop.permute.xlu1 %5301 }
 0x790   : > { %5537 = vst.msk [vmem:[#allocation3 + $0xee] sm:$0xfc] %vm5489_vm14, %v5304_v47 }
 0x791   : > { %5536 = vst.msk [vmem:[#allocation3 + $0xee] sm:$0x3] %vm5493_vm15, %v5302_v5  ;;  %5610 = vrot.lane.b32.xlu0 %v11898_v19, %s9003_s29  ;;  %5608 = vrot.lane.b32.xlu1 %v11878_v23, %s9003_s29 }
 0x793   : > { %v5308_v21 = vpop.permute.xlu0 %5307  ;;  %v5306_v62 = vpop.permute.xlu1 %5305 }
 0x794   : > { %5539 = vst.msk [vmem:[#allocation3 + $0xfe] sm:$0x3] %vm5493_vm15, %v5308_v21 }
 0x795   : > { %5538 = vst.msk [vmem:[#allocation3 + $0xf6] sm:$0xff] %vm5491_vm2, %v5306_v62  ;;  %5614 = vrot.lane.b32.xlu0 %v11923_v4, %s9003_s29  ;;  %5612 = vrot.lane.b32.xlu1 %v11895_v49, %s9003_s29 }
 0x797   : > { %v5312_v47 = vpop.permute.xlu0 %5311  ;;  %v5310_v5 = vpop.permute.xlu1 %5309 }
 0x798   : > { %5541 = vst.msk [vmem:[#allocation3 + $0x106] sm:$0xff] %vm5491_vm2, %v5312_v47  ;;  %5544 = vst.msk [vmem:[#allocation3 + $0x116] sm:$0xff] %vm5491_vm2, %v5312_v47 }
 0x799   : > { %5540 = vst.msk [vmem:[#allocation3 + $0xfe] sm:$0xfc] %vm5489_vm14, %v5310_v5  ;;  %5543 = vst.msk [vmem:[#allocation3 + $0x10e] sm:$0xfc] %vm5489_vm14, %v5310_v5  ;;  %5618 = vrot.lane.b32.xlu0 %v11940_v29, %s9003_s29  ;;  %5616 = vrot.lane.b32.xlu1 %v11920_v25, %s9003_s29 }
 0x79b   : > { %v5316_v21 = vpop.permute.xlu0 %5315  ;;  %v5314_v62 = vpop.permute.xlu1 %5313 }
 0x79c   : > { %5546 = vst.msk [vmem:[#allocation3 + $0x11e] sm:$0xfc] %vm5489_vm14, %v5316_v21 }
 0x79d   : > { %5542 = vst.msk [vmem:[#allocation3 + $0x10e] sm:$0x3] %vm5493_vm15, %v5314_v62  ;;  %5545 = vst.msk [vmem:[#allocation3 + $0x11e] sm:$0x3] %vm5493_vm15, %v5314_v62  ;;  %5622 = vrot.lane.b32.xlu0 %v11965_v50, %s9003_s29  ;;  %5620 = vrot.lane.b32.xlu1 %v11937_v38, %s9003_s29 }
 0x79f   : > { %v5320_v47 = vpop.permute.xlu0 %5319  ;;  %v5318_v5 = vpop.permute.xlu1 %5317 }
 0x7a0   : > { %5548 = vst.msk [vmem:[#allocation3 + $0x12e] sm:$0x3] %vm5493_vm15, %v5320_v47 }
 0x7a1   : > { %5547 = vst.msk [vmem:[#allocation3 + $0x126] sm:$0xff] %vm5491_vm2, %v5318_v5  ;;  %5626 = vrot.lane.b32.xlu0 %v11982_v35, %s9003_s29  ;;  %5624 = vrot.lane.b32.xlu1 %v11962_v26, %s9003_s29 }
 0x7a3   : > { %v5324_v21 = vpop.permute.xlu0 %5323  ;;  %v5322_v62 = vpop.permute.xlu1 %5321 }
 0x7a4   : > { %5550 = vst.msk [vmem:[#allocation3 + $0x136] sm:$0xff] %vm5491_vm2, %v5324_v21 }
 0x7a5   : > { %5549 = vst.msk [vmem:[#allocation3 + $0x12e] sm:$0xfc] %vm5489_vm14, %v5322_v62  ;;  %5630 = vrot.lane.b32.xlu0 %v12007_v2, %s9003_s29  ;;  %5628 = vrot.lane.b32.xlu1 %v11979_v12, %s9003_s29 }
 0x7a7   : > { %v5328_v47 = vpop.permute.xlu0 %5327  ;;  %v5326_v5 = vpop.permute.xlu1 %5325 }
 0x7a8   : > { %5552 = vst.msk [vmem:[#allocation3 + $0x13e] sm:$0xfc] %vm5489_vm14, %v5328_v47 }
 0x7a9   : > { %5551 = vst.msk [vmem:[#allocation3 + $0x13e] sm:$0x3] %vm5493_vm15, %v5326_v5  ;;  %5634 = vrot.lane.b32.xlu0 %v12024_v27, %s9003_s29  ;;  %5632 = vrot.lane.b32.xlu1 %v12004_v7, %s9003_s29 }
 0x7ab   : > { %v5332_v21 = vpop.permute.xlu0 %5331  ;;  %v5330_v62 = vpop.permute.xlu1 %5329 }
 0x7ac   : > { %5554 = vst.msk [vmem:[#allocation3 + $0x14e] sm:$0x3] %vm5493_vm15, %v5332_v21 }
 0x7ad   : > { %5553 = vst.msk [vmem:[#allocation3 + $0x146] sm:$0xff] %vm5491_vm2, %v5330_v62  ;;  %5638 = vrot.lane.b32.xlu0 %v12049_v63, %s9003_s29  ;;  %5636 = vrot.lane.b32.xlu1 %v12021_v32, %s9003_s29 }
 0x7af   : > { %v5336_v47 = vpop.permute.xlu0 %5335  ;;  %v5334_v5 = vpop.permute.xlu1 %5333 }
 0x7b0   : > { %5556 = vst.msk [vmem:[#allocation3 + $0x156] sm:$0xff] %vm5491_vm2, %v5336_v47 }
 0x7b1   : > { %5555 = vst.msk [vmem:[#allocation3 + $0x14e] sm:$0xfc] %vm5489_vm14, %v5334_v5  ;;  %5642 = vrot.lane.b32.xlu0 %v12066_v0, %s9003_s29  ;;  %5640 = vrot.lane.b32.xlu1 %v12046_v44, %s9003_s29  ;;  %v12863_v0 = vsel %vm421_vm0, %v15495_v40, %v15493_v57  ;;  %v15497_v40 = vld [vmem:[#allocation36_spill] sm:$0xff] }
 0x7b2   : > { %15496 = vst [vmem:[#allocation75_spill] sm:$0xff] %v12863_v0 }
 0x7b3   : > { %v5340_v21 = vpop.permute.xlu0 %5339  ;;  %v5338_v62 = vpop.permute.xlu1 %5337 }
 0x7b4   : > { %5558 = vst.msk [vmem:[#allocation3 + $0x15e] sm:$0xfc] %vm5489_vm14, %v5340_v21 }
 0x7b5   : > { %5557 = vst.msk [vmem:[#allocation3 + $0x15e] sm:$0x3] %vm5493_vm15, %v5338_v62  ;;  %5646 = vrot.lane.b32.xlu0 %v12093_v42, %s9003_s29  ;;  %5644 = vrot.lane.b32.xlu1 %v12063_v3, %s9003_s29 }
 0x7b7   : > { %v5344_v47 = vpop.permute.xlu0 %5343  ;;  %v5342_v5 = vpop.permute.xlu1 %5341 }
 0x7b8   : > { %5560 = vst.msk [vmem:[#allocation3 + $0x16e] sm:$0x3] %vm5493_vm15, %v5344_v47 }
 0x7b9   : > { %5559 = vst.msk [vmem:[#allocation3 + $0x166] sm:$0xff] %vm5491_vm2, %v5342_v5  ;;  %5650 = vrot.lane.b32.xlu0 %v12863_v0, %s9003_s29  ;;  %5648 = vrot.lane.b32.xlu1 %v12090_v33, %s9003_s29 }
 0x7bb   : > { %v5348_v21 = vpop.permute.xlu0 %5347  ;;  %v5346_v62 = vpop.permute.xlu1 %5345 }
 0x7bc   : > { %5562 = vst.msk [vmem:[#allocation3 + $0x176] sm:$0xff] %vm5491_vm2, %v5348_v21 }
 0x7bd   : > { %5561 = vst.msk [vmem:[#allocation3 + $0x16e] sm:$0xfc] %vm5489_vm14, %v5346_v62  ;;  %5654 = vrot.lane.b32.xlu0 %v15454_v56, %s9003_s29  ;;  %5652 = vrot.lane.b32.xlu1 %v15497_v40, %s9003_s29 }
 0x7bf   : > { %v5352_v46 = vpop.permute.xlu0 %5351  ;;  %v5350_v57 = vpop.permute.xlu1 %5349 }
 0x7c0   : > { %5564 = vst.msk [vmem:[#allocation3 + $0x17e] sm:$0xfc] %vm5489_vm14, %v5352_v46 }
 0x7c1   : > { %5563 = vst.msk [vmem:[#allocation3 + $0x17e] sm:$0x3] %vm5493_vm15, %v5350_v57  ;;  %5658 = vrot.lane.b32.xlu0 %v15455_v11, %s9003_s29  ;;  %5656 = vrot.lane.b32.xlu1 %v12125_v54, %s9003_s29 }
 0x7c3   : > { %v5356_v47 = vpop.permute.xlu0 %5355  ;;  %v5354_v5 = vpop.permute.xlu1 %5353 }
 0x7c4   : > { %5566 = vst.msk [vmem:[#allocation3 + $0x18e] sm:$0x3] %vm5493_vm15, %v5356_v47 }
 0x7c5   : > { %5565 = vst.msk [vmem:[#allocation3 + $0x186] sm:$0xff] %vm5491_vm2, %v5354_v5  ;;  %5662 = vrot.lane.b32.xlu0 %v15460_v53, %s9003_s29  ;;  %5660 = vrot.lane.b32.xlu1 %v15458_v24, %s9003_s29 }
 0x7c7   : > { %v5360_v21 = vpop.permute.xlu0 %5359  ;;  %v5358_v62 = vpop.permute.xlu1 %5357 }
 0x7c8   : > { %5568 = vst.msk [vmem:[#allocation3 + $0x196] sm:$0xff] %vm5491_vm2, %v5360_v21 }
 0x7c9   : > { %5567 = vst.msk [vmem:[#allocation3 + $0x18e] sm:$0xfc] %vm5489_vm14, %v5358_v62  ;;  %5666 = vrot.lane.b32.xlu0 %v15461_v8, %s9003_s29  ;;  %5664 = vrot.lane.b32.xlu1 %v15459_v22, %s9003_s29 }
 0x7cb   : > { %v5364_v46 = vpop.permute.xlu0 %5363  ;;  %v5362_v57 = vpop.permute.xlu1 %5361 }
 0x7cc   : > { %5570 = vst.msk [vmem:[#allocation3 + $0x19e] sm:$0xfc] %vm5489_vm14, %v5364_v46 }
 0x7cd   : > { %5569 = vst.msk [vmem:[#allocation3 + $0x19e] sm:$0x3] %vm5493_vm15, %v5362_v57  ;;  %5670 = vrot.lane.b32.xlu0 %v15466_v14, %s9003_s29  ;;  %5668 = vrot.lane.b32.xlu1 %v15464_v39, %s9003_s29 }
 0x7cf   : > { %v5368_v47 = vpop.permute.xlu0 %5367  ;;  %v5366_v5 = vpop.permute.xlu1 %5365 }
 0x7d0   : > { %5572 = vst.msk [vmem:[#allocation3 + $0x1ae] sm:$0x3] %vm5493_vm15, %v5368_v47 }
 0x7d1   : > { %5571 = vst.msk [vmem:[#allocation3 + $0x1a6] sm:$0xff] %vm5491_vm2, %v5366_v5  ;;  %5674 = vrot.lane.b32.xlu0 %v15467_v6, %s9003_s29  ;;  %5672 = vrot.lane.b32.xlu1 %v15465_v52, %s9003_s29 }
 0x7d3   : > { %v5372_v21 = vpop.permute.xlu0 %5371  ;;  %v5370_v62 = vpop.permute.xlu1 %5369 }
 0x7d4   : > { %5574 = vst.msk [vmem:[#allocation3 + $0x1b6] sm:$0xff] %vm5491_vm2, %v5372_v21 }
 0x7d5   : > { %5573 = vst.msk [vmem:[#allocation3 + $0x1ae] sm:$0xfc] %vm5489_vm14, %v5370_v62  ;;  %5678 = vrot.lane.b32.xlu0 %v15472_v1, %s9003_s29  ;;  %5676 = vrot.lane.b32.xlu1 %v15470_v43, %s9003_s29 }
 0x7d7   : > { %v5376_v46 = vpop.permute.xlu0 %5375  ;;  %v5374_v57 = vpop.permute.xlu1 %5373 }
 0x7d8   : > { %5576 = vst.msk [vmem:[#allocation3 + $0x1be] sm:$0xfc] %vm5489_vm14, %v5376_v46 }
 0x7d9   : > { %5575 = vst.msk [vmem:[#allocation3 + $0x1be] sm:$0x3] %vm5493_vm15, %v5374_v57  ;;  %5682 = vrot.lane.b32.xlu0 %v15473_v37, %s9003_s29  ;;  %5680 = vrot.lane.b32.xlu1 %v15471_v28, %s9003_s29 }
 0x7db   : > { %v5380_v47 = vpop.permute.xlu0 %5379  ;;  %v5378_v5 = vpop.permute.xlu1 %5377 }
 0x7dc   : > { %5578 = vst.msk [vmem:[#allocation3 + $0x1ce] sm:$0x3] %vm5493_vm15, %v5380_v47 }
 0x7dd   : > { %5577 = vst.msk [vmem:[#allocation3 + $0x1c6] sm:$0xff] %vm5491_vm2, %v5378_v5  ;;  %5686 = vrot.lane.b32.xlu0 %v15478_v60, %s9003_s29  ;;  %5684 = vrot.lane.b32.xlu1 %v15476_v10, %s9003_s29 }
 0x7df   : > { %v5384_v21 = vpop.permute.xlu0 %5383  ;;  %v5382_v62 = vpop.permute.xlu1 %5381 }
 0x7e0   : > { %5580 = vst.msk [vmem:[#allocation3 + $0x1d6] sm:$0xff] %vm5491_vm2, %v5384_v21  ;;  %v15498_v21 = vld [vmem:[#allocation44_spill] sm:$0xff] }
 0x7e1   : > { %5579 = vst.msk [vmem:[#allocation3 + $0x1ce] sm:$0xfc] %vm5489_vm14, %v5382_v62  ;;  %5690 = vrot.lane.b32.xlu0 %v15479_v31, %s9003_s29  ;;  %5688 = vrot.lane.b32.xlu1 %v15477_v18, %s9003_s29  ;;  %v15499_v62 = vld [vmem:[#allocation34_spill] sm:$0xff] }
 0x7e3   : > { %v5388_v46 = vpop.permute.xlu0 %5387  ;;  %v5386_v57 = vpop.permute.xlu1 %5385 }
 0x7e4   : > { %5582 = vst.msk [vmem:[#allocation3 + $0x1de] sm:$0xfc] %vm5489_vm14, %v5388_v46 }
 0x7e5   : > { %5581 = vst.msk [vmem:[#allocation3 + $0x1de] sm:$0x3] %vm5493_vm15, %v5386_v57  ;;  %5694 = vrot.lane.b32.xlu0 %v15484_v48, %s9003_s29  ;;  %5692 = vrot.lane.b32.xlu1 %v15482_v55, %s9003_s29  ;;  %v15500_v48 = vld [vmem:[#allocation43_spill] sm:$0xff] }
 0x7e7   : > { %v5392_v47 = vpop.permute.xlu0 %5391  ;;  %v5390_v5 = vpop.permute.xlu1 %5389 }
 0x7e8   : > { %5584 = vst.msk [vmem:[#allocation3 + $0x1ee] sm:$0x3] %vm5493_vm15, %v5392_v47 }
 0x7e9   : > { %5583 = vst.msk [vmem:[#allocation3 + $0x1e6] sm:$0xff] %vm5491_vm2, %v5390_v5  ;;  %5698 = vrot.lane.b32.xlu0 %v15498_v21, %s9003_s29  ;;  %5696 = vrot.lane.b32.xlu1 %v15499_v62, %s9003_s29  ;;  %v15502_v21 = vld [vmem:[#allocation66_spill] sm:$0xff] }
 0x7eb   : > { %v5396_v46 = vpop.permute.xlu0 %5395  ;;  %v5394_v57 = vpop.permute.xlu1 %5393 }
 0x7ec   : > { %5586 = vst.msk [vmem:[#allocation3 + $0x1f6] sm:$0xff] %vm5491_vm2, %v5396_v46  ;;  %vm7686_vm2 = vcmask 588800  }
 0x7ed   : > { %5585 = vst.msk [vmem:[#allocation3 + $0x1ee] sm:$0xfc] %vm5489_vm14, %v5394_v57  ;;  %5702 = vrot.lane.b32.xlu0 %v15490_v17, %s9003_s29  ;;  %5700 = vrot.lane.b32.xlu1 %v15500_v48, %s9003_s29  ;;  %v15501_v17 = vld [vmem:[#allocation71_spill] sm:$0xff]  ;;  %vm7511_vm14 = vcmask 583168  }
 0x7ef   : > { %v5591_v47 = vpop.permute.xlu0 %5590  ;;  %v5398_v5 = vpop.permute.xlu1 %5397 }
 0x7f0   : > { %5783 = vst.msk [vmem:[#allocation3] sm:$0xff] %vm5782_vm3, %v5591_v47 }
 0x7f1   : > { %5587 = vst.msk [vmem:[#allocation3 + $0x1fe] sm:$0x3] %vm5493_vm15, %v5398_v5  ;;  %5706 = vrot.lane.b32.xlu0 %v15491_v34, %s9003_s29  ;;  %5704 = vrot.lane.b32.xlu1 %v15489_v58, %s9003_s29  ;;  %v15503_v34 = vmax.f32 %v15502_v21, 0.0  ;;  %vm7509_vm15 = vcmask 589312  }
 0x7f3   : > { %v5595_v46 = vpop.permute.xlu0 %5594  ;;  %v5593_v57 = vpop.permute.xlu1 %5592  ;;  %v12965_v48 = vsel %vm421_vm0, %v15503_v34, %v15501_v17  ;;  %v15504_v17 = vld [vmem:[#allocation74_spill] sm:$0xff]  ;;  %vm6137_vm0 = vcmask 326913  }
 0x7f4   : > { %5785 = vst.msk [vmem:[#allocation3 + $0x10] sm:$0xff] %vm5782_vm3, %v5595_v46  ;;  %5784 = vst.msk [vmem:[#allocation3 + $0x8] sm:$0xff] %vm5782_vm3, %v5593_v57 }
 0x7f5   : > { %5710 = vrot.lane.b32.xlu0 %v12459_v41, %s9003_s29  ;;  %5708 = vrot.lane.b32.xlu1 %v12432_v30, %s9003_s29 }
 0x7f7   : > { %v5599_v47 = vpop.permute.xlu0 %5598  ;;  %v5597_v5 = vpop.permute.xlu1 %5596 }
 0x7f8   : > { %5787 = vst.msk [vmem:[#allocation3 + $0x20] sm:$0xff] %vm5782_vm3, %v5599_v47  ;;  %5786 = vst.msk [vmem:[#allocation3 + $0x18] sm:$0xff] %vm5782_vm3, %v5597_v5  ;;  %v15505_v47 = vld [vmem:[#allocation5_spill] sm:$0xff] }
 0x7f9   : > { %5714 = vrot.lane.b32.xlu0 %v12965_v48, %s9003_s29  ;;  %5712 = vrot.lane.b32.xlu1 %v12456_v36, %s9003_s29 }
 0x7fb   : > { %v5603_v46 = vpop.permute.xlu0 %5602  ;;  %v5601_v57 = vpop.permute.xlu1 %5600 }
 0x7fc   : > { %5789 = vst.msk [vmem:[#allocation3 + $0x30] sm:$0xff] %vm5782_vm3, %v5603_v46  ;;  %5788 = vst.msk [vmem:[#allocation3 + $0x28] sm:$0xff] %vm5782_vm3, %v5601_v57 }
 0x7fd   : > { %5849 = vrot.lane.b32.xlu0 %v11793_v45, %s9005_s10  ;;  %5716 = vrot.lane.b32.xlu1 %v15504_v17, %s9003_s29 }
 0x7ff   : > { %v5607_v34 = vpop.permute.xlu0 %5606  ;;  %v5605_v21 = vpop.permute.xlu1 %5604 }
 0x800   : > { %5791 = vst.msk [vmem:[#allocation3 + $0x40] sm:$0xff] %vm5782_vm3, %v5607_v34  ;;  %5790 = vst.msk [vmem:[#allocation3 + $0x38] sm:$0xff] %vm5782_vm3, %v5605_v21  ;;  %v15506_v21 = vld [vmem:[#allocation41_spill] sm:$0xff] }
 0x801   : > { %5853 = vrot.lane.b32.xlu0 %v15505_v47, %s9005_s10  ;;  %5851 = vrot.lane.b32.xlu1 %v11790_v51, %s9005_s10 }
 0x803   : > { %v5611_v5 = vpop.permute.xlu0 %5610  ;;  %v5609_v46 = vpop.permute.xlu1 %5608 }
 0x804   : > { %5793 = vst.msk [vmem:[#allocation3 + $0x50] sm:$0xff] %vm5782_vm3, %v5611_v5  ;;  %5792 = vst.msk [vmem:[#allocation3 + $0x48] sm:$0xff] %vm5782_vm3, %v5609_v46 }
 0x805   : > { %5857 = vrot.lane.b32.xlu0 %v11811_v16, %s9005_s10  ;;  %5855 = vrot.lane.b32.xlu1 %v11814_v9, %s9005_s10  ;;  %v15507_v9 = vld [vmem:[#allocation12_spill] sm:$0xff] }
 0x807   : > { %v5615_v57 = vpop.permute.xlu0 %5614  ;;  %v5613_v34 = vpop.permute.xlu1 %5612 }
 0x808   : > { %5795 = vst.msk [vmem:[#allocation3 + $0x60] sm:$0xff] %vm5782_vm3, %v5615_v57  ;;  %5794 = vst.msk [vmem:[#allocation3 + $0x58] sm:$0xff] %vm5782_vm3, %v5613_v34 }
 0x809   : > { %5861 = vrot.lane.b32.xlu0 %v11839_v20, %s9005_s10  ;;  %5859 = vrot.lane.b32.xlu1 %v15506_v21, %s9005_s10 }
 0x80b   : > { %v5619_v5 = vpop.permute.xlu0 %5618  ;;  %v5617_v46 = vpop.permute.xlu1 %5616 }
 0x80c   : > { %5797 = vst.msk [vmem:[#allocation3 + $0x70] sm:$0xff] %vm5782_vm3, %v5619_v5  ;;  %5796 = vst.msk [vmem:[#allocation3 + $0x68] sm:$0xff] %vm5782_vm3, %v5617_v46 }
 0x80d   : > { %5865 = vrot.lane.b32.xlu0 %v15507_v9, %s9005_s10  ;;  %5863 = vrot.lane.b32.xlu1 %v11836_v13, %s9005_s10  ;;  %v15508_v13 = vld [vmem:[#allocation17_spill] sm:$0xff] }
 0x80f   : > { %v5623_v57 = vpop.permute.xlu0 %5622  ;;  %v5621_v34 = vpop.permute.xlu1 %5620 }
 0x810   : > { %5799 = vst.msk [vmem:[#allocation3 + $0x80] sm:$0xff] %vm5782_vm3, %v5623_v57  ;;  %5798 = vst.msk [vmem:[#allocation3 + $0x78] sm:$0xff] %vm5782_vm3, %v5621_v34 }
 0x811   : > { %5869 = vrot.lane.b32.xlu0 %v11853_v15, %s9005_s10  ;;  %5867 = vrot.lane.b32.xlu1 %v11856_v59, %s9005_s10  ;;  %v15509_v59 = vld [vmem:[#allocation21_spill] sm:$0xff] }
 0x813   : > { %v5627_v5 = vpop.permute.xlu0 %5626  ;;  %v5625_v46 = vpop.permute.xlu1 %5624 }
 0x814   : > { %5801 = vst.msk [vmem:[#allocation3 + $0x90] sm:$0xff] %vm5782_vm3, %v5627_v5  ;;  %5800 = vst.msk [vmem:[#allocation3 + $0x88] sm:$0xff] %vm5782_vm3, %v5625_v46 }
 0x815   : > { %5873 = vrot.lane.b32.xlu0 %v11881_v61, %s9005_s10  ;;  %5871 = vrot.lane.b32.xlu1 %v15508_v13, %s9005_s10 }
 0x817   : > { %v5631_v57 = vpop.permute.xlu0 %5630  ;;  %v5629_v34 = vpop.permute.xlu1 %5628 }
 0x818   : > { %5803 = vst.msk [vmem:[#allocation3 + $0xa0] sm:$0xff] %vm5782_vm3, %v5631_v57  ;;  %5802 = vst.msk [vmem:[#allocation3 + $0x98] sm:$0xff] %vm5782_vm3, %v5629_v34 }
 0x819   : > { %5877 = vrot.lane.b32.xlu0 %v15509_v59, %s9005_s10  ;;  %5875 = vrot.lane.b32.xlu1 %v11878_v23, %s9005_s10  ;;  %v15510_v23 = vld [vmem:[#allocation26_spill] sm:$0xff] }
 0x81b   : > { %v5635_v5 = vpop.permute.xlu0 %5634  ;;  %v5633_v46 = vpop.permute.xlu1 %5632 }
 0x81c   : > { %5805 = vst.msk [vmem:[#allocation3 + $0xb0] sm:$0xff] %vm5782_vm3, %v5635_v5  ;;  %5804 = vst.msk [vmem:[#allocation3 + $0xa8] sm:$0xff] %vm5782_vm3, %v5633_v46 }
 0x81d   : > { %5881 = vrot.lane.b32.xlu0 %v11895_v49, %s9005_s10  ;;  %5879 = vrot.lane.b32.xlu1 %v11898_v19, %s9005_s10  ;;  %v15511_v19 = vld [vmem:[#allocation37_spill] sm:$0xff] }
 0x81f   : > { %v5639_v57 = vpop.permute.xlu0 %5638  ;;  %v5637_v34 = vpop.permute.xlu1 %5636 }
 0x820   : > { %5807 = vst.msk [vmem:[#allocation3 + $0xc0] sm:$0xff] %vm5782_vm3, %v5639_v57  ;;  %5806 = vst.msk [vmem:[#allocation3 + $0xb8] sm:$0xff] %vm5782_vm3, %v5637_v34 }
 0x821   : > { %5885 = vrot.lane.b32.xlu0 %v11923_v4, %s9005_s10  ;;  %5883 = vrot.lane.b32.xlu1 %v15510_v23, %s9005_s10 }
 0x823   : > { %v5643_v5 = vpop.permute.xlu0 %5642  ;;  %v5641_v46 = vpop.permute.xlu1 %5640 }
 0x824   : > { %5809 = vst.msk [vmem:[#allocation3 + $0xd0] sm:$0xff] %vm5782_vm3, %v5643_v5  ;;  %5808 = vst.msk [vmem:[#allocation3 + $0xc8] sm:$0xff] %vm5782_vm3, %v5641_v46 }
 0x825   : > { %5889 = vrot.lane.b32.xlu0 %v15511_v19, %s9005_s10  ;;  %5887 = vrot.lane.b32.xlu1 %v11920_v25, %s9005_s10  ;;  %v15512_v25 = vld [vmem:[#allocation42_spill] sm:$0xff] }
 0x827   : > { %v5647_v57 = vpop.permute.xlu0 %5646  ;;  %v5645_v34 = vpop.permute.xlu1 %5644 }
 0x828   : > { %5811 = vst.msk [vmem:[#allocation3 + $0xe0] sm:$0xff] %vm5782_vm3, %v5647_v57  ;;  %5810 = vst.msk [vmem:[#allocation3 + $0xd8] sm:$0xff] %vm5782_vm3, %v5645_v34 }
 0x829   : > { %5893 = vrot.lane.b32.xlu0 %v11937_v38, %s9005_s10  ;;  %5891 = vrot.lane.b32.xlu1 %v11940_v29, %s9005_s10  ;;  %v15513_v29 = vld [vmem:[#allocation47_spill] sm:$0xff] }
 0x82b   : > { %v5651_v5 = vpop.permute.xlu0 %5650  ;;  %v5649_v46 = vpop.permute.xlu1 %5648 }
 0x82c   : > { %5813 = vst.msk [vmem:[#allocation3 + $0xf0] sm:$0xff] %vm5782_vm3, %v5651_v5  ;;  %5812 = vst.msk [vmem:[#allocation3 + $0xe8] sm:$0xff] %vm5782_vm3, %v5649_v46 }
 0x82d   : > { %5897 = vrot.lane.b32.xlu0 %v11965_v50, %s9005_s10  ;;  %5895 = vrot.lane.b32.xlu1 %v15512_v25, %s9005_s10 }
 0x82f   : > { %v5655_v57 = vpop.permute.xlu0 %5654  ;;  %v5653_v34 = vpop.permute.xlu1 %5652 }
 0x830   : > { %5815 = vst.msk [vmem:[#allocation3 + $0x100] sm:$0xff] %vm5782_vm3, %v5655_v57  ;;  %5814 = vst.msk [vmem:[#allocation3 + $0xf8] sm:$0xff] %vm5782_vm3, %v5653_v34 }
 0x831   : > { %5901 = vrot.lane.b32.xlu0 %v15513_v29, %s9005_s10  ;;  %5899 = vrot.lane.b32.xlu1 %v11962_v26, %s9005_s10  ;;  %v15514_v26 = vld [vmem:[#allocation53_spill] sm:$0xff] }
 0x833   : > { %v5659_v5 = vpop.permute.xlu0 %5658  ;;  %v5657_v46 = vpop.permute.xlu1 %5656 }
 0x834   : > { %5817 = vst.msk [vmem:[#allocation3 + $0x110] sm:$0xff] %vm5782_vm3, %v5659_v5  ;;  %5816 = vst.msk [vmem:[#allocation3 + $0x108] sm:$0xff] %vm5782_vm3, %v5657_v46 }
 0x835   : > { %5905 = vrot.lane.b32.xlu0 %v11979_v12, %s9005_s10  ;;  %5903 = vrot.lane.b32.xlu1 %v11982_v35, %s9005_s10  ;;  %v15515_v35 = vld [vmem:[#allocation59_spill] sm:$0xff] }
 0x837   : > { %v5663_v57 = vpop.permute.xlu0 %5662  ;;  %v5661_v34 = vpop.permute.xlu1 %5660 }
 0x838   : > { %5819 = vst.msk [vmem:[#allocation3 + $0x120] sm:$0xff] %vm5782_vm3, %v5663_v57  ;;  %5818 = vst.msk [vmem:[#allocation3 + $0x118] sm:$0xff] %vm5782_vm3, %v5661_v34 }
 0x839   : > { %5909 = vrot.lane.b32.xlu0 %v12007_v2, %s9005_s10  ;;  %5907 = vrot.lane.b32.xlu1 %v15514_v26, %s9005_s10 }
 0x83b   : > { %v5667_v5 = vpop.permute.xlu0 %5666  ;;  %v5665_v46 = vpop.permute.xlu1 %5664 }
 0x83c   : > { %5821 = vst.msk [vmem:[#allocation3 + $0x130] sm:$0xff] %vm5782_vm3, %v5667_v5  ;;  %5820 = vst.msk [vmem:[#allocation3 + $0x128] sm:$0xff] %vm5782_vm3, %v5665_v46 }
 0x83d   : > { %5913 = vrot.lane.b32.xlu0 %v15515_v35, %s9005_s10  ;;  %5911 = vrot.lane.b32.xlu1 %v12004_v7, %s9005_s10  ;;  %v15516_v7 = vld [vmem:[#allocation65_spill] sm:$0xff] }
 0x83f   : > { %v5671_v57 = vpop.permute.xlu0 %5670  ;;  %v5669_v34 = vpop.permute.xlu1 %5668 }
 0x840   : > { %5823 = vst.msk [vmem:[#allocation3 + $0x140] sm:$0xff] %vm5782_vm3, %v5671_v57  ;;  %5822 = vst.msk [vmem:[#allocation3 + $0x138] sm:$0xff] %vm5782_vm3, %v5669_v34 }
 0x841   : > { %5917 = vrot.lane.b32.xlu0 %v12021_v32, %s9005_s10  ;;  %5915 = vrot.lane.b32.xlu1 %v12024_v27, %s9005_s10  ;;  %v15517_v27 = vld [vmem:[#allocation80_spill] sm:$0xff] }
 0x843   : > { %v5675_v5 = vpop.permute.xlu0 %5674  ;;  %v5673_v46 = vpop.permute.xlu1 %5672 }
 0x844   : > { %5825 = vst.msk [vmem:[#allocation3 + $0x150] sm:$0xff] %vm5782_vm3, %v5675_v5  ;;  %5824 = vst.msk [vmem:[#allocation3 + $0x148] sm:$0xff] %vm5782_vm3, %v5673_v46 }
 0x845   : > { %5921 = vrot.lane.b32.xlu0 %v12049_v63, %s9005_s10  ;;  %5919 = vrot.lane.b32.xlu1 %v15516_v7, %s9005_s10  ;;  %v15518_v7 = vld [vmem:[#allocation78_spill] sm:$0xff] }
 0x847   : > { %v5679_v57 = vpop.permute.xlu0 %5678  ;;  %v5677_v34 = vpop.permute.xlu1 %5676 }
 0x848   : > { %5827 = vst.msk [vmem:[#allocation3 + $0x160] sm:$0xff] %vm5782_vm3, %v5679_v57  ;;  %5826 = vst.msk [vmem:[#allocation3 + $0x158] sm:$0xff] %vm5782_vm3, %v5677_v34 }
 0x849   : > { %5925 = vrot.lane.b32.xlu0 %v15517_v27, %s9005_s10  ;;  %5923 = vrot.lane.b32.xlu1 %v12046_v44, %s9005_s10  ;;  %v15519_v44 = vld [vmem:[#allocation33_spill] sm:$0xff] }
 0x84b   : > { %v5683_v5 = vpop.permute.xlu0 %5682  ;;  %v5681_v46 = vpop.permute.xlu1 %5680 }
 0x84c   : > { %5829 = vst.msk [vmem:[#allocation3 + $0x170] sm:$0xff] %vm5782_vm3, %v5683_v5  ;;  %5828 = vst.msk [vmem:[#allocation3 + $0x168] sm:$0xff] %vm5782_vm3, %v5681_v46 }
 0x84d   : > { %5929 = vrot.lane.b32.xlu0 %v12063_v3, %s9005_s10  ;;  %5927 = vrot.lane.b32.xlu1 %v15518_v7, %s9005_s10  ;;  %v15520_v7 = vld [vmem:[#allocation35_spill] sm:$0xff] }
 0x84f   : > { %v5687_v57 = vpop.permute.xlu0 %5686  ;;  %v5685_v34 = vpop.permute.xlu1 %5684 }
 0x850   : > { %5831 = vst.msk [vmem:[#allocation3 + $0x180] sm:$0xff] %vm5782_vm3, %v5687_v57  ;;  %5830 = vst.msk [vmem:[#allocation3 + $0x178] sm:$0xff] %vm5782_vm3, %v5685_v34 }
 0x851   : > { %5933 = vrot.lane.b32.xlu0 %v12093_v42, %s9005_s10  ;;  %5931 = vrot.lane.b32.xlu1 %v15519_v44, %s9005_s10 }
 0x853   : > { %v5691_v5 = vpop.permute.xlu0 %5690  ;;  %v5689_v46 = vpop.permute.xlu1 %5688 }
 0x854   : > { %5833 = vst.msk [vmem:[#allocation3 + $0x190] sm:$0xff] %vm5782_vm3, %v5691_v5  ;;  %5832 = vst.msk [vmem:[#allocation3 + $0x188] sm:$0xff] %vm5782_vm3, %v5689_v46 }
 0x855   : > { %5937 = vrot.lane.b32.xlu0 %v15520_v7, %s9005_s10  ;;  %5935 = vrot.lane.b32.xlu1 %v12090_v33, %s9005_s10  ;;  %v15521_v33 = vld [vmem:[#allocation29_spill] sm:$0xff] }
 0x857   : > { %v5695_v57 = vpop.permute.xlu0 %5694  ;;  %v5693_v34 = vpop.permute.xlu1 %5692 }
 0x858   : > { %5835 = vst.msk [vmem:[#allocation3 + $0x1a0] sm:$0xff] %vm5782_vm3, %v5695_v57  ;;  %5834 = vst.msk [vmem:[#allocation3 + $0x198] sm:$0xff] %vm5782_vm3, %v5693_v34 }
 0x859   : > { %5941 = vrot.lane.b32.xlu0 %v15497_v40, %s9005_s10  ;;  %5939 = vrot.lane.b32.xlu1 %v12863_v0, %s9005_s10  ;;  %v15522_v0 = vld [vmem:[#allocation83_spill] sm:$0xff] }
 0x85b   : > { %v5699_v5 = vpop.permute.xlu0 %5698  ;;  %v5697_v46 = vpop.permute.xlu1 %5696 }
 0x85c   : > { %5837 = vst.msk [vmem:[#allocation3 + $0x1b0] sm:$0xff] %vm5782_vm3, %v5699_v5  ;;  %5836 = vst.msk [vmem:[#allocation3 + $0x1a8] sm:$0xff] %vm5782_vm3, %v5697_v46 }
 0x85d   : > { %5945 = vrot.lane.b32.xlu0 %v15454_v56, %s9005_s10  ;;  %5943 = vrot.lane.b32.xlu1 %v15521_v33, %s9005_s10 }
 0x85f   : > { %v5703_v57 = vpop.permute.xlu0 %5702  ;;  %v5701_v34 = vpop.permute.xlu1 %5700 }
 0x860   : > { %5839 = vst.msk [vmem:[#allocation3 + $0x1c0] sm:$0xff] %vm5782_vm3, %v5703_v57  ;;  %5838 = vst.msk [vmem:[#allocation3 + $0x1b8] sm:$0xff] %vm5782_vm3, %v5701_v34 }
 0x861   : > { %5949 = vrot.lane.b32.xlu0 %v15522_v0, %s9005_s10  ;;  %5947 = vrot.lane.b32.xlu1 %v12125_v54, %s9005_s10  ;;  %v15523_v54 = vld [vmem:[#allocation86_spill] sm:$0xff] }
 0x863   : > { %v5707_v5 = vpop.permute.xlu0 %5706  ;;  %v5705_v46 = vpop.permute.xlu1 %5704 }
 0x864   : > { %5841 = vst.msk [vmem:[#allocation3 + $0x1d0] sm:$0xff] %vm5782_vm3, %v5707_v5  ;;  %5840 = vst.msk [vmem:[#allocation3 + $0x1c8] sm:$0xff] %vm5782_vm3, %v5705_v46 }
 0x865   : > { %5953 = vrot.lane.b32.xlu0 %v15458_v24, %s9005_s10  ;;  %5951 = vrot.lane.b32.xlu1 %v15455_v11, %s9005_s10  ;;  %v15524_v11 = vld [vmem:[#allocation64_spill] sm:$0xff] }
 0x867   : > { %v5711_v57 = vpop.permute.xlu0 %5710  ;;  %v5709_v34 = vpop.permute.xlu1 %5708 }
 0x868   : > { %5843 = vst.msk [vmem:[#allocation3 + $0x1e0] sm:$0xff] %vm5782_vm3, %v5711_v57  ;;  %5842 = vst.msk [vmem:[#allocation3 + $0x1d8] sm:$0xff] %vm5782_vm3, %v5709_v34 }
 0x869   : > { %5957 = vrot.lane.b32.xlu0 %v15460_v53, %s9005_s10  ;;  %5955 = vrot.lane.b32.xlu1 %v15523_v54, %s9005_s10 }
 0x86b   : > { %v5715_v5 = vpop.permute.xlu0 %5714  ;;  %v5713_v46 = vpop.permute.xlu1 %5712 }
 0x86c   : > { %5845 = vst.msk [vmem:[#allocation3 + $0x1f0] sm:$0xff] %vm5782_vm3, %v5715_v5  ;;  %5844 = vst.msk [vmem:[#allocation3 + $0x1e8] sm:$0xff] %vm5782_vm3, %v5713_v46 }
 0x86d   : > { %5961 = vrot.lane.b32.xlu0 %v15524_v11, %s9005_s10  ;;  %5959 = vrot.lane.b32.xlu1 %v15459_v22, %s9005_s10 }
 0x86f   : > { %v5850_v57 = vpop.permute.xlu0 %5849  ;;  %v5717_v34 = vpop.permute.xlu1 %5716 }
 0x870   : > { %6138 = vst.msk [vmem:[#allocation3 - $0x1] sm:$0xfe] %vm6137_vm0, %v5850_v57  ;;  %v15525_v57 = vld [vmem:[#allocation50_spill] sm:$0xff] }
 0x871   : > { %5846 = vst.msk [vmem:[#allocation3 + $0x1f8] sm:$0xff] %vm5782_vm3, %v5717_v34  ;;  %5965 = vrot.lane.b32.xlu0 %v15464_v39, %s9005_s10  ;;  %5963 = vrot.lane.b32.xlu1 %v15461_v8, %s9005_s10  ;;  %v15526_v8 = vld [vmem:[#allocation68_spill] sm:$0xff] }
 0x873   : > { %v5854_v5 = vpop.permute.xlu0 %5853  ;;  %v5852_v46 = vpop.permute.xlu1 %5851 }
 0x874   : > { %6142 = vst.msk [vmem:[#allocation3 + $0xf] sm:$0x1] %vm6141_vm4, %v5854_v5 }
 0x875   : > { %6140 = vst.msk [vmem:[#allocation3 + $0x7] sm:$0xff] %vm6139_vm5, %v5852_v46  ;;  %5969 = vrot.lane.b32.xlu0 %v15466_v14, %s9005_s10  ;;  %5967 = vrot.lane.b32.xlu1 %v15525_v57, %s9005_s10 }
 0x877   : > { %v5858_v34 = vpop.permute.xlu0 %5857  ;;  %v5856_v22 = vpop.permute.xlu1 %5855 }
 0x878   : > { %6144 = vst.msk [vmem:[#allocation3 + $0x17] sm:$0xff] %vm6139_vm5, %v5858_v34 }
 0x879   : > { %6143 = vst.msk [vmem:[#allocation3 + $0xf] sm:$0xfe] %vm6137_vm0, %v5856_v22  ;;  %5973 = vrot.lane.b32.xlu0 %v15526_v8, %s9005_s10  ;;  %5971 = vrot.lane.b32.xlu1 %v15465_v52, %s9005_s10  ;;  %v15527_v52 = vld [vmem:[#allocation58_spill] sm:$0xff] }
 0x87b   : > { %v5862_v5 = vpop.permute.xlu0 %5861  ;;  %v5860_v46 = vpop.permute.xlu1 %5859 }
 0x87c   : > { %6146 = vst.msk [vmem:[#allocation3 + $0x1f] sm:$0xfe] %vm6137_vm0, %v5862_v5 }
 0x87d   : > { %6145 = vst.msk [vmem:[#allocation3 + $0x1f] sm:$0x1] %vm6141_vm4, %v5860_v46  ;;  %5977 = vrot.lane.b32.xlu0 %v15470_v43, %s9005_s10  ;;  %5975 = vrot.lane.b32.xlu1 %v15467_v6, %s9005_s10  ;;  %v15528_v6 = vld [vmem:[#allocation11_spill] sm:$0xff] }
 0x87f   : > { %v5866_v34 = vpop.permute.xlu0 %5865  ;;  %v5864_v22 = vpop.permute.xlu1 %5863 }
 0x880   : > { %6148 = vst.msk [vmem:[#allocation3 + $0x2f] sm:$0x1] %vm6141_vm4, %v5866_v34 }
 0x881   : > { %6147 = vst.msk [vmem:[#allocation3 + $0x27] sm:$0xff] %vm6139_vm5, %v5864_v22  ;;  %5981 = vrot.lane.b32.xlu0 %v15472_v1, %s9005_s10  ;;  %5979 = vrot.lane.b32.xlu1 %v15527_v52, %s9005_s10 }
 0x883   : > { %v5870_v5 = vpop.permute.xlu0 %5869  ;;  %v5868_v46 = vpop.permute.xlu1 %5867 }
 0x884   : > { %6150 = vst.msk [vmem:[#allocation3 + $0x37] sm:$0xff] %vm6139_vm5, %v5870_v5 }
 0x885   : > { %6149 = vst.msk [vmem:[#allocation3 + $0x2f] sm:$0xfe] %vm6137_vm0, %v5868_v46  ;;  %5985 = vrot.lane.b32.xlu0 %v15528_v6, %s9005_s10  ;;  %5983 = vrot.lane.b32.xlu1 %v15471_v28, %s9005_s10  ;;  %v15529_v28 = vld [vmem:[#allocation18_spill] sm:$0xff] }
 0x887   : > { %v5874_v34 = vpop.permute.xlu0 %5873  ;;  %v5872_v22 = vpop.permute.xlu1 %5871 }
 0x888   : > { %6152 = vst.msk [vmem:[#allocation3 + $0x3f] sm:$0xfe] %vm6137_vm0, %v5874_v34 }
 0x889   : > { %6151 = vst.msk [vmem:[#allocation3 + $0x3f] sm:$0x1] %vm6141_vm4, %v5872_v22  ;;  %5989 = vrot.lane.b32.xlu0 %v15476_v10, %s9005_s10  ;;  %5987 = vrot.lane.b32.xlu1 %v15473_v37, %s9005_s10  ;;  %v15530_v37 = vld [vmem:[#allocation23_spill] sm:$0xff] }
 0x88b   : > { %v5878_v5 = vpop.permute.xlu0 %5877  ;;  %v5876_v46 = vpop.permute.xlu1 %5875 }
 0x88c   : > { %6154 = vst.msk [vmem:[#allocation3 + $0x4f] sm:$0x1] %vm6141_vm4, %v5878_v5 }
 0x88d   : > { %6153 = vst.msk [vmem:[#allocation3 + $0x47] sm:$0xff] %vm6139_vm5, %v5876_v46  ;;  %5993 = vrot.lane.b32.xlu0 %v15478_v60, %s9005_s10  ;;  %5991 = vrot.lane.b32.xlu1 %v15529_v28, %s9005_s10 }
 0x88f   : > { %v5882_v34 = vpop.permute.xlu0 %5881  ;;  %v5880_v22 = vpop.permute.xlu1 %5879 }
 0x890   : > { %6156 = vst.msk [vmem:[#allocation3 + $0x57] sm:$0xff] %vm6139_vm5, %v5882_v34 }
 0x891   : > { %6155 = vst.msk [vmem:[#allocation3 + $0x4f] sm:$0xfe] %vm6137_vm0, %v5880_v22  ;;  %5997 = vrot.lane.b32.xlu0 %v15530_v37, %s9005_s10  ;;  %5995 = vrot.lane.b32.xlu1 %v15477_v18, %s9005_s10  ;;  %v15531_v18 = vld [vmem:[#allocation38_spill] sm:$0xff]  ;;  %v15532_v37 = vld [vmem:[#allocation32_spill] sm:$0xff] }
 0x893   : > { %v5886_v5 = vpop.permute.xlu0 %5885  ;;  %v5884_v46 = vpop.permute.xlu1 %5883 }
 0x894   : > { %6158 = vst.msk [vmem:[#allocation3 + $0x5f] sm:$0xfe] %vm6137_vm0, %v5886_v5 }
 0x895   : > { %6157 = vst.msk [vmem:[#allocation3 + $0x5f] sm:$0x1] %vm6141_vm4, %v5884_v46  ;;  %6001 = vrot.lane.b32.xlu0 %v15482_v55, %s9005_s10  ;;  %5999 = vrot.lane.b32.xlu1 %v15479_v31, %s9005_s10  ;;  %v15533_v31 = vld [vmem:[#allocation69_spill] sm:$0xff] }
 0x897   : > { %v5890_v34 = vpop.permute.xlu0 %5889  ;;  %v5888_v22 = vpop.permute.xlu1 %5887 }
 0x898   : > { %6160 = vst.msk [vmem:[#allocation3 + $0x6f] sm:$0x1] %vm6141_vm4, %v5890_v34 }
 0x899   : > { %6159 = vst.msk [vmem:[#allocation3 + $0x67] sm:$0xff] %vm6139_vm5, %v5888_v22  ;;  %6005 = vrot.lane.b32.xlu0 %v15531_v18, %s9005_s10  ;;  %6003 = vrot.lane.b32.xlu1 %v15532_v37, %s9005_s10  ;;  %v15534_v37 = vld [vmem:[#allocation43_spill] sm:$0xff]  ;;  %v15535_v18 = vld [vmem:[#allocation44_spill] sm:$0xff] }
 0x89b   : > { %v5894_v5 = vpop.permute.xlu0 %5893  ;;  %v5892_v46 = vpop.permute.xlu1 %5891 }
 0x89c   : > { %6162 = vst.msk [vmem:[#allocation3 + $0x77] sm:$0xff] %vm6139_vm5, %v5894_v5 }
 0x89d   : > { %6161 = vst.msk [vmem:[#allocation3 + $0x6f] sm:$0xfe] %vm6137_vm0, %v5892_v46  ;;  %6009 = vrot.lane.b32.xlu0 %v15533_v31, %s9005_s10  ;;  %6007 = vrot.lane.b32.xlu1 %v15499_v62, %s9005_s10  ;;  %v15536_v62 = vld [vmem:[#allocation54_spill] sm:$0xff]  ;;  %v15537_v31 = vld [vmem:[#allocation49_spill] sm:$0xff] }
 0x89f   : > { %v5898_v34 = vpop.permute.xlu0 %5897  ;;  %v5896_v22 = vpop.permute.xlu1 %5895 }
 0x8a0   : > { %6164 = vst.msk [vmem:[#allocation3 + $0x7f] sm:$0xfe] %vm6137_vm0, %v5898_v34 }
 0x8a1   : > { %6163 = vst.msk [vmem:[#allocation3 + $0x7f] sm:$0x1] %vm6141_vm4, %v5896_v22  ;;  %6013 = vrot.lane.b32.xlu0 %v15534_v37, %s9005_s10  ;;  %6011 = vrot.lane.b32.xlu1 %v15535_v18, %s9005_s10  ;;  %v15538_v18 = vld [vmem:[#allocation55_spill] sm:$0xff] }
 0x8a3   : > { %v5902_v5 = vpop.permute.xlu0 %5901  ;;  %v5900_v46 = vpop.permute.xlu1 %5899 }
 0x8a4   : > { %6166 = vst.msk [vmem:[#allocation3 + $0x8f] sm:$0x1] %vm6141_vm4, %v5902_v5 }
 0x8a5   : > { %6165 = vst.msk [vmem:[#allocation3 + $0x87] sm:$0xff] %vm6139_vm5, %v5900_v46  ;;  %6017 = vrot.lane.b32.xlu0 %v15536_v62, %s9005_s10  ;;  %6015 = vrot.lane.b32.xlu1 %v15537_v31, %s9005_s10  ;;  %v15539_v31 = vld [vmem:[#allocation61_spill] sm:$0xff] }
 0x8a7   : > { %v5906_v34 = vpop.permute.xlu0 %5905  ;;  %v5904_v22 = vpop.permute.xlu1 %5903 }
 0x8a8   : > { %6168 = vst.msk [vmem:[#allocation3 + $0x97] sm:$0xff] %vm6139_vm5, %v5906_v34 }
 0x8a9   : > { %6167 = vst.msk [vmem:[#allocation3 + $0x8f] sm:$0xfe] %vm6137_vm0, %v5904_v22  ;;  %6021 = vrot.lane.b32.xlu0 %v15538_v18, %s9005_s10  ;;  %6019 = vrot.lane.b32.xlu1 %v15489_v58, %s9005_s10  ;;  %v15540_v58 = vld [vmem:[#allocation67_spill] sm:$0xff] }
 0x8ab   : > { %v5910_v5 = vpop.permute.xlu0 %5909  ;;  %v5908_v46 = vpop.permute.xlu1 %5907 }
 0x8ac   : > { %6170 = vst.msk [vmem:[#allocation3 + $0x9f] sm:$0xfe] %vm6137_vm0, %v5910_v5 }
 0x8ad   : > { %6169 = vst.msk [vmem:[#allocation3 + $0x9f] sm:$0x1] %vm6141_vm4, %v5908_v46  ;;  %6025 = vrot.lane.b32.xlu0 %v12432_v30, %s9005_s10  ;;  %6023 = vrot.lane.b32.xlu1 %v15539_v31, %s9005_s10  ;;  %v15541_v31 = vld [vmem:[#allocation76_spill] sm:$0xff] }
 0x8af   : > { %v5914_v34 = vpop.permute.xlu0 %5913  ;;  %v5912_v22 = vpop.permute.xlu1 %5911 }
 0x8b0   : > { %6172 = vst.msk [vmem:[#allocation3 + $0xaf] sm:$0x1] %vm6141_vm4, %v5914_v34 }
 0x8b1   : > { %6171 = vst.msk [vmem:[#allocation3 + $0xa7] sm:$0xff] %vm6139_vm5, %v5912_v22  ;;  %6029 = vrot.lane.b32.xlu0 %v12459_v41, %s9005_s10  ;;  %6027 = vrot.lane.b32.xlu1 %v15540_v58, %s9005_s10 }
 0x8b3   : > { %v5918_v5 = vpop.permute.xlu0 %5917  ;;  %v5916_v46 = vpop.permute.xlu1 %5915 }
 0x8b4   : > { %6174 = vst.msk [vmem:[#allocation3 + $0xb7] sm:$0xff] %vm6139_vm5, %v5918_v5 }
 0x8b5   : > { %6173 = vst.msk [vmem:[#allocation3 + $0xaf] sm:$0xfe] %vm6137_vm0, %v5916_v46  ;;  %6033 = vrot.lane.b32.xlu0 %v15541_v31, %s9005_s10  ;;  %6031 = vrot.lane.b32.xlu1 %v12456_v36, %s9005_s10 }
 0x8b7   : > { %v5922_v34 = vpop.permute.xlu0 %5921  ;;  %v5920_v22 = vpop.permute.xlu1 %5919 }
 0x8b8   : > { %6176 = vst.msk [vmem:[#allocation3 + $0xbf] sm:$0xfe] %vm6137_vm0, %v5922_v34  ;;  %v15542_v34 = vld [vmem:[#allocation73_spill] sm:$0xff] }
 0x8b9   : > { %6175 = vst.msk [vmem:[#allocation3 + $0xbf] sm:$0x1] %vm6141_vm4, %v5920_v22  ;;  %6037 = vrot.lane.b32.xlu0 %v15504_v17, %s9005_s10  ;;  %6035 = vrot.lane.b32.xlu1 %v12965_v48, %s9005_s10 }
 0x8bb   : > { %v5926_v5 = vpop.permute.xlu0 %5925  ;;  %v5924_v46 = vpop.permute.xlu1 %5923 }
 0x8bc   : > { %6178 = vst.msk [vmem:[#allocation3 + $0xcf] sm:$0x1] %vm6141_vm4, %v5926_v5 }
 0x8bd   : > { %6177 = vst.msk [vmem:[#allocation3 + $0xc7] sm:$0xff] %vm6139_vm5, %v5924_v46  ;;  %6236 = vrot.lane.b32.xlu0 %v11793_v45, %s9006_s14  ;;  %6039 = vrot.lane.b32.xlu1 %v15542_v34, %s9005_s10  ;;  %v15543_v45 = vld [vmem:[#allocation4_spill] sm:$0xff] }
 0x8bf   : > { %v5930_v22 = vpop.permute.xlu0 %5929  ;;  %v5928_v36 = vpop.permute.xlu1 %5927 }
 0x8c0   : > { %6180 = vst.msk [vmem:[#allocation3 + $0xd7] sm:$0xff] %vm6139_vm5, %v5930_v22 }
 0x8c1   : > { %6179 = vst.msk [vmem:[#allocation3 + $0xcf] sm:$0xfe] %vm6137_vm0, %v5928_v36  ;;  %6240 = vrot.lane.b32.xlu0 %v15505_v47, %s9006_s14  ;;  %6238 = vrot.lane.b32.xlu1 %v11790_v51, %s9006_s14 }
 0x8c3   : > { %v5934_v5 = vpop.permute.xlu0 %5933  ;;  %v5932_v46 = vpop.permute.xlu1 %5931 }
 0x8c4   : > { %6182 = vst.msk [vmem:[#allocation3 + $0xdf] sm:$0xfe] %vm6137_vm0, %v5934_v5  ;;  %v15544_v5 = vld [vmem:[#allocation9_spill] sm:$0xff] }
 0x8c5   : > { %6181 = vst.msk [vmem:[#allocation3 + $0xdf] sm:$0x1] %vm6141_vm4, %v5932_v46  ;;  %6244 = vrot.lane.b32.xlu0 %v11811_v16, %s9006_s14  ;;  %6242 = vrot.lane.b32.xlu1 %v15543_v45, %s9006_s14 }
 0x8c7   : > { %v5938_v22 = vpop.permute.xlu0 %5937  ;;  %v5936_v36 = vpop.permute.xlu1 %5935 }
 0x8c8   : > { %6184 = vst.msk [vmem:[#allocation3 + $0xef] sm:$0x1] %vm6141_vm4, %v5938_v22 }
 0x8c9   : > { %6183 = vst.msk [vmem:[#allocation3 + $0xe7] sm:$0xff] %vm6139_vm5, %v5936_v36  ;;  %6248 = vrot.lane.b32.xlu0 %v11839_v20, %s9006_s14  ;;  %6246 = vrot.lane.b32.xlu1 %v15506_v21, %s9006_s14  ;;  %v15545_v36 = vld [vmem:[#allocation14_spill] sm:$0xff]  ;;  %v15546_v21 = vld [vmem:[#allocation19_spill] sm:$0xff] }
 0x8cb   : > { %v5942_v51 = vpop.permute.xlu0 %5941  ;;  %v5940_v47 = vpop.permute.xlu1 %5939 }
 0x8cc   : > { %6186 = vst.msk [vmem:[#allocation3 + $0xf7] sm:$0xff] %vm6139_vm5, %v5942_v51 }
 0x8cd   : > { %6185 = vst.msk [vmem:[#allocation3 + $0xef] sm:$0xfe] %vm6137_vm0, %v5940_v47  ;;  %6252 = vrot.lane.b32.xlu0 %v15507_v9, %s9006_s14  ;;  %6250 = vrot.lane.b32.xlu1 %v15544_v5, %s9006_s14  ;;  %v15555_v9 = vld [vmem:[#allocation70_spill] sm:$0xff] }
 0x8cf   : > { %v5946_v46 = vpop.permute.xlu0 %5945  ;;  %v5944_v22 = vpop.permute.xlu1 %5943 }
 0x8d0   : > { %6188 = vst.msk [vmem:[#allocation3 + $0xff] sm:$0xfe] %vm6137_vm0, %v5946_v46 }
 0x8d1   : > { %6187 = vst.msk [vmem:[#allocation3 + $0xff] sm:$0x1] %vm6141_vm4, %v5944_v22  ;;  %6256 = vrot.lane.b32.xlu0 %v11853_v15, %s9006_s14  ;;  %6254 = vrot.lane.b32.xlu1 %v15545_v36, %s9006_s14 }
 0x8d3   : > { %v5950_v51 = vpop.permute.xlu0 %5949  ;;  %v5948_v47 = vpop.permute.xlu1 %5947 }
 0x8d4   : > { %6190 = vst.msk [vmem:[#allocation3 + $0x10f] sm:$0x1] %vm6141_vm4, %v5950_v51 }
 0x8d5   : > { %6189 = vst.msk [vmem:[#allocation3 + $0x107] sm:$0xff] %vm6139_vm5, %v5948_v47  ;;  %6260 = vrot.lane.b32.xlu0 %v11881_v61, %s9006_s14  ;;  %6258 = vrot.lane.b32.xlu1 %v15508_v13, %s9006_s14  ;;  %v15547_v13 = vld [vmem:[#allocation22_spill] sm:$0xff] }
 0x8d7   : > { %v5954_v46 = vpop.permute.xlu0 %5953  ;;  %v5952_v22 = vpop.permute.xlu1 %5951 }
 0x8d8   : > { %6192 = vst.msk [vmem:[#allocation3 + $0x117] sm:$0xff] %vm6139_vm5, %v5954_v46 }
 0x8d9   : > { %6191 = vst.msk [vmem:[#allocation3 + $0x10f] sm:$0xfe] %vm6137_vm0, %v5952_v22  ;;  %6264 = vrot.lane.b32.xlu0 %v15509_v59, %s9006_s14  ;;  %6262 = vrot.lane.b32.xlu1 %v15546_v21, %s9006_s14  ;;  %v15548_v59 = vld [vmem:[#allocation31_spill] sm:$0xff] }
 0x8db   : > { %v5958_v51 = vpop.permute.xlu0 %5957  ;;  %v5956_v47 = vpop.permute.xlu1 %5955 }
 0x8dc   : > { %6194 = vst.msk [vmem:[#allocation3 + $0x11f] sm:$0xfe] %vm6137_vm0, %v5958_v51 }
 0x8dd   : > { %6193 = vst.msk [vmem:[#allocation3 + $0x11f] sm:$0x1] %vm6141_vm4, %v5956_v47  ;;  %6268 = vrot.lane.b32.xlu0 %v11895_v49, %s9006_s14  ;;  %6266 = vrot.lane.b32.xlu1 %v15547_v13, %s9006_s14 }
 0x8df   : > { %v5962_v46 = vpop.permute.xlu0 %5961  ;;  %v5960_v22 = vpop.permute.xlu1 %5959 }
 0x8e0   : > { %6196 = vst.msk [vmem:[#allocation3 + $0x12f] sm:$0x1] %vm6141_vm4, %v5962_v46 }
 0x8e1   : > { %6195 = vst.msk [vmem:[#allocation3 + $0x127] sm:$0xff] %vm6139_vm5, %v5960_v22  ;;  %6272 = vrot.lane.b32.xlu0 %v11923_v4, %s9006_s14  ;;  %6270 = vrot.lane.b32.xlu1 %v15510_v23, %s9006_s14  ;;  %v15549_v23 = vld [vmem:[#allocation39_spill] sm:$0xff] }
 0x8e3   : > { %v5966_v51 = vpop.permute.xlu0 %5965  ;;  %v5964_v47 = vpop.permute.xlu1 %5963 }
 0x8e4   : > { %6198 = vst.msk [vmem:[#allocation3 + $0x137] sm:$0xff] %vm6139_vm5, %v5966_v51 }
 0x8e5   : > { %6197 = vst.msk [vmem:[#allocation3 + $0x12f] sm:$0xfe] %vm6137_vm0, %v5964_v47  ;;  %6276 = vrot.lane.b32.xlu0 %v15511_v19, %s9006_s14  ;;  %6274 = vrot.lane.b32.xlu1 %v15548_v59, %s9006_s14  ;;  %v15550_v19 = vld [vmem:[#allocation46_spill] sm:$0xff] }
 0x8e7   : > { %v5970_v46 = vpop.permute.xlu0 %5969  ;;  %v5968_v22 = vpop.permute.xlu1 %5967 }
 0x8e8   : > { %6200 = vst.msk [vmem:[#allocation3 + $0x13f] sm:$0xfe] %vm6137_vm0, %v5970_v46 }
 0x8e9   : > { %6199 = vst.msk [vmem:[#allocation3 + $0x13f] sm:$0x1] %vm6141_vm4, %v5968_v22  ;;  %6280 = vrot.lane.b32.xlu0 %v11937_v38, %s9006_s14  ;;  %6278 = vrot.lane.b32.xlu1 %v15549_v23, %s9006_s14 }
 0x8eb   : > { %v5974_v51 = vpop.permute.xlu0 %5973  ;;  %v5972_v47 = vpop.permute.xlu1 %5971 }
 0x8ec   : > { %6202 = vst.msk [vmem:[#allocation3 + $0x14f] sm:$0x1] %vm6141_vm4, %v5974_v51 }
 0x8ed   : > { %6201 = vst.msk [vmem:[#allocation3 + $0x147] sm:$0xff] %vm6139_vm5, %v5972_v47  ;;  %6284 = vrot.lane.b32.xlu0 %v11965_v50, %s9006_s14  ;;  %6282 = vrot.lane.b32.xlu1 %v15512_v25, %s9006_s14  ;;  %v15551_v25 = vld [vmem:[#allocation51_spill] sm:$0xff] }
 0x8ef   : > { %v5978_v46 = vpop.permute.xlu0 %5977  ;;  %v5976_v22 = vpop.permute.xlu1 %5975 }
 0x8f0   : > { %6204 = vst.msk [vmem:[#allocation3 + $0x157] sm:$0xff] %vm6139_vm5, %v5978_v46 }
 0x8f1   : > { %6203 = vst.msk [vmem:[#allocation3 + $0x14f] sm:$0xfe] %vm6137_vm0, %v5976_v22  ;;  %6288 = vrot.lane.b32.xlu0 %v15513_v29, %s9006_s14  ;;  %6286 = vrot.lane.b32.xlu1 %v15550_v19, %s9006_s14  ;;  %v15552_v29 = vld [vmem:[#allocation57_spill] sm:$0xff] }
 0x8f3   : > { %v5982_v51 = vpop.permute.xlu0 %5981  ;;  %v5980_v47 = vpop.permute.xlu1 %5979 }
 0x8f4   : > { %6206 = vst.msk [vmem:[#allocation3 + $0x15f] sm:$0xfe] %vm6137_vm0, %v5982_v51 }
 0x8f5   : > { %6205 = vst.msk [vmem:[#allocation3 + $0x15f] sm:$0x1] %vm6141_vm4, %v5980_v47  ;;  %6292 = vrot.lane.b32.xlu0 %v11979_v12, %s9006_s14  ;;  %6290 = vrot.lane.b32.xlu1 %v15551_v25, %s9006_s14 }
 0x8f7   : > { %v5986_v46 = vpop.permute.xlu0 %5985  ;;  %v5984_v22 = vpop.permute.xlu1 %5983 }
 0x8f8   : > { %6208 = vst.msk [vmem:[#allocation3 + $0x16f] sm:$0x1] %vm6141_vm4, %v5986_v46 }
 0x8f9   : > { %6207 = vst.msk [vmem:[#allocation3 + $0x167] sm:$0xff] %vm6139_vm5, %v5984_v22  ;;  %6296 = vrot.lane.b32.xlu0 %v12007_v2, %s9006_s14  ;;  %6294 = vrot.lane.b32.xlu1 %v15514_v26, %s9006_s14  ;;  %v15553_v26 = vld [vmem:[#allocation63_spill] sm:$0xff] }
 0x8fb   : > { %v5990_v51 = vpop.permute.xlu0 %5989  ;;  %v5988_v47 = vpop.permute.xlu1 %5987 }
 0x8fc   : > { %6210 = vst.msk [vmem:[#allocation3 + $0x177] sm:$0xff] %vm6139_vm5, %v5990_v51 }
 0x8fd   : > { %6209 = vst.msk [vmem:[#allocation3 + $0x16f] sm:$0xfe] %vm6137_vm0, %v5988_v47  ;;  %6300 = vrot.lane.b32.xlu0 %v15515_v35, %s9006_s14  ;;  %6298 = vrot.lane.b32.xlu1 %v15552_v29, %s9006_s14  ;;  %v15554_v35 = vld [vmem:[#allocation65_spill] sm:$0xff] }
 0x8ff   : > { %v5994_v46 = vpop.permute.xlu0 %5993  ;;  %v5992_v22 = vpop.permute.xlu1 %5991 }
 0x900   : > { %6212 = vst.msk [vmem:[#allocation3 + $0x17f] sm:$0xfe] %vm6137_vm0, %v5994_v46 }
 0x901   : > { %6211 = vst.msk [vmem:[#allocation3 + $0x17f] sm:$0x1] %vm6141_vm4, %v5992_v22  ;;  %6304 = vrot.lane.b32.xlu0 %v12021_v32, %s9006_s14  ;;  %6302 = vrot.lane.b32.xlu1 %v15553_v26, %s9006_s14 }
 0x903   : > { %v5998_v51 = vpop.permute.xlu0 %5997  ;;  %v5996_v47 = vpop.permute.xlu1 %5995 }
 0x904   : > { %6214 = vst.msk [vmem:[#allocation3 + $0x18f] sm:$0x1] %vm6141_vm4, %v5998_v51 }
 0x905   : > { %6213 = vst.msk [vmem:[#allocation3 + $0x187] sm:$0xff] %vm6139_vm5, %v5996_v47  ;;  %6308 = vrot.lane.b32.xlu0 %v12049_v63, %s9006_s14  ;;  %6306 = vrot.lane.b32.xlu1 %v15554_v35, %s9006_s14  ;;  %v15556_v35 = vld [vmem:[#allocation78_spill] sm:$0xff] }
 0x907   : > { %v6002_v46 = vpop.permute.xlu0 %6001  ;;  %v6000_v22 = vpop.permute.xlu1 %5999 }
 0x908   : > { %6216 = vst.msk [vmem:[#allocation3 + $0x197] sm:$0xff] %vm6139_vm5, %v6002_v46 }
 0x909   : > { %6215 = vst.msk [vmem:[#allocation3 + $0x18f] sm:$0xfe] %vm6137_vm0, %v6000_v22  ;;  %6312 = vrot.lane.b32.xlu0 %v15517_v27, %s9006_s14  ;;  %6310 = vrot.lane.b32.xlu1 %v15555_v9, %s9006_s14  ;;  %v15557_v27 = vld [vmem:[#allocation24_spill] sm:$0xff] }
 0x90b   : > { %v6006_v51 = vpop.permute.xlu0 %6005  ;;  %v6004_v47 = vpop.permute.xlu1 %6003 }
 0x90c   : > { %6218 = vst.msk [vmem:[#allocation3 + $0x19f] sm:$0xfe] %vm6137_vm0, %v6006_v51 }
 0x90d   : > { %6217 = vst.msk [vmem:[#allocation3 + $0x19f] sm:$0x1] %vm6141_vm4, %v6004_v47  ;;  %6316 = vrot.lane.b32.xlu0 %v12063_v3, %s9006_s14  ;;  %6314 = vrot.lane.b32.xlu1 %v15556_v35, %s9006_s14 }
 0x90f   : > { %v6010_v46 = vpop.permute.xlu0 %6009  ;;  %v6008_v22 = vpop.permute.xlu1 %6007 }
 0x910   : > { %6220 = vst.msk [vmem:[#allocation3 + $0x1af] sm:$0x1] %vm6141_vm4, %v6010_v46 }
 0x911   : > { %6219 = vst.msk [vmem:[#allocation3 + $0x1a7] sm:$0xff] %vm6139_vm5, %v6008_v22  ;;  %6320 = vrot.lane.b32.xlu0 %v12093_v42, %s9006_s14  ;;  %6318 = vrot.lane.b32.xlu1 %v15519_v44, %s9006_s14  ;;  %v15558_v44 = vld [vmem:[#allocation75_spill] sm:$0xff] }
 0x913   : > { %v6014_v51 = vpop.permute.xlu0 %6013  ;;  %v6012_v47 = vpop.permute.xlu1 %6011 }
 0x914   : > { %6222 = vst.msk [vmem:[#allocation3 + $0x1b7] sm:$0xff] %vm6139_vm5, %v6014_v51 }
 0x915   : > { %6221 = vst.msk [vmem:[#allocation3 + $0x1af] sm:$0xfe] %vm6137_vm0, %v6012_v47  ;;  %6324 = vrot.lane.b32.xlu0 %v15520_v7, %s9006_s14  ;;  %6322 = vrot.lane.b32.xlu1 %v15557_v27, %s9006_s14  ;;  %v15559_v7 = vld [vmem:[#allocation77_spill] sm:$0xff] }
 0x917   : > { %v6018_v46 = vpop.permute.xlu0 %6017  ;;  %v6016_v22 = vpop.permute.xlu1 %6015 }
 0x918   : > { %6224 = vst.msk [vmem:[#allocation3 + $0x1bf] sm:$0xfe] %vm6137_vm0, %v6018_v46 }
 0x919   : > { %6223 = vst.msk [vmem:[#allocation3 + $0x1bf] sm:$0x1] %vm6141_vm4, %v6016_v22  ;;  %6328 = vrot.lane.b32.xlu0 %v15497_v40, %s9006_s14  ;;  %6326 = vrot.lane.b32.xlu1 %v15558_v44, %s9006_s14 }
 0x91b   : > { %v6022_v51 = vpop.permute.xlu0 %6021  ;;  %v6020_v47 = vpop.permute.xlu1 %6019 }
 0x91c   : > { %6226 = vst.msk [vmem:[#allocation3 + $0x1cf] sm:$0x1] %vm6141_vm4, %v6022_v51 }
 0x91d   : > { %6225 = vst.msk [vmem:[#allocation3 + $0x1c7] sm:$0xff] %vm6139_vm5, %v6020_v47  ;;  %6332 = vrot.lane.b32.xlu0 %v15454_v56, %s9006_s14  ;;  %6330 = vrot.lane.b32.xlu1 %v15521_v33, %s9006_s14  ;;  %v15560_v56 = vld [vmem:[#allocation85_spill] sm:$0xff] }
 0x91f   : > { %v6026_v46 = vpop.permute.xlu0 %6025  ;;  %v6024_v22 = vpop.permute.xlu1 %6023 }
 0x920   : > { %6228 = vst.msk [vmem:[#allocation3 + $0x1d7] sm:$0xff] %vm6139_vm5, %v6026_v46 }
 0x921   : > { %6227 = vst.msk [vmem:[#allocation3 + $0x1cf] sm:$0xfe] %vm6137_vm0, %v6024_v22  ;;  %6336 = vrot.lane.b32.xlu0 %v15522_v0, %s9006_s14  ;;  %6334 = vrot.lane.b32.xlu1 %v15559_v7, %s9006_s14 }
 0x923   : > { %v6030_v51 = vpop.permute.xlu0 %6029  ;;  %v6028_v47 = vpop.permute.xlu1 %6027 }
 0x924   : > { %6230 = vst.msk [vmem:[#allocation3 + $0x1df] sm:$0xfe] %vm6137_vm0, %v6030_v51  ;;  %v15561_v51 = vld [vmem:[#allocation87_spill] sm:$0xff] }
 0x925   : > { %6229 = vst.msk [vmem:[#allocation3 + $0x1df] sm:$0x1] %vm6141_vm4, %v6028_v47  ;;  %6340 = vrot.lane.b32.xlu0 %v15458_v24, %s9006_s14  ;;  %6338 = vrot.lane.b32.xlu1 %v15560_v56, %s9006_s14 }
 0x927   : > { %v6034_v46 = vpop.permute.xlu0 %6033  ;;  %v6032_v22 = vpop.permute.xlu1 %6031 }
 0x928   : > { %6232 = vst.msk [vmem:[#allocation3 + $0x1ef] sm:$0x1] %vm6141_vm4, %v6034_v46 }
 0x929   : > { %6231 = vst.msk [vmem:[#allocation3 + $0x1e7] sm:$0xff] %vm6139_vm5, %v6032_v22  ;;  %6344 = vrot.lane.b32.xlu0 %v15460_v53, %s9006_s14  ;;  %6342 = vrot.lane.b32.xlu1 %v15523_v54, %s9006_s14  ;;  %v15562_v22 = vld [vmem:[#allocation48_spill] sm:$0xff] }
 0x92b   : > { %v6038_v7 = vpop.permute.xlu0 %6037  ;;  %v6036_v0 = vpop.permute.xlu1 %6035 }
 0x92c   : > { %6234 = vst.msk [vmem:[#allocation3 + $0x1f7] sm:$0xff] %vm6139_vm5, %v6038_v7 }
 0x92d   : > { %6233 = vst.msk [vmem:[#allocation3 + $0x1ef] sm:$0xfe] %vm6137_vm0, %v6036_v0  ;;  %6348 = vrot.lane.b32.xlu0 %v15524_v11, %s9006_s14  ;;  %6346 = vrot.lane.b32.xlu1 %v15561_v51, %s9006_s14  ;;  %v15563_v11 = vld [vmem:[#allocation56_spill] sm:$0xff] }
 0x92f   : > { %v6237_v47 = vpop.permute.xlu0 %6236  ;;  %v6040_v46 = vpop.permute.xlu1 %6039 }
 0x930   : > { %6525 = vst.msk [vmem:[#allocation3 - $0x2] sm:$0xfc] %vm6524_vm6, %v6237_v47 }
 0x931   : > { %6235 = vst.msk [vmem:[#allocation3 + $0x1ff] sm:$0x1] %vm6141_vm4, %v6040_v46  ;;  %6352 = vrot.lane.b32.xlu0 %v15464_v39, %s9006_s14  ;;  %6350 = vrot.lane.b32.xlu1 %v15562_v22, %s9006_s14 }
 0x933   : > { %v6241_v7 = vpop.permute.xlu0 %6240  ;;  %v6239_v0 = vpop.permute.xlu1 %6238 }
 0x934   : > { %6529 = vst.msk [vmem:[#allocation3 + $0xe] sm:$0x3] %vm6528_vm7, %v6241_v7 }
 0x935   : > { %6527 = vst.msk [vmem:[#allocation3 + $0x6] sm:$0xff] %vm6526_vm8, %v6239_v0  ;;  %6356 = vrot.lane.b32.xlu0 %v15466_v14, %s9006_s14  ;;  %6354 = vrot.lane.b32.xlu1 %v15525_v57, %s9006_s14  ;;  %v15564_v57 = vld [vmem:[#allocation7_spill] sm:$0xff] }
 0x937   : > { %v6245_v47 = vpop.permute.xlu0 %6244  ;;  %v6243_v46 = vpop.permute.xlu1 %6242 }
 0x938   : > { %6531 = vst.msk [vmem:[#allocation3 + $0x16] sm:$0xff] %vm6526_vm8, %v6245_v47 }
 0x939   : > { %6530 = vst.msk [vmem:[#allocation3 + $0xe] sm:$0xfc] %vm6524_vm6, %v6243_v46  ;;  %6360 = vrot.lane.b32.xlu0 %v15526_v8, %s9006_s14  ;;  %6358 = vrot.lane.b32.xlu1 %v15563_v11, %s9006_s14 }
 0x93b   : > { %v6249_v7 = vpop.permute.xlu0 %6248  ;;  %v6247_v0 = vpop.permute.xlu1 %6246 }
 0x93c   : > { %6533 = vst.msk [vmem:[#allocation3 + $0x1e] sm:$0xfc] %vm6524_vm6, %v6249_v7 }
 0x93d   : > { %6532 = vst.msk [vmem:[#allocation3 + $0x1e] sm:$0x3] %vm6528_vm7, %v6247_v0  ;;  %6364 = vrot.lane.b32.xlu0 %v15470_v43, %s9006_s14  ;;  %6362 = vrot.lane.b32.xlu1 %v15564_v57, %s9006_s14  ;;  %v15565_v43 = vld [vmem:[#allocation6_spill] sm:$0xff] }
 0x93f   : > { %v6253_v47 = vpop.permute.xlu0 %6252  ;;  %v6251_v46 = vpop.permute.xlu1 %6250 }
 0x940   : > { %6535 = vst.msk [vmem:[#allocation3 + $0x2e] sm:$0x3] %vm6528_vm7, %v6253_v47 }
 0x941   : > { %6534 = vst.msk [vmem:[#allocation3 + $0x26] sm:$0xff] %vm6526_vm8, %v6251_v46  ;;  %6368 = vrot.lane.b32.xlu0 %v15472_v1, %s9006_s14  ;;  %6366 = vrot.lane.b32.xlu1 %v15527_v52, %s9006_s14  ;;  %v15566_v1 = vld [vmem:[#allocation15_spill] sm:$0xff] }
 0x943   : > { %v6257_v7 = vpop.permute.xlu0 %6256  ;;  %v6255_v0 = vpop.permute.xlu1 %6254 }
 0x944   : > { %6537 = vst.msk [vmem:[#allocation3 + $0x36] sm:$0xff] %vm6526_vm8, %v6257_v7 }
 0x945   : > { %6536 = vst.msk [vmem:[#allocation3 + $0x2e] sm:$0xfc] %vm6524_vm6, %v6255_v0  ;;  %6372 = vrot.lane.b32.xlu0 %v15528_v6, %s9006_s14  ;;  %6370 = vrot.lane.b32.xlu1 %v15565_v43, %s9006_s14 }
 0x947   : > { %v6261_v47 = vpop.permute.xlu0 %6260  ;;  %v6259_v46 = vpop.permute.xlu1 %6258 }
 0x948   : > { %6539 = vst.msk [vmem:[#allocation3 + $0x3e] sm:$0xfc] %vm6524_vm6, %v6261_v47 }
 0x949   : > { %6538 = vst.msk [vmem:[#allocation3 + $0x3e] sm:$0x3] %vm6528_vm7, %v6259_v46  ;;  %6376 = vrot.lane.b32.xlu0 %v15476_v10, %s9006_s14  ;;  %6374 = vrot.lane.b32.xlu1 %v15566_v1, %s9006_s14  ;;  %v15567_v10 = vld [vmem:[#allocation23_spill] sm:$0xff]  ;;  %v15568_v1 = vld [vmem:[#allocation20_spill] sm:$0xff] }
 0x94b   : > { %v6265_v7 = vpop.permute.xlu0 %6264  ;;  %v6263_v0 = vpop.permute.xlu1 %6262 }
 0x94c   : > { %6541 = vst.msk [vmem:[#allocation3 + $0x4e] sm:$0x3] %vm6528_vm7, %v6265_v7 }
 0x94d   : > { %6540 = vst.msk [vmem:[#allocation3 + $0x46] sm:$0xff] %vm6526_vm8, %v6263_v0  ;;  %6380 = vrot.lane.b32.xlu0 %v15478_v60, %s9006_s14  ;;  %6378 = vrot.lane.b32.xlu1 %v15529_v28, %s9006_s14  ;;  %v15569_v60 = vld [vmem:[#allocation30_spill] sm:$0xff] }
 0x94f   : > { %v6269_v47 = vpop.permute.xlu0 %6268  ;;  %v6267_v46 = vpop.permute.xlu1 %6266 }
 0x950   : > { %6543 = vst.msk [vmem:[#allocation3 + $0x56] sm:$0xff] %vm6526_vm8, %v6269_v47 }
 0x951   : > { %6542 = vst.msk [vmem:[#allocation3 + $0x4e] sm:$0xfc] %vm6524_vm6, %v6267_v46  ;;  %6384 = vrot.lane.b32.xlu0 %v15567_v10, %s9006_s14  ;;  %6382 = vrot.lane.b32.xlu1 %v15568_v1, %s9006_s14  ;;  %v15570_v10 = vld [vmem:[#allocation38_spill] sm:$0xff]  ;;  %v15571_v1 = vld [vmem:[#allocation32_spill] sm:$0xff] }
 0x953   : > { %v6273_v7 = vpop.permute.xlu0 %6272  ;;  %v6271_v0 = vpop.permute.xlu1 %6270 }
 0x954   : > { %6545 = vst.msk [vmem:[#allocation3 + $0x5e] sm:$0xfc] %vm6524_vm6, %v6273_v7 }
 0x955   : > { %6544 = vst.msk [vmem:[#allocation3 + $0x5e] sm:$0x3] %vm6528_vm7, %v6271_v0  ;;  %6388 = vrot.lane.b32.xlu0 %v15482_v55, %s9006_s14  ;;  %6386 = vrot.lane.b32.xlu1 %v15569_v60, %s9006_s14  ;;  %v15572_v55 = vld [vmem:[#allocation69_spill] sm:$0xff]  ;;  %v15573_v60 = vld [vmem:[#allocation34_spill] sm:$0xff] }
 0x957   : > { %v6277_v47 = vpop.permute.xlu0 %6276  ;;  %v6275_v46 = vpop.permute.xlu1 %6274 }
 0x958   : > { %6547 = vst.msk [vmem:[#allocation3 + $0x6e] sm:$0x3] %vm6528_vm7, %v6277_v47 }
 0x959   : > { %6546 = vst.msk [vmem:[#allocation3 + $0x66] sm:$0xff] %vm6526_vm8, %v6275_v46  ;;  %6392 = vrot.lane.b32.xlu0 %v15570_v10, %s9006_s14  ;;  %6390 = vrot.lane.b32.xlu1 %v15571_v1, %s9006_s14  ;;  %v15574_v10 = vld [vmem:[#allocation44_spill] sm:$0xff] }
 0x95b   : > { %v6281_v7 = vpop.permute.xlu0 %6280  ;;  %v6279_v0 = vpop.permute.xlu1 %6278 }
 0x95c   : > { %6549 = vst.msk [vmem:[#allocation3 + $0x76] sm:$0xff] %vm6526_vm8, %v6281_v7 }
 0x95d   : > { %6548 = vst.msk [vmem:[#allocation3 + $0x6e] sm:$0xfc] %vm6524_vm6, %v6279_v0  ;;  %6396 = vrot.lane.b32.xlu0 %v15572_v55, %s9006_s14  ;;  %6394 = vrot.lane.b32.xlu1 %v15573_v60, %s9006_s14  ;;  %v15575_v55 = vld [vmem:[#allocation49_spill] sm:$0xff] }
 0x95f   : > { %v6285_v47 = vpop.permute.xlu0 %6284  ;;  %v6283_v46 = vpop.permute.xlu1 %6282 }
 0x960   : > { %6551 = vst.msk [vmem:[#allocation3 + $0x7e] sm:$0xfc] %vm6524_vm6, %v6285_v47 }
 0x961   : > { %6550 = vst.msk [vmem:[#allocation3 + $0x7e] sm:$0x3] %vm6528_vm7, %v6283_v46  ;;  %6400 = vrot.lane.b32.xlu0 %v15534_v37, %s9006_s14  ;;  %6398 = vrot.lane.b32.xlu1 %v15574_v10, %s9006_s14  ;;  %v15576_v37 = vld [vmem:[#allocation52_spill] sm:$0xff] }
 0x963   : > { %v6289_v7 = vpop.permute.xlu0 %6288  ;;  %v6287_v0 = vpop.permute.xlu1 %6286 }
 0x964   : > { %6553 = vst.msk [vmem:[#allocation3 + $0x8e] sm:$0x3] %vm6528_vm7, %v6289_v7 }
 0x965   : > { %6552 = vst.msk [vmem:[#allocation3 + $0x86] sm:$0xff] %vm6526_vm8, %v6287_v0  ;;  %6404 = vrot.lane.b32.xlu0 %v15536_v62, %s9006_s14  ;;  %6402 = vrot.lane.b32.xlu1 %v15575_v55, %s9006_s14  ;;  %v15577_v62 = vld [vmem:[#allocation61_spill] sm:$0xff] }
 0x967   : > { %v6293_v47 = vpop.permute.xlu0 %6292  ;;  %v6291_v46 = vpop.permute.xlu1 %6290 }
 0x968   : > { %6555 = vst.msk [vmem:[#allocation3 + $0x96] sm:$0xff] %vm6526_vm8, %v6293_v47 }
 0x969   : > { %6554 = vst.msk [vmem:[#allocation3 + $0x8e] sm:$0xfc] %vm6524_vm6, %v6291_v46  ;;  %6408 = vrot.lane.b32.xlu0 %v15538_v18, %s9006_s14  ;;  %6406 = vrot.lane.b32.xlu1 %v15576_v37, %s9006_s14 }
 0x96b   : > { %v6297_v7 = vpop.permute.xlu0 %6296  ;;  %v6295_v0 = vpop.permute.xlu1 %6294 }
 0x96c   : > { %6557 = vst.msk [vmem:[#allocation3 + $0x9e] sm:$0xfc] %vm6524_vm6, %v6297_v7 }
 0x96d   : > { %6556 = vst.msk [vmem:[#allocation3 + $0x9e] sm:$0x3] %vm6528_vm7, %v6295_v0  ;;  %6412 = vrot.lane.b32.xlu0 %v12432_v30, %s9006_s14  ;;  %6410 = vrot.lane.b32.xlu1 %v15577_v62, %s9006_s14  ;;  %v15578_v30 = vld [vmem:[#allocation72_spill] sm:$0xff] }
 0x96f   : > { %v6301_v47 = vpop.permute.xlu0 %6300  ;;  %v6299_v46 = vpop.permute.xlu1 %6298 }
 0x970   : > { %6559 = vst.msk [vmem:[#allocation3 + $0xae] sm:$0x3] %vm6528_vm7, %v6301_v47 }
 0x971   : > { %6558 = vst.msk [vmem:[#allocation3 + $0xa6] sm:$0xff] %vm6526_vm8, %v6299_v46  ;;  %6416 = vrot.lane.b32.xlu0 %v12459_v41, %s9006_s14  ;;  %6414 = vrot.lane.b32.xlu1 %v15540_v58, %s9006_s14 }
 0x973   : > { %v6305_v7 = vpop.permute.xlu0 %6304  ;;  %v6303_v0 = vpop.permute.xlu1 %6302 }
 0x974   : > { %6561 = vst.msk [vmem:[#allocation3 + $0xb6] sm:$0xff] %vm6526_vm8, %v6305_v7 }
 0x975   : > { %6560 = vst.msk [vmem:[#allocation3 + $0xae] sm:$0xfc] %vm6524_vm6, %v6303_v0  ;;  %6420 = vrot.lane.b32.xlu0 %v15541_v31, %s9006_s14  ;;  %6418 = vrot.lane.b32.xlu1 %v15578_v30, %s9006_s14 }
 0x977   : > { %v6309_v47 = vpop.permute.xlu0 %6308  ;;  %v6307_v46 = vpop.permute.xlu1 %6306 }
 0x978   : > { %6563 = vst.msk [vmem:[#allocation3 + $0xbe] sm:$0xfc] %vm6524_vm6, %v6309_v47 }
 0x979   : > { %6562 = vst.msk [vmem:[#allocation3 + $0xbe] sm:$0x3] %vm6528_vm7, %v6307_v46  ;;  %6424 = vrot.lane.b32.xlu0 %v15504_v17, %s9006_s14  ;;  %6422 = vrot.lane.b32.xlu1 %v12965_v48, %s9006_s14 }
 0x97b   : > { %v6313_v7 = vpop.permute.xlu0 %6312  ;;  %v6311_v0 = vpop.permute.xlu1 %6310 }
 0x97c   : > { %6565 = vst.msk [vmem:[#allocation3 + $0xce] sm:$0x3] %vm6528_vm7, %v6313_v7 }
 0x97d   : > { %6564 = vst.msk [vmem:[#allocation3 + $0xc6] sm:$0xff] %vm6526_vm8, %v6311_v0  ;;  %6623 = vrot.lane.b32.xlu0 %v15543_v45, %s9007_s15  ;;  %6426 = vrot.lane.b32.xlu1 %v15542_v34, %s9006_s14 }
 0x97f   : > { %v6317_v47 = vpop.permute.xlu0 %6316  ;;  %v6315_v46 = vpop.permute.xlu1 %6314 }
 0x980   : > { %6567 = vst.msk [vmem:[#allocation3 + $0xd6] sm:$0xff] %vm6526_vm8, %v6317_v47 }
 0x981   : > { %6566 = vst.msk [vmem:[#allocation3 + $0xce] sm:$0xfc] %vm6524_vm6, %v6315_v46  ;;  %6627 = vrot.lane.b32.xlu0 %v11839_v20, %s9007_s15  ;;  %6625 = vrot.lane.b32.xlu1 %v11811_v16, %s9007_s15 }
 0x983   : > { %v6321_v7 = vpop.permute.xlu0 %6320  ;;  %v6319_v0 = vpop.permute.xlu1 %6318 }
 0x984   : > { %6569 = vst.msk [vmem:[#allocation3 + $0xde] sm:$0xfc] %vm6524_vm6, %v6321_v7 }
 0x985   : > { %6568 = vst.msk [vmem:[#allocation3 + $0xde] sm:$0x3] %vm6528_vm7, %v6319_v0  ;;  %6631 = vrot.lane.b32.xlu0 %v15545_v36, %s9007_s15  ;;  %6629 = vrot.lane.b32.xlu1 %v15544_v5, %s9007_s15 }
 0x987   : > { %v6325_v47 = vpop.permute.xlu0 %6324  ;;  %v6323_v46 = vpop.permute.xlu1 %6322 }
 0x988   : > { %6571 = vst.msk [vmem:[#allocation3 + $0xee] sm:$0x3] %vm6528_vm7, %v6325_v47 }
 0x989   : > { %6570 = vst.msk [vmem:[#allocation3 + $0xe6] sm:$0xff] %vm6526_vm8, %v6323_v46  ;;  %6635 = vrot.lane.b32.xlu0 %v11881_v61, %s9007_s15  ;;  %6633 = vrot.lane.b32.xlu1 %v11853_v15, %s9007_s15 }
 0x98b   : > { %v6329_v7 = vpop.permute.xlu0 %6328  ;;  %v6327_v0 = vpop.permute.xlu1 %6326 }
 0x98c   : > { %6573 = vst.msk [vmem:[#allocation3 + $0xf6] sm:$0xff] %vm6526_vm8, %v6329_v7 }
 0x98d   : > { %6572 = vst.msk [vmem:[#allocation3 + $0xee] sm:$0xfc] %vm6524_vm6, %v6327_v0  ;;  %6639 = vrot.lane.b32.xlu0 %v15547_v13, %s9007_s15  ;;  %6637 = vrot.lane.b32.xlu1 %v15546_v21, %s9007_s15 }
 0x98f   : > { %v6333_v47 = vpop.permute.xlu0 %6332  ;;  %v6331_v46 = vpop.permute.xlu1 %6330 }
 0x990   : > { %6575 = vst.msk [vmem:[#allocation3 + $0xfe] sm:$0xfc] %vm6524_vm6, %v6333_v47 }
 0x991   : > { %6574 = vst.msk [vmem:[#allocation3 + $0xfe] sm:$0x3] %vm6528_vm7, %v6331_v46  ;;  %6643 = vrot.lane.b32.xlu0 %v11923_v4, %s9007_s15  ;;  %6641 = vrot.lane.b32.xlu1 %v11895_v49, %s9007_s15 }
 0x993   : > { %v6337_v7 = vpop.permute.xlu0 %6336  ;;  %v6335_v0 = vpop.permute.xlu1 %6334 }
 0x994   : > { %6577 = vst.msk [vmem:[#allocation3 + $0x10e] sm:$0x3] %vm6528_vm7, %v6337_v7 }
 0x995   : > { %6576 = vst.msk [vmem:[#allocation3 + $0x106] sm:$0xff] %vm6526_vm8, %v6335_v0  ;;  %6647 = vrot.lane.b32.xlu0 %v15549_v23, %s9007_s15  ;;  %6645 = vrot.lane.b32.xlu1 %v15548_v59, %s9007_s15 }
 0x997   : > { %v6341_v47 = vpop.permute.xlu0 %6340  ;;  %v6339_v46 = vpop.permute.xlu1 %6338 }
 0x998   : > { %6579 = vst.msk [vmem:[#allocation3 + $0x116] sm:$0xff] %vm6526_vm8, %v6341_v47 }
 0x999   : > { %6578 = vst.msk [vmem:[#allocation3 + $0x10e] sm:$0xfc] %vm6524_vm6, %v6339_v46  ;;  %6651 = vrot.lane.b32.xlu0 %v11965_v50, %s9007_s15  ;;  %6649 = vrot.lane.b32.xlu1 %v11937_v38, %s9007_s15 }
 0x99b   : > { %v6345_v7 = vpop.permute.xlu0 %6344  ;;  %v6343_v0 = vpop.permute.xlu1 %6342 }
 0x99c   : > { %6581 = vst.msk [vmem:[#allocation3 + $0x11e] sm:$0xfc] %vm6524_vm6, %v6345_v7 }
 0x99d   : > { %6580 = vst.msk [vmem:[#allocation3 + $0x11e] sm:$0x3] %vm6528_vm7, %v6343_v0  ;;  %6655 = vrot.lane.b32.xlu0 %v15551_v25, %s9007_s15  ;;  %6653 = vrot.lane.b32.xlu1 %v15550_v19, %s9007_s15 }
 0x99f   : > { %v6349_v47 = vpop.permute.xlu0 %6348  ;;  %v6347_v46 = vpop.permute.xlu1 %6346 }
 0x9a0   : > { %6583 = vst.msk [vmem:[#allocation3 + $0x12e] sm:$0x3] %vm6528_vm7, %v6349_v47 }
 0x9a1   : > { %6582 = vst.msk [vmem:[#allocation3 + $0x126] sm:$0xff] %vm6526_vm8, %v6347_v46  ;;  %6659 = vrot.lane.b32.xlu0 %v12007_v2, %s9007_s15  ;;  %6657 = vrot.lane.b32.xlu1 %v11979_v12, %s9007_s15 }
 0x9a3   : > { %v6353_v7 = vpop.permute.xlu0 %6352  ;;  %v6351_v0 = vpop.permute.xlu1 %6350 }
 0x9a4   : > { %6585 = vst.msk [vmem:[#allocation3 + $0x136] sm:$0xff] %vm6526_vm8, %v6353_v7 }
 0x9a5   : > { %6584 = vst.msk [vmem:[#allocation3 + $0x12e] sm:$0xfc] %vm6524_vm6, %v6351_v0  ;;  %6663 = vrot.lane.b32.xlu0 %v15553_v26, %s9007_s15  ;;  %6661 = vrot.lane.b32.xlu1 %v15552_v29, %s9007_s15 }
 0x9a7   : > { %v6357_v47 = vpop.permute.xlu0 %6356  ;;  %v6355_v46 = vpop.permute.xlu1 %6354 }
 0x9a8   : > { %6587 = vst.msk [vmem:[#allocation3 + $0x13e] sm:$0xfc] %vm6524_vm6, %v6357_v47 }
 0x9a9   : > { %6586 = vst.msk [vmem:[#allocation3 + $0x13e] sm:$0x3] %vm6528_vm7, %v6355_v46  ;;  %6667 = vrot.lane.b32.xlu0 %v12049_v63, %s9007_s15  ;;  %6665 = vrot.lane.b32.xlu1 %v12021_v32, %s9007_s15 }
 0x9ab   : > { %v6361_v7 = vpop.permute.xlu0 %6360  ;;  %v6359_v0 = vpop.permute.xlu1 %6358 }
 0x9ac   : > { %6589 = vst.msk [vmem:[#allocation3 + $0x14e] sm:$0x3] %vm6528_vm7, %v6361_v7 }
 0x9ad   : > { %6588 = vst.msk [vmem:[#allocation3 + $0x146] sm:$0xff] %vm6526_vm8, %v6359_v0  ;;  %6671 = vrot.lane.b32.xlu0 %v15556_v35, %s9007_s15  ;;  %6669 = vrot.lane.b32.xlu1 %v15555_v9, %s9007_s15 }
 0x9af   : > { %v6365_v47 = vpop.permute.xlu0 %6364  ;;  %v6363_v46 = vpop.permute.xlu1 %6362 }
 0x9b0   : > { %6591 = vst.msk [vmem:[#allocation3 + $0x156] sm:$0xff] %vm6526_vm8, %v6365_v47 }
 0x9b1   : > { %6590 = vst.msk [vmem:[#allocation3 + $0x14e] sm:$0xfc] %vm6524_vm6, %v6363_v46  ;;  %6675 = vrot.lane.b32.xlu0 %v12093_v42, %s9007_s15  ;;  %6673 = vrot.lane.b32.xlu1 %v12063_v3, %s9007_s15 }
 0x9b3   : > { %v6369_v7 = vpop.permute.xlu0 %6368  ;;  %v6367_v0 = vpop.permute.xlu1 %6366 }
 0x9b4   : > { %6593 = vst.msk [vmem:[#allocation3 + $0x15e] sm:$0xfc] %vm6524_vm6, %v6369_v7 }
 0x9b5   : > { %6592 = vst.msk [vmem:[#allocation3 + $0x15e] sm:$0x3] %vm6528_vm7, %v6367_v0  ;;  %6679 = vrot.lane.b32.xlu0 %v15558_v44, %s9007_s15  ;;  %6677 = vrot.lane.b32.xlu1 %v15557_v27, %s9007_s15 }
 0x9b7   : > { %v6373_v47 = vpop.permute.xlu0 %6372  ;;  %v6371_v46 = vpop.permute.xlu1 %6370 }
 0x9b8   : > { %6595 = vst.msk [vmem:[#allocation3 + $0x16e] sm:$0x3] %vm6528_vm7, %v6373_v47  ;;  %v7670_v47 = vld [vmem:[%s13649_s22] sm:$0xff] }
 0x9b9   : > { %6594 = vst.msk [vmem:[#allocation3 + $0x166] sm:$0xff] %vm6526_vm8, %v6371_v46  ;;  %6683 = vrot.lane.b32.xlu0 %v15560_v56, %s9007_s15  ;;  %6681 = vrot.lane.b32.xlu1 %v15497_v40, %s9007_s15  ;;  %v7671_v46 = vld [vmem:[%s13649_s22 + $0x8] sm:$0xff] }
 0x9ba   : > { %v8941_v16 = vpack.c.bf16 %v7671_v46, %v7670_v47 }
 0x9bb   : > { %v6377_v7 = vpop.permute.xlu0 %6376  ;;  %v6375_v0 = vpop.permute.xlu1 %6374 }
 0x9bc   : > { %6597 = vst.msk [vmem:[#allocation3 + $0x176] sm:$0xff] %vm6526_vm8, %v6377_v7  ;;  %8957 = vmatprep.subr.bf16.mxu1 %v8941_v16  ;;  %8942 = vmatprep.subr.bf16.mxu0 %v8941_v16  ;;  %v7672_v7 = vld [vmem:[%s13649_s22 + $0x10] sm:$0xff] }
 0x9bd   : > { %6596 = vst.msk [vmem:[#allocation3 + $0x16e] sm:$0xfc] %vm6524_vm6, %v6375_v0  ;;  %6687 = vrot.lane.b32.xlu0 %v15460_v53, %s9007_s15  ;;  %6685 = vrot.lane.b32.xlu1 %v15458_v24, %s9007_s15  ;;  %v7673_v0 = vld [vmem:[%s13649_s22 + $0x18] sm:$0xff] }
 0x9be   : > { %8962 = vmatpush3.bf16.msra.mxu1 %v8941_v16  ;;  %8944 = vmatpush3.bf16.msra.mxu0 %v8941_v16  ;;  %v8945_v47 = vpack.c.bf16 %v7673_v0, %v7672_v7  ;;  %v7675_v16 = vld [vmem:[%s13649_s22 + $0x28] sm:$0xff] }
 0x9bf   : > { %v6381_v45 = vpop.permute.xlu0 %6380  ;;  %v6379_v34 = vpop.permute.xlu1 %6378 }
 0x9c0   : > { %6599 = vst.msk [vmem:[#allocation3 + $0x17e] sm:$0xfc] %vm6524_vm6, %v6381_v45  ;;  %8958 = vmatprep.subr.bf16.mxu1 %v8945_v47  ;;  %8946 = vmatprep.subr.bf16.mxu0 %v8945_v47 }
 0x9c1   : > { %6598 = vst.msk [vmem:[#allocation3 + $0x17e] sm:$0x3] %vm6528_vm7, %v6379_v34  ;;  %6691 = vrot.lane.b32.xlu0 %v15562_v22, %s9007_s15  ;;  %6689 = vrot.lane.b32.xlu1 %v15561_v51, %s9007_s15  ;;  %v7674_v34 = vld [vmem:[%s13649_s22 + $0x20] sm:$0xff] }
 0x9c2   : > { %8963 = vmatpush3.bf16.msra.mxu1 %v8945_v47  ;;  %8948 = vmatpush3.bf16.msra.mxu0 %v8945_v47  ;;  %v8949_v45 = vpack.c.bf16 %v7675_v16, %v7674_v34 }
 0x9c3   : > { %v6385_v46 = vpop.permute.xlu0 %6384  ;;  %v6383_v17 = vpop.permute.xlu1 %6382 }
 0x9c4   : > { %6601 = vst.msk [vmem:[#allocation3 + $0x18e] sm:$0x3] %vm6528_vm7, %v6385_v46  ;;  %8959 = vmatprep.subr.bf16.mxu1 %v8949_v45  ;;  %8950 = vmatprep.subr.bf16.mxu0 %v8949_v45  ;;  %v7677_v46 = vld [vmem:[%s13649_s22 + $0x38] sm:$0xff] }
 0x9c5   : > { %6600 = vst.msk [vmem:[#allocation3 + $0x186] sm:$0xff] %vm6526_vm8, %v6383_v17  ;;  %6695 = vrot.lane.b32.xlu0 %v15466_v14, %s9007_s15  ;;  %6693 = vrot.lane.b32.xlu1 %v15464_v39, %s9007_s15  ;;  %v7676_v17 = vld [vmem:[%s13649_s22 + $0x30] sm:$0xff] }
 0x9c6   : > { %8964 = vmatpush3.bf16.msra.mxu1 %v8949_v45  ;;  %8952 = vmatpush3.bf16.msra.mxu0 %v8949_v45  ;;  %v8953_v47 = vpack.c.bf16 %v7677_v46, %v7676_v17  ;;  %v7678_v45 = vld [vmem:[%s13649_s22 + $0x40] sm:$0xff] }
 0x9c7   : > { %v6389_v7 = vpop.permute.xlu0 %6388  ;;  %v6387_v0 = vpop.permute.xlu1 %6386  ;;  %v15579_v17 = vld [vmem:[#allocation12_spill] sm:$0xff] }
 0x9c8   : > { %6603 = vst.msk [vmem:[#allocation3 + $0x196] sm:$0xff] %vm6526_vm8, %v6389_v7  ;;  %8960 = vmatprep.subr.bf16.mxu1 %v8953_v47  ;;  %8954 = vmatprep.subr.bf16.mxu0 %v8953_v47 }
 0x9c9   : > { %6602 = vst.msk [vmem:[#allocation3 + $0x18e] sm:$0xfc] %vm6524_vm6, %v6387_v0  ;;  %6699 = vrot.lane.b32.xlu0 %v15564_v57, %s9007_s15  ;;  %6697 = vrot.lane.b32.xlu1 %v15563_v11, %s9007_s15 }
 0x9ca   : > { %8965 = vmatpush3.bf16.msra.mxu1 %v8953_v47  ;;  %8956 = vmatpush3.bf16.msra.mxu0 %v8953_v47 }
 0x9cb   : > { %v6393_v34 = vpop.permute.xlu0 %6392  ;;  %v6391_v16 = vpop.permute.xlu1 %6390  ;;  %8961 = vmatprep.subr.mxu1 %v7678_v45  ;;  %8835 = vmatprep.subr.mxu0 %v7678_v45 }
 0x9cc   : > { %6605 = vst.msk [vmem:[#allocation3 + $0x19e] sm:$0xfc] %vm6524_vm6, %v6393_v34 }
 0x9cd   : > { %6604 = vst.msk [vmem:[#allocation3 + $0x19e] sm:$0x3] %vm6528_vm7, %v6391_v16  ;;  %6876 = vrot.lane.b32.xlu0 %v15544_v5, %s9008_s23  ;;  %6874 = vrot.lane.b32.xlu1 %v11839_v20, %s9008_s23 }
 0x9ce   : > { %8966 = vmatpush3.msra.mxu1 %v7678_v45  ;;  %8836 = vmatpush3.msra.mxu0 %v7678_v45 }
 0x9cf   : > { %v6397_v7 = vpop.permute.xlu0 %6396  ;;  %v6395_v0 = vpop.permute.xlu1 %6394 }
 0x9d0   : > { %6607 = vst.msk [vmem:[#allocation3 + $0x1ae] sm:$0x3] %vm6528_vm7, %v6397_v7 }
 0x9d1   : > { %6606 = vst.msk [vmem:[#allocation3 + $0x1a6] sm:$0xff] %vm6526_vm8, %v6395_v0  ;;  %7243 = vrot.lane.b32.xlu0 %v11839_v20, %s9009_s24  ;;  %6878 = vrot.lane.b32.xlu1 %v15579_v17, %s9008_s23 }
 0x9d3   : > { %v6401_v46 = vpop.permute.xlu0 %6400  ;;  %v6399_v47 = vpop.permute.xlu1 %6398 }
 0x9d4   : > { %6609 = vst.msk [vmem:[#allocation3 + $0x1b6] sm:$0xff] %vm6526_vm8, %v6401_v46 }
 0x9d5   : > { %6608 = vst.msk [vmem:[#allocation3 + $0x1ae] sm:$0xfc] %vm6524_vm6, %v6399_v47  ;;  %7247 = vrot.lane.b32.xlu0 %v15579_v17, %s9009_s24  ;;  %7245 = vrot.lane.b32.xlu1 %v15544_v5, %s9009_s24  ;;  %v15580_v5 = vld [vmem:[#allocation17_spill] sm:$0xff] }
 0x9d7   : > { %v6405_v34 = vpop.permute.xlu0 %6404  ;;  %v6403_v16 = vpop.permute.xlu1 %6402 }
 0x9d8   : > { %6611 = vst.msk [vmem:[#allocation3 + $0x1be] sm:$0xfc] %vm6524_vm6, %v6405_v34 }
 0x9d9   : > { %6610 = vst.msk [vmem:[#allocation3 + $0x1be] sm:$0x3] %vm6528_vm7, %v6403_v16  ;;  %6882 = vrot.lane.b32.xlu0 %v11853_v15, %s9008_s23  ;;  %6880 = vrot.lane.b32.xlu1 %v15545_v36, %s9008_s23 }
 0x9db   : > { %v6409_v20 = vpop.permute.xlu0 %6408  ;;  %v6407_v45 = vpop.permute.xlu1 %6406 }
 0x9dc   : > { %6613 = vst.msk [vmem:[#allocation3 + $0x1ce] sm:$0x3] %vm6528_vm7, %v6409_v20 }
 0x9dd   : > { %6612 = vst.msk [vmem:[#allocation3 + $0x1c6] sm:$0xff] %vm6526_vm8, %v6407_v45  ;;  %7249 = vrot.lane.b32.xlu0 %v15545_v36, %s9009_s24  ;;  %6884 = vrot.lane.b32.xlu1 %v15580_v5, %s9008_s23 }
 0x9df   : > { %v6413_v7 = vpop.permute.xlu0 %6412  ;;  %v6411_v0 = vpop.permute.xlu1 %6410 }
 0x9e0   : > { %6615 = vst.msk [vmem:[#allocation3 + $0x1d6] sm:$0xff] %vm6526_vm8, %v6413_v7 }
 0x9e1   : > { %6614 = vst.msk [vmem:[#allocation3 + $0x1ce] sm:$0xfc] %vm6524_vm6, %v6411_v0  ;;  %7253 = vrot.lane.b32.xlu0 %v15580_v5, %s9009_s24  ;;  %7251 = vrot.lane.b32.xlu1 %v11853_v15, %s9009_s24  ;;  %v15581_v15 = vld [vmem:[#allocation21_spill] sm:$0xff] }
 0x9e3   : > { %v6417_v17 = vpop.permute.xlu0 %6416  ;;  %v6415_v46 = vpop.permute.xlu1 %6414 }
 0x9e4   : > { %6617 = vst.msk [vmem:[#allocation3 + $0x1de] sm:$0xfc] %vm6524_vm6, %v6417_v17 }
 0x9e5   : > { %6616 = vst.msk [vmem:[#allocation3 + $0x1de] sm:$0x3] %vm6528_vm7, %v6415_v46  ;;  %6888 = vrot.lane.b32.xlu0 %v15546_v21, %s9008_s23  ;;  %6886 = vrot.lane.b32.xlu1 %v11881_v61, %s9008_s23 }
 0x9e7   : > { %v6421_v36 = vpop.permute.xlu0 %6420  ;;  %v6419_v47 = vpop.permute.xlu1 %6418 }
 0x9e8   : > { %6619 = vst.msk [vmem:[#allocation3 + $0x1ee] sm:$0x3] %vm6528_vm7, %v6421_v36 }
 0x9e9   : > { %6618 = vst.msk [vmem:[#allocation3 + $0x1e6] sm:$0xff] %vm6526_vm8, %v6419_v47  ;;  %7255 = vrot.lane.b32.xlu0 %v11881_v61, %s9009_s24  ;;  %6890 = vrot.lane.b32.xlu1 %v15581_v15, %s9008_s23 }
 0x9eb   : > { %v6425_v34 = vpop.permute.xlu0 %6424  ;;  %v6423_v16 = vpop.permute.xlu1 %6422 }
 0x9ec   : > { %6621 = vst.msk [vmem:[#allocation3 + $0x1f6] sm:$0xff] %vm6526_vm8, %v6425_v34 }
 0x9ed   : > { %6620 = vst.msk [vmem:[#allocation3 + $0x1ee] sm:$0xfc] %vm6524_vm6, %v6423_v16  ;;  %7259 = vrot.lane.b32.xlu0 %v15581_v15, %s9009_s24  ;;  %7257 = vrot.lane.b32.xlu1 %v15546_v21, %s9009_s24  ;;  %v15582_v21 = vld [vmem:[#allocation26_spill] sm:$0xff] }
 0x9ef   : > { %v6624_v20 = vpop.permute.xlu0 %6623  ;;  %v6427_v45 = vpop.permute.xlu1 %6426 }
 0x9f0   : > { %6804 = vst.msk [vmem:[#allocation3] sm:$0xff] %vm6803_vm9, %v6624_v20 }
 0x9f1   : > { %6622 = vst.msk [vmem:[#allocation3 + $0x1fe] sm:$0x3] %vm6528_vm7, %v6427_v45  ;;  %6894 = vrot.lane.b32.xlu0 %v11895_v49, %s9008_s23  ;;  %6892 = vrot.lane.b32.xlu1 %v15547_v13, %s9008_s23 }
 0x9f3   : > { %v6628_v61 = vpop.permute.xlu0 %6627  ;;  %v6626_v5 = vpop.permute.xlu1 %6625 }
 0x9f4   : > { %6806 = vst.msk [vmem:[#allocation3 + $0x10] sm:$0xff] %vm6803_vm9, %v6628_v61  ;;  %6805 = vst.msk [vmem:[#allocation3 + $0x8] sm:$0xff] %vm6803_vm9, %v6626_v5 }
 0x9f5   : > { %7261 = vrot.lane.b32.xlu0 %v15547_v13, %s9009_s24  ;;  %6896 = vrot.lane.b32.xlu1 %v15582_v21, %s9008_s23 }
 0x9f7   : > { %v6632_v7 = vpop.permute.xlu0 %6631  ;;  %v6630_v0 = vpop.permute.xlu1 %6629 }
 0x9f8   : > { %6808 = vst.msk [vmem:[#allocation3 + $0x20] sm:$0xff] %vm6803_vm9, %v6632_v7  ;;  %6807 = vst.msk [vmem:[#allocation3 + $0x18] sm:$0xff] %vm6803_vm9, %v6630_v0 }
 0x9f9   : > { %7265 = vrot.lane.b32.xlu0 %v15582_v21, %s9009_s24  ;;  %7263 = vrot.lane.b32.xlu1 %v11895_v49, %s9009_s24  ;;  %v15583_v49 = vld [vmem:[#allocation37_spill] sm:$0xff] }
 0x9fb   : > { %v6636_v17 = vpop.permute.xlu0 %6635  ;;  %v6634_v46 = vpop.permute.xlu1 %6633 }
 0x9fc   : > { %6810 = vst.msk [vmem:[#allocation3 + $0x30] sm:$0xff] %vm6803_vm9, %v6636_v17  ;;  %6809 = vst.msk [vmem:[#allocation3 + $0x28] sm:$0xff] %vm6803_vm9, %v6634_v46 }
 0x9fd   : > { %6900 = vrot.lane.b32.xlu0 %v15548_v59, %s9008_s23  ;;  %6898 = vrot.lane.b32.xlu1 %v11923_v4, %s9008_s23 }
 0x9ff   : > { %v6640_v13 = vpop.permute.xlu0 %6639  ;;  %v6638_v36 = vpop.permute.xlu1 %6637 }
 0xa00   : > { %6812 = vst.msk [vmem:[#allocation3 + $0x40] sm:$0xff] %vm6803_vm9, %v6640_v13  ;;  %6811 = vst.msk [vmem:[#allocation3 + $0x38] sm:$0xff] %vm6803_vm9, %v6638_v36 }
 0xa01   : > { %7267 = vrot.lane.b32.xlu0 %v11923_v4, %s9009_s24  ;;  %6902 = vrot.lane.b32.xlu1 %v15583_v49, %s9008_s23 }
 0xa03   : > { %v6644_v47 = vpop.permute.xlu0 %6643  ;;  %v6642_v15 = vpop.permute.xlu1 %6641 }
 0xa04   : > { %6814 = vst.msk [vmem:[#allocation3 + $0x50] sm:$0xff] %vm6803_vm9, %v6644_v47  ;;  %6813 = vst.msk [vmem:[#allocation3 + $0x48] sm:$0xff] %vm6803_vm9, %v6642_v15 }
 0xa05   : > { %7271 = vrot.lane.b32.xlu0 %v15583_v49, %s9009_s24  ;;  %7269 = vrot.lane.b32.xlu1 %v15548_v59, %s9009_s24  ;;  %v15584_v59 = vld [vmem:[#allocation42_spill] sm:$0xff] }
 0xa07   : > { %v6648_v34 = vpop.permute.xlu0 %6647  ;;  %v6646_v16 = vpop.permute.xlu1 %6645 }
 0xa08   : > { %6816 = vst.msk [vmem:[#allocation3 + $0x60] sm:$0xff] %vm6803_vm9, %v6648_v34  ;;  %6815 = vst.msk [vmem:[#allocation3 + $0x58] sm:$0xff] %vm6803_vm9, %v6646_v16 }
 0xa09   : > { %6906 = vrot.lane.b32.xlu0 %v11937_v38, %s9008_s23  ;;  %6904 = vrot.lane.b32.xlu1 %v15549_v23, %s9008_s23 }
 0xa0b   : > { %v6652_v4 = vpop.permute.xlu0 %6651  ;;  %v6650_v20 = vpop.permute.xlu1 %6649 }
 0xa0c   : > { %6818 = vst.msk [vmem:[#allocation3 + $0x70] sm:$0xff] %vm6803_vm9, %v6652_v4  ;;  %6817 = vst.msk [vmem:[#allocation3 + $0x68] sm:$0xff] %vm6803_vm9, %v6650_v20 }
 0xa0d   : > { %7273 = vrot.lane.b32.xlu0 %v15549_v23, %s9009_s24  ;;  %6908 = vrot.lane.b32.xlu1 %v15584_v59, %s9008_s23 }
 0xa0f   : > { %v6656_v45 = vpop.permute.xlu0 %6655  ;;  %v6654_v61 = vpop.permute.xlu1 %6653 }
 0xa10   : > { %6820 = vst.msk [vmem:[#allocation3 + $0x80] sm:$0xff] %vm6803_vm9, %v6656_v45  ;;  %6819 = vst.msk [vmem:[#allocation3 + $0x78] sm:$0xff] %vm6803_vm9, %v6654_v61 }
 0xa11   : > { %7277 = vrot.lane.b32.xlu0 %v15584_v59, %s9009_s24  ;;  %7275 = vrot.lane.b32.xlu1 %v11937_v38, %s9009_s24  ;;  %v15585_v38 = vld [vmem:[#allocation47_spill] sm:$0xff] }
 0xa13   : > { %v6660_v5 = vpop.permute.xlu0 %6659  ;;  %v6658_v21 = vpop.permute.xlu1 %6657 }
 0xa14   : > { %6822 = vst.msk [vmem:[#allocation3 + $0x90] sm:$0xff] %vm6803_vm9, %v6660_v5  ;;  %6821 = vst.msk [vmem:[#allocation3 + $0x88] sm:$0xff] %vm6803_vm9, %v6658_v21 }
 0xa15   : > { %6912 = vrot.lane.b32.xlu0 %v15550_v19, %s9008_s23  ;;  %6910 = vrot.lane.b32.xlu1 %v11965_v50, %s9008_s23 }
 0xa17   : > { %v6664_v23 = vpop.permute.xlu0 %6663  ;;  %v6662_v7 = vpop.permute.xlu1 %6661 }
 0xa18   : > { %6824 = vst.msk [vmem:[#allocation3 + $0xa0] sm:$0xff] %vm6803_vm9, %v6664_v23  ;;  %6823 = vst.msk [vmem:[#allocation3 + $0x98] sm:$0xff] %vm6803_vm9, %v6662_v7 }
 0xa19   : > { %7279 = vrot.lane.b32.xlu0 %v11965_v50, %s9009_s24  ;;  %6914 = vrot.lane.b32.xlu1 %v15585_v38, %s9008_s23 }
 0xa1b   : > { %v6668_v0 = vpop.permute.xlu0 %6667  ;;  %v6666_v17 = vpop.permute.xlu1 %6665 }
 0xa1c   : > { %6826 = vst.msk [vmem:[#allocation3 + $0xb0] sm:$0xff] %vm6803_vm9, %v6668_v0  ;;  %6825 = vst.msk [vmem:[#allocation3 + $0xa8] sm:$0xff] %vm6803_vm9, %v6666_v17 }
 0xa1d   : > { %7283 = vrot.lane.b32.xlu0 %v15585_v38, %s9009_s24  ;;  %7281 = vrot.lane.b32.xlu1 %v15550_v19, %s9009_s24  ;;  %v15586_v19 = vld [vmem:[#allocation53_spill] sm:$0xff] }
 0xa1f   : > { %v6672_v46 = vpop.permute.xlu0 %6671  ;;  %v6670_v13 = vpop.permute.xlu1 %6669 }
 0xa20   : > { %6828 = vst.msk [vmem:[#allocation3 + $0xc0] sm:$0xff] %vm6803_vm9, %v6672_v46  ;;  %6827 = vst.msk [vmem:[#allocation3 + $0xb8] sm:$0xff] %vm6803_vm9, %v6670_v13 }
 0xa21   : > { %6918 = vrot.lane.b32.xlu0 %v11979_v12, %s9008_s23  ;;  %6916 = vrot.lane.b32.xlu1 %v15551_v25, %s9008_s23 }
 0xa23   : > { %v6676_v50 = vpop.permute.xlu0 %6675  ;;  %v6674_v36 = vpop.permute.xlu1 %6673 }
 0xa24   : > { %6830 = vst.msk [vmem:[#allocation3 + $0xd0] sm:$0xff] %vm6803_vm9, %v6676_v50  ;;  %6829 = vst.msk [vmem:[#allocation3 + $0xc8] sm:$0xff] %vm6803_vm9, %v6674_v36 }
 0xa25   : > { %7285 = vrot.lane.b32.xlu0 %v15551_v25, %s9009_s24  ;;  %6920 = vrot.lane.b32.xlu1 %v15586_v19, %s9008_s23 }
 0xa27   : > { %v6680_v49 = vpop.permute.xlu0 %6679  ;;  %v6678_v47 = vpop.permute.xlu1 %6677 }
 0xa28   : > { %6832 = vst.msk [vmem:[#allocation3 + $0xe0] sm:$0xff] %vm6803_vm9, %v6680_v49  ;;  %6834 = vst.msk [vmem:[#allocation3 + $0xf0] sm:$0xff] %vm6803_vm9, %v6680_v49 }
 0xa29   : > { %6831 = vst.msk [vmem:[#allocation3 + $0xd8] sm:$0xff] %vm6803_vm9, %v6678_v47  ;;  %7289 = vrot.lane.b32.xlu0 %v15586_v19, %s9009_s24  ;;  %7287 = vrot.lane.b32.xlu1 %v11979_v12, %s9009_s24  ;;  %v15587_v12 = vld [vmem:[#allocation59_spill] sm:$0xff]  ;;  %v15590_v19 = vld [vmem:[#allocation33_spill] sm:$0xff] }
 0xa2b   : > { %v6684_v15 = vpop.permute.xlu0 %6683  ;;  %v6682_v34 = vpop.permute.xlu1 %6681 }
 0xa2c   : > { %6836 = vst.msk [vmem:[#allocation3 + $0x100] sm:$0xff] %vm6803_vm9, %v6684_v15  ;;  %6833 = vst.msk [vmem:[#allocation3 + $0xe8] sm:$0xff] %vm6803_vm9, %v6682_v34 }
 0xa2d   : > { %6835 = vst.msk [vmem:[#allocation3 + $0xf8] sm:$0xff] %vm6803_vm9, %v6682_v34  ;;  %6924 = vrot.lane.b32.xlu0 %v15552_v29, %s9008_s23  ;;  %6922 = vrot.lane.b32.xlu1 %v12007_v2, %s9008_s23 }
 0xa2f   : > { %v6688_v25 = vpop.permute.xlu0 %6687  ;;  %v6686_v16 = vpop.permute.xlu1 %6685 }
 0xa30   : > { %6838 = vst.msk [vmem:[#allocation3 + $0x110] sm:$0xff] %vm6803_vm9, %v6688_v25  ;;  %6837 = vst.msk [vmem:[#allocation3 + $0x108] sm:$0xff] %vm6803_vm9, %v6686_v16 }
 0xa31   : > { %7291 = vrot.lane.b32.xlu0 %v12007_v2, %s9009_s24  ;;  %6926 = vrot.lane.b32.xlu1 %v15587_v12, %s9008_s23 }
 0xa33   : > { %v6692_v4 = vpop.permute.xlu0 %6691  ;;  %v6690_v20 = vpop.permute.xlu1 %6689 }
 0xa34   : > { %6840 = vst.msk [vmem:[#allocation3 + $0x120] sm:$0xff] %vm6803_vm9, %v6692_v4  ;;  %6839 = vst.msk [vmem:[#allocation3 + $0x118] sm:$0xff] %vm6803_vm9, %v6690_v20 }
 0xa35   : > { %7295 = vrot.lane.b32.xlu0 %v15587_v12, %s9009_s24  ;;  %7293 = vrot.lane.b32.xlu1 %v15552_v29, %s9009_s24  ;;  %v15588_v29 = vld [vmem:[#allocation65_spill] sm:$0xff]  ;;  %v15591_v12 = vld [vmem:[#allocation35_spill] sm:$0xff] }
 0xa37   : > { %v6696_v59 = vpop.permute.xlu0 %6695  ;;  %v6694_v45 = vpop.permute.xlu1 %6693 }
 0xa38   : > { %6842 = vst.msk [vmem:[#allocation3 + $0x130] sm:$0xff] %vm6803_vm9, %v6696_v59  ;;  %6841 = vst.msk [vmem:[#allocation3 + $0x128] sm:$0xff] %vm6803_vm9, %v6694_v45 }
 0xa39   : > { %6930 = vrot.lane.b32.xlu0 %v12021_v32, %s9008_s23  ;;  %6928 = vrot.lane.b32.xlu1 %v15553_v26, %s9008_s23 }
 0xa3b   : > { %v6700_v2 = vpop.permute.xlu0 %6699  ;;  %v6698_v61 = vpop.permute.xlu1 %6697 }
 0xa3c   : > { %6844 = vst.msk [vmem:[#allocation3 + $0x140] sm:$0xff] %vm6803_vm9, %v6700_v2  ;;  %6843 = vst.msk [vmem:[#allocation3 + $0x138] sm:$0xff] %vm6803_vm9, %v6698_v61 }
 0xa3d   : > { %7297 = vrot.lane.b32.xlu0 %v15553_v26, %s9009_s24  ;;  %6932 = vrot.lane.b32.xlu1 %v15588_v29, %s9008_s23 }
 0xa3f   : > { %v6877_v5 = vpop.permute.xlu0 %6876  ;;  %v6875_v21 = vpop.permute.xlu1 %6874 }
 0xa40   : > { %7145 = vst.msk [vmem:[#allocation3 + $0x17] sm:$0xff] %vm7140_vm10, %v6877_v5 }
 0xa41   : > { %7144 = vst.msk [vmem:[#allocation3 + $0xf] sm:$0xfe] %vm7138_vm11, %v6875_v21  ;;  %7301 = vrot.lane.b32.xlu0 %v15588_v29, %s9009_s24  ;;  %7299 = vrot.lane.b32.xlu1 %v12021_v32, %s9009_s24  ;;  %v15589_v32 = vld [vmem:[#allocation80_spill] sm:$0xff] }
 0xa43   : > { %v7244_v26 = vpop.permute.xlu0 %7243  ;;  %v6879_v23 = vpop.permute.xlu1 %6878 }
 0xa44   : > { %7513 = vst.msk [vmem:[#allocation3 + $0xe] sm:$0xfc] %vm7507_vm12, %v7244_v26 }
 0xa45   : > { %7146 = vst.msk [vmem:[#allocation3 + $0x1f] sm:$0x1] %vm7142_vm13, %v6879_v23  ;;  %6936 = vrot.lane.b32.xlu0 %v15555_v9, %s9008_s23  ;;  %6934 = vrot.lane.b32.xlu1 %v12049_v63, %s9008_s23 }
 0xa47   : > { %v7248_v7 = vpop.permute.xlu0 %7247  ;;  %v7246_v38 = vpop.permute.xlu1 %7245 }
 0xa48   : > { %7515 = vst.msk [vmem:[#allocation3 + $0x1e] sm:$0x3] %vm7511_vm14, %v7248_v7 }
 0xa49   : > { %7514 = vst.msk [vmem:[#allocation3 + $0x16] sm:$0xff] %vm7509_vm15, %v7246_v38  ;;  %7303 = vrot.lane.b32.xlu0 %v12049_v63, %s9009_s24  ;;  %6938 = vrot.lane.b32.xlu1 %v15589_v32, %s9008_s23 }
 0xa4b   : > { %v6883_v0 = vpop.permute.xlu0 %6882  ;;  %v6881_v17 = vpop.permute.xlu1 %6880 }
 0xa4c   : > { %7148 = vst.msk [vmem:[#allocation3 + $0x27] sm:$0xff] %vm7140_vm10, %v6883_v0 }
 0xa4d   : > { %7147 = vst.msk [vmem:[#allocation3 + $0x1f] sm:$0xfe] %vm7138_vm11, %v6881_v17  ;;  %7307 = vrot.lane.b32.xlu0 %v15589_v32, %s9009_s24  ;;  %7305 = vrot.lane.b32.xlu1 %v15555_v9, %s9009_s24 }
 0xa4f   : > { %v7250_v46 = vpop.permute.xlu0 %7249  ;;  %v6885_v13 = vpop.permute.xlu1 %6884 }
 0xa50   : > { %v7608_v50 = vld [vmem:[#allocation3 + $0x10] sm:$0xff]  ;;  %v7609_v63 = vld [vmem:[#allocation3 + $0x18] sm:$0xff]  ;;  %7516 = vst.msk [vmem:[#allocation3 + $0x1e] sm:$0xfc] %vm7507_vm12, %v7250_v46 }
 0xa51   : > { %7149 = vst.msk [vmem:[#allocation3 + $0x2f] sm:$0x1] %vm7142_vm13, %v6885_v13  ;;  %8840 = vmatprep.mubr.msk.f32.mxu1 %vm7686_vm2, %v7608_v50  ;;  %6942 = vrot.lane.b32.xlu0 %v12063_v3, %s9008_s23 }
 0xa52   : > { %6940 = vrot.lane.b32.xlu1 %v15556_v35, %s9008_s23  ;;  %8841 = vmatmul.mubr.msk.f32.vlgmr.msra.gmra.mrb[0].mxu1 %vm7686_vm2, %v7609_v63 }
 0xa53   : > { %v7254_v9 = vpop.permute.xlu0 %7253  ;;  %v7252_v36 = vpop.permute.xlu1 %7251 }
 0xa54   : > { %7518 = vst.msk [vmem:[#allocation3 + $0x2e] sm:$0x3] %vm7511_vm14, %v7254_v9 }
 0xa55   : > { %7517 = vst.msk [vmem:[#allocation3 + $0x26] sm:$0xff] %vm7509_vm15, %v7252_v36  ;;  %7309 = vrot.lane.b32.xlu0 %v15556_v35, %s9009_s24 }
 0xa56   : > { %6944 = vrot.lane.b32.xlu1 %v15590_v19, %s9008_s23 }
 0xa57   : > { %v6889_v49 = vpop.permute.xlu0 %6888  ;;  %v6887_v47 = vpop.permute.xlu1 %6886 }
 0xa58   : > { %7151 = vst.msk [vmem:[#allocation3 + $0x37] sm:$0xff] %vm7140_vm10, %v6889_v49  ;;  %v15593_v49 = vld [vmem:[#allocation50_spill] sm:$0xff] }
 0xa59   : > { %7150 = vst.msk [vmem:[#allocation3 + $0x2f] sm:$0xfe] %vm7138_vm11, %v6887_v47  ;;  %7313 = vrot.lane.b32.xlu0 %v15590_v19, %s9009_s24 }
 0xa5a   : > { %7311 = vrot.lane.b32.xlu1 %v12063_v3, %s9009_s24 }
 0xa5b   : > { %v7256_v15 = vpop.permute.xlu0 %7255  ;;  %v6891_v34 = vpop.permute.xlu1 %6890 }
 0xa5c   : > { %v7610_v25 = vld [vmem:[#allocation3 + $0x20] sm:$0xff]  ;;  %v7611_v16 = vld [vmem:[#allocation3 + $0x28] sm:$0xff]  ;;  %7519 = vst.msk [vmem:[#allocation3 + $0x2e] sm:$0xfc] %vm7507_vm12, %v7256_v15 }
 0xa5d   : > { %7152 = vst.msk [vmem:[#allocation3 + $0x3f] sm:$0x1] %vm7142_vm13, %v6891_v34  ;;  %8843 = vmatprep.mubr.msk.f32.mxu1 %vm7686_vm2, %v7610_v25  ;;  %6948 = vrot.lane.b32.xlu0 %v15557_v27, %s9008_s23 }
 0xa5e   : > { %6946 = vrot.lane.b32.xlu1 %v12093_v42, %s9008_s23  ;;  %8844 = vmatmul.mubr.msk.f32.gmra.mrb[2].mxu1 %vm7686_vm2, %v7611_v16 }
 0xa5f   : > { %v7260_v35 = vpop.permute.xlu0 %7259  ;;  %v7258_v3 = vpop.permute.xlu1 %7257 }
 0xa60   : > { %7521 = vst.msk [vmem:[#allocation3 + $0x3e] sm:$0x3] %vm7511_vm14, %v7260_v35 }
 0xa61   : > { %7520 = vst.msk [vmem:[#allocation3 + $0x36] sm:$0xff] %vm7509_vm15, %v7258_v3  ;;  %7315 = vrot.lane.b32.xlu0 %v12093_v42, %s9009_s24 }
 0xa62   : > { %6950 = vrot.lane.b32.xlu1 %v15591_v12, %s9008_s23 }
 0xa63   : > { %v6895_v4 = vpop.permute.xlu0 %6894  ;;  %v6893_v20 = vpop.permute.xlu1 %6892 }
 0xa64   : > { %7154 = vst.msk [vmem:[#allocation3 + $0x47] sm:$0xff] %vm7140_vm10, %v6895_v4 }
 0xa65   : > { %7153 = vst.msk [vmem:[#allocation3 + $0x3f] sm:$0xfe] %vm7138_vm11, %v6893_v20  ;;  %7319 = vrot.lane.b32.xlu0 %v15591_v12, %s9009_s24 }
 0xa66   : > { %7317 = vrot.lane.b32.xlu1 %v15557_v27, %s9009_s24 }
 0xa67   : > { %v7262_v59 = vpop.permute.xlu0 %7261  ;;  %v6897_v45 = vpop.permute.xlu1 %6896 }
 0xa68   : > { %v7612_v2 = vld [vmem:[#allocation3 + $0x30] sm:$0xff]  ;;  %v7613_v61 = vld [vmem:[#allocation3 + $0x38] sm:$0xff]  ;;  %7522 = vst.msk [vmem:[#allocation3 + $0x3e] sm:$0xfc] %vm7507_vm12, %v7262_v59 }
 0xa69   : > { %7155 = vst.msk [vmem:[#allocation3 + $0x4f] sm:$0x1] %vm7142_vm13, %v6897_v45  ;;  %8846 = vmatprep.mubr.msk.f32.mxu1 %vm7686_vm2, %v7612_v2  ;;  %6954 = vrot.lane.b32.xlu0 %v15497_v40, %s9008_s23 }
 0xa6a   : > { %6952 = vrot.lane.b32.xlu1 %v15558_v44, %s9008_s23  ;;  %8847 = vmatmul.mubr.msk.f32.gmra.mrb[4].mxu1 %vm7686_vm2, %v7613_v61 }
 0xa6b   : > { %v7266_v42 = vpop.permute.xlu0 %7265  ;;  %v7264_v27 = vpop.permute.xlu1 %7263 }
 0xa6c   : > { %7524 = vst.msk [vmem:[#allocation3 + $0x4e] sm:$0x3] %vm7511_vm14, %v7266_v42 }
 0xa6d   : > { %7523 = vst.msk [vmem:[#allocation3 + $0x46] sm:$0xff] %vm7509_vm15, %v7264_v27  ;;  %7321 = vrot.lane.b32.xlu0 %v15558_v44, %s9009_s24 }
 0xa6e   : > { %6956 = vrot.lane.b32.xlu1 %v15521_v33, %s9008_s23 }
 0xa6f   : > { %v6901_v29 = vpop.permute.xlu0 %6900  ;;  %v6899_v5 = vpop.permute.xlu1 %6898 }
 0xa70   : > { %7157 = vst.msk [vmem:[#allocation3 + $0x57] sm:$0xff] %vm7140_vm10, %v6901_v29 }
 0xa71   : > { %7156 = vst.msk [vmem:[#allocation3 + $0x4f] sm:$0xfe] %vm7138_vm11, %v6899_v5  ;;  %7325 = vrot.lane.b32.xlu0 %v15521_v33, %s9009_s24 }
 0xa72   : > { %7323 = vrot.lane.b32.xlu1 %v15497_v40, %s9009_s24 }
 0xa73   : > { %v7268_v21 = vpop.permute.xlu0 %7267  ;;  %v6903_v26 = vpop.permute.xlu1 %6902 }
 0xa74   : > { %v7614_v23 = vld [vmem:[#allocation3 + $0x40] sm:$0xff]  ;;  %v7615_v7 = vld [vmem:[#allocation3 + $0x48] sm:$0xff]  ;;  %7525 = vst.msk [vmem:[#allocation3 + $0x4e] sm:$0xfc] %vm7507_vm12, %v7268_v21  ;;  %v15595_v21 = vld [vmem:[#allocation10_spill] sm:$0xff] }
 0xa75   : > { %7158 = vst.msk [vmem:[#allocation3 + $0x5f] sm:$0x1] %vm7142_vm13, %v6903_v26  ;;  %8849 = vmatprep.mubr.msk.f32.mxu1 %vm7686_vm2, %v7614_v23  ;;  %6960 = vrot.lane.b32.xlu0 %v15458_v24, %s9008_s23 }
 0xa76   : > { %6958 = vrot.lane.b32.xlu1 %v15560_v56, %s9008_s23  ;;  %8850 = vmatmul.mubr.msk.f32.gmra.mrb[6].mxu1 %vm7686_vm2, %v7615_v7 }
 0xa77   : > { %v7272_v44 = vpop.permute.xlu0 %7271  ;;  %v7270_v33 = vpop.permute.xlu1 %7269 }
 0xa78   : > { %7527 = vst.msk [vmem:[#allocation3 + $0x5e] sm:$0x3] %vm7511_vm14, %v7272_v44 }
 0xa79   : > { %7526 = vst.msk [vmem:[#allocation3 + $0x56] sm:$0xff] %vm7509_vm15, %v7270_v33  ;;  %7327 = vrot.lane.b32.xlu0 %v15560_v56, %s9009_s24  ;;  %v15592_v56 = vld [vmem:[#allocation64_spill] sm:$0xff] }
 0xa7a   : > { %6962 = vrot.lane.b32.xlu1 %v15523_v54, %s9008_s23 }
 0xa7b   : > { %v6907_v40 = vpop.permute.xlu0 %6906  ;;  %v6905_v38 = vpop.permute.xlu1 %6904 }
 0xa7c   : > { %7160 = vst.msk [vmem:[#allocation3 + $0x67] sm:$0xff] %vm7140_vm10, %v6907_v40 }
 0xa7d   : > { %7159 = vst.msk [vmem:[#allocation3 + $0x5f] sm:$0xfe] %vm7138_vm11, %v6905_v38  ;;  %7331 = vrot.lane.b32.xlu0 %v15523_v54, %s9009_s24 }
 0xa7e   : > { %7329 = vrot.lane.b32.xlu1 %v15458_v24, %s9009_s24 }
 0xa7f   : > { %v7274_v32 = vpop.permute.xlu0 %7273  ;;  %v6909_v0 = vpop.permute.xlu1 %6908 }
 0xa80   : > { %v7616_v17 = vld [vmem:[#allocation3 + $0x50] sm:$0xff]  ;;  %v7617_v46 = vld [vmem:[#allocation3 + $0x58] sm:$0xff]  ;;  %7528 = vst.msk [vmem:[#allocation3 + $0x5e] sm:$0xfc] %vm7507_vm12, %v7274_v32 }
 0xa81   : > { %7161 = vst.msk [vmem:[#allocation3 + $0x6f] sm:$0x1] %vm7142_vm13, %v6909_v0  ;;  %8852 = vmatprep.mubr.msk.f32.mxu1 %vm7686_vm2, %v7616_v17  ;;  %6966 = vrot.lane.b32.xlu0 %v15561_v51, %s9008_s23  ;;  %v15596_v0 = vld [vmem:[#allocation15_spill] sm:$0xff] }
 0xa82   : > { %6964 = vrot.lane.b32.xlu1 %v15460_v53, %s9008_s23  ;;  %8853 = vmatmul.mubr.msk.f32.gmra.mrb[8].mxu1 %vm7686_vm2, %v7617_v46 }
 0xa83   : > { %v7278_v54 = vpop.permute.xlu0 %7277  ;;  %v7276_v24 = vpop.permute.xlu1 %7275 }
 0xa84   : > { %7530 = vst.msk [vmem:[#allocation3 + $0x6e] sm:$0x3] %vm7511_vm14, %v7278_v54 }
 0xa85   : > { %7529 = vst.msk [vmem:[#allocation3 + $0x66] sm:$0xff] %vm7509_vm15, %v7276_v24  ;;  %7333 = vrot.lane.b32.xlu0 %v15460_v53, %s9009_s24 }
 0xa86   : > { %6968 = vrot.lane.b32.xlu1 %v15592_v56, %s9008_s23 }
 0xa87   : > { %v6913_v13 = vpop.permute.xlu0 %6912  ;;  %v6911_v50 = vpop.permute.xlu1 %6910 }
 0xa88   : > { %7163 = vst.msk [vmem:[#allocation3 + $0x77] sm:$0xff] %vm7140_vm10, %v6913_v13 }
 0xa89   : > { %7162 = vst.msk [vmem:[#allocation3 + $0x6f] sm:$0xfe] %vm7138_vm11, %v6911_v50  ;;  %7337 = vrot.lane.b32.xlu0 %v15592_v56, %s9009_s24 }
 0xa8a   : > { %7335 = vrot.lane.b32.xlu1 %v15561_v51, %s9009_s24 }
 0xa8b   : > { %v7280_v63 = vpop.permute.xlu0 %7279  ;;  %v6915_v9 = vpop.permute.xlu1 %6914 }
 0xa8c   : > { %v7618_v36 = vld [vmem:[#allocation3 + $0x60] sm:$0xff]  ;;  %v7619_v19 = vld [vmem:[#allocation3 + $0x68] sm:$0xff]  ;;  %7531 = vst.msk [vmem:[#allocation3 + $0x6e] sm:$0xfc] %vm7507_vm12, %v7280_v63 }
 0xa8d   : > { %7164 = vst.msk [vmem:[#allocation3 + $0x7f] sm:$0x1] %vm7142_vm13, %v6915_v9  ;;  %8855 = vmatprep.mubr.msk.f32.mxu1 %vm7686_vm2, %v7618_v36  ;;  %6972 = vrot.lane.b32.xlu0 %v15464_v39, %s9008_s23  ;;  %v15598_v36 = vld [vmem:[#allocation25_spill] sm:$0xff] }
 0xa8e   : > { %6970 = vrot.lane.b32.xlu1 %v15562_v22, %s9008_s23  ;;  %8856 = vmatmul.mubr.msk.f32.gmra.mrb[10].mxu1 %vm7686_vm2, %v7619_v19 }
 0xa8f   : > { %v7284_v53 = vpop.permute.xlu0 %7283  ;;  %v7282_v51 = vpop.permute.xlu1 %7281 }
 0xa90   : > { %7533 = vst.msk [vmem:[#allocation3 + $0x7e] sm:$0x3] %vm7511_vm14, %v7284_v53 }
 0xa91   : > { %7532 = vst.msk [vmem:[#allocation3 + $0x76] sm:$0xff] %vm7509_vm15, %v7282_v51  ;;  %7339 = vrot.lane.b32.xlu0 %v15562_v22, %s9009_s24 }
 0xa92   : > { %6974 = vrot.lane.b32.xlu1 %v15593_v49, %s9008_s23 }
 0xa93   : > { %v6919_v47 = vpop.permute.xlu0 %6918  ;;  %v6917_v15 = vpop.permute.xlu1 %6916 }
 0xa94   : > { %7166 = vst.msk [vmem:[#allocation3 + $0x87] sm:$0xff] %vm7140_vm10, %v6919_v47  ;;  %v15599_v47 = vld [vmem:[#allocation20_spill] sm:$0xff] }
 0xa95   : > { %7165 = vst.msk [vmem:[#allocation3 + $0x7f] sm:$0xfe] %vm7138_vm11, %v6917_v15  ;;  %7343 = vrot.lane.b32.xlu0 %v15593_v49, %s9009_s24 }
 0xa96   : > { %7341 = vrot.lane.b32.xlu1 %v15464_v39, %s9009_s24 }
 0xa97   : > { %v7286_v34 = vpop.permute.xlu0 %7285  ;;  %v6921_v25 = vpop.permute.xlu1 %6920 }
 0xa98   : > { %v7620_v16 = vld [vmem:[#allocation3 + $0x70] sm:$0xff]  ;;  %v7621_v35 = vld [vmem:[#allocation3 + $0x78] sm:$0xff]  ;;  %7534 = vst.msk [vmem:[#allocation3 + $0x7e] sm:$0xfc] %vm7507_vm12, %v7286_v34 }
 0xa99   : > { %7167 = vst.msk [vmem:[#allocation3 + $0x8f] sm:$0x1] %vm7142_vm13, %v6921_v25  ;;  %8858 = vmatprep.mubr.msk.f32.mxu1 %vm7686_vm2, %v7620_v16  ;;  %6978 = vrot.lane.b32.xlu0 %v15563_v11, %s9008_s23  ;;  %v15600_v34 = vld [vmem:[#allocation23_spill] sm:$0xff] }
 0xa9a   : > { %6976 = vrot.lane.b32.xlu1 %v15466_v14, %s9008_s23  ;;  %8859 = vmatmul.mubr.msk.f32.gmra.mrb[12].mxu1 %vm7686_vm2, %v7621_v35 }
 0xa9b   : > { %v7290_v22 = vpop.permute.xlu0 %7289  ;;  %v7288_v39 = vpop.permute.xlu1 %7287 }
 0xa9c   : > { %7536 = vst.msk [vmem:[#allocation3 + $0x8e] sm:$0x3] %vm7511_vm14, %v7290_v22 }
 0xa9d   : > { %7535 = vst.msk [vmem:[#allocation3 + $0x86] sm:$0xff] %vm7509_vm15, %v7288_v39  ;;  %7345 = vrot.lane.b32.xlu0 %v15466_v14, %s9009_s24  ;;  %v15594_v14 = vld [vmem:[#allocation81_spill] sm:$0xff] }
 0xa9e   : > { %6980 = vrot.lane.b32.xlu1 %v15526_v8, %s9008_s23 }
 0xa9f   : > { %v6925_v3 = vpop.permute.xlu0 %6924  ;;  %v6923_v12 = vpop.permute.xlu1 %6922 }
 0xaa0   : > { %7169 = vst.msk [vmem:[#allocation3 + $0x97] sm:$0xff] %vm7140_vm10, %v6925_v3 }
 0xaa1   : > { %7168 = vst.msk [vmem:[#allocation3 + $0x8f] sm:$0xfe] %vm7138_vm11, %v6923_v12  ;;  %7349 = vrot.lane.b32.xlu0 %v15526_v8, %s9009_s24  ;;  %v15601_v12 = vld [vmem:[#allocation30_spill] sm:$0xff] }
 0xaa2   : > { %7347 = vrot.lane.b32.xlu1 %v15563_v11, %s9009_s24 }
 0xaa3   : > { %v7292_v4 = vpop.permute.xlu0 %7291  ;;  %v6927_v20 = vpop.permute.xlu1 %6926 }
 0xaa4   : > { %v7622_v59 = vld [vmem:[#allocation3 + $0x80] sm:$0xff]  ;;  %v7623_v45 = vld [vmem:[#allocation3 + $0x88] sm:$0xff]  ;;  %7537 = vst.msk [vmem:[#allocation3 + $0x8e] sm:$0xfc] %vm7507_vm12, %v7292_v4 }
 0xaa5   : > { %7170 = vst.msk [vmem:[#allocation3 + $0x9f] sm:$0x1] %vm7142_vm13, %v6927_v20  ;;  %8861 = vmatprep.mubr.msk.f32.mxu1 %vm7686_vm2, %v7622_v59  ;;  %6982 = vrot.lane.b32.xlu0 %v15564_v57, %s9008_s23  ;;  %v15602_v59 = vld [vmem:[#allocation27_spill] sm:$0xff] }
 0xaa6   : > { %6701 = vrot.lane.b32.xlu1 %v15594_v14, %s9007_s15  ;;  %8862 = vmatmul.mubr.msk.f32.gmra.mrb[14].mxu1 %vm7686_vm2, %v7623_v45 }
 0xaa7   : > { %v7296_v8 = vpop.permute.xlu0 %7295  ;;  %v7294_v11 = vpop.permute.xlu1 %7293 }
 0xaa8   : > { %7539 = vst.msk [vmem:[#allocation3 + $0x9e] sm:$0x3] %vm7511_vm14, %v7296_v8 }
 0xaa9   : > { %7538 = vst.msk [vmem:[#allocation3 + $0x96] sm:$0xff] %vm7509_vm15, %v7294_v11  ;;  %6986 = vrot.lane.b32.xlu0 %v15527_v52, %s9008_s23 }
 0xaaa   : > { %6984 = vrot.lane.b32.xlu1 %v15594_v14, %s9008_s23 }
 0xaab   : > { %v6931_v2 = vpop.permute.xlu0 %6930  ;;  %v6929_v61 = vpop.permute.xlu1 %6928 }
 0xaac   : > { %7172 = vst.msk [vmem:[#allocation3 + $0xa7] sm:$0xff] %vm7140_vm10, %v6931_v2 }
 0xaad   : > { %7171 = vst.msk [vmem:[#allocation3 + $0x9f] sm:$0xfe] %vm7138_vm11, %v6929_v61  ;;  %7353 = vrot.lane.b32.xlu0 %v15594_v14, %s9009_s24 }
 0xaae   : > { %7351 = vrot.lane.b32.xlu1 %v15564_v57, %s9009_s24 }
 0xaaf   : > { %v7298_v42 = vpop.permute.xlu0 %7297  ;;  %v6933_v27 = vpop.permute.xlu1 %6932 }
 0xab0   : > { %v7624_v29 = vld [vmem:[#allocation3 + $0x90] sm:$0xff]  ;;  %v7625_v5 = vld [vmem:[#allocation3 + $0x98] sm:$0xff]  ;;  %7540 = vst.msk [vmem:[#allocation3 + $0x9e] sm:$0xfc] %vm7507_vm12, %v7298_v42 }
 0xab1   : > { %7173 = vst.msk [vmem:[#allocation3 + $0xaf] sm:$0x1] %vm7142_vm13, %v6933_v27  ;;  %8864 = vmatprep.mubr.msk.f32.mxu1 %vm7686_vm2, %v7624_v29  ;;  %6703 = vrot.lane.b32.xlu0 %v15595_v21, %s9007_s15 }
 0xab2   : > { %7355 = vrot.lane.b32.xlu1 %v15527_v52, %s9009_s24  ;;  %8865 = vmatmul.mubr.msk.f32.gmra.mrb[16].mxu1 %vm7686_vm2, %v7625_v5  ;;  %v15603_v5 = vld [vmem:[#allocation38_spill] sm:$0xff] }
 0xab3   : > { %v7302_v26 = vpop.permute.xlu0 %7301  ;;  %v7300_v57 = vpop.permute.xlu1 %7299 }
 0xab4   : > { %7542 = vst.msk [vmem:[#allocation3 + $0xae] sm:$0x3] %vm7511_vm14, %v7302_v26 }
 0xab5   : > { %7541 = vst.msk [vmem:[#allocation3 + $0xa6] sm:$0xff] %vm7509_vm15, %v7300_v57  ;;  %6988 = vrot.lane.b32.xlu0 %v15595_v21, %s9008_s23 }
 0xab6   : > { %6705 = vrot.lane.b32.xlu1 %v15565_v43, %s9007_s15 }
 0xab7   : > { %v6937_v23 = vpop.permute.xlu0 %6936  ;;  %v6935_v7 = vpop.permute.xlu1 %6934 }
 0xab8   : > { %7175 = vst.msk [vmem:[#allocation3 + $0xb7] sm:$0xff] %vm7140_vm10, %v6937_v23 }
 0xab9   : > { %7174 = vst.msk [vmem:[#allocation3 + $0xaf] sm:$0xfe] %vm7138_vm11, %v6935_v7  ;;  %6992 = vrot.lane.b32.xlu0 %v15528_v6, %s9008_s23 }
 0xaba   : > { %6990 = vrot.lane.b32.xlu1 %v15565_v43, %s9008_s23 }
 0xabb   : > { %v7304_v52 = vpop.permute.xlu0 %7303  ;;  %v6939_v44 = vpop.permute.xlu1 %6938 }
 0xabc   : > { %v7626_v33 = vld [vmem:[#allocation3 + $0xa0] sm:$0xff]  ;;  %v7627_v40 = vld [vmem:[#allocation3 + $0xa8] sm:$0xff]  ;;  %7543 = vst.msk [vmem:[#allocation3 + $0xae] sm:$0xfc] %vm7507_vm12, %v7304_v52 }
 0xabd   : > { %7176 = vst.msk [vmem:[#allocation3 + $0xbf] sm:$0x1] %vm7142_vm13, %v6939_v44  ;;  %8867 = vmatprep.mubr.msk.f32.mxu1 %vm7686_vm2, %v7626_v33  ;;  %7359 = vrot.lane.b32.xlu0 %v15565_v43, %s9009_s24  ;;  %v15597_v43 = vld [vmem:[#allocation13_spill] sm:$0xff] }
 0xabe   : > { %7357 = vrot.lane.b32.xlu1 %v15595_v21, %s9009_s24  ;;  %8868 = vmatmul.mubr.msk.f32.gmra.mrb[18].mxu1 %vm7686_vm2, %v7627_v40 }
 0xabf   : > { %v7308_v38 = vpop.permute.xlu0 %7307  ;;  %v7306_v32 = vpop.permute.xlu1 %7305 }
 0xac0   : > { %7545 = vst.msk [vmem:[#allocation3 + $0xbe] sm:$0x3] %vm7511_vm14, %v7308_v38 }
 0xac1   : > { %7544 = vst.msk [vmem:[#allocation3 + $0xb6] sm:$0xff] %vm7509_vm15, %v7306_v32  ;;  %6707 = vrot.lane.b32.xlu0 %v15596_v0, %s9007_s15 }
 0xac2   : > { %7361 = vrot.lane.b32.xlu1 %v15528_v6, %s9009_s24 }
 0xac3   : > { %v6943_v17 = vpop.permute.xlu0 %6942 }
 0xac4   : > { %v6941_v46 = vpop.permute.xlu1 %6940  ;;  %7178 = vst.msk [vmem:[#allocation3 + $0xc7] sm:$0xff] %vm7140_vm10, %v6943_v17 }
 0xac5   : > { %7177 = vst.msk [vmem:[#allocation3 + $0xbf] sm:$0xfe] %vm7138_vm11, %v6941_v46  ;;  %6994 = vrot.lane.b32.xlu0 %v15596_v0, %s9008_s23 }
 0xac6   : > { %6709 = vrot.lane.b32.xlu1 %v15597_v43, %s9007_s15 }
 0xac7   : > { %v7310_v54 = vpop.permute.xlu0 %7309 }
 0xac8   : > { %v6945_v24 = vpop.permute.xlu1 %6944  ;;  %v7628_v56 = vld [vmem:[#allocation3 + $0xb0] sm:$0xff]  ;;  %v7629_v13 = vld [vmem:[#allocation3 + $0xb8] sm:$0xff]  ;;  %7546 = vst.msk [vmem:[#allocation3 + $0xbe] sm:$0xfc] %vm7507_vm12, %v7310_v54 }
 0xac9   : > { %7179 = vst.msk [vmem:[#allocation3 + $0xcf] sm:$0x1] %vm7142_vm13, %v6945_v24  ;;  %8870 = vmatprep.mubr.msk.f32.mxu1 %vm7686_vm2, %v7628_v56  ;;  %6998 = vrot.lane.b32.xlu0 %v15529_v28, %s9008_s23 }
 0xaca   : > { %6996 = vrot.lane.b32.xlu1 %v15597_v43, %s9008_s23  ;;  %8871 = vmatmul.mubr.msk.f32.gmra.mrb[20].mxu1 %vm7686_vm2, %v7629_v13 }
 0xacb   : > { %v7314_v6 = vpop.permute.xlu0 %7313 }
 0xacc   : > { %v7312_v50 = vpop.permute.xlu1 %7311  ;;  %7548 = vst.msk [vmem:[#allocation3 + $0xce] sm:$0x3] %vm7511_vm14, %v7314_v6 }
 0xacd   : > { %7547 = vst.msk [vmem:[#allocation3 + $0xc6] sm:$0xff] %vm7509_vm15, %v7312_v50  ;;  %7365 = vrot.lane.b32.xlu0 %v15597_v43, %s9009_s24 }
 0xace   : > { %7363 = vrot.lane.b32.xlu1 %v15596_v0, %s9009_s24 }
 0xacf   : > { %v6949_v63 = vpop.permute.xlu0 %6948 }
 0xad0   : > { %v6947_v9 = vpop.permute.xlu1 %6946  ;;  %7181 = vst.msk [vmem:[#allocation3 + $0xd7] sm:$0xff] %vm7140_vm10, %v6949_v63 }
 0xad1   : > { %7180 = vst.msk [vmem:[#allocation3 + $0xcf] sm:$0xfe] %vm7138_vm11, %v6947_v9  ;;  %6711 = vrot.lane.b32.xlu0 %v15598_v36, %s9007_s15 }
 0xad2   : > { %7367 = vrot.lane.b32.xlu1 %v15529_v28, %s9009_s24 }
 0xad3   : > { %v7316_v19 = vpop.permute.xlu0 %7315 }
 0xad4   : > { %v6951_v53 = vpop.permute.xlu1 %6950  ;;  %v7630_v51 = vld [vmem:[#allocation3 + $0xc0] sm:$0xff]  ;;  %v7631_v49 = vld [vmem:[#allocation3 + $0xc8] sm:$0xff]  ;;  %7549 = vst.msk [vmem:[#allocation3 + $0xce] sm:$0xfc] %vm7507_vm12, %v7316_v19 }
 0xad5   : > { %7182 = vst.msk [vmem:[#allocation3 + $0xdf] sm:$0x1] %vm7142_vm13, %v6951_v53  ;;  %8873 = vmatprep.mubr.msk.f32.mxu1 %vm7686_vm2, %v7630_v51  ;;  %7000 = vrot.lane.b32.xlu0 %v15598_v36, %s9008_s23 }
 0xad6   : > { %6713 = vrot.lane.b32.xlu1 %v15599_v47, %s9007_s15  ;;  %8874 = vmatmul.mubr.msk.f32.gmra.mrb[22].mxu1 %vm7686_vm2, %v7631_v49 }
 0xad7   : > { %v7320_v15 = vpop.permute.xlu0 %7319 }
 0xad8   : > { %v7318_v28 = vpop.permute.xlu1 %7317  ;;  %7551 = vst.msk [vmem:[#allocation3 + $0xde] sm:$0x3] %vm7511_vm14, %v7320_v15 }
 0xad9   : > { %7550 = vst.msk [vmem:[#allocation3 + $0xd6] sm:$0xff] %vm7509_vm15, %v7318_v28  ;;  %7004 = vrot.lane.b32.xlu0 %v15600_v34, %s9008_s23 }
 0xada   : > { %7002 = vrot.lane.b32.xlu1 %v15599_v47, %s9008_s23 }
 0xadb   : > { %v6955_v25 = vpop.permute.xlu0 %6954 }
 0xadc   : > { %v6953_v16 = vpop.permute.xlu1 %6952  ;;  %7184 = vst.msk [vmem:[#allocation3 + $0xe7] sm:$0xff] %vm7140_vm10, %v6955_v25  ;;  %7187 = vst.msk [vmem:[#allocation3 + $0xf7] sm:$0xff] %vm7140_vm10, %v6955_v25 }
 0xadd   : > { %7183 = vst.msk [vmem:[#allocation3 + $0xdf] sm:$0xfe] %vm7138_vm11, %v6953_v16  ;;  %7186 = vst.msk [vmem:[#allocation3 + $0xef] sm:$0xfe] %vm7138_vm11, %v6953_v16  ;;  %7371 = vrot.lane.b32.xlu0 %v15599_v47, %s9009_s24  ;;  %v14250_v16 = vld [vmem:[%s287_s27] ss:$0 sm:$0xff] }
 0xade   : > { %7369 = vrot.lane.b32.xlu1 %v15598_v36, %s9009_s24  ;;  %v15606_v36 = vld [vmem:[#allocation54_spill] sm:$0xff] }
 0xadf   : > { %v7322_v35 = vpop.permute.xlu0 %7321 }
 0xae0   : > { %v6957_v22 = vpop.permute.xlu1 %6956  ;;  %v7632_v39 = vld [vmem:[#allocation3 + $0xd0] sm:$0xff]  ;;  %v7633_v3 = vld [vmem:[#allocation3 + $0xd8] sm:$0xff]  ;;  %7552 = vst.msk [vmem:[#allocation3 + $0xde] sm:$0xfc] %vm7507_vm12, %v7322_v35  ;;  %7555 = vst.msk [vmem:[#allocation3 + $0xee] sm:$0xfc] %vm7507_vm12, %v7322_v35 }
 0xae1   : > { %7185 = vst.msk [vmem:[#allocation3 + $0xef] sm:$0x1] %vm7142_vm13, %v6957_v22  ;;  %7188 = vst.msk [vmem:[#allocation3 + $0xff] sm:$0x1] %vm7142_vm13, %v6957_v22  ;;  %8876 = vmatprep.mubr.msk.f32.mxu1 %vm7686_vm2, %v7632_v39  ;;  %6715 = vrot.lane.b32.xlu0 %v15601_v12, %s9007_s15 }
 0xae2   : > { %7373 = vrot.lane.b32.xlu1 %v15600_v34, %s9009_s24  ;;  %8877 = vmatmul.mubr.msk.f32.gmra.mrb[24].mxu1 %vm7686_vm2, %v7633_v3 }
 0xae3   : > { %v7326_v4 = vpop.permute.xlu0 %7325 }
 0xae4   : > { %v7324_v20 = vpop.permute.xlu1 %7323  ;;  %7554 = vst.msk [vmem:[#allocation3 + $0xee] sm:$0x3] %vm7511_vm14, %v7326_v4  ;;  %7557 = vst.msk [vmem:[#allocation3 + $0xfe] sm:$0x3] %vm7511_vm14, %v7326_v4 }
 0xae5   : > { %7553 = vst.msk [vmem:[#allocation3 + $0xe6] sm:$0xff] %vm7509_vm15, %v7324_v20  ;;  %7556 = vst.msk [vmem:[#allocation3 + $0xf6] sm:$0xff] %vm7509_vm15, %v7324_v20  ;;  %7006 = vrot.lane.b32.xlu0 %v15601_v12, %s9008_s23 }
 0xae6   : > { %6717 = vrot.lane.b32.xlu1 %v15602_v59, %s9007_s15 }
 0xae7   : > { %v6961_v45 = vpop.permute.xlu0 %6960 }
 0xae8   : > { %v6959_v14 = vpop.permute.xlu1 %6958  ;;  %7190 = vst.msk [vmem:[#allocation3 + $0x107] sm:$0xff] %vm7140_vm10, %v6961_v45 }
 0xae9   : > { %7189 = vst.msk [vmem:[#allocation3 + $0xff] sm:$0xfe] %vm7138_vm11, %v6959_v14  ;;  %7010 = vrot.lane.b32.xlu0 %v15571_v1, %s9008_s23 }
 0xaea   : > { %7008 = vrot.lane.b32.xlu1 %v15602_v59, %s9008_s23 }
 0xaeb   : > { %v7328_v8 = vpop.permute.xlu0 %7327 }
 0xaec   : > { %v6963_v11 = vpop.permute.xlu1 %6962  ;;  %v7634_v2 = vld [vmem:[#allocation3 + $0xe0] sm:$0xff]  ;;  %v7635_v61 = vld [vmem:[#allocation3 + $0xe8] sm:$0xff]  ;;  %7558 = vst.msk [vmem:[#allocation3 + $0xfe] sm:$0xfc] %vm7507_vm12, %v7328_v8  ;;  %v7636_v42 = vld [vmem:[#allocation3 + $0xf0] sm:$0xff] }
 0xaed   : > { %7191 = vst.msk [vmem:[#allocation3 + $0x10f] sm:$0x1] %vm7142_vm13, %v6963_v11  ;;  %8879 = vmatprep.mubr.msk.f32.mxu1 %vm7686_vm2, %v7634_v2  ;;  %7377 = vrot.lane.b32.xlu0 %v15602_v59, %s9009_s24  ;;  %v7637_v21 = vld [vmem:[#allocation3 + $0xf8] sm:$0xff] }
 0xaee   : > { %7375 = vrot.lane.b32.xlu1 %v15601_v12, %s9009_s24  ;;  %8880 = vmatmul.mubr.msk.f32.gmra.mrb[26].mxu1 %vm7686_vm2, %v7635_v61 }
 0xaef   : > { %8882 = vmatprep.mubr.msk.f32.mxu1 %vm7686_vm2, %v7636_v42  ;;  %v7332_v27 = vpop.permute.xlu0 %7331 }
 0xaf0   : > { %v7330_v29 = vpop.permute.xlu1 %7329  ;;  %7560 = vst.msk [vmem:[#allocation3 + $0x10e] sm:$0x3] %vm7511_vm14, %v7332_v27 }
 0xaf1   : > { %7559 = vst.msk [vmem:[#allocation3 + $0x106] sm:$0xff] %vm7509_vm15, %v7330_v29  ;;  %6719 = vrot.lane.b32.xlu0 %v15603_v5, %s9007_s15 }
 0xaf2   : > { %7379 = vrot.lane.b32.xlu1 %v15571_v1, %s9009_s24  ;;  %8883 = vmatmul.mubr.msk.f32.gmra.mrb[28].mxu1 %vm7686_vm2, %v7637_v21  ;;  %v15604_v1 = vld [vmem:[#allocation69_spill] sm:$0xff] }
 0xaf3   : > { %v6967_v26 = vpop.permute.xlu0 %6966 }
 0xaf4   : > { %v6965_v57 = vpop.permute.xlu1 %6964  ;;  %7193 = vst.msk [vmem:[#allocation3 + $0x117] sm:$0xff] %vm7140_vm10, %v6967_v26 }
 0xaf5   : > { %7192 = vst.msk [vmem:[#allocation3 + $0x10f] sm:$0xfe] %vm7138_vm11, %v6965_v57  ;;  %7012 = vrot.lane.b32.xlu0 %v15603_v5, %s9008_s23 }
 0xaf6   : > { %6721 = vrot.lane.b32.xlu1 %v15573_v60, %s9007_s15 }
 0xaf7   : > { %v7334_v23 = vpop.permute.xlu0 %7333 }
 0xaf8   : > { %v6969_v7 = vpop.permute.xlu1 %6968  ;;  %v7638_v52 = vld [vmem:[#allocation3 + $0x100] sm:$0xff]  ;;  %v7639_v44 = vld [vmem:[#allocation3 + $0x108] sm:$0xff]  ;;  %7561 = vst.msk [vmem:[#allocation3 + $0x10e] sm:$0xfc] %vm7507_vm12, %v7334_v23 }
 0xaf9   : > { %7194 = vst.msk [vmem:[#allocation3 + $0x11f] sm:$0x1] %vm7142_vm13, %v6969_v7  ;;  %8885 = vmatprep.mubr.msk.f32.mxu1 %vm7686_vm2, %v7638_v52  ;;  %7016 = vrot.lane.b32.xlu0 %v15604_v1, %s9008_s23 }
 0xafa   : > { %7014 = vrot.lane.b32.xlu1 %v15573_v60, %s9008_s23  ;;  %8886 = vmatmul.mubr.msk.f32.gmra.mrb[30].mxu1 %vm7686_vm2, %v7639_v44 }
 0xafb   : > { %v7338_v33 = vpop.permute.xlu0 %7337 }
 0xafc   : > { %v7336_v40 = vpop.permute.xlu1 %7335  ;;  %7563 = vst.msk [vmem:[#allocation3 + $0x11e] sm:$0x3] %vm7511_vm14, %v7338_v33 }
 0xafd   : > { %7562 = vst.msk [vmem:[#allocation3 + $0x116] sm:$0xff] %vm7509_vm15, %v7336_v40  ;;  %7383 = vrot.lane.b32.xlu0 %v15573_v60, %s9009_s24  ;;  %v15605_v60 = vld [vmem:[#allocation43_spill] sm:$0xff] }
 0xafe   : > { %7381 = vrot.lane.b32.xlu1 %v15603_v5, %s9009_s24 }
 0xaff   : > { %v6973_v38 = vpop.permute.xlu0 %6972 }
 0xb00   : > { %v6971_v32 = vpop.permute.xlu1 %6970  ;;  %7196 = vst.msk [vmem:[#allocation3 + $0x127] sm:$0xff] %vm7140_vm10, %v6973_v38  ;;  %v15608_v38 = vld [vmem:[#allocation74_spill] sm:$0xff] }
 0xb01   : > { %7195 = vst.msk [vmem:[#allocation3 + $0x11f] sm:$0xfe] %vm7138_vm11, %v6971_v32  ;;  %6723 = vrot.lane.b32.xlu0 %v15574_v10, %s9007_s15 }
 0xb02   : > { %7385 = vrot.lane.b32.xlu1 %v15604_v1, %s9009_s24 }
 0xb03   : > { %v7340_v0 = vpop.permute.xlu0 %7339 }
 0xb04   : > { %v6975_v17 = vpop.permute.xlu1 %6974  ;;  %v7640_v46 = vld [vmem:[#allocation3 + $0x110] sm:$0xff]  ;;  %v7641_v43 = vld [vmem:[#allocation3 + $0x118] sm:$0xff]  ;;  %7564 = vst.msk [vmem:[#allocation3 + $0x11e] sm:$0xfc] %vm7507_vm12, %v7340_v0 }
 0xb05   : > { %7197 = vst.msk [vmem:[#allocation3 + $0x12f] sm:$0x1] %vm7142_vm13, %v6975_v17  ;;  %8888 = vmatprep.mubr.msk.f32.mxu1 %vm7686_vm2, %v7640_v46  ;;  %7018 = vrot.lane.b32.xlu0 %v15574_v10, %s9008_s23  ;;  %v15609_v46 = vld [vmem:[#allocation73_spill] sm:$0xff] }
 0xb06   : > { %6725 = vrot.lane.b32.xlu1 %v15605_v60, %s9007_s15  ;;  %8889 = vmatmul.mubr.msk.f32.gmra.mrb[32].mxu1 %vm7686_vm2, %v7641_v43 }
 0xb07   : > { %v7344_v54 = vpop.permute.xlu0 %7343 }
 0xb08   : > { %v7342_v24 = vpop.permute.xlu1 %7341  ;;  %7566 = vst.msk [vmem:[#allocation3 + $0x12e] sm:$0x3] %vm7511_vm14, %v7344_v54 }
 0xb09   : > { %7565 = vst.msk [vmem:[#allocation3 + $0x126] sm:$0xff] %vm7509_vm15, %v7342_v24  ;;  %7022 = vrot.lane.b32.xlu0 %v15575_v55, %s9008_s23 }
 0xb0a   : > { %7020 = vrot.lane.b32.xlu1 %v15605_v60, %s9008_s23 }
 0xb0b   : > { %v6979_v56 = vpop.permute.xlu0 %6978 }
 0xb0c   : > { %v6977_v13 = vpop.permute.xlu1 %6976  ;;  %7199 = vst.msk [vmem:[#allocation3 + $0x137] sm:$0xff] %vm7140_vm10, %v6979_v56 }
 0xb0d   : > { %7198 = vst.msk [vmem:[#allocation3 + $0x12f] sm:$0xfe] %vm7138_vm11, %v6977_v13  ;;  %7389 = vrot.lane.b32.xlu0 %v15605_v60, %s9009_s24 }
 0xb0e   : > { %7387 = vrot.lane.b32.xlu1 %v15574_v10, %s9009_s24 }
 0xb0f   : > { %v7346_v6 = vpop.permute.xlu0 %7345 }
 0xb10   : > { %v6981_v50 = vpop.permute.xlu1 %6980  ;;  %v7642_v63 = vld [vmem:[#allocation3 + $0x120] sm:$0xff]  ;;  %v7643_v9 = vld [vmem:[#allocation3 + $0x128] sm:$0xff]  ;;  %7567 = vst.msk [vmem:[#allocation3 + $0x12e] sm:$0xfc] %vm7507_vm12, %v7346_v6 }
 0xb11   : > { %7200 = vst.msk [vmem:[#allocation3 + $0x13f] sm:$0x1] %vm7142_vm13, %v6981_v50  ;;  %8891 = vmatprep.mubr.msk.f32.mxu1 %vm7686_vm2, %v7642_v63  ;;  %6727 = vrot.lane.b32.xlu0 %v15606_v36, %s9007_s15  ;;  %v15610_v63 = vld [vmem:[#allocation4_spill] sm:$0xff] }
 0xb12   : > { %7391 = vrot.lane.b32.xlu1 %v15575_v55, %s9009_s24  ;;  %8892 = vmatmul.mubr.msk.f32.gmra.mrb[34].mxu1 %vm7686_vm2, %v7643_v9 }
 0xb13   : > { %v7350_v19 = vpop.permute.xlu0 %7349 }
 0xb14   : > { %v7348_v10 = vpop.permute.xlu1 %7347  ;;  %7569 = vst.msk [vmem:[#allocation3 + $0x13e] sm:$0x3] %vm7511_vm14, %v7350_v19  ;;  %v15611_v19 = vld [vmem:[#allocation41_spill] sm:$0xff] }
 0xb15   : > { %7568 = vst.msk [vmem:[#allocation3 + $0x136] sm:$0xff] %vm7509_vm15, %v7348_v10  ;;  %7024 = vrot.lane.b32.xlu0 %v15606_v36, %s9008_s23  ;;  %v15612_v10 = vld [vmem:[#allocation8_spill] sm:$0xff] }
 0xb16   : > { %6729 = vrot.lane.b32.xlu1 %v15576_v37, %s9007_s15 }
 0xb17   : > { %v6983_v53 = vpop.permute.xlu0 %6982 }
 0xb18   : > { %v6702_v51 = vpop.permute.xlu1 %6701  ;;  %7201 = vst.msk [vmem:[#allocation3 + $0x13f] sm:$0xfe] %vm7138_vm11, %v6983_v53 }
 0xb19   : > { %6845 = vst.msk [vmem:[#allocation3 + $0x148] sm:$0xff] %vm6803_vm9, %v6702_v51  ;;  %7028 = vrot.lane.b32.xlu0 %v15538_v18, %s9008_s23 }
 0xb1a   : > { %7026 = vrot.lane.b32.xlu1 %v15576_v37, %s9008_s23 }
 0xb1b   : > { %v6987_v55 = vpop.permute.xlu0 %6986 }
 0xb1c   : > { %v6985_v49 = vpop.permute.xlu1 %6984  ;;  %v7644_v47 = vld [vmem:[#allocation3 + $0x130] sm:$0xff]  ;;  %v7645_v15 = vld [vmem:[#allocation3 + $0x138] sm:$0xff]  ;;  %7203 = vst.msk [vmem:[#allocation3 + $0x14f] sm:$0x1] %vm7142_vm13, %v6987_v55 }
 0xb1d   : > { %7202 = vst.msk [vmem:[#allocation3 + $0x147] sm:$0xff] %vm7140_vm10, %v6985_v49  ;;  %8894 = vmatprep.mubr.msk.f32.mxu1 %vm7686_vm2, %v7644_v47  ;;  %7395 = vrot.lane.b32.xlu0 %v15576_v37, %s9009_s24 }
 0xb1e   : > { %7393 = vrot.lane.b32.xlu1 %v15606_v36, %s9009_s24  ;;  %8895 = vmatmul.mubr.msk.f32.gmra.mrb[36].mxu1 %vm7686_vm2, %v7645_v15 }
 0xb1f   : > { %v7354_v28 = vpop.permute.xlu0 %7353 }
 0xb20   : > { %v7352_v34 = vpop.permute.xlu1 %7351  ;;  %7571 = vst.msk [vmem:[#allocation3 + $0x146] sm:$0xff] %vm7509_vm15, %v7354_v28 }
 0xb21   : > { %7570 = vst.msk [vmem:[#allocation3 + $0x13e] sm:$0xfc] %vm7507_vm12, %v7352_v34  ;;  %6731 = vrot.lane.b32.xlu0 %v15577_v62, %s9007_s15 }
 0xb22   : > { %7397 = vrot.lane.b32.xlu1 %v15538_v18, %s9009_s24  ;;  %v15607_v18 = vld [vmem:[#allocation60_spill] sm:$0xff] }
 0xb23   : > { %v6704_v37 = vpop.permute.xlu0 %6703 }
 0xb24   : > { %v7356_v25 = vpop.permute.xlu1 %7355  ;;  %6846 = vst.msk [vmem:[#allocation3 + $0x150] sm:$0xff] %vm6803_vm9, %v6704_v37 }
 0xb25   : > { %7572 = vst.msk [vmem:[#allocation3 + $0x14e] sm:$0x3] %vm7511_vm14, %v7356_v25  ;;  %v8842_v35 = vpop.f32.mrb[0].mxu1  ;;  %7030 = vrot.lane.b32.xlu0 %v15577_v62, %s9008_s23 }
 0xb26   : > { %6733 = vrot.lane.b32.xlu1 %v15607_v18, %s9007_s15  ;;  %v7961_v22 = vadd.f32 %v8842_v35, %v14250_v16  ;;  %v7955_v39 = vpop.f32.mrb[1].mxu1 }
 0xb27   : > { %v7956_v3 = vadd.f32 %v14250_v16, %v7955_v39  ;;  %v6989_v12 = vpop.permute.xlu0 %6988 }
 0xb28   : > { %v6706_v4 = vpop.permute.xlu1 %6705  ;;  %v7646_v20 = vld [vmem:[#allocation3 + $0x140] sm:$0xff]  ;;  %8267 = vst.msk [vmem:[%s14259_s30 + $0x18] sm:$0xff] %vm740_vm1, %v7961_v22 }
 0xb29   : > { %7204 = vst.msk [vmem:[#allocation3 + $0x14f] sm:$0xfe] %vm7138_vm11, %v6989_v12  ;;  %8897 = vmatprep.mubr.msk.f32.mxu1 %vm7686_vm2, %v7646_v20  ;;  %7034 = vrot.lane.b32.xlu0 %v15540_v58, %s9008_s23 }
 0xb2a   : > { %6847 = vst.msk [vmem:[#allocation3 + $0x158] sm:$0xff] %vm6803_vm9, %v6706_v4  ;;  %7032 = vrot.lane.b32.xlu1 %v15607_v18, %s9008_s23 }
 0xb2b   : > { %8266 = vst.msk [vmem:[%s14259_s30 + $0x10] sm:$0xff] %vm740_vm1, %v7956_v3  ;;  %v6993_v59 = vpop.permute.xlu0 %6992 }
 0xb2c   : > { %v6991_v45 = vpop.permute.xlu1 %6990  ;;  %v7647_v14 = vld [vmem:[#allocation3 + $0x148] sm:$0xff]  ;;  %7206 = vst.msk [vmem:[#allocation3 + $0x15f] sm:$0x1] %vm7142_vm13, %v6993_v59 }
 0xb2d   : > { %7205 = vst.msk [vmem:[#allocation3 + $0x157] sm:$0xff] %vm7140_vm10, %v6991_v45  ;;  %8898 = vmatmul.mubr.msk.f32.gmra.mrb[38].mxu1 %vm7686_vm2, %v7647_v14  ;;  %7401 = vrot.lane.b32.xlu0 %v15607_v18, %s9009_s24 }
 0xb2e   : > { %7399 = vrot.lane.b32.xlu1 %v15577_v62, %s9009_s24 }
 0xb2f   : > { %v7360_v8 = vpop.permute.xlu0 %7359 }
 0xb30   : > { %v7358_v11 = vpop.permute.xlu1 %7357  ;;  %7574 = vst.msk [vmem:[#allocation3 + $0x156] sm:$0xff] %vm7509_vm15, %v7360_v8 }
 0xb31   : > { %7573 = vst.msk [vmem:[#allocation3 + $0x14e] sm:$0xfc] %vm7507_vm12, %v7358_v11  ;;  %v8845_v2 = vpop.f32.mrb[2].mxu1  ;;  %6735 = vrot.lane.b32.xlu0 %v12459_v41, %s9007_s15 }
 0xb32   : > { %7403 = vrot.lane.b32.xlu1 %v15540_v58, %s9009_s24  ;;  %v7971_v61 = vadd.f32 %v8845_v2, %v14250_v16  ;;  %v7965_v42 = vpop.f32.mrb[3].mxu1 }
 0xb33   : > { %v7966_v27 = vadd.f32 %v14250_v16, %v7965_v42  ;;  %v6708_v62 = vpop.permute.xlu0 %6707 }
 0xb34   : > { %v7362_v29 = vpop.permute.xlu1 %7361  ;;  %8269 = vst.msk [vmem:[%s14259_s30 + $0x28] sm:$0xff] %vm740_vm1, %v7971_v61 }
 0xb35   : > { %6848 = vst.msk [vmem:[#allocation3 + $0x160] sm:$0xff] %vm6803_vm9, %v6708_v62  ;;  %7036 = vrot.lane.b32.xlu0 %v12459_v41, %s9008_s23 }
 0xb36   : > { %7575 = vst.msk [vmem:[#allocation3 + $0x15e] sm:$0x3] %vm7511_vm14, %v7362_v29  ;;  %6737 = vrot.lane.b32.xlu1 %v15578_v30, %s9007_s15 }
 0xb37   : > { %8268 = vst.msk [vmem:[%s14259_s30 + $0x20] sm:$0xff] %vm740_vm1, %v7966_v27  ;;  %v6995_v58 = vpop.permute.xlu0 %6994 }
 0xb38   : > { %v6710_v5 = vpop.permute.xlu1 %6709  ;;  %v7648_v21 = vld [vmem:[#allocation3 + $0x150] sm:$0xff]  ;;  %7207 = vst.msk [vmem:[#allocation3 + $0x15f] sm:$0xfe] %vm7138_vm11, %v6995_v58 }
 0xb39   : > { %6849 = vst.msk [vmem:[#allocation3 + $0x168] sm:$0xff] %vm6803_vm9, %v6710_v5  ;;  %8900 = vmatprep.mubr.msk.f32.mxu1 %vm7686_vm2, %v7648_v21  ;;  %7040 = vrot.lane.b32.xlu0 %v15541_v31, %s9008_s23 }
 0xb3a   : > { %7038 = vrot.lane.b32.xlu1 %v15578_v30, %s9008_s23 }
 0xb3b   : > { %v6999_v26 = vpop.permute.xlu0 %6998 }
 0xb3c   : > { %v6997_v57 = vpop.permute.xlu1 %6996  ;;  %7209 = vst.msk [vmem:[#allocation3 + $0x16f] sm:$0x1] %vm7142_vm13, %v6999_v26 }
 0xb3d   : > { %v7649_v23 = vld [vmem:[#allocation3 + $0x158] sm:$0xff]  ;;  %7208 = vst.msk [vmem:[#allocation3 + $0x167] sm:$0xff] %vm7140_vm10, %v6997_v57  ;;  %v8848_v7 = vpop.f32.mrb[4].mxu1  ;;  %7407 = vrot.lane.b32.xlu0 %v15578_v30, %s9009_s24 }
 0xb3e   : > { %8901 = vmatmul.mubr.msk.f32.gmra.mrb[40].mxu1 %vm7686_vm2, %v7649_v23  ;;  %7405 = vrot.lane.b32.xlu1 %v12459_v41, %s9009_s24  ;;  %v7981_v52 = vadd.f32 %v8848_v7, %v14250_v16  ;;  %v7975_v44 = vpop.f32.mrb[5].mxu1 }
 0xb3f   : > { %v7976_v1 = vadd.f32 %v14250_v16, %v7975_v44  ;;  %v7366_v33 = vpop.permute.xlu0 %7365 }
 0xb40   : > { %v7364_v40 = vpop.permute.xlu1 %7363  ;;  %8271 = vst.msk [vmem:[%s14259_s30 + $0x38] sm:$0xff] %vm740_vm1, %v7981_v52 }
 0xb41   : > { %7577 = vst.msk [vmem:[#allocation3 + $0x166] sm:$0xff] %vm7509_vm15, %v7366_v33  ;;  %6739 = vrot.lane.b32.xlu0 %v12965_v48, %s9007_s15 }
 0xb42   : > { %7576 = vst.msk [vmem:[#allocation3 + $0x15e] sm:$0xfc] %vm7507_vm12, %v7364_v40  ;;  %7409 = vrot.lane.b32.xlu1 %v15541_v31, %s9009_s24 }
 0xb43   : > { %8270 = vst.msk [vmem:[%s14259_s30 + $0x30] sm:$0xff] %vm740_vm1, %v7976_v1  ;;  %v6712_v41 = vpop.permute.xlu0 %6711 }
 0xb44   : > { %v7368_v30 = vpop.permute.xlu1 %7367  ;;  %6850 = vst.msk [vmem:[#allocation3 + $0x170] sm:$0xff] %vm6803_vm9, %v6712_v41 }
 0xb45   : > { %7578 = vst.msk [vmem:[#allocation3 + $0x16e] sm:$0x3] %vm7511_vm14, %v7368_v30  ;;  %7042 = vrot.lane.b32.xlu0 %v12965_v48, %s9008_s23 }
 0xb46   : > { %6741 = vrot.lane.b32.xlu1 %v15608_v38, %s9007_s15 }
 0xb47   : > { %v7001_v32 = vpop.permute.xlu0 %7000 }
 0xb48   : > { %v6714_v0 = vpop.permute.xlu1 %6713  ;;  %7210 = vst.msk [vmem:[#allocation3 + $0x16f] sm:$0xfe] %vm7138_vm11, %v7001_v32 }
 0xb49   : > { %v7650_v17 = vld [vmem:[#allocation3 + $0x160] sm:$0xff]  ;;  %6851 = vst.msk [vmem:[#allocation3 + $0x178] sm:$0xff] %vm6803_vm9, %v6714_v0  ;;  %v8851_v31 = vpop.f32.mrb[6].mxu1  ;;  %7046 = vrot.lane.b32.xlu0 %v15609_v46, %s9008_s23 }
 0xb4a   : > { %8903 = vmatprep.mubr.msk.f32.mxu1 %vm7686_vm2, %v7650_v17  ;;  %7044 = vrot.lane.b32.xlu1 %v15608_v38, %s9008_s23  ;;  %v7991_v43 = vadd.f32 %v8851_v31, %v14250_v16  ;;  %v7985_v60 = vpop.f32.mrb[7].mxu1 }
 0xb4b   : > { %v7986_v54 = vadd.f32 %v14250_v16, %v7985_v60  ;;  %v7005_v24 = vpop.permute.xlu0 %7004 }
 0xb4c   : > { %v7003_v56 = vpop.permute.xlu1 %7002  ;;  %v7651_v13 = vld [vmem:[#allocation3 + $0x168] sm:$0xff]  ;;  %8273 = vst.msk [vmem:[%s14259_s30 + $0x48] sm:$0xff] %vm740_vm1, %v7991_v43 }
 0xb4d   : > { %7212 = vst.msk [vmem:[#allocation3 + $0x17f] sm:$0x1] %vm7142_vm13, %v7005_v24  ;;  %8904 = vmatmul.mubr.msk.f32.gmra.mrb[42].mxu1 %vm7686_vm2, %v7651_v13  ;;  %7413 = vrot.lane.b32.xlu0 %v15608_v38, %s9009_s24 }
 0xb4e   : > { %7211 = vst.msk [vmem:[#allocation3 + $0x177] sm:$0xff] %vm7140_vm10, %v7003_v56  ;;  %7411 = vrot.lane.b32.xlu1 %v12965_v48, %s9009_s24 }
 0xb4f   : > { %8272 = vst.msk [vmem:[%s14259_s30 + $0x40] sm:$0xff] %vm740_vm1, %v7986_v54  ;;  %v7372_v6 = vpop.permute.xlu0 %7371 }
 0xb50   : > { %v7370_v50 = vpop.permute.xlu1 %7369  ;;  %7580 = vst.msk [vmem:[#allocation3 + $0x176] sm:$0xff] %vm7509_vm15, %v7372_v6 }
 0xb51   : > { %7579 = vst.msk [vmem:[#allocation3 + $0x16e] sm:$0xfc] %vm7507_vm12, %v7370_v50  ;;  %6868 = vrot.lane.b32.xlu0 %v15610_v63, %s9008_s23 }
 0xb52   : > { %7415 = vrot.lane.b32.xlu1 %v15609_v46, %s9009_s24 }
 0xb53   : > { %v6716_v9 = vpop.permute.xlu0 %6715 }
 0xb54   : > { %v7374_v36 = vpop.permute.xlu1 %7373  ;;  %6852 = vst.msk [vmem:[#allocation3 + $0x180] sm:$0xff] %vm6803_vm9, %v6716_v9 }
 0xb55   : > { %7581 = vst.msk [vmem:[#allocation3 + $0x17e] sm:$0x3] %vm7511_vm14, %v7374_v36  ;;  %v8854_v48 = vpop.f32.mrb[8].mxu1  ;;  %6872 = vrot.lane.b32.xlu0 %v15611_v19, %s9008_s23 }
 0xb56   : > { %6870 = vrot.lane.b32.xlu1 %v15612_v10, %s9008_s23  ;;  %v8001_v53 = vadd.f32 %v8854_v48, %v14250_v16  ;;  %v7995_v51 = vpop.f32.mrb[9].mxu1 }
 0xb57   : > { %v7996_v55 = vadd.f32 %v14250_v16, %v7995_v51  ;;  %v7007_v49 = vpop.permute.xlu0 %7006 }
 0xb58   : > { %v6718_v47 = vpop.permute.xlu1 %6717  ;;  %v7652_v15 = vld [vmem:[#allocation3 + $0x170] sm:$0xff]  ;;  %8275 = vst.msk [vmem:[%s14259_s30 + $0x58] sm:$0xff] %vm740_vm1, %v8001_v53 }
 0xb59   : > { %7213 = vst.msk [vmem:[#allocation3 + $0x17f] sm:$0xfe] %vm7138_vm11, %v7007_v49  ;;  %8906 = vmatprep.mubr.msk.f32.mxu1 %vm7686_vm2, %v7652_v15  ;;  %7239 = vrot.lane.b32.xlu0 %v15612_v10, %s9009_s24 }
 0xb5a   : > { %6853 = vst.msk [vmem:[#allocation3 + $0x188] sm:$0xff] %vm6803_vm9, %v6718_v47  ;;  %7237 = vrot.lane.b32.xlu1 %v15610_v63, %s9009_s24 }
 0xb5b   : > { %8274 = vst.msk [vmem:[%s14259_s30 + $0x50] sm:$0xff] %vm740_vm1, %v7996_v55  ;;  %v7011_v28 = vpop.permute.xlu0 %7010 }
 0xb5c   : > { %v7009_v34 = vpop.permute.xlu1 %7008  ;;  %v7653_v37 = vld [vmem:[#allocation3 + $0x178] sm:$0xff]  ;;  %7215 = vst.msk [vmem:[#allocation3 + $0x18f] sm:$0x1] %vm7142_vm13, %v7011_v28 }
 0xb5d   : > { %7214 = vst.msk [vmem:[#allocation3 + $0x187] sm:$0xff] %vm7140_vm10, %v7009_v34  ;;  %8907 = vmatmul.mubr.msk.f32.gmra.mrb[44].mxu1 %vm7686_vm2, %v7653_v37 }
 0xb5e   : > { %7241 = vrot.lane.b32.xlu1 %v15611_v19, %s9009_s24 }
 0xb5f   : > { %v7378_v25 = vpop.permute.xlu0 %7377 }
 0xb60   : > { %v7376_v35 = vpop.permute.xlu1 %7375  ;;  %7583 = vst.msk [vmem:[#allocation3 + $0x186] sm:$0xff] %vm7509_vm15, %v7378_v25 }
 0xb61   : > { %7582 = vst.msk [vmem:[#allocation3 + $0x17e] sm:$0xfc] %vm7507_vm12, %v7376_v35  ;;  %v8857_v18 = vpop.f32.mrb[10].mxu1 }
 0xb62   : > { %v8011_v22 = vadd.f32 %v8857_v18, %v14250_v16  ;;  %v8005_v39 = vpop.f32.mrb[11].mxu1 }
 0xb63   : > { %v8006_v3 = vadd.f32 %v14250_v16, %v8005_v39  ;;  %v6720_v12 = vpop.permute.xlu0 %6719 }
 0xb64   : > { %v7380_v4 = vpop.permute.xlu1 %7379  ;;  %8277 = vst.msk [vmem:[%s14259_s30 + $0x68] sm:$0xff] %vm740_vm1, %v8011_v22 }
 0xb65   : > { %6854 = vst.msk [vmem:[#allocation3 + $0x190] sm:$0xff] %vm6803_vm9, %v6720_v12 }
 0xb66   : > { %7584 = vst.msk [vmem:[#allocation3 + $0x18e] sm:$0x3] %vm7511_vm14, %v7380_v4 }
 0xb67   : > { %8276 = vst.msk [vmem:[%s14259_s30 + $0x60] sm:$0xff] %vm740_vm1, %v8006_v3  ;;  %v7013_v20 = vpop.permute.xlu0 %7012 }
 0xb68   : > { %v6722_v59 = vpop.permute.xlu1 %6721  ;;  %v7654_v45 = vld [vmem:[#allocation3 + $0x180] sm:$0xff]  ;;  %7216 = vst.msk [vmem:[#allocation3 + $0x18f] sm:$0xfe] %vm7138_vm11, %v7013_v20 }
 0xb69   : > { %6855 = vst.msk [vmem:[#allocation3 + $0x198] sm:$0xff] %vm6803_vm9, %v6722_v59  ;;  %8909 = vmatprep.mubr.msk.f32.mxu1 %vm7686_vm2, %v7654_v45 }
 0xb6b   : > { %v7017_v14 = vpop.permute.xlu0 %7016 }
 0xb6c   : > { %v7015_v8 = vpop.permute.xlu1 %7014  ;;  %7218 = vst.msk [vmem:[#allocation3 + $0x19f] sm:$0x1] %vm7142_vm13, %v7017_v14 }
 0xb6d   : > { %v7655_v11 = vld [vmem:[#allocation3 + $0x188] sm:$0xff]  ;;  %7217 = vst.msk [vmem:[#allocation3 + $0x197] sm:$0xff] %vm7140_vm10, %v7015_v8  ;;  %v8860_v2 = vpop.f32.mrb[12].mxu1 }
 0xb6e   : > { %8910 = vmatmul.mubr.msk.f32.gmra.mrb[46].mxu1 %vm7686_vm2, %v7655_v11  ;;  %v8021_v61 = vadd.f32 %v8860_v2, %v14250_v16  ;;  %v8015_v42 = vpop.f32.mrb[13].mxu1 }
 0xb6f   : > { %v8016_v27 = vadd.f32 %v14250_v16, %v8015_v42  ;;  %v7384_v62 = vpop.permute.xlu0 %7383 }
 0xb70   : > { %v7382_v29 = vpop.permute.xlu1 %7381  ;;  %8279 = vst.msk [vmem:[%s14259_s30 + $0x78] sm:$0xff] %vm740_vm1, %v8021_v61 }
 0xb71   : > { %7586 = vst.msk [vmem:[#allocation3 + $0x196] sm:$0xff] %vm7509_vm15, %v7384_v62 }
 0xb72   : > { %7585 = vst.msk [vmem:[#allocation3 + $0x18e] sm:$0xfc] %vm7507_vm12, %v7382_v29 }
 0xb73   : > { %8278 = vst.msk [vmem:[%s14259_s30 + $0x70] sm:$0xff] %vm740_vm1, %v8016_v27  ;;  %v6724_v58 = vpop.permute.xlu0 %6723 }
 0xb74   : > { %v7386_v5 = vpop.permute.xlu1 %7385  ;;  %6856 = vst.msk [vmem:[#allocation3 + $0x1a0] sm:$0xff] %vm6803_vm9, %v6724_v58 }
 0xb75   : > { %7587 = vst.msk [vmem:[#allocation3 + $0x19e] sm:$0x3] %vm7511_vm14, %v7386_v5 }
 0xb77   : > { %v7019_v21 = vpop.permute.xlu0 %7018 }
 0xb78   : > { %v6726_v26 = vpop.permute.xlu1 %6725  ;;  %7219 = vst.msk [vmem:[#allocation3 + $0x19f] sm:$0xfe] %vm7138_vm11, %v7019_v21 }
 0xb79   : > { %v7656_v57 = vld [vmem:[#allocation3 + $0x190] sm:$0xff]  ;;  %6857 = vst.msk [vmem:[#allocation3 + $0x1a8] sm:$0xff] %vm6803_vm9, %v6726_v26  ;;  %v8863_v23 = vpop.f32.mrb[14].mxu1 }
 0xb7a   : > { %8912 = vmatprep.mubr.msk.f32.mxu1 %vm7686_vm2, %v7656_v57  ;;  %v8031_v7 = vadd.f32 %v8863_v23, %v14250_v16  ;;  %v8025_v52 = vpop.f32.mrb[15].mxu1 }
 0xb7b   : > { %v8026_v44 = vadd.f32 %v14250_v16, %v8025_v52  ;;  %v7023_v1 = vpop.permute.xlu0 %7022 }
 0xb7c   : > { %v7021_v33 = vpop.permute.xlu1 %7020  ;;  %v7657_v40 = vld [vmem:[#allocation3 + $0x198] sm:$0xff]  ;;  %8281 = vst.msk [vmem:[%s14259_s30 + $0x88] sm:$0xff] %vm740_vm1, %v8031_v7 }
 0xb7d   : > { %7221 = vst.msk [vmem:[#allocation3 + $0x1af] sm:$0x1] %vm7142_vm13, %v7023_v1  ;;  %8913 = vmatmul.mubr.msk.f32.gmra.mrb[48].mxu1 %vm7686_vm2, %v7657_v40 }
 0xb7e   : > { %7220 = vst.msk [vmem:[#allocation3 + $0x1a7] sm:$0xff] %vm7140_vm10, %v7021_v33 }
 0xb7f   : > { %8280 = vst.msk [vmem:[%s14259_s30 + $0x80] sm:$0xff] %vm740_vm1, %v8026_v44  ;;  %v7390_v41 = vpop.permute.xlu0 %7389 }
 0xb80   : > { %v7388_v30 = vpop.permute.xlu1 %7387  ;;  %7589 = vst.msk [vmem:[#allocation3 + $0x1a6] sm:$0xff] %vm7509_vm15, %v7390_v41 }
 0xb81   : > { %7588 = vst.msk [vmem:[#allocation3 + $0x19e] sm:$0xfc] %vm7507_vm12, %v7388_v30 }
 0xb83   : > { %v6728_v38 = vpop.permute.xlu0 %6727 }
 0xb84   : > { %v7392_v32 = vpop.permute.xlu1 %7391  ;;  %6858 = vst.msk [vmem:[#allocation3 + $0x1b0] sm:$0xff] %vm6803_vm9, %v6728_v38 }
 0xb85   : > { %7590 = vst.msk [vmem:[#allocation3 + $0x1ae] sm:$0x3] %vm7511_vm14, %v7392_v32  ;;  %v8866_v0 = vpop.f32.mrb[16].mxu1 }
 0xb86   : > { %v8041_v17 = vadd.f32 %v8866_v0, %v14250_v16  ;;  %v8035_v31 = vpop.f32.mrb[17].mxu1 }
 0xb87   : > { %v8036_v46 = vadd.f32 %v14250_v16, %v8035_v31  ;;  %v7025_v43 = vpop.permute.xlu0 %7024 }
 0xb88   : > { %v6730_v60 = vpop.permute.xlu1 %6729  ;;  %v7658_v54 = vld [vmem:[#allocation3 + $0x1a0] sm:$0xff]  ;;  %8283 = vst.msk [vmem:[%s14259_s30 + $0x98] sm:$0xff] %vm740_vm1, %v8041_v17 }
 0xb89   : > { %7222 = vst.msk [vmem:[#allocation3 + $0x1af] sm:$0xfe] %vm7138_vm11, %v7025_v43  ;;  %8915 = vmatprep.mubr.msk.f32.mxu1 %vm7686_vm2, %v7658_v54 }
 0xb8a   : > { %6859 = vst.msk [vmem:[#allocation3 + $0x1b8] sm:$0xff] %vm6803_vm9, %v6730_v60 }
 0xb8b   : > { %8282 = vst.msk [vmem:[%s14259_s30 + $0x90] sm:$0xff] %vm740_vm1, %v8036_v46  ;;  %v7029_v24 = vpop.permute.xlu0 %7028 }
 0xb8c   : > { %v7027_v56 = vpop.permute.xlu1 %7026  ;;  %v7659_v13 = vld [vmem:[#allocation3 + $0x1a8] sm:$0xff]  ;;  %7224 = vst.msk [vmem:[#allocation3 + $0x1bf] sm:$0x1] %vm7142_vm13, %v7029_v24 }
 0xb8d   : > { %7223 = vst.msk [vmem:[#allocation3 + $0x1b7] sm:$0xff] %vm7140_vm10, %v7027_v56  ;;  %8916 = vmatmul.mubr.msk.f32.gmra.mrb[50].mxu1 %vm7686_vm2, %v7659_v13 }
 0xb8f   : > { %v7396_v6 = vpop.permute.xlu0 %7395 }
 0xb90   : > { %v7394_v50 = vpop.permute.xlu1 %7393  ;;  %7592 = vst.msk [vmem:[#allocation3 + $0x1b6] sm:$0xff] %vm7509_vm15, %v7396_v6 }
 0xb91   : > { %7591 = vst.msk [vmem:[#allocation3 + $0x1ae] sm:$0xfc] %vm7507_vm12, %v7394_v50  ;;  %v8869_v63 = vpop.f32.mrb[18].mxu1 }
 0xb92   : > { %v8051_v9 = vadd.f32 %v8869_v63, %v14250_v16  ;;  %v8045_v36 = vpop.f32.mrb[19].mxu1 }
 0xb93   : > { %v8046_v48 = vadd.f32 %v14250_v16, %v8045_v36  ;;  %v6732_v19 = vpop.permute.xlu0 %6731 }
 0xb94   : > { %v7398_v10 = vpop.permute.xlu1 %7397  ;;  %8285 = vst.msk [vmem:[%s14259_s30 + $0xa8] sm:$0xff] %vm740_vm1, %v8051_v9 }
 0xb95   : > { %6860 = vst.msk [vmem:[#allocation3 + $0x1c0] sm:$0xff] %vm6803_vm9, %v6732_v19 }
 0xb96   : > { %7593 = vst.msk [vmem:[#allocation3 + $0x1be] sm:$0x3] %vm7511_vm14, %v7398_v10 }
 0xb97   : > { %8284 = vst.msk [vmem:[%s14259_s30 + $0xa0] sm:$0xff] %vm740_vm1, %v8046_v48  ;;  %v7031_v53 = vpop.permute.xlu0 %7030 }
 0xb98   : > { %v6734_v51 = vpop.permute.xlu1 %6733  ;;  %v7660_v55 = vld [vmem:[#allocation3 + $0x1b0] sm:$0xff]  ;;  %7225 = vst.msk [vmem:[#allocation3 + $0x1bf] sm:$0xfe] %vm7138_vm11, %v7031_v53 }
 0xb99   : > { %6861 = vst.msk [vmem:[#allocation3 + $0x1c8] sm:$0xff] %vm6803_vm9, %v6734_v51  ;;  %8918 = vmatprep.mubr.msk.f32.mxu1 %vm7686_vm2, %v7660_v55 }
 0xb9b   : > { %v7035_v49 = vpop.permute.xlu0 %7034 }
 0xb9c   : > { %v7033_v47 = vpop.permute.xlu1 %7032  ;;  %7227 = vst.msk [vmem:[#allocation3 + $0x1cf] sm:$0x1] %vm7142_vm13, %v7035_v49 }
 0xb9d   : > { %v7661_v15 = vld [vmem:[#allocation3 + $0x1b8] sm:$0xff]  ;;  %7226 = vst.msk [vmem:[#allocation3 + $0x1c7] sm:$0xff] %vm7140_vm10, %v7033_v47  ;;  %v8872_v28 = vpop.f32.mrb[20].mxu1 }
 0xb9e   : > { %8919 = vmatmul.mubr.msk.f32.gmra.mrb[52].mxu1 %vm7686_vm2, %v7661_v15  ;;  %v8061_v34 = vadd.f32 %v8872_v28, %v14250_v16  ;;  %v8055_v37 = vpop.f32.mrb[21].mxu1 }
 0xb9f   : > { %v8056_v25 = vadd.f32 %v14250_v16, %v8055_v37  ;;  %v7402_v35 = vpop.permute.xlu0 %7401 }
 0xba0   : > { %v7400_v18 = vpop.permute.xlu1 %7399  ;;  %8287 = vst.msk [vmem:[%s14259_s30 + $0xb8] sm:$0xff] %vm740_vm1, %v8061_v34 }
 0xba1   : > { %7595 = vst.msk [vmem:[#allocation3 + $0x1c6] sm:$0xff] %vm7509_vm15, %v7402_v35 }
 0xba2   : > { %7594 = vst.msk [vmem:[#allocation3 + $0x1be] sm:$0xfc] %vm7507_vm12, %v7400_v18 }
 0xba3   : > { %8286 = vst.msk [vmem:[%s14259_s30 + $0xb0] sm:$0xff] %vm740_vm1, %v8056_v25  ;;  %v6736_v22 = vpop.permute.xlu0 %6735 }
 0xba4   : > { %v7404_v39 = vpop.permute.xlu1 %7403  ;;  %6862 = vst.msk [vmem:[#allocation3 + $0x1d0] sm:$0xff] %vm6803_vm9, %v6736_v22 }
 0xba5   : > { %7596 = vst.msk [vmem:[#allocation3 + $0x1ce] sm:$0x3] %vm7511_vm14, %v7404_v39 }
 0xba7   : > { %v7037_v3 = vpop.permute.xlu0 %7036 }
 0xba8   : > { %v6738_v12 = vpop.permute.xlu1 %6737  ;;  %7228 = vst.msk [vmem:[#allocation3 + $0x1cf] sm:$0xfe] %vm7138_vm11, %v7037_v3 }
 0xba9   : > { %v7662_v4 = vld [vmem:[#allocation3 + $0x1c0] sm:$0xff]  ;;  %6863 = vst.msk [vmem:[#allocation3 + $0x1d8] sm:$0xff] %vm6803_vm9, %v6738_v12  ;;  %v8875_v20 = vpop.f32.mrb[22].mxu1 }
 0xbaa   : > { %8921 = vmatprep.mubr.msk.f32.mxu1 %vm7686_vm2, %v7662_v4  ;;  %v8071_v59 = vadd.f32 %v8875_v20, %v14250_v16  ;;  %v8065_v45 = vpop.f32.mrb[23].mxu1 }
 0xbab   : > { %v8066_v14 = vadd.f32 %v14250_v16, %v8065_v45  ;;  %v7041_v8 = vpop.permute.xlu0 %7040 }
 0xbac   : > { %v7039_v11 = vpop.permute.xlu1 %7038  ;;  %v7663_v2 = vld [vmem:[#allocation3 + $0x1c8] sm:$0xff]  ;;  %8289 = vst.msk [vmem:[%s14259_s30 + $0xc8] sm:$0xff] %vm740_vm1, %v8071_v59 }
 0xbad   : > { %7230 = vst.msk [vmem:[#allocation3 + $0x1df] sm:$0x1] %vm7142_vm13, %v7041_v8  ;;  %8922 = vmatmul.mubr.msk.f32.gmra.mrb[54].mxu1 %vm7686_vm2, %v7663_v2 }
 0xbae   : > { %7229 = vst.msk [vmem:[#allocation3 + $0x1d7] sm:$0xff] %vm7140_vm10, %v7039_v11 }
 0xbaf   : > { %8288 = vst.msk [vmem:[%s14259_s30 + $0xc0] sm:$0xff] %vm740_vm1, %v8066_v14  ;;  %v7408_v61 = vpop.permute.xlu0 %7407 }
 0xbb0   : > { %v7406_v42 = vpop.permute.xlu1 %7405  ;;  %7598 = vst.msk [vmem:[#allocation3 + $0x1d6] sm:$0xff] %vm7509_vm15, %v7408_v61 }
 0xbb1   : > { %7597 = vst.msk [vmem:[#allocation3 + $0x1ce] sm:$0xfc] %vm7507_vm12, %v7406_v42 }
 0xbb3   : > { %v6740_v27 = vpop.permute.xlu0 %6739 }
 0xbb4   : > { %v7410_v62 = vpop.permute.xlu1 %7409  ;;  %6864 = vst.msk [vmem:[#allocation3 + $0x1e0] sm:$0xff] %vm6803_vm9, %v6740_v27  ;;  %6866 = vst.msk [vmem:[#allocation3 + $0x1f0] sm:$0xff] %vm6803_vm9, %v6740_v27 }
 0xbb5   : > { %7599 = vst.msk [vmem:[#allocation3 + $0x1de] sm:$0x3] %vm7511_vm14, %v7410_v62  ;;  %v8878_v29 = vpop.f32.mrb[24].mxu1 }
 0xbb6   : > { %v8081_v58 = vadd.f32 %v8878_v29, %v14250_v16  ;;  %v8075_v5 = vpop.f32.mrb[25].mxu1 }
 0xbb7   : > { %v8076_v21 = vadd.f32 %v14250_v16, %v8075_v5  ;;  %v7043_v26 = vpop.permute.xlu0 %7042 }
 0xbb8   : > { %v6742_v57 = vpop.permute.xlu1 %6741  ;;  %v7664_v23 = vld [vmem:[#allocation3 + $0x1d0] sm:$0xff]  ;;  %8291 = vst.msk [vmem:[%s14259_s30 + $0xd8] sm:$0xff] %vm740_vm1, %v8081_v58 }
 0xbb9   : > { %7231 = vst.msk [vmem:[#allocation3 + $0x1df] sm:$0xfe] %vm7138_vm11, %v7043_v26  ;;  %7234 = vst.msk [vmem:[#allocation3 + $0x1ef] sm:$0xfe] %vm7138_vm11, %v7043_v26  ;;  %8924 = vmatprep.mubr.msk.f32.mxu1 %vm7686_vm2, %v7664_v23 }
 0xbba   : > { %6865 = vst.msk [vmem:[#allocation3 + $0x1e8] sm:$0xff] %vm6803_vm9, %v6742_v57  ;;  %6867 = vst.msk [vmem:[#allocation3 + $0x1f8] sm:$0xff] %vm6803_vm9, %v6742_v57 }
 0xbbb   : > { %8290 = vst.msk [vmem:[%s14259_s30 + $0xd0] sm:$0xff] %vm740_vm1, %v8076_v21  ;;  %v7047_v7 = vpop.permute.xlu0 %7046 }
 0xbbc   : > { %v7045_v52 = vpop.permute.xlu1 %7044  ;;  %v7665_v44 = vld [vmem:[#allocation3 + $0x1d8] sm:$0xff]  ;;  %7233 = vst.msk [vmem:[#allocation3 + $0x1ef] sm:$0x1] %vm7142_vm13, %v7047_v7  ;;  %7236 = vst.msk [vmem:[#allocation3 + $0x1ff] sm:$0x1] %vm7142_vm13, %v7047_v7 }
 0xbbd   : > { %7232 = vst.msk [vmem:[#allocation3 + $0x1e7] sm:$0xff] %vm7140_vm10, %v7045_v52  ;;  %7235 = vst.msk [vmem:[#allocation3 + $0x1f7] sm:$0xff] %vm7140_vm10, %v7045_v52  ;;  %8925 = vmatmul.mubr.msk.f32.gmra.mrb[56].mxu1 %vm7686_vm2, %v7665_v44 }
 0xbbf   : > { %v7414_v1 = vpop.permute.xlu0 %7413 }
 0xbc0   : > { %v7412_v33 = vpop.permute.xlu1 %7411  ;;  %7601 = vst.msk [vmem:[#allocation3 + $0x1e6] sm:$0xff] %vm7509_vm15, %v7414_v1  ;;  %7604 = vst.msk [vmem:[#allocation3 + $0x1f6] sm:$0xff] %vm7509_vm15, %v7414_v1 }
 0xbc1   : > { %7600 = vst.msk [vmem:[#allocation3 + $0x1de] sm:$0xfc] %vm7507_vm12, %v7412_v33  ;;  %7603 = vst.msk [vmem:[#allocation3 + $0x1ee] sm:$0xfc] %vm7507_vm12, %v7412_v33  ;;  %v8881_v40 = vpop.f32.mrb[26].mxu1 }
 0xbc2   : > { %v8091_v41 = vadd.f32 %v8881_v40, %v14250_v16  ;;  %v8085_v30 = vpop.f32.mrb[27].mxu1 }
 0xbc3   : > { %v8086_v38 = vadd.f32 %v14250_v16, %v8085_v30  ;;  %v6869_v32 = vpop.permute.xlu0 %6868 }
 0xbc4   : > { %v7416_v0 = vpop.permute.xlu1 %7415  ;;  %8293 = vst.msk [vmem:[%s14259_s30 + $0xe8] sm:$0xff] %vm740_vm1, %v8091_v41 }
 0xbc5   : > { %7139 = vst.msk [vmem:[#allocation3 - $0x1] sm:$0xfe] %vm7138_vm11, %v6869_v32  ;;  %v8884_v17 = vpop.f32.mrb[28].mxu1 }
 0xbc6   : > { %7602 = vst.msk [vmem:[#allocation3 + $0x1ee] sm:$0x3] %vm7511_vm14, %v7416_v0  ;;  %7605 = vst.msk [vmem:[#allocation3 + $0x1fe] sm:$0x3] %vm7511_vm14, %v7416_v0  ;;  %v8101_v31 = vadd.f32 %v8884_v17, %v14250_v16  ;;  %v8095_v46 = vpop.f32.mrb[29].mxu1 }
 0xbc7   : > { %8292 = vst.msk [vmem:[%s14259_s30 + $0xe0] sm:$0xff] %vm740_vm1, %v8086_v38  ;;  %v8096_v43 = vadd.f32 %v14250_v16, %v8095_v46  ;;  %v6873_v60 = vpop.permute.xlu0 %6872 }
 0xbc8   : > { %v6871_v54 = vpop.permute.xlu1 %6870  ;;  %v7666_v24 = vld [vmem:[#allocation3 + $0x1e0] sm:$0xff]  ;;  %8295 = vst.msk [vmem:[%s14259_s30 + $0xf8] sm:$0xff] %vm740_vm1, %v8101_v31  ;;  %v7668_v50 = vld [vmem:[#allocation3 + $0x1f0] sm:$0xff] }
 0xbc9   : > { %7143 = vst.msk [vmem:[#allocation3 + $0xf] sm:$0x1] %vm7142_vm13, %v6873_v60  ;;  %8927 = vmatprep.mubr.msk.f32.mxu1 %vm7686_vm2, %v7666_v24 }
 0xbca   : > { %7141 = vst.msk [vmem:[#allocation3 + $0x7] sm:$0xff] %vm7140_vm10, %v6871_v54 }
 0xbcb   : > { %8294 = vst.msk [vmem:[%s14259_s30 + $0xf0] sm:$0xff] %vm740_vm1, %v8096_v43  ;;  %v7240_v56 = vpop.permute.xlu0 %7239 }
 0xbcc   : > { %v7238_v13 = vpop.permute.xlu1 %7237  ;;  %7510 = vst.msk [vmem:[#allocation3 + $0x6] sm:$0xff] %vm7509_vm15, %v7240_v56 }
 0xbcd   : > { %v7667_v6 = vld [vmem:[#allocation3 + $0x1e8] sm:$0xff]  ;;  %7508 = vst.msk [vmem:[#allocation3 - $0x2] sm:$0xfc] %vm7507_vm12, %v7238_v13  ;;  %v8887_v63 = vpop.f32.mrb[30].mxu1  ;;  %v7669_v10 = vld [vmem:[#allocation3 + $0x1f8] sm:$0xff] }
 0xbce   : > { %8928 = vmatmul.mubr.msk.f32.gmra.mrb[58].mxu1 %vm7686_vm2, %v7667_v6  ;;  %v8111_v9 = vadd.f32 %v8887_v63, %v14250_v16  ;;  %v8105_v36 = vpop.f32.mrb[31].mxu1 }
 0xbcf   : > { %8930 = vmatprep.mubr.msk.f32.mxu1 %vm7686_vm2, %v7668_v50  ;;  %v8106_v48 = vadd.f32 %v14250_v16, %v8105_v36 }
 0xbd0   : > { %v7242_v19 = vpop.permute.xlu1 %7241  ;;  %8297 = vst.msk [vmem:[%s14259_s30 + $0x108] sm:$0xff] %vm740_vm1, %v8111_v9 }
 0xbd1   : > { %7512 = vst.msk [vmem:[#allocation3 + $0xe] sm:$0x3] %vm7511_vm14, %v7242_v19 }
 0xbd2   : > { %8931 = vmatmul.mubr.msk.f32.gmra.mrb[60].mxu1 %vm7686_vm2, %v7669_v10  ;;  %8296 = vst.msk [vmem:[%s14259_s30 + $0x100] sm:$0xff] %vm740_vm1, %v8106_v48 }
 0xbd4   : > { %v7606_v53 = vld [vmem:[#allocation3] sm:$0xff] }
 0xbd5   : > { %8837 = vmatprep.mubr.msk.f32.mxu0 %vm7686_vm2, %v7606_v53 }
 0xbd8   : > { %v7607_v51 = vld [vmem:[#allocation3 + $0x8] sm:$0xff] }
 0xbd9   : > { %8838 = vmatmul.mubr.msk.f32.vlgmr.msra.gmra.mrb[64].mxu0 %vm7686_vm2, %v7607_v51  ;;  %v8890_v55 = vpop.f32.mrb[32].mxu1 }
 0xbda   : > { %v8121_v49 = vadd.f32 %v8890_v55, %v14250_v16  ;;  %v8115_v47 = vpop.f32.mrb[33].mxu1 }
 0xbdb   : > { %v8116_v15 = vadd.f32 %v14250_v16, %v8115_v47 }
 0xbdc   : > { %8299 = vst.msk [vmem:[%s14259_s30 + $0x118] sm:$0xff] %vm740_vm1, %v8121_v49 }
 0xbdd   : > { %8298 = vst.msk [vmem:[%s14259_s30 + $0x110] sm:$0xff] %vm740_vm1, %v8116_v15 }
 0xbe5   : > { %v8893_v28 = vpop.f32.mrb[34].mxu1 }
 0xbe6   : > { %v8131_v34 = vadd.f32 %v8893_v28, %v14250_v16  ;;  %v8125_v37 = vpop.f32.mrb[35].mxu1 }
 0xbe7   : > { %v8126_v25 = vadd.f32 %v14250_v16, %v8125_v37 }
 0xbe8   : > { %8301 = vst.msk [vmem:[%s14259_s30 + $0x128] sm:$0xff] %vm740_vm1, %v8131_v34 }
 0xbe9   : > { %8300 = vst.msk [vmem:[%s14259_s30 + $0x120] sm:$0xff] %vm740_vm1, %v8126_v25 }
 0xbf1   : > { %v8896_v35 = vpop.f32.mrb[36].mxu1 }
 0xbf2   : > { %v8141_v18 = vadd.f32 %v8896_v35, %v14250_v16  ;;  %v8135_v22 = vpop.f32.mrb[37].mxu1 }
 0xbf3   : > { %v8136_v39 = vadd.f32 %v14250_v16, %v8135_v22 }
 0xbf4   : > { %8303 = vst.msk [vmem:[%s14259_s30 + $0x138] sm:$0xff] %vm740_vm1, %v8141_v18 }
 0xbf5   : > { %8302 = vst.msk [vmem:[%s14259_s30 + $0x130] sm:$0xff] %vm740_vm1, %v8136_v39 }
 0xc00   : > { %v8899_v3 = vpop.f32.mrb[38].mxu1 }
 0xc01   : > { %v8151_v12 = vadd.f32 %v8899_v3, %v14250_v16  ;;  %v8145_v4 = vpop.f32.mrb[39].mxu1 }
 0xc02   : > { %v8146_v20 = vadd.f32 %v14250_v16, %v8145_v4 }
 0xc03   : > { %8305 = vst.msk [vmem:[%s14259_s30 + $0x148] sm:$0xff] %vm740_vm1, %v8151_v12 }
 0xc04   : > { %8304 = vst.msk [vmem:[%s14259_s30 + $0x140] sm:$0xff] %vm740_vm1, %v8146_v20 }
 0xc11   : > { %v8902_v59 = vpop.f32.mrb[40].mxu1 }
 0xc12   : > { %v8161_v45 = vadd.f32 %v8902_v59, %v14250_v16  ;;  %v8155_v14 = vpop.f32.mrb[41].mxu1 }
 0xc13   : > { %v8156_v8 = vadd.f32 %v14250_v16, %v8155_v14 }
 0xc14   : > { %8307 = vst.msk [vmem:[%s14259_s30 + $0x158] sm:$0xff] %vm740_vm1, %v8161_v45 }
 0xc15   : > { %8306 = vst.msk [vmem:[%s14259_s30 + $0x150] sm:$0xff] %vm740_vm1, %v8156_v8 }
 0xc20   : > { %v8905_v11 = vpop.f32.mrb[42].mxu1 }
 0xc21   : > { %v8171_v2 = vadd.f32 %v8905_v11, %v14250_v16  ;;  %v8165_v61 = vpop.f32.mrb[43].mxu1 }
 0xc22   : > { %v8166_v42 = vadd.f32 %v14250_v16, %v8165_v61 }
 0xc23   : > { %8309 = vst.msk [vmem:[%s14259_s30 + $0x168] sm:$0xff] %vm740_vm1, %v8171_v2 }
 0xc24   : > { %8308 = vst.msk [vmem:[%s14259_s30 + $0x160] sm:$0xff] %vm740_vm1, %v8166_v42 }
 0xc30   : > { %v8908_v27 = vpop.f32.mrb[44].mxu1 }
 0xc31   : > { %v8181_v62 = vadd.f32 %v8908_v27, %v14250_v16  ;;  %v8175_v29 = vpop.f32.mrb[45].mxu1 }
 0xc32   : > { %v8176_v58 = vadd.f32 %v14250_v16, %v8175_v29 }
 0xc33   : > { %8311 = vst.msk [vmem:[%s14259_s30 + $0x178] sm:$0xff] %vm740_vm1, %v8181_v62 }
 0xc34   : > { %8310 = vst.msk [vmem:[%s14259_s30 + $0x170] sm:$0xff] %vm740_vm1, %v8176_v58 }
 0xc41   : > { %v8911_v5 = vpop.f32.mrb[46].mxu1 }
 0xc42   : > { %v8191_v21 = vadd.f32 %v8911_v5, %v14250_v16  ;;  %v8185_v26 = vpop.f32.mrb[47].mxu1 }
 0xc43   : > { %v8186_v57 = vadd.f32 %v14250_v16, %v8185_v26 }
 0xc44   : > { %8313 = vst.msk [vmem:[%s14259_s30 + $0x188] sm:$0xff] %vm740_vm1, %v8191_v21 }
 0xc45   : > { %8312 = vst.msk [vmem:[%s14259_s30 + $0x180] sm:$0xff] %vm740_vm1, %v8186_v57 }
 0xc50   : > { %v8914_v23 = vpop.f32.mrb[48].mxu1 }
 0xc51   : > { %v8201_v7 = vadd.f32 %v8914_v23, %v14250_v16  ;;  %v8195_v52 = vpop.f32.mrb[49].mxu1 }
 0xc52   : > { %v8196_v44 = vadd.f32 %v14250_v16, %v8195_v52 }
 0xc53   : > { %8315 = vst.msk [vmem:[%s14259_s30 + $0x198] sm:$0xff] %vm740_vm1, %v8201_v7 }
 0xc54   : > { %8314 = vst.msk [vmem:[%s14259_s30 + $0x190] sm:$0xff] %vm740_vm1, %v8196_v44 }
 0xc60   : > { %v8917_v1 = vpop.f32.mrb[50].mxu1 }
 0xc61   : > { %v8211_v33 = vadd.f32 %v8917_v1, %v14250_v16  ;;  %v8205_v40 = vpop.f32.mrb[51].mxu1 }
 0xc62   : > { %v8206_v41 = vadd.f32 %v14250_v16, %v8205_v40 }
 0xc63   : > { %8317 = vst.msk [vmem:[%s14259_s30 + $0x1a8] sm:$0xff] %vm740_vm1, %v8211_v33 }
 0xc64   : > { %8316 = vst.msk [vmem:[%s14259_s30 + $0x1a0] sm:$0xff] %vm740_vm1, %v8206_v41 }
 0xc71   : > { %v8920_v30 = vpop.f32.mrb[52].mxu1 }
 0xc72   : > { %v8221_v38 = vadd.f32 %v8920_v30, %v14250_v16  ;;  %v8215_v32 = vpop.f32.mrb[53].mxu1 }
 0xc73   : > { %v8216_v0 = vadd.f32 %v14250_v16, %v8215_v32 }
 0xc74   : > { %8319 = vst.msk [vmem:[%s14259_s30 + $0x1b8] sm:$0xff] %vm740_vm1, %v8221_v38 }
 0xc75   : > { %8318 = vst.msk [vmem:[%s14259_s30 + $0x1b0] sm:$0xff] %vm740_vm1, %v8216_v0 }
 0xc80   : > { %v8923_v17 = vpop.f32.mrb[54].mxu1 }
 0xc81   : > { %v8231_v31 = vadd.f32 %v8923_v17, %v14250_v16  ;;  %v8225_v46 = vpop.f32.mrb[55].mxu1 }
 0xc82   : > { %v8226_v43 = vadd.f32 %v14250_v16, %v8225_v46 }
 0xc83   : > { %8321 = vst.msk [vmem:[%s14259_s30 + $0x1c8] sm:$0xff] %vm740_vm1, %v8231_v31 }
 0xc84   : > { %8320 = vst.msk [vmem:[%s14259_s30 + $0x1c0] sm:$0xff] %vm740_vm1, %v8226_v43 }
 0xc90   : > { %v8926_v60 = vpop.f32.mrb[56].mxu1 }
 0xc91   : > { %v8241_v54 = vadd.f32 %v8926_v60, %v14250_v16  ;;  %v8235_v24 = vpop.f32.mrb[57].mxu1 }
 0xc92   : > { %v8236_v56 = vadd.f32 %v14250_v16, %v8235_v24 }
 0xc93   : > { %8323 = vst.msk [vmem:[%s14259_s30 + $0x1d8] sm:$0xff] %vm740_vm1, %v8241_v54 }
 0xc94   : > { %8322 = vst.msk [vmem:[%s14259_s30 + $0x1d0] sm:$0xff] %vm740_vm1, %v8236_v56 }
 0xca1   : > { %v8929_v13 = vpop.f32.mrb[58].mxu1 }
 0xca2   : > { %v8251_v6 = vadd.f32 %v8929_v13, %v14250_v16  ;;  %v8245_v50 = vpop.f32.mrb[59].mxu1 }
 0xca3   : > { %v8246_v63 = vadd.f32 %v14250_v16, %v8245_v50 }
 0xca4   : > { %8325 = vst.msk [vmem:[%s14259_s30 + $0x1e8] sm:$0xff] %vm740_vm1, %v8251_v6 }
 0xca5   : > { %8324 = vst.msk [vmem:[%s14259_s30 + $0x1e0] sm:$0xff] %vm740_vm1, %v8246_v63  ;;  %v8932_v9 = vpop.f32.mrb[60].mxu1 }
 0xca6   : > { %v8261_v36 = vadd.f32 %v8932_v9, %v14250_v16  ;;  %v8255_v48 = vpop.f32.mrb[61].mxu1 }
 0xca7   : > { %v8256_v19 = vadd.f32 %v14250_v16, %v8255_v48 }
 0xca8   : > { %8327 = vst.msk [vmem:[%s14259_s30 + $0x1f8] sm:$0xff] %vm740_vm1, %v8261_v36 }
 0xca9   : > { %8326 = vst.msk [vmem:[%s14259_s30 + $0x1f0] sm:$0xff] %vm740_vm1, %v8256_v19 }
 0xcac   : > { %v8839_v10 = vpop.f32.mrb[64].mxu0 }
 0xcad   : > { %v7951_v53 = vadd.f32 %v8839_v10, %v14250_v16  ;;  %v7945_v51 = vpop.f32.mrb[65].mxu0 }
 0xcae   : > { %v7946_v55 = vadd.f32 %v14250_v16, %v7945_v51 }
 0xcaf   : > { %8265 = vst.msk [vmem:[%s14259_s30 + $0x8] sm:$0xff] %vm740_vm1, %v7951_v53 }
 0xcb0   : > { %8264 = vst.msk [vmem:[%s14259_s30] sm:$0xff] %vm740_vm1, %v7946_v55 }
 0xcb1 PF: > { %s15_s18 = sadd.s32 1, %s8996_s18  }
 0xcb2   : > { %p12_p4 = scmp.ge.s32.totalorder %s15_s18, 7  }
 0xcb4   :  { %14 = sbr.rel (!%p12_p4) target bundleno = 1 (0x1), region = 82 }

</bundles_post_ra>
